<compile_context>
chip_gen: v6e
topology: v6e:2x2x1
jax: 0.10.0
libtpu: 0.0.40
codegen_flags: <defaults>
</compile_context>

<pallas_src>
import math
from functools import partial

import jax
import jax.numpy as jnp
import numpy as np
from jax import lax
from jax.experimental import pallas as pl
from jax.experimental.pallas import tpu as pltpu

EPS = 1e-5  # torch.nn.InstanceNorm3d default eps


def _store_kw_planes(vol_ref, dz, plane):
    """Store one (H, W, C) plane into the kw-concatenated padded volume.

    vol_ref: [D+2, (H+2)*W, 3*C] bf16 with
        vol[dz, hz*W + w, kw*C + c] = zero_padded_x[dz, hz, w + kw, c].
    The w-edge zeros of the kw=0 / kw=2 blocks are baked in here; the (d, h)
    halo rows are zeroed once per grid step by the caller.
    """
    H, W, C = plane.shape
    z = jnp.zeros((H, 1, C), plane.dtype)
    left = jnp.concatenate([z, plane[:, :W - 1, :]], axis=1)   # kw = 0 taps
    right = jnp.concatenate([plane[:, 1:, :], z], axis=1)      # kw = 2 taps
    cat = jnp.concatenate([left, plane, right], axis=2)        # (H, W, 3C)
    vol_ref[pl.ds(dz, 1), pl.ds(W, H * W), :] = (
        cat.reshape(1, H * W, 3 * C).astype(vol_ref.dtype))


def _conv_pass(vol_ref, w_ref, raw_ref, *, D, H, W, Cout, unroll):
    """'same' 3x3x3 conv over the kw-concatenated padded volume.

    Per output plane: 9 MXU matmuls (H*W, 3*Cin) x (3*Cin, Cout); each patch
    is a relayout-free, sublane-aligned row-slice of a kd-slab.  Raw f32
    planes are staged in raw_ref and per-channel sum / sum-of-squares are
    carried through the loop (fused InstanceNorm statistics, single pass).
    Returns (mean, inv_std), each (1, Cout) f32.
    """
    HW = H * W
    taps = [w_ref[i] for i in range(9)]          # 9 x (3*Cin, Cout), hoisted

    def body(d, carry):
        s1, s2 = carry
        acc = jnp.zeros((HW, Cout), jnp.float32)
        for kd in range(3):
            slab = vol_ref[pl.ds(d + kd, 1), :, :].reshape((H + 2) * W, -1)
            for kh in range(3):
                patch = slab[kh * W:kh * W + HW, :]   # aligned when W % 8 == 0
                acc = acc + jnp.dot(patch, taps[kd * 3 + kh],
                                    preferred_element_type=jnp.float32)
        raw_ref[pl.ds(d, 1), :, :] = acc.reshape(1, HW, Cout)
        return (s1 + jnp.sum(acc, axis=0, keepdims=True),
                s2 + jnp.sum(acc * acc, axis=0, keepdims=True))

    zero = jnp.zeros((1, Cout), jnp.float32)
    s1, s2 = lax.fori_loop(0, D, body, (zero, zero), unroll=unroll)

    inv_n = 1.0 / float(D * HW)
    mean = s1 * inv_n
    # TODO(synk): E[x^2]-mean^2 in f32 (clamped); switch to a second pass over
    # raw_ref (Welford-style) if cancellation ever matters for real data.
    var = jnp.maximum(s2 * inv_n - mean * mean, 0.0)
    return mean, lax.rsqrt(var + EPS)


def basic_block_kernel(x_ref, w1_ref, w2_ref, o_ref, vol_ref, raw_ref,
                       *, H, W, unroll):
    # x_ref:  [D, H*W, Cin]   unpadded input block (also the residual source)
    # o_ref:  [D, H*W, Cout]  output block (written exactly once, per plane)
    # vol_ref:[D+2, (H+2)*W, 3*C] bf16 kw-concatenated padded conv input
    # raw_ref:[D, H*W, Cout] f32 raw conv-output staging
    D, HW, Cin = x_ref.shape
    Cout = o_ref.shape[-1]
    C3 = vol_ref.shape[-1]
    HW2 = (H + 2) * W

    # ---- zero the depth / height halo of the padded volume ------------------
    # (interior rows are fully overwritten below; per-step zeroing stays
    # correct when the batch grid axis is sharded across TensorCores)
    vol_ref[pl.ds(0, 1), :, :] = jnp.zeros((1, HW2, C3), vol_ref.dtype)
    vol_ref[pl.ds(D + 1, 1), :, :] = jnp.zeros((1, HW2, C3), vol_ref.dtype)
    vol_ref[pl.ds(1, D), pl.ds(0, W), :] = jnp.zeros((D, W, C3), vol_ref.dtype)
    vol_ref[pl.ds(1, D), pl.ds((H + 1) * W, W), :] = (
        jnp.zeros((D, W, C3), vol_ref.dtype))

    # ---- stage conv1 input (per plane, bounded live ranges) -----------------
    def build_x(d, c):
        xp = x_ref[pl.ds(d, 1), :, :].reshape(H, W, Cin).astype(jnp.float32)
        _store_kw_planes(vol_ref, 1 + d, xp)
        return c
    lax.fori_loop(0, D, build_x, 0, unroll=unroll)

    # ---- conv1 + fused InstanceNorm stats (conv bias dropped: cancelled) ----
    mean1, inv1 = _conv_pass(vol_ref, w1_ref, raw_ref,
                             D=D, H=H, W=W, Cout=Cout, unroll=unroll)
    scale1 = jnp.broadcast_to(inv1, (HW, Cout))           # hoisted broadcasts
    shift1 = jnp.broadcast_to(-mean1 * inv1, (HW, Cout))

    # ---- norm1 + ReLU, written straight back into vol (conv2's input) -------
    def norm1_body(d, c):
        r = raw_ref[pl.ds(d, 1), :, :].reshape(HW, Cout)
        hN = jnp.maximum(r * scale1 + shift1, 0.0)
        _store_kw_planes(vol_ref, 1 + d, hN.reshape(H, W, Cout))
        return c
    lax.fori_loop(0, D, norm1_body, 0, unroll=unroll)

    # ---- conv2 + fused InstanceNorm stats ------------------------------------
    mean2, inv2 = _conv_pass(vol_ref, w2_ref, raw_ref,
                             D=D, H=H, W=W, Cout=Cout, unroll=unroll)
    scale2 = jnp.broadcast_to(inv2, (HW, Cout))
    shift2 = jnp.broadcast_to(-mean2 * inv2, (HW, Cout))

    # ---- norm2 + identity shortcut + ReLU, per plane -------------------------
    def out_body(d, c):
        r = raw_ref[pl.ds(d, 1), :, :].reshape(HW, Cout)
        res = x_ref[pl.ds(d, 1), :, :].reshape(HW, Cout).astype(jnp.float32)
        y = jnp.maximum(r * scale2 + shift2 + res, 0.0)
        o_ref[pl.ds(d, 1), :, :] = y.reshape(1, HW, Cout).astype(o_ref.dtype)
        return c
    lax.fori_loop(0, D, out_body, 0, unroll=unroll)


def _physical_vmem_bytes():
    try:
        info = pltpu.get_tpu_info()
        for name in ("vmem_capacity_bytes", "vmem_size_bytes", "vmem_bytes"):
            v = getattr(info, name, None)
            if v:
                return int(v)
    except Exception:
        pass
    return 128 * 1024 * 1024


def basic_block_3d(x_ncdhw, w1, b1, w2, b2):
    """Forward of BasicBlock3D (use_1x1conv=False, stride=1).

    x_ncdhw: [N, C, D, H, W]  (PyTorch layout)
    w1, w2:  [3, 3, 3, C, C]  (DHWIO)
    b1, b2:  [C]  accepted for API parity only: a per-channel bias feeding a
             non-affine InstanceNorm3d is cancelled exactly by the mean
             subtraction, so it is not sent to the kernel.
    returns: [N, C, D, H, W]
    """
    N, Cin, D, H, W = x_ncdhw.shape
    Cout = w1.shape[-1]
    assert Cin == Cout, "identity shortcut requires in_channels == out_channels"
    del b1, b2  # mathematically inert under non-affine InstanceNorm

    # Channels-last, (H*W)-row x C-lane layout inside the kernel.
    # TODO(synk): channels-last activations at the model level would remove
    # these wrapper transposes (one HBM round-trip of the activation each way).
    x = jnp.transpose(x_ncdhw, (0, 2, 3, 4, 1)).reshape(N, D, H * W, Cin)

    # kw folded into the MXU contraction: (kd*3+kh, kw*Cin+ci, Cout), bf16.
    w1f = w1.reshape(9, 3 * Cin, Cout).astype(jnp.bfloat16)
    w2f = w2.reshape(9, 3 * Cout, Cout).astype(jnp.bfloat16)

    bpe = x.dtype.itemsize
    est = (2 * D * H * W * Cin * bpe                          # x block (dbl buf)
           + 2 * D * H * W * Cout * bpe                       # out block
           + (D + 2) * (H + 2) * W * 3 * max(Cin, Cout) * 2   # vol (bf16)
           + D * H * W * Cout * 4                             # raw f32 staging
           + 4 * 9 * 3 * Cin * Cout * 2                       # weights
           + (1 << 20))
    # v7x: 64 MiB VMEM/TC -> cap ~54 MiB; v5e/v6e: 128 MiB -> cap ~108 MiB.
    cap = int(_physical_vmem_bytes() * 0.85)
    vmem_limit = min(cap, max(32 * 1024 * 1024, 2 * est))

    unroll = True if D <= 8 else 4   # short plane loops: unroll for LLO visibility

    kernel = partial(basic_block_kernel, H=H, W=W, unroll=unroll)

    out = pl.pallas_call(
        kernel,
        out_shape=jax.ShapeDtypeStruct((N, D, H * W, Cout), x.dtype),
        grid_spec=pltpu.PrefetchScalarGridSpec(
            num_scalar_prefetch=0,
            grid=(N,),  # one grid step per batch sample
            in_specs=[
                pl.BlockSpec((None, D, H * W, Cin), lambda n: (n, 0, 0, 0)),
                pl.BlockSpec((9, 3 * Cin, Cout), lambda n: (0, 0, 0)),
                pl.BlockSpec((9, 3 * Cout, Cout), lambda n: (0, 0, 0)),
            ],
            out_specs=pl.BlockSpec((None, D, H * W, Cout),
                                   lambda n: (n, 0, 0, 0)),
            scratch_shapes=[
                pltpu.VMEM((D + 2, (H + 2) * W, 3 * max(Cin, Cout)),
                           jnp.bfloat16),                       # vol
                pltpu.VMEM((D, H * W, Cout), jnp.float32),      # raw conv planes
            ],
        ),
        compiler_params=pltpu.CompilerParams(
            dimension_semantics=("parallel",),  # batch independent (v7x 2 TCs)
            vmem_limit_bytes=vmem_limit,
        ),
    )(x, w1f, w2f)

    return jnp.transpose(out.reshape(N, D, H, W, Cout), (0, 4, 1, 2, 3))


def reference_basic_block_3d(x_ncdhw, w1, b1, w2, b2):
    """Pure-JAX reference mirroring the PyTorch forward (for validation)."""
    xt = jnp.transpose(x_ncdhw, (0, 2, 3, 4, 1))
    dn = ('NDHWC', 'DHWIO', 'NDHWC')

    def conv(y, w, b):
        out = jax.lax.conv_general_dilated(
            y, w, window_strides=(1, 1, 1),
            padding=((1, 1), (1, 1), (1, 1)),
            dimension_numbers=dn, precision=jax.lax.Precision.HIGHEST)
        return out + b.reshape(1, 1, 1, 1, -1)

    def inorm(y):
        m = jnp.mean(y, axis=(1, 2, 3), keepdims=True)
        v = jnp.mean((y - m) ** 2, axis=(1, 2, 3), keepdims=True)
        return (y - m) * jax.lax.rsqrt(v + EPS)

    h = jnp.maximum(inorm(conv(xt, w1, b1)), 0.0)
    h2 = inorm(conv(h, w2, b2))
    out = jnp.maximum(h2 + xt, 0.0)
    return jnp.transpose(out, (0, 4, 1, 2, 3))


if __name__ == "__main__":
    key = jax.random.PRNGKey(0)
    k1, k2, k3, k4, k5 = jax.random.split(key, 5)

    # Small shapes: batch=2, channels=8, depth=4, spatial=8x8
    N, C, D, H, W = 2, 8, 4, 8, 8
    x = jax.random.normal(k1, (N, C, D, H, W), jnp.float32)

    # Deterministic synthetic parameters (Conv3d-style fan-in scaling).
    fan_in = C * 3 * 3 * 3
    bound = 1.0 / math.sqrt(fan_in)
    w1 = jax.random.uniform(k2, (3, 3, 3, C, C), jnp.float32, -bound, bound)
    b1 = jax.random.uniform(k3, (C,), jnp.float32, -bound, bound)
    w2 = jax.random.uniform(k4, (3, 3, 3, C, C), jnp.float32, -bound, bound)
    b2 = jax.random.uniform(k5, (C,), jnp.float32, -bound, bound)

    out = jax.block_until_ready(basic_block_3d(x, w1, b1, w2, b2))
    ref = jax.block_until_ready(reference_basic_block_3d(x, w1, b1, w2, b2))
    # Tolerance reflects bf16 MXU operands and a bf16 intermediate activation
    # vs an f32/HIGHEST reference through two conv + InstanceNorm stages.
    np.testing.assert_allclose(np.asarray(out), np.asarray(ref),
                               atol=5e-2, rtol=5e-2)
    print("KERNEL_OK")
</pallas_src>

<mosaic_0001>
module attributes {stable_mosaic.version = 11 : i64} {
  func.func @basic_block_kernel(%arg0: i32, %arg1: memref<1x4x64x8xf32, #tpu.memory_space<vmem>>, %arg2: memref<9x24x8xbf16, #tpu.memory_space<vmem>>, %arg3: memref<9x24x8xbf16, #tpu.memory_space<vmem>>, %arg4: memref<1x4x64x8xf32, #tpu.memory_space<vmem>>, %arg5: memref<6x80x24xbf16, #tpu.memory_space<vmem>>, %arg6: memref<4x64x8xf32, #tpu.memory_space<vmem>>) attributes {dimension_semantics = [#tpu.dimension_semantics<parallel>], iteration_bounds = array<i64: 2>, scalar_prefetch = 0 : i64, scratch_operands = 2 : i64, tpu.core_type = #tpu.core_type<tc>, window_params = [{transform_indices = @transform_0, window_bounds = array<i64: 1, 4, 64, 8>}, {pipeline_mode = #tpu.pipeline_mode<synchronous>, transform_indices = @transform_1, window_bounds = array<i64: 9, 24, 8>}, {pipeline_mode = #tpu.pipeline_mode<synchronous>, transform_indices = @transform_2, window_bounds = array<i64: 9, 24, 8>}, {transform_indices = @transform_3, window_bounds = array<i64: 1, 4, 64, 8>}]} {
    %cst = arith.constant 0.000000e+00 : bf16
    %0 = vector.broadcast %cst : bf16 to vector<1x80x24xbf16>
    %c0 = arith.constant 0 : index
    %c0_0 = arith.constant 0 : index
    %c0_1 = arith.constant 0 : index
    %1 = vector.load %arg5[%c0, %c0_0, %c0_1] : memref<6x80x24xbf16, #tpu.memory_space<vmem>>, vector<1x80x24xbf16>
    tpu.vector_store %arg5[%c0, %c0_0, %c0_1], %0 {strides = array<i32>} : memref<6x80x24xbf16, #tpu.memory_space<vmem>>, vector<1x80x24xbf16>,
    %cst_2 = arith.constant 0.000000e+00 : bf16
    %2 = vector.broadcast %cst_2 : bf16 to vector<1x80x24xbf16>
    %c5 = arith.constant 5 : index
    %c0_3 = arith.constant 0 : index
    %c0_4 = arith.constant 0 : index
    %3 = vector.load %arg5[%c5, %c0_3, %c0_4] : memref<6x80x24xbf16, #tpu.memory_space<vmem>>, vector<1x80x24xbf16>
    tpu.vector_store %arg5[%c5, %c0_3, %c0_4], %2 {strides = array<i32>} : memref<6x80x24xbf16, #tpu.memory_space<vmem>>, vector<1x80x24xbf16>,
    %cst_5 = arith.constant 0.000000e+00 : bf16
    %4 = vector.broadcast %cst_5 : bf16 to vector<4x8x24xbf16>
    %c1 = arith.constant 1 : index
    %c0_6 = arith.constant 0 : index
    %c0_7 = arith.constant 0 : index
    %5 = vector.load %arg5[%c1, %c0_6, %c0_7] : memref<6x80x24xbf16, #tpu.memory_space<vmem>>, vector<4x8x24xbf16>
    tpu.vector_store %arg5[%c1, %c0_6, %c0_7], %4 {strides = array<i32>} : memref<6x80x24xbf16, #tpu.memory_space<vmem>>, vector<4x8x24xbf16>,
    %cst_8 = arith.constant 0.000000e+00 : bf16
    %6 = vector.broadcast %cst_8 : bf16 to vector<4x8x24xbf16>
    %c1_9 = arith.constant 1 : index
    %c72 = arith.constant 72 : index
    %c0_10 = arith.constant 0 : index
    %7 = vector.load %arg5[%c1_9, %c72, %c0_10] : memref<6x80x24xbf16, #tpu.memory_space<vmem>>, vector<4x8x24xbf16>
    tpu.vector_store %arg5[%c1_9, %c72, %c0_10], %6 {strides = array<i32>} : memref<6x80x24xbf16, #tpu.memory_space<vmem>>, vector<4x8x24xbf16>,
    %c0_i32 = arith.constant 0 : i32
    %c0_11 = arith.constant 0 : index
    %8 = arith.index_cast %c0_i32 : i32 to index
    %c0_12 = arith.constant 0 : index
    %c0_13 = arith.constant 0 : index
    %9 = vector.load %arg1[%c0_11, %8, %c0_12, %c0_13] : memref<1x4x64x8xf32, #tpu.memory_space<vmem>>, vector<1x1x64x8xf32>
    %10 = vector.shape_cast %9 : vector<1x1x64x8xf32> to vector<1x64x8xf32>
    %11 = vector.shape_cast %10 : vector<1x64x8xf32> to vector<8x8x8xf32>
    %c1_i32 = arith.constant 1 : i32
    %12 = arith.addi %c1_i32, %c0_i32 : i32
    %cst_14 = arith.constant 0.000000e+00 : f32
    %13 = vector.broadcast %cst_14 : f32 to vector<8x1x8xf32>
    %14 = vector.extract_strided_slice %11 {offsets = [0, 0, 0], sizes = [8, 7, 8], strides = [1, 1, 1]} : vector<8x8x8xf32> to vector<8x7x8xf32>
    %15 = tpu.concatenate %13, %14 in 1 : vector<8x1x8xf32>, vector<8x7x8xf32> -> vector<8x8x8xf32>
    %16 = vector.extract_strided_slice %11 {offsets = [0, 1, 0], sizes = [8, 7, 8], strides = [1, 1, 1]} : vector<8x8x8xf32> to vector<8x7x8xf32>
    %17 = tpu.concatenate %16, %13 in 1 : vector<8x7x8xf32>, vector<8x1x8xf32> -> vector<8x8x8xf32>
    %18 = tpu.concatenate %15, %11, %17 in 2 : vector<8x8x8xf32>, vector<8x8x8xf32>, vector<8x8x8xf32> -> vector<8x8x24xf32>
    %19 = vector.shape_cast %18 : vector<8x8x24xf32> to vector<1x64x24xf32>
    %20 = arith.truncf %19 : vector<1x64x24xf32> to vector<1x64x24xbf16>
    %21 = arith.index_cast %12 : i32 to index
    %c8 = arith.constant 8 : index
    %c0_15 = arith.constant 0 : index
    %22 = vector.load %arg5[%21, %c8, %c0_15] : memref<6x80x24xbf16, #tpu.memory_space<vmem>>, vector<1x64x24xbf16>
    tpu.vector_store %arg5[%21, %c8, %c0_15], %20 {strides = array<i32>} : memref<6x80x24xbf16, #tpu.memory_space<vmem>>, vector<1x64x24xbf16>,
    %c1_i32_16 = arith.constant 1 : i32
    %c0_17 = arith.constant 0 : index
    %23 = arith.index_cast %c1_i32_16 : i32 to index
    %c0_18 = arith.constant 0 : index
    %c0_19 = arith.constant 0 : index
    %24 = vector.load %arg1[%c0_17, %23, %c0_18, %c0_19] : memref<1x4x64x8xf32, #tpu.memory_space<vmem>>, vector<1x1x64x8xf32>
    %25 = vector.shape_cast %24 : vector<1x1x64x8xf32> to vector<1x64x8xf32>
    %26 = vector.shape_cast %25 : vector<1x64x8xf32> to vector<8x8x8xf32>
    %c1_i32_20 = arith.constant 1 : i32
    %27 = arith.addi %c1_i32_20, %c1_i32_16 : i32
    %cst_21 = arith.constant 0.000000e+00 : f32
    %28 = vector.broadcast %cst_21 : f32 to vector<8x1x8xf32>
    %29 = vector.extract_strided_slice %26 {offsets = [0, 0, 0], sizes = [8, 7, 8], strides = [1, 1, 1]} : vector<8x8x8xf32> to vector<8x7x8xf32>
    %30 = tpu.concatenate %28, %29 in 1 : vector<8x1x8xf32>, vector<8x7x8xf32> -> vector<8x8x8xf32>
    %31 = vector.extract_strided_slice %26 {offsets = [0, 1, 0], sizes = [8, 7, 8], strides = [1, 1, 1]} : vector<8x8x8xf32> to vector<8x7x8xf32>
    %32 = tpu.concatenate %31, %28 in 1 : vector<8x7x8xf32>, vector<8x1x8xf32> -> vector<8x8x8xf32>
    %33 = tpu.concatenate %30, %26, %32 in 2 : vector<8x8x8xf32>, vector<8x8x8xf32>, vector<8x8x8xf32> -> vector<8x8x24xf32>
    %34 = vector.shape_cast %33 : vector<8x8x24xf32> to vector<1x64x24xf32>
    %35 = arith.truncf %34 : vector<1x64x24xf32> to vector<1x64x24xbf16>
    %36 = arith.index_cast %27 : i32 to index
    %c8_22 = arith.constant 8 : index
    %c0_23 = arith.constant 0 : index
    %37 = vector.load %arg5[%36, %c8_22, %c0_23] : memref<6x80x24xbf16, #tpu.memory_space<vmem>>, vector<1x64x24xbf16>
    tpu.vector_store %arg5[%36, %c8_22, %c0_23], %35 {strides = array<i32>} : memref<6x80x24xbf16, #tpu.memory_space<vmem>>, vector<1x64x24xbf16>,
    %c2_i32 = arith.constant 2 : i32
    %c0_24 = arith.constant 0 : index
    %38 = arith.index_cast %c2_i32 : i32 to index
    %c0_25 = arith.constant 0 : index
    %c0_26 = arith.constant 0 : index
    %39 = vector.load %arg1[%c0_24, %38, %c0_25, %c0_26] : memref<1x4x64x8xf32, #tpu.memory_space<vmem>>, vector<1x1x64x8xf32>
    %40 = vector.shape_cast %39 : vector<1x1x64x8xf32> to vector<1x64x8xf32>
    %41 = vector.shape_cast %40 : vector<1x64x8xf32> to vector<8x8x8xf32>
    %c1_i32_27 = arith.constant 1 : i32
    %42 = arith.addi %c1_i32_27, %c2_i32 : i32
    %cst_28 = arith.constant 0.000000e+00 : f32
    %43 = vector.broadcast %cst_28 : f32 to vector<8x1x8xf32>
    %44 = vector.extract_strided_slice %41 {offsets = [0, 0, 0], sizes = [8, 7, 8], strides = [1, 1, 1]} : vector<8x8x8xf32> to vector<8x7x8xf32>
    %45 = tpu.concatenate %43, %44 in 1 : vector<8x1x8xf32>, vector<8x7x8xf32> -> vector<8x8x8xf32>
    %46 = vector.extract_strided_slice %41 {offsets = [0, 1, 0], sizes = [8, 7, 8], strides = [1, 1, 1]} : vector<8x8x8xf32> to vector<8x7x8xf32>
    %47 = tpu.concatenate %46, %43 in 1 : vector<8x7x8xf32>, vector<8x1x8xf32> -> vector<8x8x8xf32>
    %48 = tpu.concatenate %45, %41, %47 in 2 : vector<8x8x8xf32>, vector<8x8x8xf32>, vector<8x8x8xf32> -> vector<8x8x24xf32>
    %49 = vector.shape_cast %48 : vector<8x8x24xf32> to vector<1x64x24xf32>
    %50 = arith.truncf %49 : vector<1x64x24xf32> to vector<1x64x24xbf16>
    %51 = arith.index_cast %42 : i32 to index
    %c8_29 = arith.constant 8 : index
    %c0_30 = arith.constant 0 : index
    %52 = vector.load %arg5[%51, %c8_29, %c0_30] : memref<6x80x24xbf16, #tpu.memory_space<vmem>>, vector<1x64x24xbf16>
    tpu.vector_store %arg5[%51, %c8_29, %c0_30], %50 {strides = array<i32>} : memref<6x80x24xbf16, #tpu.memory_space<vmem>>, vector<1x64x24xbf16>,
    %c3_i32 = arith.constant 3 : i32
    %c0_31 = arith.constant 0 : index
    %53 = arith.index_cast %c3_i32 : i32 to index
    %c0_32 = arith.constant 0 : index
    %c0_33 = arith.constant 0 : index
    %54 = vector.load %arg1[%c0_31, %53, %c0_32, %c0_33] : memref<1x4x64x8xf32, #tpu.memory_space<vmem>>, vector<1x1x64x8xf32>
    %55 = vector.shape_cast %54 : vector<1x1x64x8xf32> to vector<1x64x8xf32>
    %56 = vector.shape_cast %55 : vector<1x64x8xf32> to vector<8x8x8xf32>
    %c1_i32_34 = arith.constant 1 : i32
    %57 = arith.addi %c1_i32_34, %c3_i32 : i32
    %cst_35 = arith.constant 0.000000e+00 : f32
    %58 = vector.broadcast %cst_35 : f32 to vector<8x1x8xf32>
    %59 = vector.extract_strided_slice %56 {offsets = [0, 0, 0], sizes = [8, 7, 8], strides = [1, 1, 1]} : vector<8x8x8xf32> to vector<8x7x8xf32>
    %60 = tpu.concatenate %58, %59 in 1 : vector<8x1x8xf32>, vector<8x7x8xf32> -> vector<8x8x8xf32>
    %61 = vector.extract_strided_slice %56 {offsets = [0, 1, 0], sizes = [8, 7, 8], strides = [1, 1, 1]} : vector<8x8x8xf32> to vector<8x7x8xf32>
    %62 = tpu.concatenate %61, %58 in 1 : vector<8x7x8xf32>, vector<8x1x8xf32> -> vector<8x8x8xf32>
    %63 = tpu.concatenate %60, %56, %62 in 2 : vector<8x8x8xf32>, vector<8x8x8xf32>, vector<8x8x8xf32> -> vector<8x8x24xf32>
    %64 = vector.shape_cast %63 : vector<8x8x24xf32> to vector<1x64x24xf32>
    %65 = arith.truncf %64 : vector<1x64x24xf32> to vector<1x64x24xbf16>
    %66 = arith.index_cast %57 : i32 to index
    %c8_36 = arith.constant 8 : index
    %c0_37 = arith.constant 0 : index
    %67 = vector.load %arg5[%66, %c8_36, %c0_37] : memref<6x80x24xbf16, #tpu.memory_space<vmem>>, vector<1x64x24xbf16>
    tpu.vector_store %arg5[%66, %c8_36, %c0_37], %65 {strides = array<i32>} : memref<6x80x24xbf16, #tpu.memory_space<vmem>>, vector<1x64x24xbf16>,
    %c4_i32 = arith.constant 4 : i32
    %c0_38 = arith.constant 0 : index
    %c0_39 = arith.constant 0 : index
    %c0_40 = arith.constant 0 : index
    %68 = vector.load %arg2[%c0_38, %c0_39, %c0_40] : memref<9x24x8xbf16, #tpu.memory_space<vmem>>, vector<1x24x8xbf16>
    %69 = vector.shape_cast %68 : vector<1x24x8xbf16> to vector<24x8xbf16>
    %c1_41 = arith.constant 1 : index
    %c0_42 = arith.constant 0 : index
    %c0_43 = arith.constant 0 : index
    %70 = vector.load %arg2[%c1_41, %c0_42, %c0_43] : memref<9x24x8xbf16, #tpu.memory_space<vmem>>, vector<1x24x8xbf16>
    %71 = vector.shape_cast %70 : vector<1x24x8xbf16> to vector<24x8xbf16>
    %c2 = arith.constant 2 : index
    %c0_44 = arith.constant 0 : index
    %c0_45 = arith.constant 0 : index
    %72 = vector.load %arg2[%c2, %c0_44, %c0_45] : memref<9x24x8xbf16, #tpu.memory_space<vmem>>, vector<1x24x8xbf16>
    %73 = vector.shape_cast %72 : vector<1x24x8xbf16> to vector<24x8xbf16>
    %c3 = arith.constant 3 : index
    %c0_46 = arith.constant 0 : index
    %c0_47 = arith.constant 0 : index
    %74 = vector.load %arg2[%c3, %c0_46, %c0_47] : memref<9x24x8xbf16, #tpu.memory_space<vmem>>, vector<1x24x8xbf16>
    %75 = vector.shape_cast %74 : vector<1x24x8xbf16> to vector<24x8xbf16>
    %c4 = arith.constant 4 : index
    %c0_48 = arith.constant 0 : index
    %c0_49 = arith.constant 0 : index
    %76 = vector.load %arg2[%c4, %c0_48, %c0_49] : memref<9x24x8xbf16, #tpu.memory_space<vmem>>, vector<1x24x8xbf16>
    %77 = vector.shape_cast %76 : vector<1x24x8xbf16> to vector<24x8xbf16>
    %c5_50 = arith.constant 5 : index
    %c0_51 = arith.constant 0 : index
    %c0_52 = arith.constant 0 : index
    %78 = vector.load %arg2[%c5_50, %c0_51, %c0_52] : memref<9x24x8xbf16, #tpu.memory_space<vmem>>, vector<1x24x8xbf16>
    %79 = vector.shape_cast %78 : vector<1x24x8xbf16> to vector<24x8xbf16>
    %c6 = arith.constant 6 : index
    %c0_53 = arith.constant 0 : index
    %c0_54 = arith.constant 0 : index
    %80 = vector.load %arg2[%c6, %c0_53, %c0_54] : memref<9x24x8xbf16, #tpu.memory_space<vmem>>, vector<1x24x8xbf16>
    %81 = vector.shape_cast %80 : vector<1x24x8xbf16> to vector<24x8xbf16>
    %c7 = arith.constant 7 : index
    %c0_55 = arith.constant 0 : index
    %c0_56 = arith.constant 0 : index
    %82 = vector.load %arg2[%c7, %c0_55, %c0_56] : memref<9x24x8xbf16, #tpu.memory_space<vmem>>, vector<1x24x8xbf16>
    %83 = vector.shape_cast %82 : vector<1x24x8xbf16> to vector<24x8xbf16>
    %c8_57 = arith.constant 8 : index
    %c0_58 = arith.constant 0 : index
    %c0_59 = arith.constant 0 : index
    %84 = vector.load %arg2[%c8_57, %c0_58, %c0_59] : memref<9x24x8xbf16, #tpu.memory_space<vmem>>, vector<1x24x8xbf16>
    %85 = vector.shape_cast %84 : vector<1x24x8xbf16> to vector<24x8xbf16>
    %cst_60 = arith.constant 0.000000e+00 : f32
    %86 = vector.broadcast %cst_60 : f32 to vector<1x8xf32>
    %c0_i32_61 = arith.constant 0 : i32
    %cst_62 = arith.constant 0.000000e+00 : f32
    %87 = vector.broadcast %cst_62 : f32 to vector<64x8xf32>
    %c0_i32_63 = arith.constant 0 : i32
    %88 = arith.addi %c0_i32_61, %c0_i32_63 : i32
    %89 = arith.index_cast %88 : i32 to index
    %c0_64 = arith.constant 0 : index
    %c0_65 = arith.constant 0 : index
    %90 = vector.load %arg5[%89, %c0_64, %c0_65] : memref<6x80x24xbf16, #tpu.memory_space<vmem>>, vector<1x80x24xbf16>
    %91 = vector.shape_cast %90 : vector<1x80x24xbf16> to vector<80x24xbf16>
    %92 = vector.extract_strided_slice %91 {offsets = [0, 0], sizes = [64, 24], strides = [1, 1]} : vector<80x24xbf16> to vector<64x24xbf16>
    %cst_66 = arith.constant dense<0.000000e+00> : vector<64x8xf32>
    %93 = tpu.matmul %92, %69, %cst_66 {dimension_numbers = #tpu.dot_dimension_numbers<[1], [0], [0], [1], [0, 0, 1, 1], [], []>} : vector<64x24xbf16>, vector<24x8xbf16>, vector<64x8xf32> -> vector<64x8xf32>
    %94 = arith.addf %87, %93 : vector<64x8xf32>
    %95 = vector.extract_strided_slice %91 {offsets = [8, 0], sizes = [64, 24], strides = [1, 1]} : vector<80x24xbf16> to vector<64x24xbf16>
    %cst_67 = arith.constant dense<0.000000e+00> : vector<64x8xf32>
    %96 = tpu.matmul %95, %71, %cst_67 {dimension_numbers = #tpu.dot_dimension_numbers<[1], [0], [0], [1], [0, 0, 1, 1], [], []>} : vector<64x24xbf16>, vector<24x8xbf16>, vector<64x8xf32> -> vector<64x8xf32>
    %97 = arith.addf %94, %96 : vector<64x8xf32>
    %98 = vector.extract_strided_slice %91 {offsets = [16, 0], sizes = [64, 24], strides = [1, 1]} : vector<80x24xbf16> to vector<64x24xbf16>
    %cst_68 = arith.constant dense<0.000000e+00> : vector<64x8xf32>
    %99 = tpu.matmul %98, %73, %cst_68 {dimension_numbers = #tpu.dot_dimension_numbers<[1], [0], [0], [1], [0, 0, 1, 1], [], []>} : vector<64x24xbf16>, vector<24x8xbf16>, vector<64x8xf32> -> vector<64x8xf32>
    %100 = arith.addf %97, %99 : vector<64x8xf32>
    %c1_i32_69 = arith.constant 1 : i32
    %101 = arith.addi %c0_i32_61, %c1_i32_69 : i32
    %102 = arith.index_cast %101 : i32 to index
    %c0_70 = arith.constant 0 : index
    %c0_71 = arith.constant 0 : index
    %103 = vector.load %arg5[%102, %c0_70, %c0_71] : memref<6x80x24xbf16, #tpu.memory_space<vmem>>, vector<1x80x24xbf16>
    %104 = vector.shape_cast %103 : vector<1x80x24xbf16> to vector<80x24xbf16>
    %105 = vector.extract_strided_slice %104 {offsets = [0, 0], sizes = [64, 24], strides = [1, 1]} : vector<80x24xbf16> to vector<64x24xbf16>
    %cst_72 = arith.constant dense<0.000000e+00> : vector<64x8xf32>
    %106 = tpu.matmul %105, %75, %cst_72 {dimension_numbers = #tpu.dot_dimension_numbers<[1], [0], [0], [1], [0, 0, 1, 1], [], []>} : vector<64x24xbf16>, vector<24x8xbf16>, vector<64x8xf32> -> vector<64x8xf32>
    %107 = arith.addf %100, %106 : vector<64x8xf32>
    %108 = vector.extract_strided_slice %104 {offsets = [8, 0], sizes = [64, 24], strides = [1, 1]} : vector<80x24xbf16> to vector<64x24xbf16>
    %cst_73 = arith.constant dense<0.000000e+00> : vector<64x8xf32>
    %109 = tpu.matmul %108, %77, %cst_73 {dimension_numbers = #tpu.dot_dimension_numbers<[1], [0], [0], [1], [0, 0, 1, 1], [], []>} : vector<64x24xbf16>, vector<24x8xbf16>, vector<64x8xf32> -> vector<64x8xf32>
    %110 = arith.addf %107, %109 : vector<64x8xf32>
    %111 = vector.extract_strided_slice %104 {offsets = [16, 0], sizes = [64, 24], strides = [1, 1]} : vector<80x24xbf16> to vector<64x24xbf16>
    %cst_74 = arith.constant dense<0.000000e+00> : vector<64x8xf32>
    %112 = tpu.matmul %111, %79, %cst_74 {dimension_numbers = #tpu.dot_dimension_numbers<[1], [0], [0], [1], [0, 0, 1, 1], [], []>} : vector<64x24xbf16>, vector<24x8xbf16>, vector<64x8xf32> -> vector<64x8xf32>
    %113 = arith.addf %110, %112 : vector<64x8xf32>
    %c2_i32_75 = arith.constant 2 : i32
    %114 = arith.addi %c0_i32_61, %c2_i32_75 : i32
    %115 = arith.index_cast %114 : i32 to index
    %c0_76 = arith.constant 0 : index
    %c0_77 = arith.constant 0 : index
    %116 = vector.load %arg5[%115, %c0_76, %c0_77] : memref<6x80x24xbf16, #tpu.memory_space<vmem>>, vector<1x80x24xbf16>
    %117 = vector.shape_cast %116 : vector<1x80x24xbf16> to vector<80x24xbf16>
    %118 = vector.extract_strided_slice %117 {offsets = [0, 0], sizes = [64, 24], strides = [1, 1]} : vector<80x24xbf16> to vector<64x24xbf16>
    %cst_78 = arith.constant dense<0.000000e+00> : vector<64x8xf32>
    %119 = tpu.matmul %118, %81, %cst_78 {dimension_numbers = #tpu.dot_dimension_numbers<[1], [0], [0], [1], [0, 0, 1, 1], [], []>} : vector<64x24xbf16>, vector<24x8xbf16>, vector<64x8xf32> -> vector<64x8xf32>
    %120 = arith.addf %113, %119 : vector<64x8xf32>
    %121 = vector.extract_strided_slice %117 {offsets = [8, 0], sizes = [64, 24], strides = [1, 1]} : vector<80x24xbf16> to vector<64x24xbf16>
    %cst_79 = arith.constant dense<0.000000e+00> : vector<64x8xf32>
    %122 = tpu.matmul %121, %83, %cst_79 {dimension_numbers = #tpu.dot_dimension_numbers<[1], [0], [0], [1], [0, 0, 1, 1], [], []>} : vector<64x24xbf16>, vector<24x8xbf16>, vector<64x8xf32> -> vector<64x8xf32>
    %123 = arith.addf %120, %122 : vector<64x8xf32>
    %124 = vector.extract_strided_slice %117 {offsets = [16, 0], sizes = [64, 24], strides = [1, 1]} : vector<80x24xbf16> to vector<64x24xbf16>
    %cst_80 = arith.constant dense<0.000000e+00> : vector<64x8xf32>
    %125 = tpu.matmul %124, %85, %cst_80 {dimension_numbers = #tpu.dot_dimension_numbers<[1], [0], [0], [1], [0, 0, 1, 1], [], []>} : vector<64x24xbf16>, vector<24x8xbf16>, vector<64x8xf32> -> vector<64x8xf32>
    %126 = arith.addf %123, %125 : vector<64x8xf32>
    %127 = vector.shape_cast %126 : vector<64x8xf32> to vector<1x64x8xf32>
    %128 = arith.index_cast %c0_i32_61 : i32 to index
    %c0_81 = arith.constant 0 : index
    %c0_82 = arith.constant 0 : index
    %129 = vector.load %arg6[%128, %c0_81, %c0_82] : memref<4x64x8xf32, #tpu.memory_space<vmem>>, vector<1x64x8xf32>
    tpu.vector_store %arg6[%128, %c0_81, %c0_82], %127 {strides = array<i32>} : memref<4x64x8xf32, #tpu.memory_space<vmem>>, vector<1x64x8xf32>,
    %cst_83 = arith.constant dense<0.000000e+00> : vector<8xf32>
    %130 = vector.multi_reduction <add>, %126, %cst_83 [0] : vector<64x8xf32> to vector<8xf32>
    %131 = vector.shape_cast %130 : vector<8xf32> to vector<1x8xf32>
    %132 = arith.addf %86, %131 : vector<1x8xf32>
    %133 = arith.mulf %126, %126 : vector<64x8xf32>
    %cst_84 = arith.constant dense<0.000000e+00> : vector<8xf32>
    %134 = vector.multi_reduction <add>, %133, %cst_84 [0] : vector<64x8xf32> to vector<8xf32>
    %135 = vector.shape_cast %134 : vector<8xf32> to vector<1x8xf32>
    %136 = arith.addf %86, %135 : vector<1x8xf32>
    %c1_i32_85 = arith.constant 1 : i32
    %cst_86 = arith.constant 0.000000e+00 : f32
    %137 = vector.broadcast %cst_86 : f32 to vector<64x8xf32>
    %c0_i32_87 = arith.constant 0 : i32
    %138 = arith.addi %c1_i32_85, %c0_i32_87 : i32
    %139 = arith.index_cast %138 : i32 to index
    %c0_88 = arith.constant 0 : index
    %c0_89 = arith.constant 0 : index
    %140 = vector.load %arg5[%139, %c0_88, %c0_89] : memref<6x80x24xbf16, #tpu.memory_space<vmem>>, vector<1x80x24xbf16>
    %141 = vector.shape_cast %140 : vector<1x80x24xbf16> to vector<80x24xbf16>
    %142 = vector.extract_strided_slice %141 {offsets = [0, 0], sizes = [64, 24], strides = [1, 1]} : vector<80x24xbf16> to vector<64x24xbf16>
    %cst_90 = arith.constant dense<0.000000e+00> : vector<64x8xf32>
    %143 = tpu.matmul %142, %69, %cst_90 {dimension_numbers = #tpu.dot_dimension_numbers<[1], [0], [0], [1], [0, 0, 1, 1], [], []>} : vector<64x24xbf16>, vector<24x8xbf16>, vector<64x8xf32> -> vector<64x8xf32>
    %144 = arith.addf %137, %143 : vector<64x8xf32>
    %145 = vector.extract_strided_slice %141 {offsets = [8, 0], sizes = [64, 24], strides = [1, 1]} : vector<80x24xbf16> to vector<64x24xbf16>
    %cst_91 = arith.constant dense<0.000000e+00> : vector<64x8xf32>
    %146 = tpu.matmul %145, %71, %cst_91 {dimension_numbers = #tpu.dot_dimension_numbers<[1], [0], [0], [1], [0, 0, 1, 1], [], []>} : vector<64x24xbf16>, vector<24x8xbf16>, vector<64x8xf32> -> vector<64x8xf32>
    %147 = arith.addf %144, %146 : vector<64x8xf32>
    %148 = vector.extract_strided_slice %141 {offsets = [16, 0], sizes = [64, 24], strides = [1, 1]} : vector<80x24xbf16> to vector<64x24xbf16>
    %cst_92 = arith.constant dense<0.000000e+00> : vector<64x8xf32>
    %149 = tpu.matmul %148, %73, %cst_92 {dimension_numbers = #tpu.dot_dimension_numbers<[1], [0], [0], [1], [0, 0, 1, 1], [], []>} : vector<64x24xbf16>, vector<24x8xbf16>, vector<64x8xf32> -> vector<64x8xf32>
    %150 = arith.addf %147, %149 : vector<64x8xf32>
    %c1_i32_93 = arith.constant 1 : i32
    %151 = arith.addi %c1_i32_85, %c1_i32_93 : i32
    %152 = arith.index_cast %151 : i32 to index
    %c0_94 = arith.constant 0 : index
    %c0_95 = arith.constant 0 : index
    %153 = vector.load %arg5[%152, %c0_94, %c0_95] : memref<6x80x24xbf16, #tpu.memory_space<vmem>>, vector<1x80x24xbf16>
    %154 = vector.shape_cast %153 : vector<1x80x24xbf16> to vector<80x24xbf16>
    %155 = vector.extract_strided_slice %154 {offsets = [0, 0], sizes = [64, 24], strides = [1, 1]} : vector<80x24xbf16> to vector<64x24xbf16>
    %cst_96 = arith.constant dense<0.000000e+00> : vector<64x8xf32>
    %156 = tpu.matmul %155, %75, %cst_96 {dimension_numbers = #tpu.dot_dimension_numbers<[1], [0], [0], [1], [0, 0, 1, 1], [], []>} : vector<64x24xbf16>, vector<24x8xbf16>, vector<64x8xf32> -> vector<64x8xf32>
    %157 = arith.addf %150, %156 : vector<64x8xf32>
    %158 = vector.extract_strided_slice %154 {offsets = [8, 0], sizes = [64, 24], strides = [1, 1]} : vector<80x24xbf16> to vector<64x24xbf16>
    %cst_97 = arith.constant dense<0.000000e+00> : vector<64x8xf32>
    %159 = tpu.matmul %158, %77, %cst_97 {dimension_numbers = #tpu.dot_dimension_numbers<[1], [0], [0], [1], [0, 0, 1, 1], [], []>} : vector<64x24xbf16>, vector<24x8xbf16>, vector<64x8xf32> -> vector<64x8xf32>
    %160 = arith.addf %157, %159 : vector<64x8xf32>
    %161 = vector.extract_strided_slice %154 {offsets = [16, 0], sizes = [64, 24], strides = [1, 1]} : vector<80x24xbf16> to vector<64x24xbf16>
    %cst_98 = arith.constant dense<0.000000e+00> : vector<64x8xf32>
    %162 = tpu.matmul %161, %79, %cst_98 {dimension_numbers = #tpu.dot_dimension_numbers<[1], [0], [0], [1], [0, 0, 1, 1], [], []>} : vector<64x24xbf16>, vector<24x8xbf16>, vector<64x8xf32> -> vector<64x8xf32>
    %163 = arith.addf %160, %162 : vector<64x8xf32>
    %c2_i32_99 = arith.constant 2 : i32
    %164 = arith.addi %c1_i32_85, %c2_i32_99 : i32
    %165 = arith.index_cast %164 : i32 to index
    %c0_100 = arith.constant 0 : index
    %c0_101 = arith.constant 0 : index
    %166 = vector.load %arg5[%165, %c0_100, %c0_101] : memref<6x80x24xbf16, #tpu.memory_space<vmem>>, vector<1x80x24xbf16>
    %167 = vector.shape_cast %166 : vector<1x80x24xbf16> to vector<80x24xbf16>
    %168 = vector.extract_strided_slice %167 {offsets = [0, 0], sizes = [64, 24], strides = [1, 1]} : vector<80x24xbf16> to vector<64x24xbf16>
    %cst_102 = arith.constant dense<0.000000e+00> : vector<64x8xf32>
    %169 = tpu.matmul %168, %81, %cst_102 {dimension_numbers = #tpu.dot_dimension_numbers<[1], [0], [0], [1], [0, 0, 1, 1], [], []>} : vector<64x24xbf16>, vector<24x8xbf16>, vector<64x8xf32> -> vector<64x8xf32>
    %170 = arith.addf %163, %169 : vector<64x8xf32>
    %171 = vector.extract_strided_slice %167 {offsets = [8, 0], sizes = [64, 24], strides = [1, 1]} : vector<80x24xbf16> to vector<64x24xbf16>
    %cst_103 = arith.constant dense<0.000000e+00> : vector<64x8xf32>
    %172 = tpu.matmul %171, %83, %cst_103 {dimension_numbers = #tpu.dot_dimension_numbers<[1], [0], [0], [1], [0, 0, 1, 1], [], []>} : vector<64x24xbf16>, vector<24x8xbf16>, vector<64x8xf32> -> vector<64x8xf32>
    %173 = arith.addf %170, %172 : vector<64x8xf32>
    %174 = vector.extract_strided_slice %167 {offsets = [16, 0], sizes = [64, 24], strides = [1, 1]} : vector<80x24xbf16> to vector<64x24xbf16>
    %cst_104 = arith.constant dense<0.000000e+00> : vector<64x8xf32>
    %175 = tpu.matmul %174, %85, %cst_104 {dimension_numbers = #tpu.dot_dimension_numbers<[1], [0], [0], [1], [0, 0, 1, 1], [], []>} : vector<64x24xbf16>, vector<24x8xbf16>, vector<64x8xf32> -> vector<64x8xf32>
    %176 = arith.addf %173, %175 : vector<64x8xf32>
    %177 = vector.shape_cast %176 : vector<64x8xf32> to vector<1x64x8xf32>
    %178 = arith.index_cast %c1_i32_85 : i32 to index
    %c0_105 = arith.constant 0 : index
    %c0_106 = arith.constant 0 : index
    %179 = vector.load %arg6[%178, %c0_105, %c0_106] : memref<4x64x8xf32, #tpu.memory_space<vmem>>, vector<1x64x8xf32>
    tpu.vector_store %arg6[%178, %c0_105, %c0_106], %177 {strides = array<i32>} : memref<4x64x8xf32, #tpu.memory_space<vmem>>, vector<1x64x8xf32>,
    %cst_107 = arith.constant dense<0.000000e+00> : vector<8xf32>
    %180 = vector.multi_reduction <add>, %176, %cst_107 [0] : vector<64x8xf32> to vector<8xf32>
    %181 = vector.shape_cast %180 : vector<8xf32> to vector<1x8xf32>
    %182 = arith.addf %132, %181 : vector<1x8xf32>
    %183 = arith.mulf %176, %176 : vector<64x8xf32>
    %cst_108 = arith.constant dense<0.000000e+00> : vector<8xf32>
    %184 = vector.multi_reduction <add>, %183, %cst_108 [0] : vector<64x8xf32> to vector<8xf32>
    %185 = vector.shape_cast %184 : vector<8xf32> to vector<1x8xf32>
    %186 = arith.addf %136, %185 : vector<1x8xf32>
    %c2_i32_109 = arith.constant 2 : i32
    %cst_110 = arith.constant 0.000000e+00 : f32
    %187 = vector.broadcast %cst_110 : f32 to vector<64x8xf32>
    %c0_i32_111 = arith.constant 0 : i32
    %188 = arith.addi %c2_i32_109, %c0_i32_111 : i32
    %189 = arith.index_cast %188 : i32 to index
    %c0_112 = arith.constant 0 : index
    %c0_113 = arith.constant 0 : index
    %190 = vector.load %arg5[%189, %c0_112, %c0_113] : memref<6x80x24xbf16, #tpu.memory_space<vmem>>, vector<1x80x24xbf16>
    %191 = vector.shape_cast %190 : vector<1x80x24xbf16> to vector<80x24xbf16>
    %192 = vector.extract_strided_slice %191 {offsets = [0, 0], sizes = [64, 24], strides = [1, 1]} : vector<80x24xbf16> to vector<64x24xbf16>
    %cst_114 = arith.constant dense<0.000000e+00> : vector<64x8xf32>
    %193 = tpu.matmul %192, %69, %cst_114 {dimension_numbers = #tpu.dot_dimension_numbers<[1], [0], [0], [1], [0, 0, 1, 1], [], []>} : vector<64x24xbf16>, vector<24x8xbf16>, vector<64x8xf32> -> vector<64x8xf32>
    %194 = arith.addf %187, %193 : vector<64x8xf32>
    %195 = vector.extract_strided_slice %191 {offsets = [8, 0], sizes = [64, 24], strides = [1, 1]} : vector<80x24xbf16> to vector<64x24xbf16>
    %cst_115 = arith.constant dense<0.000000e+00> : vector<64x8xf32>
    %196 = tpu.matmul %195, %71, %cst_115 {dimension_numbers = #tpu.dot_dimension_numbers<[1], [0], [0], [1], [0, 0, 1, 1], [], []>} : vector<64x24xbf16>, vector<24x8xbf16>, vector<64x8xf32> -> vector<64x8xf32>
    %197 = arith.addf %194, %196 : vector<64x8xf32>
    %198 = vector.extract_strided_slice %191 {offsets = [16, 0], sizes = [64, 24], strides = [1, 1]} : vector<80x24xbf16> to vector<64x24xbf16>
    %cst_116 = arith.constant dense<0.000000e+00> : vector<64x8xf32>
    %199 = tpu.matmul %198, %73, %cst_116 {dimension_numbers = #tpu.dot_dimension_numbers<[1], [0], [0], [1], [0, 0, 1, 1], [], []>} : vector<64x24xbf16>, vector<24x8xbf16>, vector<64x8xf32> -> vector<64x8xf32>
    %200 = arith.addf %197, %199 : vector<64x8xf32>
    %c1_i32_117 = arith.constant 1 : i32
    %201 = arith.addi %c2_i32_109, %c1_i32_117 : i32
    %202 = arith.index_cast %201 : i32 to index
    %c0_118 = arith.constant 0 : index
    %c0_119 = arith.constant 0 : index
    %203 = vector.load %arg5[%202, %c0_118, %c0_119] : memref<6x80x24xbf16, #tpu.memory_space<vmem>>, vector<1x80x24xbf16>
    %204 = vector.shape_cast %203 : vector<1x80x24xbf16> to vector<80x24xbf16>
    %205 = vector.extract_strided_slice %204 {offsets = [0, 0], sizes = [64, 24], strides = [1, 1]} : vector<80x24xbf16> to vector<64x24xbf16>
    %cst_120 = arith.constant dense<0.000000e+00> : vector<64x8xf32>
    %206 = tpu.matmul %205, %75, %cst_120 {dimension_numbers = #tpu.dot_dimension_numbers<[1], [0], [0], [1], [0, 0, 1, 1], [], []>} : vector<64x24xbf16>, vector<24x8xbf16>, vector<64x8xf32> -> vector<64x8xf32>
    %207 = arith.addf %200, %206 : vector<64x8xf32>
    %208 = vector.extract_strided_slice %204 {offsets = [8, 0], sizes = [64, 24], strides = [1, 1]} : vector<80x24xbf16> to vector<64x24xbf16>
    %cst_121 = arith.constant dense<0.000000e+00> : vector<64x8xf32>
    %209 = tpu.matmul %208, %77, %cst_121 {dimension_numbers = #tpu.dot_dimension_numbers<[1], [0], [0], [1], [0, 0, 1, 1], [], []>} : vector<64x24xbf16>, vector<24x8xbf16>, vector<64x8xf32> -> vector<64x8xf32>
    %210 = arith.addf %207, %209 : vector<64x8xf32>
    %211 = vector.extract_strided_slice %204 {offsets = [16, 0], sizes = [64, 24], strides = [1, 1]} : vector<80x24xbf16> to vector<64x24xbf16>
    %cst_122 = arith.constant dense<0.000000e+00> : vector<64x8xf32>
    %212 = tpu.matmul %211, %79, %cst_122 {dimension_numbers = #tpu.dot_dimension_numbers<[1], [0], [0], [1], [0, 0, 1, 1], [], []>} : vector<64x24xbf16>, vector<24x8xbf16>, vector<64x8xf32> -> vector<64x8xf32>
    %213 = arith.addf %210, %212 : vector<64x8xf32>
    %c2_i32_123 = arith.constant 2 : i32
    %214 = arith.addi %c2_i32_109, %c2_i32_123 : i32
    %215 = arith.index_cast %214 : i32 to index
    %c0_124 = arith.constant 0 : index
    %c0_125 = arith.constant 0 : index
    %216 = vector.load %arg5[%215, %c0_124, %c0_125] : memref<6x80x24xbf16, #tpu.memory_space<vmem>>, vector<1x80x24xbf16>
    %217 = vector.shape_cast %216 : vector<1x80x24xbf16> to vector<80x24xbf16>
    %218 = vector.extract_strided_slice %217 {offsets = [0, 0], sizes = [64, 24], strides = [1, 1]} : vector<80x24xbf16> to vector<64x24xbf16>
    %cst_126 = arith.constant dense<0.000000e+00> : vector<64x8xf32>
    %219 = tpu.matmul %218, %81, %cst_126 {dimension_numbers = #tpu.dot_dimension_numbers<[1], [0], [0], [1], [0, 0, 1, 1], [], []>} : vector<64x24xbf16>, vector<24x8xbf16>, vector<64x8xf32> -> vector<64x8xf32>
    %220 = arith.addf %213, %219 : vector<64x8xf32>
    %221 = vector.extract_strided_slice %217 {offsets = [8, 0], sizes = [64, 24], strides = [1, 1]} : vector<80x24xbf16> to vector<64x24xbf16>
    %cst_127 = arith.constant dense<0.000000e+00> : vector<64x8xf32>
    %222 = tpu.matmul %221, %83, %cst_127 {dimension_numbers = #tpu.dot_dimension_numbers<[1], [0], [0], [1], [0, 0, 1, 1], [], []>} : vector<64x24xbf16>, vector<24x8xbf16>, vector<64x8xf32> -> vector<64x8xf32>
    %223 = arith.addf %220, %222 : vector<64x8xf32>
    %224 = vector.extract_strided_slice %217 {offsets = [16, 0], sizes = [64, 24], strides = [1, 1]} : vector<80x24xbf16> to vector<64x24xbf16>
    %cst_128 = arith.constant dense<0.000000e+00> : vector<64x8xf32>
    %225 = tpu.matmul %224, %85, %cst_128 {dimension_numbers = #tpu.dot_dimension_numbers<[1], [0], [0], [1], [0, 0, 1, 1], [], []>} : vector<64x24xbf16>, vector<24x8xbf16>, vector<64x8xf32> -> vector<64x8xf32>
    %226 = arith.addf %223, %225 : vector<64x8xf32>
    %227 = vector.shape_cast %226 : vector<64x8xf32> to vector<1x64x8xf32>
    %228 = arith.index_cast %c2_i32_109 : i32 to index
    %c0_129 = arith.constant 0 : index
    %c0_130 = arith.constant 0 : index
    %229 = vector.load %arg6[%228, %c0_129, %c0_130] : memref<4x64x8xf32, #tpu.memory_space<vmem>>, vector<1x64x8xf32>
    tpu.vector_store %arg6[%228, %c0_129, %c0_130], %227 {strides = array<i32>} : memref<4x64x8xf32, #tpu.memory_space<vmem>>, vector<1x64x8xf32>,
    %cst_131 = arith.constant dense<0.000000e+00> : vector<8xf32>
    %230 = vector.multi_reduction <add>, %226, %cst_131 [0] : vector<64x8xf32> to vector<8xf32>
    %231 = vector.shape_cast %230 : vector<8xf32> to vector<1x8xf32>
    %232 = arith.addf %182, %231 : vector<1x8xf32>
    %233 = arith.mulf %226, %226 : vector<64x8xf32>
    %cst_132 = arith.constant dense<0.000000e+00> : vector<8xf32>
    %234 = vector.multi_reduction <add>, %233, %cst_132 [0] : vector<64x8xf32> to vector<8xf32>
    %235 = vector.shape_cast %234 : vector<8xf32> to vector<1x8xf32>
    %236 = arith.addf %186, %235 : vector<1x8xf32>
    %c3_i32_133 = arith.constant 3 : i32
    %cst_134 = arith.constant 0.000000e+00 : f32
    %237 = vector.broadcast %cst_134 : f32 to vector<64x8xf32>
    %c0_i32_135 = arith.constant 0 : i32
    %238 = arith.addi %c3_i32_133, %c0_i32_135 : i32
    %239 = arith.index_cast %238 : i32 to index
    %c0_136 = arith.constant 0 : index
    %c0_137 = arith.constant 0 : index
    %240 = vector.load %arg5[%239, %c0_136, %c0_137] : memref<6x80x24xbf16, #tpu.memory_space<vmem>>, vector<1x80x24xbf16>
    %241 = vector.shape_cast %240 : vector<1x80x24xbf16> to vector<80x24xbf16>
    %242 = vector.extract_strided_slice %241 {offsets = [0, 0], sizes = [64, 24], strides = [1, 1]} : vector<80x24xbf16> to vector<64x24xbf16>
    %cst_138 = arith.constant dense<0.000000e+00> : vector<64x8xf32>
    %243 = tpu.matmul %242, %69, %cst_138 {dimension_numbers = #tpu.dot_dimension_numbers<[1], [0], [0], [1], [0, 0, 1, 1], [], []>} : vector<64x24xbf16>, vector<24x8xbf16>, vector<64x8xf32> -> vector<64x8xf32>
    %244 = arith.addf %237, %243 : vector<64x8xf32>
    %245 = vector.extract_strided_slice %241 {offsets = [8, 0], sizes = [64, 24], strides = [1, 1]} : vector<80x24xbf16> to vector<64x24xbf16>
    %cst_139 = arith.constant dense<0.000000e+00> : vector<64x8xf32>
    %246 = tpu.matmul %245, %71, %cst_139 {dimension_numbers = #tpu.dot_dimension_numbers<[1], [0], [0], [1], [0, 0, 1, 1], [], []>} : vector<64x24xbf16>, vector<24x8xbf16>, vector<64x8xf32> -> vector<64x8xf32>
    %247 = arith.addf %244, %246 : vector<64x8xf32>
    %248 = vector.extract_strided_slice %241 {offsets = [16, 0], sizes = [64, 24], strides = [1, 1]} : vector<80x24xbf16> to vector<64x24xbf16>
    %cst_140 = arith.constant dense<0.000000e+00> : vector<64x8xf32>
    %249 = tpu.matmul %248, %73, %cst_140 {dimension_numbers = #tpu.dot_dimension_numbers<[1], [0], [0], [1], [0, 0, 1, 1], [], []>} : vector<64x24xbf16>, vector<24x8xbf16>, vector<64x8xf32> -> vector<64x8xf32>
    %250 = arith.addf %247, %249 : vector<64x8xf32>
    %c1_i32_141 = arith.constant 1 : i32
    %251 = arith.addi %c3_i32_133, %c1_i32_141 : i32
    %252 = arith.index_cast %251 : i32 to index
    %c0_142 = arith.constant 0 : index
    %c0_143 = arith.constant 0 : index
    %253 = vector.load %arg5[%252, %c0_142, %c0_143] : memref<6x80x24xbf16, #tpu.memory_space<vmem>>, vector<1x80x24xbf16>
    %254 = vector.shape_cast %253 : vector<1x80x24xbf16> to vector<80x24xbf16>
    %255 = vector.extract_strided_slice %254 {offsets = [0, 0], sizes = [64, 24], strides = [1, 1]} : vector<80x24xbf16> to vector<64x24xbf16>
    %cst_144 = arith.constant dense<0.000000e+00> : vector<64x8xf32>
    %256 = tpu.matmul %255, %75, %cst_144 {dimension_numbers = #tpu.dot_dimension_numbers<[1], [0], [0], [1], [0, 0, 1, 1], [], []>} : vector<64x24xbf16>, vector<24x8xbf16>, vector<64x8xf32> -> vector<64x8xf32>
    %257 = arith.addf %250, %256 : vector<64x8xf32>
    %258 = vector.extract_strided_slice %254 {offsets = [8, 0], sizes = [64, 24], strides = [1, 1]} : vector<80x24xbf16> to vector<64x24xbf16>
    %cst_145 = arith.constant dense<0.000000e+00> : vector<64x8xf32>
    %259 = tpu.matmul %258, %77, %cst_145 {dimension_numbers = #tpu.dot_dimension_numbers<[1], [0], [0], [1], [0, 0, 1, 1], [], []>} : vector<64x24xbf16>, vector<24x8xbf16>, vector<64x8xf32> -> vector<64x8xf32>
    %260 = arith.addf %257, %259 : vector<64x8xf32>
    %261 = vector.extract_strided_slice %254 {offsets = [16, 0], sizes = [64, 24], strides = [1, 1]} : vector<80x24xbf16> to vector<64x24xbf16>
    %cst_146 = arith.constant dense<0.000000e+00> : vector<64x8xf32>
    %262 = tpu.matmul %261, %79, %cst_146 {dimension_numbers = #tpu.dot_dimension_numbers<[1], [0], [0], [1], [0, 0, 1, 1], [], []>} : vector<64x24xbf16>, vector<24x8xbf16>, vector<64x8xf32> -> vector<64x8xf32>
    %263 = arith.addf %260, %262 : vector<64x8xf32>
    %c2_i32_147 = arith.constant 2 : i32
    %264 = arith.addi %c3_i32_133, %c2_i32_147 : i32
    %265 = arith.index_cast %264 : i32 to index
    %c0_148 = arith.constant 0 : index
    %c0_149 = arith.constant 0 : index
    %266 = vector.load %arg5[%265, %c0_148, %c0_149] : memref<6x80x24xbf16, #tpu.memory_space<vmem>>, vector<1x80x24xbf16>
    %267 = vector.shape_cast %266 : vector<1x80x24xbf16> to vector<80x24xbf16>
    %268 = vector.extract_strided_slice %267 {offsets = [0, 0], sizes = [64, 24], strides = [1, 1]} : vector<80x24xbf16> to vector<64x24xbf16>
    %cst_150 = arith.constant dense<0.000000e+00> : vector<64x8xf32>
    %269 = tpu.matmul %268, %81, %cst_150 {dimension_numbers = #tpu.dot_dimension_numbers<[1], [0], [0], [1], [0, 0, 1, 1], [], []>} : vector<64x24xbf16>, vector<24x8xbf16>, vector<64x8xf32> -> vector<64x8xf32>
    %270 = arith.addf %263, %269 : vector<64x8xf32>
    %271 = vector.extract_strided_slice %267 {offsets = [8, 0], sizes = [64, 24], strides = [1, 1]} : vector<80x24xbf16> to vector<64x24xbf16>
    %cst_151 = arith.constant dense<0.000000e+00> : vector<64x8xf32>
    %272 = tpu.matmul %271, %83, %cst_151 {dimension_numbers = #tpu.dot_dimension_numbers<[1], [0], [0], [1], [0, 0, 1, 1], [], []>} : vector<64x24xbf16>, vector<24x8xbf16>, vector<64x8xf32> -> vector<64x8xf32>
    %273 = arith.addf %270, %272 : vector<64x8xf32>
    %274 = vector.extract_strided_slice %267 {offsets = [16, 0], sizes = [64, 24], strides = [1, 1]} : vector<80x24xbf16> to vector<64x24xbf16>
    %cst_152 = arith.constant dense<0.000000e+00> : vector<64x8xf32>
    %275 = tpu.matmul %274, %85, %cst_152 {dimension_numbers = #tpu.dot_dimension_numbers<[1], [0], [0], [1], [0, 0, 1, 1], [], []>} : vector<64x24xbf16>, vector<24x8xbf16>, vector<64x8xf32> -> vector<64x8xf32>
    %276 = arith.addf %273, %275 : vector<64x8xf32>
    %277 = vector.shape_cast %276 : vector<64x8xf32> to vector<1x64x8xf32>
    %278 = arith.index_cast %c3_i32_133 : i32 to index
    %c0_153 = arith.constant 0 : index
    %c0_154 = arith.constant 0 : index
    %279 = vector.load %arg6[%278, %c0_153, %c0_154] : memref<4x64x8xf32, #tpu.memory_space<vmem>>, vector<1x64x8xf32>
    tpu.vector_store %arg6[%278, %c0_153, %c0_154], %277 {strides = array<i32>} : memref<4x64x8xf32, #tpu.memory_space<vmem>>, vector<1x64x8xf32>,
    %cst_155 = arith.constant dense<0.000000e+00> : vector<8xf32>
    %280 = vector.multi_reduction <add>, %276, %cst_155 [0] : vector<64x8xf32> to vector<8xf32>
    %281 = vector.shape_cast %280 : vector<8xf32> to vector<1x8xf32>
    %282 = arith.addf %232, %281 : vector<1x8xf32>
    %283 = arith.mulf %276, %276 : vector<64x8xf32>
    %cst_156 = arith.constant dense<0.000000e+00> : vector<8xf32>
    %284 = vector.multi_reduction <add>, %283, %cst_156 [0] : vector<64x8xf32> to vector<8xf32>
    %285 = vector.shape_cast %284 : vector<8xf32> to vector<1x8xf32>
    %286 = arith.addf %236, %285 : vector<1x8xf32>
    %c4_i32_157 = arith.constant 4 : i32
    %cst_158 = arith.constant 3.906250e-03 : f32
    %287 = vector.broadcast %cst_158 : f32 to vector<1x8xf32>
    %288 = arith.mulf %282, %287 : vector<1x8xf32>
    %cst_159 = arith.constant 3.906250e-03 : f32
    %289 = vector.broadcast %cst_159 : f32 to vector<1x8xf32>
    %290 = arith.mulf %286, %289 : vector<1x8xf32>
    %291 = arith.mulf %288, %288 : vector<1x8xf32>
    %292 = arith.subf %290, %291 : vector<1x8xf32>
    %cst_160 = arith.constant 0.000000e+00 : f32
    %293 = vector.broadcast %cst_160 : f32 to vector<1x8xf32>
    %294 = arith.maximumf %292, %293 : vector<1x8xf32>
    %cst_161 = arith.constant 9.99999974E-6 : f32
    %295 = vector.broadcast %cst_161 : f32 to vector<1x8xf32>
    %296 = arith.addf %294, %295 : vector<1x8xf32>
    %297 = math.rsqrt %296 : vector<1x8xf32>
    %298 = vector.shape_cast %297 : vector<1x8xf32> to vector<1x8xf32>
    %299 = vector.broadcast %298 : vector<1x8xf32> to vector<64x8xf32>
    %cst_162 = arith.constant 0.000000e+00 : f32
    %300 = vector.broadcast %cst_162 : f32 to vector<1x8xf32>
    %301 = arith.subf %300, %288 : vector<1x8xf32>
    %302 = arith.mulf %301, %297 : vector<1x8xf32>
    %303 = vector.shape_cast %302 : vector<1x8xf32> to vector<1x8xf32>
    %304 = vector.broadcast %303 : vector<1x8xf32> to vector<64x8xf32>
    %c0_i32_163 = arith.constant 0 : i32
    %305 = arith.index_cast %c0_i32_163 : i32 to index
    %c0_164 = arith.constant 0 : index
    %c0_165 = arith.constant 0 : index
    %306 = vector.load %arg6[%305, %c0_164, %c0_165] : memref<4x64x8xf32, #tpu.memory_space<vmem>>, vector<1x64x8xf32>
    %307 = vector.shape_cast %306 : vector<1x64x8xf32> to vector<64x8xf32>
    %308 = arith.mulf %307, %299 : vector<64x8xf32>
    %309 = arith.addf %308, %304 : vector<64x8xf32>
    %cst_166 = arith.constant 0.000000e+00 : f32
    %310 = vector.broadcast %cst_166 : f32 to vector<64x8xf32>
    %311 = arith.maximumf %309, %310 : vector<64x8xf32>
    %c1_i32_167 = arith.constant 1 : i32
    %312 = arith.addi %c1_i32_167, %c0_i32_163 : i32
    %313 = vector.shape_cast %311 : vector<64x8xf32> to vector<8x8x8xf32>
    %cst_168 = arith.constant 0.000000e+00 : f32
    %314 = vector.broadcast %cst_168 : f32 to vector<8x1x8xf32>
    %315 = vector.extract_strided_slice %313 {offsets = [0, 0, 0], sizes = [8, 7, 8], strides = [1, 1, 1]} : vector<8x8x8xf32> to vector<8x7x8xf32>
    %316 = tpu.concatenate %314, %315 in 1 : vector<8x1x8xf32>, vector<8x7x8xf32> -> vector<8x8x8xf32>
    %317 = vector.extract_strided_slice %313 {offsets = [0, 1, 0], sizes = [8, 7, 8], strides = [1, 1, 1]} : vector<8x8x8xf32> to vector<8x7x8xf32>
    %318 = tpu.concatenate %317, %314 in 1 : vector<8x7x8xf32>, vector<8x1x8xf32> -> vector<8x8x8xf32>
    %319 = tpu.concatenate %316, %313, %318 in 2 : vector<8x8x8xf32>, vector<8x8x8xf32>, vector<8x8x8xf32> -> vector<8x8x24xf32>
    %320 = vector.shape_cast %319 : vector<8x8x24xf32> to vector<1x64x24xf32>
    %321 = arith.truncf %320 : vector<1x64x24xf32> to vector<1x64x24xbf16>
    %322 = arith.index_cast %312 : i32 to index
    %c8_169 = arith.constant 8 : index
    %c0_170 = arith.constant 0 : index
    %323 = vector.load %arg5[%322, %c8_169, %c0_170] : memref<6x80x24xbf16, #tpu.memory_space<vmem>>, vector<1x64x24xbf16>
    tpu.vector_store %arg5[%322, %c8_169, %c0_170], %321 {strides = array<i32>} : memref<6x80x24xbf16, #tpu.memory_space<vmem>>, vector<1x64x24xbf16>,
    %c1_i32_171 = arith.constant 1 : i32
    %324 = arith.index_cast %c1_i32_171 : i32 to index
    %c0_172 = arith.constant 0 : index
    %c0_173 = arith.constant 0 : index
    %325 = vector.load %arg6[%324, %c0_172, %c0_173] : memref<4x64x8xf32, #tpu.memory_space<vmem>>, vector<1x64x8xf32>
    %326 = vector.shape_cast %325 : vector<1x64x8xf32> to vector<64x8xf32>
    %327 = arith.mulf %326, %299 : vector<64x8xf32>
    %328 = arith.addf %327, %304 : vector<64x8xf32>
    %cst_174 = arith.constant 0.000000e+00 : f32
    %329 = vector.broadcast %cst_174 : f32 to vector<64x8xf32>
    %330 = arith.maximumf %328, %329 : vector<64x8xf32>
    %c1_i32_175 = arith.constant 1 : i32
    %331 = arith.addi %c1_i32_175, %c1_i32_171 : i32
    %332 = vector.shape_cast %330 : vector<64x8xf32> to vector<8x8x8xf32>
    %cst_176 = arith.constant 0.000000e+00 : f32
    %333 = vector.broadcast %cst_176 : f32 to vector<8x1x8xf32>
    %334 = vector.extract_strided_slice %332 {offsets = [0, 0, 0], sizes = [8, 7, 8], strides = [1, 1, 1]} : vector<8x8x8xf32> to vector<8x7x8xf32>
    %335 = tpu.concatenate %333, %334 in 1 : vector<8x1x8xf32>, vector<8x7x8xf32> -> vector<8x8x8xf32>
    %336 = vector.extract_strided_slice %332 {offsets = [0, 1, 0], sizes = [8, 7, 8], strides = [1, 1, 1]} : vector<8x8x8xf32> to vector<8x7x8xf32>
    %337 = tpu.concatenate %336, %333 in 1 : vector<8x7x8xf32>, vector<8x1x8xf32> -> vector<8x8x8xf32>
    %338 = tpu.concatenate %335, %332, %337 in 2 : vector<8x8x8xf32>, vector<8x8x8xf32>, vector<8x8x8xf32> -> vector<8x8x24xf32>
    %339 = vector.shape_cast %338 : vector<8x8x24xf32> to vector<1x64x24xf32>
    %340 = arith.truncf %339 : vector<1x64x24xf32> to vector<1x64x24xbf16>
    %341 = arith.index_cast %331 : i32 to index
    %c8_177 = arith.constant 8 : index
    %c0_178 = arith.constant 0 : index
    %342 = vector.load %arg5[%341, %c8_177, %c0_178] : memref<6x80x24xbf16, #tpu.memory_space<vmem>>, vector<1x64x24xbf16>
    tpu.vector_store %arg5[%341, %c8_177, %c0_178], %340 {strides = array<i32>} : memref<6x80x24xbf16, #tpu.memory_space<vmem>>, vector<1x64x24xbf16>,
    %c2_i32_179 = arith.constant 2 : i32
    %343 = arith.index_cast %c2_i32_179 : i32 to index
    %c0_180 = arith.constant 0 : index
    %c0_181 = arith.constant 0 : index
    %344 = vector.load %arg6[%343, %c0_180, %c0_181] : memref<4x64x8xf32, #tpu.memory_space<vmem>>, vector<1x64x8xf32>
    %345 = vector.shape_cast %344 : vector<1x64x8xf32> to vector<64x8xf32>
    %346 = arith.mulf %345, %299 : vector<64x8xf32>
    %347 = arith.addf %346, %304 : vector<64x8xf32>
    %cst_182 = arith.constant 0.000000e+00 : f32
    %348 = vector.broadcast %cst_182 : f32 to vector<64x8xf32>
    %349 = arith.maximumf %347, %348 : vector<64x8xf32>
    %c1_i32_183 = arith.constant 1 : i32
    %350 = arith.addi %c1_i32_183, %c2_i32_179 : i32
    %351 = vector.shape_cast %349 : vector<64x8xf32> to vector<8x8x8xf32>
    %cst_184 = arith.constant 0.000000e+00 : f32
    %352 = vector.broadcast %cst_184 : f32 to vector<8x1x8xf32>
    %353 = vector.extract_strided_slice %351 {offsets = [0, 0, 0], sizes = [8, 7, 8], strides = [1, 1, 1]} : vector<8x8x8xf32> to vector<8x7x8xf32>
    %354 = tpu.concatenate %352, %353 in 1 : vector<8x1x8xf32>, vector<8x7x8xf32> -> vector<8x8x8xf32>
    %355 = vector.extract_strided_slice %351 {offsets = [0, 1, 0], sizes = [8, 7, 8], strides = [1, 1, 1]} : vector<8x8x8xf32> to vector<8x7x8xf32>
    %356 = tpu.concatenate %355, %352 in 1 : vector<8x7x8xf32>, vector<8x1x8xf32> -> vector<8x8x8xf32>
    %357 = tpu.concatenate %354, %351, %356 in 2 : vector<8x8x8xf32>, vector<8x8x8xf32>, vector<8x8x8xf32> -> vector<8x8x24xf32>
    %358 = vector.shape_cast %357 : vector<8x8x24xf32> to vector<1x64x24xf32>
    %359 = arith.truncf %358 : vector<1x64x24xf32> to vector<1x64x24xbf16>
    %360 = arith.index_cast %350 : i32 to index
    %c8_185 = arith.constant 8 : index
    %c0_186 = arith.constant 0 : index
    %361 = vector.load %arg5[%360, %c8_185, %c0_186] : memref<6x80x24xbf16, #tpu.memory_space<vmem>>, vector<1x64x24xbf16>
    tpu.vector_store %arg5[%360, %c8_185, %c0_186], %359 {strides = array<i32>} : memref<6x80x24xbf16, #tpu.memory_space<vmem>>, vector<1x64x24xbf16>,
    %c3_i32_187 = arith.constant 3 : i32
    %362 = arith.index_cast %c3_i32_187 : i32 to index
    %c0_188 = arith.constant 0 : index
    %c0_189 = arith.constant 0 : index
    %363 = vector.load %arg6[%362, %c0_188, %c0_189] : memref<4x64x8xf32, #tpu.memory_space<vmem>>, vector<1x64x8xf32>
    %364 = vector.shape_cast %363 : vector<1x64x8xf32> to vector<64x8xf32>
    %365 = arith.mulf %364, %299 : vector<64x8xf32>
    %366 = arith.addf %365, %304 : vector<64x8xf32>
    %cst_190 = arith.constant 0.000000e+00 : f32
    %367 = vector.broadcast %cst_190 : f32 to vector<64x8xf32>
    %368 = arith.maximumf %366, %367 : vector<64x8xf32>
    %c1_i32_191 = arith.constant 1 : i32
    %369 = arith.addi %c1_i32_191, %c3_i32_187 : i32
    %370 = vector.shape_cast %368 : vector<64x8xf32> to vector<8x8x8xf32>
    %cst_192 = arith.constant 0.000000e+00 : f32
    %371 = vector.broadcast %cst_192 : f32 to vector<8x1x8xf32>
    %372 = vector.extract_strided_slice %370 {offsets = [0, 0, 0], sizes = [8, 7, 8], strides = [1, 1, 1]} : vector<8x8x8xf32> to vector<8x7x8xf32>
    %373 = tpu.concatenate %371, %372 in 1 : vector<8x1x8xf32>, vector<8x7x8xf32> -> vector<8x8x8xf32>
    %374 = vector.extract_strided_slice %370 {offsets = [0, 1, 0], sizes = [8, 7, 8], strides = [1, 1, 1]} : vector<8x8x8xf32> to vector<8x7x8xf32>
    %375 = tpu.concatenate %374, %371 in 1 : vector<8x7x8xf32>, vector<8x1x8xf32> -> vector<8x8x8xf32>
    %376 = tpu.concatenate %373, %370, %375 in 2 : vector<8x8x8xf32>, vector<8x8x8xf32>, vector<8x8x8xf32> -> vector<8x8x24xf32>
    %377 = vector.shape_cast %376 : vector<8x8x24xf32> to vector<1x64x24xf32>
    %378 = arith.truncf %377 : vector<1x64x24xf32> to vector<1x64x24xbf16>
    %379 = arith.index_cast %369 : i32 to index
    %c8_193 = arith.constant 8 : index
    %c0_194 = arith.constant 0 : index
    %380 = vector.load %arg5[%379, %c8_193, %c0_194] : memref<6x80x24xbf16, #tpu.memory_space<vmem>>, vector<1x64x24xbf16>
    tpu.vector_store %arg5[%379, %c8_193, %c0_194], %378 {strides = array<i32>} : memref<6x80x24xbf16, #tpu.memory_space<vmem>>, vector<1x64x24xbf16>,
    %c4_i32_195 = arith.constant 4 : i32
    %c0_196 = arith.constant 0 : index
    %c0_197 = arith.constant 0 : index
    %c0_198 = arith.constant 0 : index
    %381 = vector.load %arg3[%c0_196, %c0_197, %c0_198] : memref<9x24x8xbf16, #tpu.memory_space<vmem>>, vector<1x24x8xbf16>
    %382 = vector.shape_cast %381 : vector<1x24x8xbf16> to vector<24x8xbf16>
    %c1_199 = arith.constant 1 : index
    %c0_200 = arith.constant 0 : index
    %c0_201 = arith.constant 0 : index
    %383 = vector.load %arg3[%c1_199, %c0_200, %c0_201] : memref<9x24x8xbf16, #tpu.memory_space<vmem>>, vector<1x24x8xbf16>
    %384 = vector.shape_cast %383 : vector<1x24x8xbf16> to vector<24x8xbf16>
    %c2_202 = arith.constant 2 : index
    %c0_203 = arith.constant 0 : index
    %c0_204 = arith.constant 0 : index
    %385 = vector.load %arg3[%c2_202, %c0_203, %c0_204] : memref<9x24x8xbf16, #tpu.memory_space<vmem>>, vector<1x24x8xbf16>
    %386 = vector.shape_cast %385 : vector<1x24x8xbf16> to vector<24x8xbf16>
    %c3_205 = arith.constant 3 : index
    %c0_206 = arith.constant 0 : index
    %c0_207 = arith.constant 0 : index
    %387 = vector.load %arg3[%c3_205, %c0_206, %c0_207] : memref<9x24x8xbf16, #tpu.memory_space<vmem>>, vector<1x24x8xbf16>
    %388 = vector.shape_cast %387 : vector<1x24x8xbf16> to vector<24x8xbf16>
    %c4_208 = arith.constant 4 : index
    %c0_209 = arith.constant 0 : index
    %c0_210 = arith.constant 0 : index
    %389 = vector.load %arg3[%c4_208, %c0_209, %c0_210] : memref<9x24x8xbf16, #tpu.memory_space<vmem>>, vector<1x24x8xbf16>
    %390 = vector.shape_cast %389 : vector<1x24x8xbf16> to vector<24x8xbf16>
    %c5_211 = arith.constant 5 : index
    %c0_212 = arith.constant 0 : index
    %c0_213 = arith.constant 0 : index
    %391 = vector.load %arg3[%c5_211, %c0_212, %c0_213] : memref<9x24x8xbf16, #tpu.memory_space<vmem>>, vector<1x24x8xbf16>
    %392 = vector.shape_cast %391 : vector<1x24x8xbf16> to vector<24x8xbf16>
    %c6_214 = arith.constant 6 : index
    %c0_215 = arith.constant 0 : index
    %c0_216 = arith.constant 0 : index
    %393 = vector.load %arg3[%c6_214, %c0_215, %c0_216] : memref<9x24x8xbf16, #tpu.memory_space<vmem>>, vector<1x24x8xbf16>
    %394 = vector.shape_cast %393 : vector<1x24x8xbf16> to vector<24x8xbf16>
    %c7_217 = arith.constant 7 : index
    %c0_218 = arith.constant 0 : index
    %c0_219 = arith.constant 0 : index
    %395 = vector.load %arg3[%c7_217, %c0_218, %c0_219] : memref<9x24x8xbf16, #tpu.memory_space<vmem>>, vector<1x24x8xbf16>
    %396 = vector.shape_cast %395 : vector<1x24x8xbf16> to vector<24x8xbf16>
    %c8_220 = arith.constant 8 : index
    %c0_221 = arith.constant 0 : index
    %c0_222 = arith.constant 0 : index
    %397 = vector.load %arg3[%c8_220, %c0_221, %c0_222] : memref<9x24x8xbf16, #tpu.memory_space<vmem>>, vector<1x24x8xbf16>
    %398 = vector.shape_cast %397 : vector<1x24x8xbf16> to vector<24x8xbf16>
    %cst_223 = arith.constant 0.000000e+00 : f32
    %399 = vector.broadcast %cst_223 : f32 to vector<1x8xf32>
    %c0_i32_224 = arith.constant 0 : i32
    %cst_225 = arith.constant 0.000000e+00 : f32
    %400 = vector.broadcast %cst_225 : f32 to vector<64x8xf32>
    %c0_i32_226 = arith.constant 0 : i32
    %401 = arith.addi %c0_i32_224, %c0_i32_226 : i32
    %402 = arith.index_cast %401 : i32 to index
    %c0_227 = arith.constant 0 : index
    %c0_228 = arith.constant 0 : index
    %403 = vector.load %arg5[%402, %c0_227, %c0_228] : memref<6x80x24xbf16, #tpu.memory_space<vmem>>, vector<1x80x24xbf16>
    %404 = vector.shape_cast %403 : vector<1x80x24xbf16> to vector<80x24xbf16>
    %405 = vector.extract_strided_slice %404 {offsets = [0, 0], sizes = [64, 24], strides = [1, 1]} : vector<80x24xbf16> to vector<64x24xbf16>
    %cst_229 = arith.constant dense<0.000000e+00> : vector<64x8xf32>
    %406 = tpu.matmul %405, %382, %cst_229 {dimension_numbers = #tpu.dot_dimension_numbers<[1], [0], [0], [1], [0, 0, 1, 1], [], []>} : vector<64x24xbf16>, vector<24x8xbf16>, vector<64x8xf32> -> vector<64x8xf32>
    %407 = arith.addf %400, %406 : vector<64x8xf32>
    %408 = vector.extract_strided_slice %404 {offsets = [8, 0], sizes = [64, 24], strides = [1, 1]} : vector<80x24xbf16> to vector<64x24xbf16>
    %cst_230 = arith.constant dense<0.000000e+00> : vector<64x8xf32>
    %409 = tpu.matmul %408, %384, %cst_230 {dimension_numbers = #tpu.dot_dimension_numbers<[1], [0], [0], [1], [0, 0, 1, 1], [], []>} : vector<64x24xbf16>, vector<24x8xbf16>, vector<64x8xf32> -> vector<64x8xf32>
    %410 = arith.addf %407, %409 : vector<64x8xf32>
    %411 = vector.extract_strided_slice %404 {offsets = [16, 0], sizes = [64, 24], strides = [1, 1]} : vector<80x24xbf16> to vector<64x24xbf16>
    %cst_231 = arith.constant dense<0.000000e+00> : vector<64x8xf32>
    %412 = tpu.matmul %411, %386, %cst_231 {dimension_numbers = #tpu.dot_dimension_numbers<[1], [0], [0], [1], [0, 0, 1, 1], [], []>} : vector<64x24xbf16>, vector<24x8xbf16>, vector<64x8xf32> -> vector<64x8xf32>
    %413 = arith.addf %410, %412 : vector<64x8xf32>
    %c1_i32_232 = arith.constant 1 : i32
    %414 = arith.addi %c0_i32_224, %c1_i32_232 : i32
    %415 = arith.index_cast %414 : i32 to index
    %c0_233 = arith.constant 0 : index
    %c0_234 = arith.constant 0 : index
    %416 = vector.load %arg5[%415, %c0_233, %c0_234] : memref<6x80x24xbf16, #tpu.memory_space<vmem>>, vector<1x80x24xbf16>
    %417 = vector.shape_cast %416 : vector<1x80x24xbf16> to vector<80x24xbf16>
    %418 = vector.extract_strided_slice %417 {offsets = [0, 0], sizes = [64, 24], strides = [1, 1]} : vector<80x24xbf16> to vector<64x24xbf16>
    %cst_235 = arith.constant dense<0.000000e+00> : vector<64x8xf32>
    %419 = tpu.matmul %418, %388, %cst_235 {dimension_numbers = #tpu.dot_dimension_numbers<[1], [0], [0], [1], [0, 0, 1, 1], [], []>} : vector<64x24xbf16>, vector<24x8xbf16>, vector<64x8xf32> -> vector<64x8xf32>
    %420 = arith.addf %413, %419 : vector<64x8xf32>
    %421 = vector.extract_strided_slice %417 {offsets = [8, 0], sizes = [64, 24], strides = [1, 1]} : vector<80x24xbf16> to vector<64x24xbf16>
    %cst_236 = arith.constant dense<0.000000e+00> : vector<64x8xf32>
    %422 = tpu.matmul %421, %390, %cst_236 {dimension_numbers = #tpu.dot_dimension_numbers<[1], [0], [0], [1], [0, 0, 1, 1], [], []>} : vector<64x24xbf16>, vector<24x8xbf16>, vector<64x8xf32> -> vector<64x8xf32>
    %423 = arith.addf %420, %422 : vector<64x8xf32>
    %424 = vector.extract_strided_slice %417 {offsets = [16, 0], sizes = [64, 24], strides = [1, 1]} : vector<80x24xbf16> to vector<64x24xbf16>
    %cst_237 = arith.constant dense<0.000000e+00> : vector<64x8xf32>
    %425 = tpu.matmul %424, %392, %cst_237 {dimension_numbers = #tpu.dot_dimension_numbers<[1], [0], [0], [1], [0, 0, 1, 1], [], []>} : vector<64x24xbf16>, vector<24x8xbf16>, vector<64x8xf32> -> vector<64x8xf32>
    %426 = arith.addf %423, %425 : vector<64x8xf32>
    %c2_i32_238 = arith.constant 2 : i32
    %427 = arith.addi %c0_i32_224, %c2_i32_238 : i32
    %428 = arith.index_cast %427 : i32 to index
    %c0_239 = arith.constant 0 : index
    %c0_240 = arith.constant 0 : index
    %429 = vector.load %arg5[%428, %c0_239, %c0_240] : memref<6x80x24xbf16, #tpu.memory_space<vmem>>, vector<1x80x24xbf16>
    %430 = vector.shape_cast %429 : vector<1x80x24xbf16> to vector<80x24xbf16>
    %431 = vector.extract_strided_slice %430 {offsets = [0, 0], sizes = [64, 24], strides = [1, 1]} : vector<80x24xbf16> to vector<64x24xbf16>
    %cst_241 = arith.constant dense<0.000000e+00> : vector<64x8xf32>
    %432 = tpu.matmul %431, %394, %cst_241 {dimension_numbers = #tpu.dot_dimension_numbers<[1], [0], [0], [1], [0, 0, 1, 1], [], []>} : vector<64x24xbf16>, vector<24x8xbf16>, vector<64x8xf32> -> vector<64x8xf32>
    %433 = arith.addf %426, %432 : vector<64x8xf32>
    %434 = vector.extract_strided_slice %430 {offsets = [8, 0], sizes = [64, 24], strides = [1, 1]} : vector<80x24xbf16> to vector<64x24xbf16>
    %cst_242 = arith.constant dense<0.000000e+00> : vector<64x8xf32>
    %435 = tpu.matmul %434, %396, %cst_242 {dimension_numbers = #tpu.dot_dimension_numbers<[1], [0], [0], [1], [0, 0, 1, 1], [], []>} : vector<64x24xbf16>, vector<24x8xbf16>, vector<64x8xf32> -> vector<64x8xf32>
    %436 = arith.addf %433, %435 : vector<64x8xf32>
    %437 = vector.extract_strided_slice %430 {offsets = [16, 0], sizes = [64, 24], strides = [1, 1]} : vector<80x24xbf16> to vector<64x24xbf16>
    %cst_243 = arith.constant dense<0.000000e+00> : vector<64x8xf32>
    %438 = tpu.matmul %437, %398, %cst_243 {dimension_numbers = #tpu.dot_dimension_numbers<[1], [0], [0], [1], [0, 0, 1, 1], [], []>} : vector<64x24xbf16>, vector<24x8xbf16>, vector<64x8xf32> -> vector<64x8xf32>
    %439 = arith.addf %436, %438 : vector<64x8xf32>
    %440 = vector.shape_cast %439 : vector<64x8xf32> to vector<1x64x8xf32>
    %441 = arith.index_cast %c0_i32_224 : i32 to index
    %c0_244 = arith.constant 0 : index
    %c0_245 = arith.constant 0 : index
    %442 = vector.load %arg6[%441, %c0_244, %c0_245] : memref<4x64x8xf32, #tpu.memory_space<vmem>>, vector<1x64x8xf32>
    tpu.vector_store %arg6[%441, %c0_244, %c0_245], %440 {strides = array<i32>} : memref<4x64x8xf32, #tpu.memory_space<vmem>>, vector<1x64x8xf32>,
    %cst_246 = arith.constant dense<0.000000e+00> : vector<8xf32>
    %443 = vector.multi_reduction <add>, %439, %cst_246 [0] : vector<64x8xf32> to vector<8xf32>
    %444 = vector.shape_cast %443 : vector<8xf32> to vector<1x8xf32>
    %445 = arith.addf %399, %444 : vector<1x8xf32>
    %446 = arith.mulf %439, %439 : vector<64x8xf32>
    %cst_247 = arith.constant dense<0.000000e+00> : vector<8xf32>
    %447 = vector.multi_reduction <add>, %446, %cst_247 [0] : vector<64x8xf32> to vector<8xf32>
    %448 = vector.shape_cast %447 : vector<8xf32> to vector<1x8xf32>
    %449 = arith.addf %399, %448 : vector<1x8xf32>
    %c1_i32_248 = arith.constant 1 : i32
    %cst_249 = arith.constant 0.000000e+00 : f32
    %450 = vector.broadcast %cst_249 : f32 to vector<64x8xf32>
    %c0_i32_250 = arith.constant 0 : i32
    %451 = arith.addi %c1_i32_248, %c0_i32_250 : i32
    %452 = arith.index_cast %451 : i32 to index
    %c0_251 = arith.constant 0 : index
    %c0_252 = arith.constant 0 : index
    %453 = vector.load %arg5[%452, %c0_251, %c0_252] : memref<6x80x24xbf16, #tpu.memory_space<vmem>>, vector<1x80x24xbf16>
    %454 = vector.shape_cast %453 : vector<1x80x24xbf16> to vector<80x24xbf16>
    %455 = vector.extract_strided_slice %454 {offsets = [0, 0], sizes = [64, 24], strides = [1, 1]} : vector<80x24xbf16> to vector<64x24xbf16>
    %cst_253 = arith.constant dense<0.000000e+00> : vector<64x8xf32>
    %456 = tpu.matmul %455, %382, %cst_253 {dimension_numbers = #tpu.dot_dimension_numbers<[1], [0], [0], [1], [0, 0, 1, 1], [], []>} : vector<64x24xbf16>, vector<24x8xbf16>, vector<64x8xf32> -> vector<64x8xf32>
    %457 = arith.addf %450, %456 : vector<64x8xf32>
    %458 = vector.extract_strided_slice %454 {offsets = [8, 0], sizes = [64, 24], strides = [1, 1]} : vector<80x24xbf16> to vector<64x24xbf16>
    %cst_254 = arith.constant dense<0.000000e+00> : vector<64x8xf32>
    %459 = tpu.matmul %458, %384, %cst_254 {dimension_numbers = #tpu.dot_dimension_numbers<[1], [0], [0], [1], [0, 0, 1, 1], [], []>} : vector<64x24xbf16>, vector<24x8xbf16>, vector<64x8xf32> -> vector<64x8xf32>
    %460 = arith.addf %457, %459 : vector<64x8xf32>
    %461 = vector.extract_strided_slice %454 {offsets = [16, 0], sizes = [64, 24], strides = [1, 1]} : vector<80x24xbf16> to vector<64x24xbf16>
    %cst_255 = arith.constant dense<0.000000e+00> : vector<64x8xf32>
    %462 = tpu.matmul %461, %386, %cst_255 {dimension_numbers = #tpu.dot_dimension_numbers<[1], [0], [0], [1], [0, 0, 1, 1], [], []>} : vector<64x24xbf16>, vector<24x8xbf16>, vector<64x8xf32> -> vector<64x8xf32>
    %463 = arith.addf %460, %462 : vector<64x8xf32>
    %c1_i32_256 = arith.constant 1 : i32
    %464 = arith.addi %c1_i32_248, %c1_i32_256 : i32
    %465 = arith.index_cast %464 : i32 to index
    %c0_257 = arith.constant 0 : index
    %c0_258 = arith.constant 0 : index
    %466 = vector.load %arg5[%465, %c0_257, %c0_258] : memref<6x80x24xbf16, #tpu.memory_space<vmem>>, vector<1x80x24xbf16>
    %467 = vector.shape_cast %466 : vector<1x80x24xbf16> to vector<80x24xbf16>
    %468 = vector.extract_strided_slice %467 {offsets = [0, 0], sizes = [64, 24], strides = [1, 1]} : vector<80x24xbf16> to vector<64x24xbf16>
    %cst_259 = arith.constant dense<0.000000e+00> : vector<64x8xf32>
    %469 = tpu.matmul %468, %388, %cst_259 {dimension_numbers = #tpu.dot_dimension_numbers<[1], [0], [0], [1], [0, 0, 1, 1], [], []>} : vector<64x24xbf16>, vector<24x8xbf16>, vector<64x8xf32> -> vector<64x8xf32>
    %470 = arith.addf %463, %469 : vector<64x8xf32>
    %471 = vector.extract_strided_slice %467 {offsets = [8, 0], sizes = [64, 24], strides = [1, 1]} : vector<80x24xbf16> to vector<64x24xbf16>
    %cst_260 = arith.constant dense<0.000000e+00> : vector<64x8xf32>
    %472 = tpu.matmul %471, %390, %cst_260 {dimension_numbers = #tpu.dot_dimension_numbers<[1], [0], [0], [1], [0, 0, 1, 1], [], []>} : vector<64x24xbf16>, vector<24x8xbf16>, vector<64x8xf32> -> vector<64x8xf32>
    %473 = arith.addf %470, %472 : vector<64x8xf32>
    %474 = vector.extract_strided_slice %467 {offsets = [16, 0], sizes = [64, 24], strides = [1, 1]} : vector<80x24xbf16> to vector<64x24xbf16>
    %cst_261 = arith.constant dense<0.000000e+00> : vector<64x8xf32>
    %475 = tpu.matmul %474, %392, %cst_261 {dimension_numbers = #tpu.dot_dimension_numbers<[1], [0], [0], [1], [0, 0, 1, 1], [], []>} : vector<64x24xbf16>, vector<24x8xbf16>, vector<64x8xf32> -> vector<64x8xf32>
    %476 = arith.addf %473, %475 : vector<64x8xf32>
    %c2_i32_262 = arith.constant 2 : i32
    %477 = arith.addi %c1_i32_248, %c2_i32_262 : i32
    %478 = arith.index_cast %477 : i32 to index
    %c0_263 = arith.constant 0 : index
    %c0_264 = arith.constant 0 : index
    %479 = vector.load %arg5[%478, %c0_263, %c0_264] : memref<6x80x24xbf16, #tpu.memory_space<vmem>>, vector<1x80x24xbf16>
    %480 = vector.shape_cast %479 : vector<1x80x24xbf16> to vector<80x24xbf16>
    %481 = vector.extract_strided_slice %480 {offsets = [0, 0], sizes = [64, 24], strides = [1, 1]} : vector<80x24xbf16> to vector<64x24xbf16>
    %cst_265 = arith.constant dense<0.000000e+00> : vector<64x8xf32>
    %482 = tpu.matmul %481, %394, %cst_265 {dimension_numbers = #tpu.dot_dimension_numbers<[1], [0], [0], [1], [0, 0, 1, 1], [], []>} : vector<64x24xbf16>, vector<24x8xbf16>, vector<64x8xf32> -> vector<64x8xf32>
    %483 = arith.addf %476, %482 : vector<64x8xf32>
    %484 = vector.extract_strided_slice %480 {offsets = [8, 0], sizes = [64, 24], strides = [1, 1]} : vector<80x24xbf16> to vector<64x24xbf16>
    %cst_266 = arith.constant dense<0.000000e+00> : vector<64x8xf32>
    %485 = tpu.matmul %484, %396, %cst_266 {dimension_numbers = #tpu.dot_dimension_numbers<[1], [0], [0], [1], [0, 0, 1, 1], [], []>} : vector<64x24xbf16>, vector<24x8xbf16>, vector<64x8xf32> -> vector<64x8xf32>
    %486 = arith.addf %483, %485 : vector<64x8xf32>
    %487 = vector.extract_strided_slice %480 {offsets = [16, 0], sizes = [64, 24], strides = [1, 1]} : vector<80x24xbf16> to vector<64x24xbf16>
    %cst_267 = arith.constant dense<0.000000e+00> : vector<64x8xf32>
    %488 = tpu.matmul %487, %398, %cst_267 {dimension_numbers = #tpu.dot_dimension_numbers<[1], [0], [0], [1], [0, 0, 1, 1], [], []>} : vector<64x24xbf16>, vector<24x8xbf16>, vector<64x8xf32> -> vector<64x8xf32>
    %489 = arith.addf %486, %488 : vector<64x8xf32>
    %490 = vector.shape_cast %489 : vector<64x8xf32> to vector<1x64x8xf32>
    %491 = arith.index_cast %c1_i32_248 : i32 to index
    %c0_268 = arith.constant 0 : index
    %c0_269 = arith.constant 0 : index
    %492 = vector.load %arg6[%491, %c0_268, %c0_269] : memref<4x64x8xf32, #tpu.memory_space<vmem>>, vector<1x64x8xf32>
    tpu.vector_store %arg6[%491, %c0_268, %c0_269], %490 {strides = array<i32>} : memref<4x64x8xf32, #tpu.memory_space<vmem>>, vector<1x64x8xf32>,
    %cst_270 = arith.constant dense<0.000000e+00> : vector<8xf32>
    %493 = vector.multi_reduction <add>, %489, %cst_270 [0] : vector<64x8xf32> to vector<8xf32>
    %494 = vector.shape_cast %493 : vector<8xf32> to vector<1x8xf32>
    %495 = arith.addf %445, %494 : vector<1x8xf32>
    %496 = arith.mulf %489, %489 : vector<64x8xf32>
    %cst_271 = arith.constant dense<0.000000e+00> : vector<8xf32>
    %497 = vector.multi_reduction <add>, %496, %cst_271 [0] : vector<64x8xf32> to vector<8xf32>
    %498 = vector.shape_cast %497 : vector<8xf32> to vector<1x8xf32>
    %499 = arith.addf %449, %498 : vector<1x8xf32>
    %c2_i32_272 = arith.constant 2 : i32
    %cst_273 = arith.constant 0.000000e+00 : f32
    %500 = vector.broadcast %cst_273 : f32 to vector<64x8xf32>
    %c0_i32_274 = arith.constant 0 : i32
    %501 = arith.addi %c2_i32_272, %c0_i32_274 : i32
    %502 = arith.index_cast %501 : i32 to index
    %c0_275 = arith.constant 0 : index
    %c0_276 = arith.constant 0 : index
    %503 = vector.load %arg5[%502, %c0_275, %c0_276] : memref<6x80x24xbf16, #tpu.memory_space<vmem>>, vector<1x80x24xbf16>
    %504 = vector.shape_cast %503 : vector<1x80x24xbf16> to vector<80x24xbf16>
    %505 = vector.extract_strided_slice %504 {offsets = [0, 0], sizes = [64, 24], strides = [1, 1]} : vector<80x24xbf16> to vector<64x24xbf16>
    %cst_277 = arith.constant dense<0.000000e+00> : vector<64x8xf32>
    %506 = tpu.matmul %505, %382, %cst_277 {dimension_numbers = #tpu.dot_dimension_numbers<[1], [0], [0], [1], [0, 0, 1, 1], [], []>} : vector<64x24xbf16>, vector<24x8xbf16>, vector<64x8xf32> -> vector<64x8xf32>
    %507 = arith.addf %500, %506 : vector<64x8xf32>
    %508 = vector.extract_strided_slice %504 {offsets = [8, 0], sizes = [64, 24], strides = [1, 1]} : vector<80x24xbf16> to vector<64x24xbf16>
    %cst_278 = arith.constant dense<0.000000e+00> : vector<64x8xf32>
    %509 = tpu.matmul %508, %384, %cst_278 {dimension_numbers = #tpu.dot_dimension_numbers<[1], [0], [0], [1], [0, 0, 1, 1], [], []>} : vector<64x24xbf16>, vector<24x8xbf16>, vector<64x8xf32> -> vector<64x8xf32>
    %510 = arith.addf %507, %509 : vector<64x8xf32>
    %511 = vector.extract_strided_slice %504 {offsets = [16, 0], sizes = [64, 24], strides = [1, 1]} : vector<80x24xbf16> to vector<64x24xbf16>
    %cst_279 = arith.constant dense<0.000000e+00> : vector<64x8xf32>
    %512 = tpu.matmul %511, %386, %cst_279 {dimension_numbers = #tpu.dot_dimension_numbers<[1], [0], [0], [1], [0, 0, 1, 1], [], []>} : vector<64x24xbf16>, vector<24x8xbf16>, vector<64x8xf32> -> vector<64x8xf32>
    %513 = arith.addf %510, %512 : vector<64x8xf32>
    %c1_i32_280 = arith.constant 1 : i32
    %514 = arith.addi %c2_i32_272, %c1_i32_280 : i32
    %515 = arith.index_cast %514 : i32 to index
    %c0_281 = arith.constant 0 : index
    %c0_282 = arith.constant 0 : index
    %516 = vector.load %arg5[%515, %c0_281, %c0_282] : memref<6x80x24xbf16, #tpu.memory_space<vmem>>, vector<1x80x24xbf16>
    %517 = vector.shape_cast %516 : vector<1x80x24xbf16> to vector<80x24xbf16>
    %518 = vector.extract_strided_slice %517 {offsets = [0, 0], sizes = [64, 24], strides = [1, 1]} : vector<80x24xbf16> to vector<64x24xbf16>
    %cst_283 = arith.constant dense<0.000000e+00> : vector<64x8xf32>
    %519 = tpu.matmul %518, %388, %cst_283 {dimension_numbers = #tpu.dot_dimension_numbers<[1], [0], [0], [1], [0, 0, 1, 1], [], []>} : vector<64x24xbf16>, vector<24x8xbf16>, vector<64x8xf32> -> vector<64x8xf32>
    %520 = arith.addf %513, %519 : vector<64x8xf32>
    %521 = vector.extract_strided_slice %517 {offsets = [8, 0], sizes = [64, 24], strides = [1, 1]} : vector<80x24xbf16> to vector<64x24xbf16>
    %cst_284 = arith.constant dense<0.000000e+00> : vector<64x8xf32>
    %522 = tpu.matmul %521, %390, %cst_284 {dimension_numbers = #tpu.dot_dimension_numbers<[1], [0], [0], [1], [0, 0, 1, 1], [], []>} : vector<64x24xbf16>, vector<24x8xbf16>, vector<64x8xf32> -> vector<64x8xf32>
    %523 = arith.addf %520, %522 : vector<64x8xf32>
    %524 = vector.extract_strided_slice %517 {offsets = [16, 0], sizes = [64, 24], strides = [1, 1]} : vector<80x24xbf16> to vector<64x24xbf16>
    %cst_285 = arith.constant dense<0.000000e+00> : vector<64x8xf32>
    %525 = tpu.matmul %524, %392, %cst_285 {dimension_numbers = #tpu.dot_dimension_numbers<[1], [0], [0], [1], [0, 0, 1, 1], [], []>} : vector<64x24xbf16>, vector<24x8xbf16>, vector<64x8xf32> -> vector<64x8xf32>
    %526 = arith.addf %523, %525 : vector<64x8xf32>
    %c2_i32_286 = arith.constant 2 : i32
    %527 = arith.addi %c2_i32_272, %c2_i32_286 : i32
    %528 = arith.index_cast %527 : i32 to index
    %c0_287 = arith.constant 0 : index
    %c0_288 = arith.constant 0 : index
    %529 = vector.load %arg5[%528, %c0_287, %c0_288] : memref<6x80x24xbf16, #tpu.memory_space<vmem>>, vector<1x80x24xbf16>
    %530 = vector.shape_cast %529 : vector<1x80x24xbf16> to vector<80x24xbf16>
    %531 = vector.extract_strided_slice %530 {offsets = [0, 0], sizes = [64, 24], strides = [1, 1]} : vector<80x24xbf16> to vector<64x24xbf16>
    %cst_289 = arith.constant dense<0.000000e+00> : vector<64x8xf32>
    %532 = tpu.matmul %531, %394, %cst_289 {dimension_numbers = #tpu.dot_dimension_numbers<[1], [0], [0], [1], [0, 0, 1, 1], [], []>} : vector<64x24xbf16>, vector<24x8xbf16>, vector<64x8xf32> -> vector<64x8xf32>
    %533 = arith.addf %526, %532 : vector<64x8xf32>
    %534 = vector.extract_strided_slice %530 {offsets = [8, 0], sizes = [64, 24], strides = [1, 1]} : vector<80x24xbf16> to vector<64x24xbf16>
    %cst_290 = arith.constant dense<0.000000e+00> : vector<64x8xf32>
    %535 = tpu.matmul %534, %396, %cst_290 {dimension_numbers = #tpu.dot_dimension_numbers<[1], [0], [0], [1], [0, 0, 1, 1], [], []>} : vector<64x24xbf16>, vector<24x8xbf16>, vector<64x8xf32> -> vector<64x8xf32>
    %536 = arith.addf %533, %535 : vector<64x8xf32>
    %537 = vector.extract_strided_slice %530 {offsets = [16, 0], sizes = [64, 24], strides = [1, 1]} : vector<80x24xbf16> to vector<64x24xbf16>
    %cst_291 = arith.constant dense<0.000000e+00> : vector<64x8xf32>
    %538 = tpu.matmul %537, %398, %cst_291 {dimension_numbers = #tpu.dot_dimension_numbers<[1], [0], [0], [1], [0, 0, 1, 1], [], []>} : vector<64x24xbf16>, vector<24x8xbf16>, vector<64x8xf32> -> vector<64x8xf32>
    %539 = arith.addf %536, %538 : vector<64x8xf32>
    %540 = vector.shape_cast %539 : vector<64x8xf32> to vector<1x64x8xf32>
    %541 = arith.index_cast %c2_i32_272 : i32 to index
    %c0_292 = arith.constant 0 : index
    %c0_293 = arith.constant 0 : index
    %542 = vector.load %arg6[%541, %c0_292, %c0_293] : memref<4x64x8xf32, #tpu.memory_space<vmem>>, vector<1x64x8xf32>
    tpu.vector_store %arg6[%541, %c0_292, %c0_293], %540 {strides = array<i32>} : memref<4x64x8xf32, #tpu.memory_space<vmem>>, vector<1x64x8xf32>,
    %cst_294 = arith.constant dense<0.000000e+00> : vector<8xf32>
    %543 = vector.multi_reduction <add>, %539, %cst_294 [0] : vector<64x8xf32> to vector<8xf32>
    %544 = vector.shape_cast %543 : vector<8xf32> to vector<1x8xf32>
    %545 = arith.addf %495, %544 : vector<1x8xf32>
    %546 = arith.mulf %539, %539 : vector<64x8xf32>
    %cst_295 = arith.constant dense<0.000000e+00> : vector<8xf32>
    %547 = vector.multi_reduction <add>, %546, %cst_295 [0] : vector<64x8xf32> to vector<8xf32>
    %548 = vector.shape_cast %547 : vector<8xf32> to vector<1x8xf32>
    %549 = arith.addf %499, %548 : vector<1x8xf32>
    %c3_i32_296 = arith.constant 3 : i32
    %cst_297 = arith.constant 0.000000e+00 : f32
    %550 = vector.broadcast %cst_297 : f32 to vector<64x8xf32>
    %c0_i32_298 = arith.constant 0 : i32
    %551 = arith.addi %c3_i32_296, %c0_i32_298 : i32
    %552 = arith.index_cast %551 : i32 to index
    %c0_299 = arith.constant 0 : index
    %c0_300 = arith.constant 0 : index
    %553 = vector.load %arg5[%552, %c0_299, %c0_300] : memref<6x80x24xbf16, #tpu.memory_space<vmem>>, vector<1x80x24xbf16>
    %554 = vector.shape_cast %553 : vector<1x80x24xbf16> to vector<80x24xbf16>
    %555 = vector.extract_strided_slice %554 {offsets = [0, 0], sizes = [64, 24], strides = [1, 1]} : vector<80x24xbf16> to vector<64x24xbf16>
    %cst_301 = arith.constant dense<0.000000e+00> : vector<64x8xf32>
    %556 = tpu.matmul %555, %382, %cst_301 {dimension_numbers = #tpu.dot_dimension_numbers<[1], [0], [0], [1], [0, 0, 1, 1], [], []>} : vector<64x24xbf16>, vector<24x8xbf16>, vector<64x8xf32> -> vector<64x8xf32>
    %557 = arith.addf %550, %556 : vector<64x8xf32>
    %558 = vector.extract_strided_slice %554 {offsets = [8, 0], sizes = [64, 24], strides = [1, 1]} : vector<80x24xbf16> to vector<64x24xbf16>
    %cst_302 = arith.constant dense<0.000000e+00> : vector<64x8xf32>
    %559 = tpu.matmul %558, %384, %cst_302 {dimension_numbers = #tpu.dot_dimension_numbers<[1], [0], [0], [1], [0, 0, 1, 1], [], []>} : vector<64x24xbf16>, vector<24x8xbf16>, vector<64x8xf32> -> vector<64x8xf32>
    %560 = arith.addf %557, %559 : vector<64x8xf32>
    %561 = vector.extract_strided_slice %554 {offsets = [16, 0], sizes = [64, 24], strides = [1, 1]} : vector<80x24xbf16> to vector<64x24xbf16>
    %cst_303 = arith.constant dense<0.000000e+00> : vector<64x8xf32>
    %562 = tpu.matmul %561, %386, %cst_303 {dimension_numbers = #tpu.dot_dimension_numbers<[1], [0], [0], [1], [0, 0, 1, 1], [], []>} : vector<64x24xbf16>, vector<24x8xbf16>, vector<64x8xf32> -> vector<64x8xf32>
    %563 = arith.addf %560, %562 : vector<64x8xf32>
    %c1_i32_304 = arith.constant 1 : i32
    %564 = arith.addi %c3_i32_296, %c1_i32_304 : i32
    %565 = arith.index_cast %564 : i32 to index
    %c0_305 = arith.constant 0 : index
    %c0_306 = arith.constant 0 : index
    %566 = vector.load %arg5[%565, %c0_305, %c0_306] : memref<6x80x24xbf16, #tpu.memory_space<vmem>>, vector<1x80x24xbf16>
    %567 = vector.shape_cast %566 : vector<1x80x24xbf16> to vector<80x24xbf16>
    %568 = vector.extract_strided_slice %567 {offsets = [0, 0], sizes = [64, 24], strides = [1, 1]} : vector<80x24xbf16> to vector<64x24xbf16>
    %cst_307 = arith.constant dense<0.000000e+00> : vector<64x8xf32>
    %569 = tpu.matmul %568, %388, %cst_307 {dimension_numbers = #tpu.dot_dimension_numbers<[1], [0], [0], [1], [0, 0, 1, 1], [], []>} : vector<64x24xbf16>, vector<24x8xbf16>, vector<64x8xf32> -> vector<64x8xf32>
    %570 = arith.addf %563, %569 : vector<64x8xf32>
    %571 = vector.extract_strided_slice %567 {offsets = [8, 0], sizes = [64, 24], strides = [1, 1]} : vector<80x24xbf16> to vector<64x24xbf16>
    %cst_308 = arith.constant dense<0.000000e+00> : vector<64x8xf32>
    %572 = tpu.matmul %571, %390, %cst_308 {dimension_numbers = #tpu.dot_dimension_numbers<[1], [0], [0], [1], [0, 0, 1, 1], [], []>} : vector<64x24xbf16>, vector<24x8xbf16>, vector<64x8xf32> -> vector<64x8xf32>
    %573 = arith.addf %570, %572 : vector<64x8xf32>
    %574 = vector.extract_strided_slice %567 {offsets = [16, 0], sizes = [64, 24], strides = [1, 1]} : vector<80x24xbf16> to vector<64x24xbf16>
    %cst_309 = arith.constant dense<0.000000e+00> : vector<64x8xf32>
    %575 = tpu.matmul %574, %392, %cst_309 {dimension_numbers = #tpu.dot_dimension_numbers<[1], [0], [0], [1], [0, 0, 1, 1], [], []>} : vector<64x24xbf16>, vector<24x8xbf16>, vector<64x8xf32> -> vector<64x8xf32>
    %576 = arith.addf %573, %575 : vector<64x8xf32>
    %c2_i32_310 = arith.constant 2 : i32
    %577 = arith.addi %c3_i32_296, %c2_i32_310 : i32
    %578 = arith.index_cast %577 : i32 to index
    %c0_311 = arith.constant 0 : index
    %c0_312 = arith.constant 0 : index
    %579 = vector.load %arg5[%578, %c0_311, %c0_312] : memref<6x80x24xbf16, #tpu.memory_space<vmem>>, vector<1x80x24xbf16>
    %580 = vector.shape_cast %579 : vector<1x80x24xbf16> to vector<80x24xbf16>
    %581 = vector.extract_strided_slice %580 {offsets = [0, 0], sizes = [64, 24], strides = [1, 1]} : vector<80x24xbf16> to vector<64x24xbf16>
    %cst_313 = arith.constant dense<0.000000e+00> : vector<64x8xf32>
    %582 = tpu.matmul %581, %394, %cst_313 {dimension_numbers = #tpu.dot_dimension_numbers<[1], [0], [0], [1], [0, 0, 1, 1], [], []>} : vector<64x24xbf16>, vector<24x8xbf16>, vector<64x8xf32> -> vector<64x8xf32>
    %583 = arith.addf %576, %582 : vector<64x8xf32>
    %584 = vector.extract_strided_slice %580 {offsets = [8, 0], sizes = [64, 24], strides = [1, 1]} : vector<80x24xbf16> to vector<64x24xbf16>
    %cst_314 = arith.constant dense<0.000000e+00> : vector<64x8xf32>
    %585 = tpu.matmul %584, %396, %cst_314 {dimension_numbers = #tpu.dot_dimension_numbers<[1], [0], [0], [1], [0, 0, 1, 1], [], []>} : vector<64x24xbf16>, vector<24x8xbf16>, vector<64x8xf32> -> vector<64x8xf32>
    %586 = arith.addf %583, %585 : vector<64x8xf32>
    %587 = vector.extract_strided_slice %580 {offsets = [16, 0], sizes = [64, 24], strides = [1, 1]} : vector<80x24xbf16> to vector<64x24xbf16>
    %cst_315 = arith.constant dense<0.000000e+00> : vector<64x8xf32>
    %588 = tpu.matmul %587, %398, %cst_315 {dimension_numbers = #tpu.dot_dimension_numbers<[1], [0], [0], [1], [0, 0, 1, 1], [], []>} : vector<64x24xbf16>, vector<24x8xbf16>, vector<64x8xf32> -> vector<64x8xf32>
    %589 = arith.addf %586, %588 : vector<64x8xf32>
    %590 = vector.shape_cast %589 : vector<64x8xf32> to vector<1x64x8xf32>
    %591 = arith.index_cast %c3_i32_296 : i32 to index
    %c0_316 = arith.constant 0 : index
    %c0_317 = arith.constant 0 : index
    %592 = vector.load %arg6[%591, %c0_316, %c0_317] : memref<4x64x8xf32, #tpu.memory_space<vmem>>, vector<1x64x8xf32>
    tpu.vector_store %arg6[%591, %c0_316, %c0_317], %590 {strides = array<i32>} : memref<4x64x8xf32, #tpu.memory_space<vmem>>, vector<1x64x8xf32>,
    %cst_318 = arith.constant dense<0.000000e+00> : vector<8xf32>
    %593 = vector.multi_reduction <add>, %589, %cst_318 [0] : vector<64x8xf32> to vector<8xf32>
    %594 = vector.shape_cast %593 : vector<8xf32> to vector<1x8xf32>
    %595 = arith.addf %545, %594 : vector<1x8xf32>
    %596 = arith.mulf %589, %589 : vector<64x8xf32>
    %cst_319 = arith.constant dense<0.000000e+00> : vector<8xf32>
    %597 = vector.multi_reduction <add>, %596, %cst_319 [0] : vector<64x8xf32> to vector<8xf32>
    %598 = vector.shape_cast %597 : vector<8xf32> to vector<1x8xf32>
    %599 = arith.addf %549, %598 : vector<1x8xf32>
    %c4_i32_320 = arith.constant 4 : i32
    %cst_321 = arith.constant 3.906250e-03 : f32
    %600 = vector.broadcast %cst_321 : f32 to vector<1x8xf32>
    %601 = arith.mulf %595, %600 : vector<1x8xf32>
    %cst_322 = arith.constant 3.906250e-03 : f32
    %602 = vector.broadcast %cst_322 : f32 to vector<1x8xf32>
    %603 = arith.mulf %599, %602 : vector<1x8xf32>
    %604 = arith.mulf %601, %601 : vector<1x8xf32>
    %605 = arith.subf %603, %604 : vector<1x8xf32>
    %cst_323 = arith.constant 0.000000e+00 : f32
    %606 = vector.broadcast %cst_323 : f32 to vector<1x8xf32>
    %607 = arith.maximumf %605, %606 : vector<1x8xf32>
    %cst_324 = arith.constant 9.99999974E-6 : f32
    %608 = vector.broadcast %cst_324 : f32 to vector<1x8xf32>
    %609 = arith.addf %607, %608 : vector<1x8xf32>
    %610 = math.rsqrt %609 : vector<1x8xf32>
    %611 = vector.shape_cast %610 : vector<1x8xf32> to vector<1x8xf32>
    %612 = vector.broadcast %611 : vector<1x8xf32> to vector<64x8xf32>
    %cst_325 = arith.constant 0.000000e+00 : f32
    %613 = vector.broadcast %cst_325 : f32 to vector<1x8xf32>
    %614 = arith.subf %613, %601 : vector<1x8xf32>
    %615 = arith.mulf %614, %610 : vector<1x8xf32>
    %616 = vector.shape_cast %615 : vector<1x8xf32> to vector<1x8xf32>
    %617 = vector.broadcast %616 : vector<1x8xf32> to vector<64x8xf32>
    %c0_i32_326 = arith.constant 0 : i32
    %618 = arith.index_cast %c0_i32_326 : i32 to index
    %c0_327 = arith.constant 0 : index
    %c0_328 = arith.constant 0 : index
    %619 = vector.load %arg6[%618, %c0_327, %c0_328] : memref<4x64x8xf32, #tpu.memory_space<vmem>>, vector<1x64x8xf32>
    %620 = vector.shape_cast %619 : vector<1x64x8xf32> to vector<64x8xf32>
    %c0_329 = arith.constant 0 : index
    %621 = arith.index_cast %c0_i32_326 : i32 to index
    %c0_330 = arith.constant 0 : index
    %c0_331 = arith.constant 0 : index
    %622 = vector.load %arg1[%c0_329, %621, %c0_330, %c0_331] : memref<1x4x64x8xf32, #tpu.memory_space<vmem>>, vector<1x1x64x8xf32>
    %623 = vector.shape_cast %622 : vector<1x1x64x8xf32> to vector<1x64x8xf32>
    %624 = vector.shape_cast %623 : vector<1x64x8xf32> to vector<64x8xf32>
    %625 = arith.mulf %620, %612 : vector<64x8xf32>
    %626 = arith.addf %625, %617 : vector<64x8xf32>
    %627 = arith.addf %626, %624 : vector<64x8xf32>
    %cst_332 = arith.constant 0.000000e+00 : f32
    %628 = vector.broadcast %cst_332 : f32 to vector<64x8xf32>
    %629 = arith.maximumf %627, %628 : vector<64x8xf32>
    %630 = vector.shape_cast %629 : vector<64x8xf32> to vector<1x64x8xf32>
    %c0_333 = arith.constant 0 : index
    %631 = arith.index_cast %c0_i32_326 : i32 to index
    %c0_334 = arith.constant 0 : index
    %c0_335 = arith.constant 0 : index
    %632 = vector.load %arg4[%c0_333, %631, %c0_334, %c0_335] : memref<1x4x64x8xf32, #tpu.memory_space<vmem>>, vector<1x1x64x8xf32>
    %633 = vector.shape_cast %632 : vector<1x1x64x8xf32> to vector<1x64x8xf32>
    %634 = vector.shape_cast %630 : vector<1x64x8xf32> to vector<1x1x64x8xf32>
    tpu.vector_store %arg4[%c0_333, %631, %c0_334, %c0_335], %634 {strides = array<i32>} : memref<1x4x64x8xf32, #tpu.memory_space<vmem>>, vector<1x1x64x8xf32>,
    %c1_i32_336 = arith.constant 1 : i32
    %635 = arith.index_cast %c1_i32_336 : i32 to index
    %c0_337 = arith.constant 0 : index
    %c0_338 = arith.constant 0 : index
    %636 = vector.load %arg6[%635, %c0_337, %c0_338] : memref<4x64x8xf32, #tpu.memory_space<vmem>>, vector<1x64x8xf32>
    %637 = vector.shape_cast %636 : vector<1x64x8xf32> to vector<64x8xf32>
    %c0_339 = arith.constant 0 : index
    %638 = arith.index_cast %c1_i32_336 : i32 to index
    %c0_340 = arith.constant 0 : index
    %c0_341 = arith.constant 0 : index
    %639 = vector.load %arg1[%c0_339, %638, %c0_340, %c0_341] : memref<1x4x64x8xf32, #tpu.memory_space<vmem>>, vector<1x1x64x8xf32>
    %640 = vector.shape_cast %639 : vector<1x1x64x8xf32> to vector<1x64x8xf32>
    %641 = vector.shape_cast %640 : vector<1x64x8xf32> to vector<64x8xf32>
    %642 = arith.mulf %637, %612 : vector<64x8xf32>
    %643 = arith.addf %642, %617 : vector<64x8xf32>
    %644 = arith.addf %643, %641 : vector<64x8xf32>
    %cst_342 = arith.constant 0.000000e+00 : f32
    %645 = vector.broadcast %cst_342 : f32 to vector<64x8xf32>
    %646 = arith.maximumf %644, %645 : vector<64x8xf32>
    %647 = vector.shape_cast %646 : vector<64x8xf32> to vector<1x64x8xf32>
    %c0_343 = arith.constant 0 : index
    %648 = arith.index_cast %c1_i32_336 : i32 to index
    %c0_344 = arith.constant 0 : index
    %c0_345 = arith.constant 0 : index
    %649 = vector.load %arg4[%c0_343, %648, %c0_344, %c0_345] : memref<1x4x64x8xf32, #tpu.memory_space<vmem>>, vector<1x1x64x8xf32>
    %650 = vector.shape_cast %649 : vector<1x1x64x8xf32> to vector<1x64x8xf32>
    %651 = vector.shape_cast %647 : vector<1x64x8xf32> to vector<1x1x64x8xf32>
    tpu.vector_store %arg4[%c0_343, %648, %c0_344, %c0_345], %651 {strides = array<i32>} : memref<1x4x64x8xf32, #tpu.memory_space<vmem>>, vector<1x1x64x8xf32>,
    %c2_i32_346 = arith.constant 2 : i32
    %652 = arith.index_cast %c2_i32_346 : i32 to index
    %c0_347 = arith.constant 0 : index
    %c0_348 = arith.constant 0 : index
    %653 = vector.load %arg6[%652, %c0_347, %c0_348] : memref<4x64x8xf32, #tpu.memory_space<vmem>>, vector<1x64x8xf32>
    %654 = vector.shape_cast %653 : vector<1x64x8xf32> to vector<64x8xf32>
    %c0_349 = arith.constant 0 : index
    %655 = arith.index_cast %c2_i32_346 : i32 to index
    %c0_350 = arith.constant 0 : index
    %c0_351 = arith.constant 0 : index
    %656 = vector.load %arg1[%c0_349, %655, %c0_350, %c0_351] : memref<1x4x64x8xf32, #tpu.memory_space<vmem>>, vector<1x1x64x8xf32>
    %657 = vector.shape_cast %656 : vector<1x1x64x8xf32> to vector<1x64x8xf32>
    %658 = vector.shape_cast %657 : vector<1x64x8xf32> to vector<64x8xf32>
    %659 = arith.mulf %654, %612 : vector<64x8xf32>
    %660 = arith.addf %659, %617 : vector<64x8xf32>
    %661 = arith.addf %660, %658 : vector<64x8xf32>
    %cst_352 = arith.constant 0.000000e+00 : f32
    %662 = vector.broadcast %cst_352 : f32 to vector<64x8xf32>
    %663 = arith.maximumf %661, %662 : vector<64x8xf32>
    %664 = vector.shape_cast %663 : vector<64x8xf32> to vector<1x64x8xf32>
    %c0_353 = arith.constant 0 : index
    %665 = arith.index_cast %c2_i32_346 : i32 to index
    %c0_354 = arith.constant 0 : index
    %c0_355 = arith.constant 0 : index
    %666 = vector.load %arg4[%c0_353, %665, %c0_354, %c0_355] : memref<1x4x64x8xf32, #tpu.memory_space<vmem>>, vector<1x1x64x8xf32>
    %667 = vector.shape_cast %666 : vector<1x1x64x8xf32> to vector<1x64x8xf32>
    %668 = vector.shape_cast %664 : vector<1x64x8xf32> to vector<1x1x64x8xf32>
    tpu.vector_store %arg4[%c0_353, %665, %c0_354, %c0_355], %668 {strides = array<i32>} : memref<1x4x64x8xf32, #tpu.memory_space<vmem>>, vector<1x1x64x8xf32>,
    %c3_i32_356 = arith.constant 3 : i32
    %669 = arith.index_cast %c3_i32_356 : i32 to index
    %c0_357 = arith.constant 0 : index
    %c0_358 = arith.constant 0 : index
    %670 = vector.load %arg6[%669, %c0_357, %c0_358] : memref<4x64x8xf32, #tpu.memory_space<vmem>>, vector<1x64x8xf32>
    %671 = vector.shape_cast %670 : vector<1x64x8xf32> to vector<64x8xf32>
    %c0_359 = arith.constant 0 : index
    %672 = arith.index_cast %c3_i32_356 : i32 to index
    %c0_360 = arith.constant 0 : index
    %c0_361 = arith.constant 0 : index
    %673 = vector.load %arg1[%c0_359, %672, %c0_360, %c0_361] : memref<1x4x64x8xf32, #tpu.memory_space<vmem>>, vector<1x1x64x8xf32>
    %674 = vector.shape_cast %673 : vector<1x1x64x8xf32> to vector<1x64x8xf32>
    %675 = vector.shape_cast %674 : vector<1x64x8xf32> to vector<64x8xf32>
    %676 = arith.mulf %671, %612 : vector<64x8xf32>
    %677 = arith.addf %676, %617 : vector<64x8xf32>
    %678 = arith.addf %677, %675 : vector<64x8xf32>
    %cst_362 = arith.constant 0.000000e+00 : f32
    %679 = vector.broadcast %cst_362 : f32 to vector<64x8xf32>
    %680 = arith.maximumf %678, %679 : vector<64x8xf32>
    %681 = vector.shape_cast %680 : vector<64x8xf32> to vector<1x64x8xf32>
    %c0_363 = arith.constant 0 : index
    %682 = arith.index_cast %c3_i32_356 : i32 to index
    %c0_364 = arith.constant 0 : index
    %c0_365 = arith.constant 0 : index
    %683 = vector.load %arg4[%c0_363, %682, %c0_364, %c0_365] : memref<1x4x64x8xf32, #tpu.memory_space<vmem>>, vector<1x1x64x8xf32>
    %684 = vector.shape_cast %683 : vector<1x1x64x8xf32> to vector<1x64x8xf32>
    %685 = vector.shape_cast %681 : vector<1x64x8xf32> to vector<1x1x64x8xf32>
    tpu.vector_store %arg4[%c0_363, %682, %c0_364, %c0_365], %685 {strides = array<i32>} : memref<1x4x64x8xf32, #tpu.memory_space<vmem>>, vector<1x1x64x8xf32>,
    %c4_i32_366 = arith.constant 4 : i32
    return
  }
  func.func @transform_0(%arg0: i32) -> (i32, i32, i32, i32) {
    %c0_i32 = arith.constant 0 : i32
    %c0_i32_0 = arith.constant 0 : i32
    %c0_i32_1 = arith.constant 0 : i32
    %c0_i32_2 = arith.constant 0 : i32
    return %arg0, %c0_i32, %c0_i32_0, %c0_i32_1 : i32, i32, i32, i32
  }
  func.func @transform_1(%arg0: i32) -> (i32, i32, i32) {
    %c0_i32 = arith.constant 0 : i32
    %c0_i32_0 = arith.constant 0 : i32
    %c0_i32_1 = arith.constant 0 : i32
    %c0_i32_2 = arith.constant 0 : i32
    return %c0_i32, %c0_i32_0, %c0_i32_1 : i32, i32, i32
  }
  func.func @transform_2(%arg0: i32) -> (i32, i32, i32) {
    %c0_i32 = arith.constant 0 : i32
    %c0_i32_0 = arith.constant 0 : i32
    %c0_i32_1 = arith.constant 0 : i32
    %c0_i32_2 = arith.constant 0 : i32
    return %c0_i32, %c0_i32_0, %c0_i32_1 : i32, i32, i32
  }
  func.func @transform_3(%arg0: i32) -> (i32, i32, i32, i32) {
    %c0_i32 = arith.constant 0 : i32
    %c0_i32_0 = arith.constant 0 : i32
    %c0_i32_1 = arith.constant 0 : i32
    %c0_i32_2 = arith.constant 0 : i32
    return %arg0, %c0_i32, %c0_i32_0, %c0_i32_1 : i32, i32, i32, i32
  }
}

</mosaic_0001>

<bundles_post_ra>
// kernel: tpu_custom_call.1
= control target key start
LH: loop header
LB: loop body
LE: loop exit
PB: predicated region body
PF: predicated region fallthrough
CT: control target
= control target key end

     0   :  { %s12253_s12 = smov 0   ;;  %s15451_s0 = inlined_call_operand.vmem [shape: f32[2,4,64,8], index: 0, kind: input, shape index: {}]   ;;  %s15452_s1 = inlined_call_operand.vmem [shape: bf16[9,24,8], index: 1, kind: input, shape index: {}]   ;;  %s15453_s2 = inlined_call_operand.vmem [shape: bf16[9,24,8], index: 2, kind: input, shape index: {}]   ;;  %s15454_s3 = inlined_call_operand.vmem [shape: f32[2,4,64,8], index: 3, kind: output, shape index: {}]  }
   0x1 LB: > { %s9500_s13 = sadd.s32 4294967295, %s12228_s12   ;;  %p9504_p0 = scmp.ge.s32.totalorder %s12228_s12, 1  ;;  %s12228_s12 = sphi %s12253_s12, %s13_s12  }
   0x2   : > { %p137_p1 = scmp.lt.s32.totalorder %s12228_s12, 3 }
   0x4   : > { %p138_p2 = pnand %p9504_p0, %p137_p1 }
   0x6   : > { %141 = sbr.rel (%p138_p2) target bundleno = 1362 (0x552), region = 32 }
   0xb   : > { %p161_p3 = scmp.lt.s32.totalorder %s9500_s13, 1  ;;  %v11960_v0 = vld [vmem:[%s15452_s1 + $0x14] ss:$0 sps:$4 sm:$0xff]   ;;  %vm1004_vm0 = vcmask 1043456   ;;  %v11961_v1 = vld [vmem:[%s15452_s1 + $0xc] sm:$0xff]   ;;  %vm172_vm1 = vcmask 191488  }
   0xc   : > { %11597 = vmatprep.subr.msk.bf16.mxu0 %vm1004_vm0, %v11960_v0  ;;  %v12271_v2 = vsel %vm1004_vm0, %v11960_v0, 0  ;;  %v12230_v3 = vmov 0   ;;  %v11966_v4 = vld [vmem:[%s15452_s1 + $0x8] ss:$0 sps:$4 sm:$0xff]   ;;  %v12309_v5 = vld [vmem:[%s15452_s1 + $0x20] ss:$0 sps:$4 sm:$0xff]  }
   0xd   : > { %s15475_s13 = smov (!%p161_p3, %s9500_s13), 1  ;;  %174 = vst.msk [vmem:[#allocation2 + $0x4] sm:$0xf] %vm172_vm1, %v12230_v3  ;;  %175 = vst.msk [vmem:[#allocation2 + $0x8] sm:$0xf] %vm172_vm1, %v12230_v3  ;;  %10734 = vmatpush3.bf16.msra.mxu0 %v12271_v2  ;;  %v11969_v6 = vld [vmem:[%s15452_s1] sm:$0xff]   ;;  %11598 = vmatprep.subr.msk.bf16.mxu1 %vm1004_vm0, %v11966_v4 }
   0xe   : > { %176 = vst.msk [vmem:[#allocation2 + $0xc] sm:$0xf] %vm172_vm1, %v12230_v3  ;;  %177 = vst.msk [vmem:[#allocation2 + $0x10] sm:$0xf] %vm172_vm1, %v12230_v3  ;;  %s10235_s20 = sshll.u32 %s15475_s13, 8  ;;  %10735 = vmatprep.subr.bf16.mxu0 %v11961_v1  ;;  %v12323_v7 = vsel %vm1004_vm0, %v11966_v4, 0 }
   0xf   : > { %178 = vst.msk [vmem:[#allocation2 + $0x14] sm:$0xf] %vm172_vm1, %v12230_v3  ;;  %173 = vst.msk [vmem:[#allocation2] sm:$0xf] %vm172_vm1, %v12230_v3  ;;  %s12319_s27 = scalar_lea.vmem %s15451_s0, %s10235_s20  ;;  %vm260_vm2 = vcmask 1046528   ;;  %10746 = vmatpush3.bf16.msra.mxu1 %v12323_v7  ;;  %s12231_s28 = smov 8  }
  0x10   : > { %179 = vst.msk [vmem:[#allocation2 + $0x18] sm:$0xf] %vm172_vm1, %v12230_v3  ;;  %180 = vst.msk [vmem:[#allocation2 + $0x1c] sm:$0xf] %vm172_vm1, %v12230_v3  ;;  %v12326_v8 = vld [vmem:[%s12319_s27] sm:$0xff]  ;;  %v12329_v9 = vld [vmem:[%s12319_s27 + $0x8] sm:$0xff]  ;;  %10747 = vmatprep.subr.bf16.mxu1 %v11969_v6  ;;  %s15310_s7 = scalar_lea.vmem %s15454_s3, %s10235_s20 }
  0x11   : > { %181 = vst.msk [vmem:[#allocation2 + $0x20] sm:$0xf] %vm172_vm1, %v12230_v3  ;;  %182 = vst.msk [vmem:[#allocation2 + $0x24] sm:$0xf] %vm172_vm1, %v12230_v3  ;;  %v12332_v10 = vld [vmem:[%s12319_s27 + $0x10] sm:$0xff]  ;;  %v11680_v11 = vpack.i.bf16 %v12329_v9, %v12326_v8  ;;  %v244_v12 = vrot.slane %v12326_v8, 1  ;;  %10736 = vmatpush3.bf16.msra.mxu0 %v11961_v1 }
  0x12   : > { %184 = vst.msk [vmem:[#allocation2 + $0xc8] sm:$0xf] %vm172_vm1, %v12230_v3  ;;  %185 = vst.msk [vmem:[#allocation2 + $0xcc] sm:$0xf] %vm172_vm1, %v12230_v3  ;;  %v12339_v13 = vld [vmem:[%s12319_s27 + $0x18] sm:$0xff]  ;;  %v245_v14 = vrot.slane %v12329_v9, 1  ;;  %11599 = vmatprep.subr.msk.bf16.mxu0 %vm1004_vm0, %v12309_v5 }
  0x13   : > { %186 = vst.msk [vmem:[#allocation2 + $0xd0] sm:$0xf] %vm172_vm1, %v12230_v3  ;;  %187 = vst.msk [vmem:[#allocation2 + $0xd4] sm:$0xf] %vm172_vm1, %v12230_v3  ;;  %11681 = vrot.lane.b32.xlu0 %v11680_v11, %s12231_s28  ;;  %v261_v15 = vsel %vm260_vm2, %v244_v12, 0.0  ;;  %v11685_v16 = vpack.i.bf16 %v12339_v13, %v12332_v10  ;;  %v246_v17 = vrot.slane %v12332_v10, 1  ;;  %10748 = vmatpush3.bf16.msra.mxu1 %v11969_v6 }
  0x14   : > { %188 = vst.msk [vmem:[#allocation2 + $0xd8] sm:$0xf] %vm172_vm1, %v12230_v3  ;;  %189 = vst.msk [vmem:[#allocation2 + $0xdc] sm:$0xf] %vm172_vm1, %v12230_v3  ;;  %v12348_v18 = vld [vmem:[%s12319_s27 + $0x20] sm:$0xff]  ;;  %v262_v19 = vsel %vm260_vm2, %v245_v14, 0.0 }
  0x15   : > { %190 = vst.msk [vmem:[#allocation2 + $0xe0] sm:$0xf] %vm172_vm1, %v12230_v3  ;;  %191 = vst.msk [vmem:[#allocation2 + $0xe4] sm:$0xf] %vm172_vm1, %v12230_v3  ;;  %v247_v20 = vrot.slane %v12339_v13, 1  ;;  %v12355_v21 = vld [vmem:[%s12319_s27 + $0x28] sm:$0xff]  ;;  %v11695_v22 = vpack.i.bf16 %v262_v19, %v261_v15 }
  0x16   : > { %192 = vst.msk [vmem:[#allocation2 + $0xe8] sm:$0xf] %vm172_vm1, %v12230_v3  ;;  %193 = vst.msk [vmem:[#allocation2 + $0xec] sm:$0xf] %vm172_vm1, %v12230_v3  ;;  %v263_v23 = vsel %vm260_vm2, %v246_v17, 0.0  ;;  %v12359_v24 = vld [vmem:[%s12319_s27 + $0x30] sm:$0xff]  ;;  %v11690_v29 = vpack.i.bf16 %v12355_v21, %v12348_v18 }
  0x17   : > { %195 = vst.msk [vmem:[#allocation2 + $0x28] sm:$0xf] %vm172_vm1, %v12230_v3  ;;  %196 = vst.msk [vmem:[#allocation2 + $0x50] sm:$0xf] %vm172_vm1, %v12230_v3  ;;  %v12362_v25 = vld [vmem:[%s12319_s27 + $0x38] sm:$0xff]  ;;  %v264_v26 = vsel %vm260_vm2, %v247_v20, 0.0  ;;  %11686 = vrot.lane.b32.xlu0 %v11685_v16, %s12231_s28 }
  0x18   : > { %197 = vst.msk [vmem:[#allocation2 + $0x78] sm:$0xf] %vm172_vm1, %v12230_v3  ;;  %198 = vst.msk [vmem:[#allocation2 + $0xa0] sm:$0xf] %vm172_vm1, %v12230_v3  ;;  %v248_v27 = vrot.slane %v12348_v18, 1  ;;  %s12232_s29 = smov 16   ;;  %v11700_v28 = vpack.i.bf16 %v264_v26, %v263_v23  ;;  %v11705_v37 = vpack.i.bf16 %v12362_v25, %v12359_v24 }
  0x19   : > { %199 = vst.msk [vmem:[#allocation2 + $0x4c] sm:$0xf] %vm172_vm1, %v12230_v3  ;;  %200 = vst.msk [vmem:[#allocation2 + $0x74] sm:$0xf] %vm172_vm1, %v12230_v3  ;;  %11696 = vrot.lane.b32.xlu1 %v11695_v22, %s12232_s29  ;;  %v249_v30 = vrot.slane %v12355_v21, 1  ;;  %v250_v32 = vrot.slane %v12359_v24, 1 }
  0x1a   : > { %201 = vst.msk [vmem:[#allocation2 + $0x9c] sm:$0xf] %vm172_vm1, %v12230_v3  ;;  %202 = vst.msk [vmem:[#allocation2 + $0xc4] sm:$0xf] %vm172_vm1, %v12230_v3  ;;  %v265_v31 = vsel %vm260_vm2, %v248_v27, 0.0  ;;  %v251_v33 = vrot.slane %v12362_v25, 1 }
  0x1b   : > { %v266_v34 = vsel %vm260_vm2, %v249_v30, 0.0  ;;  %v12376_v35 = vld [vmem:[%s12319_s27 + $0x40] sm:$0xff]  ;;  %v12379_v36 = vld [vmem:[%s12319_s27 + $0x48] sm:$0xff]  ;;  %11691 = vrot.lane.b32.xlu0 %v11690_v29, %s12231_s28  ;;  %v267_v39 = vsel %vm260_vm2, %v250_v32, 0.0  ;;  %v12390_v43 = vld [vmem:[%s12319_s27 + $0x50] sm:$0xff]  ;;  %vm991_vm3 = vcmask 195584  }
  0x1c   : > { %v11710_v38 = vpack.i.bf16 %v266_v34, %v265_v31  ;;  %v268_v40 = vsel %vm260_vm2, %v251_v33, 0.0  ;;  %v424_v41 = vrot.slane %v12376_v35, 1  ;;  %v425_v42 = vrot.slane %v12379_v36, 1  ;;  %v12393_v44 = vld [vmem:[%s12319_s27 + $0x58] sm:$0xff]  ;;  %v953_v45 = vld [vmem:[#allocation2 + $0x4] sm:$0xf] }
  0x1d   : > { %11701 = vrot.lane.b32.xlu1 %v11700_v28, %s12232_s29  ;;  %v11715_v46 = vpack.i.bf16 %v268_v40, %v267_v39  ;;  %v11720_v47 = vpack.i.bf16 %v12379_v36, %v12376_v35  ;;  %v954_v48 = vld [vmem:[#allocation2 + $0x8] sm:$0xf]  ;;  %v955_v49 = vld [vmem:[#allocation2 + $0xc] sm:$0xf]  ;;  %v956_v50 = vld [vmem:[#allocation2 + $0x10] sm:$0xf]  ;;  %v11725_v58 = vpack.i.bf16 %v12393_v44, %v12390_v43 }
  0x1e   : > { %v440_v51 = vsel %vm260_vm2, %v424_v41, 0.0  ;;  %v441_v52 = vsel %vm260_vm2, %v425_v42, 0.0  ;;  %v426_v53 = vrot.slane %v12390_v43, 1  ;;  %v427_v54 = vrot.slane %v12393_v44, 1  ;;  %v12404_v55 = vld [vmem:[%s12319_s27 + $0x60] sm:$0xff]  ;;  %v12407_v56 = vld [vmem:[%s12319_s27 + $0x68] sm:$0xff] }
  0x1f   : > { %11711 = vrot.lane.b32.xlu0 %v11710_v38, %s12232_s29  ;;  %v11971_v57 = vld [vmem:[%s15452_s1 + $0x2c] ss:$0 sps:$4 sm:$0xff]   ;;  %v957_v59 = vld [vmem:[#allocation2 + $0x14] sm:$0xf]  ;;  %v12416_v60 = vsel %vm1004_vm0, %v12309_v5, 0  ;;  %v11730_v61 = vpack.i.bf16 %v441_v52, %v440_v51  ;;  %v9589_v62 = vcombine.low %v953_v45, %v954_v48  ;;  %v9590_v63 = vcombine.low %v955_v49, %v956_v50  ;;  %v11970_v5 = vld [vmem:[%s15452_s1 + $0x18] sm:$0xff]  }
  0x20   : > { %v958_v0 = vld [vmem:[#allocation2 + $0x18] sm:$0xf]  ;;  %v442_v1 = vsel %vm260_vm2, %v426_v53, 0.0  ;;  %v443_v3 = vsel %vm260_vm2, %v427_v54, 0.0  ;;  %v428_v4 = vrot.slane %v12404_v55, 1  ;;  %v429_v6 = vrot.slane %v12407_v56, 1  ;;  %11600 = vmatprep.subr.msk.bf16.mxu1 %vm1004_vm0, %v11971_v57 }
  0x21   : > { %11706 = vrot.lane.b32.xlu1 %v11705_v37, %s12231_s28  ;;  %10737 = vmatprep.mubr.msk.bf16.mxu0 %vm991_vm3, %v9589_v62  ;;  %v952_v11 = vld [vmem:[#allocation2] sm:$0xf]  ;;  %v9591_v12 = vcombine.low %v957_v59, %v958_v0  ;;  %v11735_v14 = vpack.i.bf16 %v443_v3, %v442_v1  ;;  %v11740_v15 = vpack.i.bf16 %v12407_v56, %v12404_v55  ;;  %v959_v16 = vld [vmem:[#allocation2 + $0x1c] sm:$0xf]  ;;  %v12437_v19 = vld [vmem:[%s12319_s27 + $0x70] sm:$0xff]  ;;  %v12449_v29 = vsel %vm1004_vm0, %v11971_v57, 0 }
  0x22   : > { %10738 = vmatmul.mubr.msk.bf16.vlgmr.msra.gmra.mxu0 %vm991_vm3, %v9590_v63  ;;  %v12434_v17 = vld [vmem:[#allocation2 + $0x20] sm:$0xf]  ;;  %v12440_v20 = vld [vmem:[%s12319_s27 + $0x78] sm:$0xff]  ;;  %v444_v22 = vsel %vm260_vm2, %v428_v4, 0.0  ;;  %v445_v23 = vsel %vm260_vm2, %v429_v6, 0.0  ;;  %v9600_v26 = vcombine.low %v954_v48, %v955_v49  ;;  %v9599_v27 = vcombine.low %v952_v11, %v953_v45  ;;  %v11972_v30 = vld [vmem:[%s15452_s1 + $0x24] sm:$0xff]  }
  0x23   : > { %11721 = vrot.lane.b32.xlu0 %v11720_v47, %s12231_s28  ;;  %10741 = vmatprep.mubr.msk.bf16.mxu0 %vm991_vm3, %v9591_v12  ;;  %v9592_v28 = vcombine.low %v959_v16, %v12434_v17  ;;  %v11745_v31 = vpack.i.bf16 %v12440_v20, %v12437_v19  ;;  %v11750_v32 = vpack.i.bf16 %v445_v23, %v444_v22  ;;  %v12459_v33 = vld [vmem:[%s12319_s27 + $0x80] sm:$0xff]  ;;  %v12462_v34 = vld [vmem:[%s12319_s27 + $0x88] sm:$0xff]  ;;  %v430_v38 = vrot.slane %v12437_v19, 1  ;;  %v11973_v40 = vld [vmem:[%s15452_s1 + $0x38] ss:$0 sps:$4 sm:$0xff]  }
  0x24   : > { %10758 = vmatpush3.bf16.msra.mxu0 %v12416_v60  ;;  %10749 = vmatprep.mubr.msk.bf16.mxu1 %vm991_vm3, %v9599_v27  ;;  %v9601_v37 = vcombine.low %v956_v50, %v957_v59  ;;  %v431_v39 = vrot.slane %v12440_v20, 1  ;;  %v12476_v41 = vld [vmem:[%s15452_s1 + $0x44] ss:$0 sps:$4 sm:$0xff]   ;;  %v602_v42 = vrot.slane %v12459_v33, 1  ;;  %v603_v45 = vrot.slane %v12462_v34, 1  ;;  %v12485_v48 = vld [vmem:[%s12319_s27 + $0x90] sm:$0xff] }
  0x25   : > { %11716 = vrot.lane.b32.xlu1 %v11715_v46, %s12232_s29  ;;  %10759 = vmatprep.subr.bf16.mxu0 %v11970_v5  ;;  %v446_v46 = vsel %vm260_vm2, %v430_v38, 0.0  ;;  %v12488_v49 = vld [vmem:[%s12319_s27 + $0x98] sm:$0xff]  ;;  %v9602_v50 = vcombine.low %v958_v0, %v959_v16  ;;  %v11755_v51 = vpack.i.bf16 %v12462_v34, %v12459_v33  ;;  %v604_v57 = vrot.slane %v12485_v48, 1  ;;  %v12507_v59 = vld [vmem:[%s12319_s27 + $0xb0] sm:$0xff]  ;;  %v12517_v0 = vld [vmem:[%s12319_s27 + $0xa8] sm:$0xff] }
  0x26   : > { %10750 = vmatmul.mubr.msk.bf16.vlgmr.msra.gmra.mxu1 %vm991_vm3, %v9600_v26  ;;  %v447_v47 = vsel %vm260_vm2, %v431_v39, 0.0  ;;  %v11760_v52 = vpack.i.bf16 %v12488_v49, %v12485_v48  ;;  %v618_v53 = vsel %vm260_vm2, %v602_v42, 0.0  ;;  %v619_v54 = vsel %vm260_vm2, %v603_v45, 0.0  ;;  %v11974_v62 = vld [vmem:[%s15452_s1 + $0x30] sm:$0xff]   ;;  %v12544_v27 = vld [vmem:[%s12319_s27 + $0xb8] sm:$0xff] }
  0x27   : > { %11731 = vrot.lane.b32.xlu0 %v11730_v61, %s12232_s29  ;;  %10753 = vmatprep.mubr.msk.bf16.mxu1 %vm991_vm3, %v9601_v37  ;;  %v12511_v61 = vsel %vm1004_vm0, %v11973_v40, 0  ;;  %v11765_v63 = vpack.i.bf16 %v619_v54, %v618_v53  ;;  %v608_v1 = vrot.slane %v12507_v59, 1  ;;  %v605_v3 = vrot.slane %v12488_v49, 1  ;;  %v12532_v12 = vld [vmem:[%s15452_s1 + $0x50] ss:$0 sps:$4 sm:$0xff]   ;;  %v12563_v38 = vld [vmem:[%s12319_s27 + $0xd8] sm:$0xff] }
  0x28   : > { %10760 = vmatpush3.bf16.msra.mxu0 %v11970_v5  ;;  %10770 = vmatpush3.bf16.msra.mxu1 %v12449_v29  ;;  %v607_v6 = vrot.slane %v12517_v0, 1  ;;  %v961_v5 = vld [vmem:[#allocation2 + $0x24] sm:$0xf]  ;;  %v620_v11 = vsel %vm260_vm2, %v604_v57, 0.0  ;;  %vm235_vm4 = vcmask 1040384   ;;  %vm325_vm5 = vcmask 64512  }
  0x29   : > { %11726 = vrot.lane.b32.xlu1 %v11725_v58, %s12231_s28  ;;  %10771 = vmatprep.subr.bf16.mxu1 %v11972_v30  ;;  %v12504_v58 = vld [vmem:[%s12319_s27 + $0xa0] sm:$0xff]  ;;  %v621_v16 = vsel %vm260_vm2, %v605_v3, 0.0  ;;  %v12592_v3 = vld [vmem:[%s12319_s27 + $0xf0] sm:$0xff]  ;;  %vm334_vm6 = vcmask 130048  }
  0x2a   : > { %10742 = vmatmul.mubr.msk.bf16.gmra.mxu0 %vm991_vm3, %v9592_v28  ;;  %11601 = vmatprep.subr.msk.bf16.mxu0 %vm1004_vm0, %v11973_v40  ;;  %v606_v4 = vrot.slane %v12504_v58, 1  ;;  %v623_v23 = vsel %vm260_vm2, %v607_v6, 0.0  ;;  %v12551_v28 = vld [vmem:[%s12319_s27 + $0xc0] sm:$0xff] }
  0x2b   : > { %11741 = vrot.lane.b32.xlu0 %v11740_v15, %s12231_s28  ;;  %10761 = vmatprep.mubr.msk.bf16.mxu0 %vm991_vm3, %v9600_v26  ;;  %v9609_v15 = vcombine.low %v12434_v17, %v961_v5  ;;  %v624_v26 = vsel %vm260_vm2, %v608_v1, 0.0  ;;  %v609_v17 = vrot.slane %v12544_v27, 1  ;;  %v780_v40 = vrot.slane %v12551_v28, 1  ;;  %v12584_v57 = vld [vmem:[%s12319_s27 + $0xe0] sm:$0xff] }
  0x2c   : > { %10772 = vmatpush3.bf16.msra.mxu1 %v11972_v30  ;;  %v622_v22 = vsel %vm260_vm2, %v606_v4, 0.0  ;;  %v12554_v30 = vld [vmem:[%s12319_s27 + $0xc8] sm:$0xff]  ;;  %v12595_v4 = vld [vmem:[%s12319_s27 + $0xf8] sm:$0xff]  ;;  %v784_v6 = vrot.slane %v12584_v57, 1 }
  0x2d   : > { %11736 = vrot.lane.b32.xlu1 %v11735_v14, %s12232_s29  ;;  %11602 = vmatprep.subr.msk.bf16.mxu1 %vm1004_vm0, %v12476_v41  ;;  %v11770_v14 = vpack.i.bf16 %v12517_v0, %v12504_v58  ;;  %v625_v39 = vsel %vm260_vm2, %v609_v17, 0.0  ;;  %v781_v42 = vrot.slane %v12554_v30, 1  ;;  %v787_v17 = vrot.slane %v12595_v4, 1 }
  0x2e   : > { %10754 = vmatmul.mubr.msk.bf16.gmra.mxu1 %vm991_vm3, %v9602_v50 }
  0x2f   : > { %11751 = vrot.lane.b32.xlu0 %v11750_v32, %s12232_s29  ;;  %v11780_v32 = vpack.i.bf16 %v624_v26, %v623_v23 }
  0x31   : > { %11746 = vrot.lane.b32.xlu1 %v11745_v31, %s12231_s28  ;;  %v11775_v31 = vpack.i.bf16 %v622_v22, %v621_v16  ;;  %v786_v22 = vrot.slane %v12592_v3, 1 }
  0x32   : > { %10762 = vmatmul.mubr.msk.bf16.vlgmr.msra.gmra.mxu0 %vm991_vm3, %v9601_v37  ;;  %v12560_v37 = vld [vmem:[%s12319_s27 + $0xd0] sm:$0xff] }
  0x33   : > { %494 = vrot.lane.b32.xlu0 %v447_v47, %s12232_s29  ;;  %10765 = vmatprep.mubr.msk.bf16.mxu0 %vm991_vm3, %v9602_v50  ;;  %v782_v45 = vrot.slane %v12560_v37, 1  ;;  %v11785_v47 = vpack.i.bf16 %v12554_v30, %v12551_v28  ;;  %v11790_v50 = vpack.i.bf16 %v12563_v38, %v12560_v37  ;;  %v802_v26 = vsel %vm260_vm2, %v786_v22, 0.0 }
  0x34   : > { %10782 = vmatpush3.bf16.msra.mxu0 %v12511_v61 }
  0x35   : > { %492 = vrot.lane.b32.xlu1 %v446_v46, %s12232_s29  ;;  %10783 = vmatprep.subr.bf16.mxu0 %v11974_v62  ;;  %v783_v46 = vrot.slane %v12563_v38, 1  ;;  %v798_v53 = vsel %vm260_vm2, %v782_v45, 0.0 }
  0x37   : > { %11761 = vrot.lane.b32.xlu0 %v11760_v52, %s12231_s28  ;;  %v797_v52 = vsel %vm260_vm2, %v781_v42, 0.0  ;;  %v799_v54 = vsel %vm260_vm2, %v783_v46, 0.0  ;;  %v221_v42 = vrot.slane %v12332_v10, 7 }
  0x38   : > { %10784 = vmatpush3.bf16.msra.mxu0 %v11974_v62  ;;  %v12587_v62 = vld [vmem:[%s12319_s27 + $0xe8] sm:$0xff]  ;;  %v11800_v1 = vpack.i.bf16 %v799_v54, %v798_v53  ;;  %v223_v53 = vrot.slane %v12348_v18, 7 }
  0x39   : > { %11756 = vrot.lane.b32.xlu1 %v11755_v51, %s12231_s28  ;;  %11603 = vmatprep.subr.msk.bf16.mxu0 %vm1004_vm0, %v12532_v12  ;;  %v796_v51 = vsel %vm260_vm2, %v780_v40, 0.0  ;;  %v785_v5 = vrot.slane %v12587_v62, 1  ;;  %v222_v40 = vrot.slane %v12339_v13, 7  ;;  %v238_v10 = vsel %vm235_vm4, 0.0, %v221_v42 }
  0x3a   : > { %10766 = vmatmul.mubr.msk.bf16.gmra.mxu0 %vm991_vm3, %v9609_v15  ;;  %v800_v15 = vsel %vm260_vm2, %v784_v6, 0.0  ;;  %v240_v18 = vsel %vm235_vm4, 0.0, %v223_v53 }
  0x3b   : > { %662 = vrot.lane.b32.xlu0 %v620_v11, %s12232_s29  ;;  %v11805_v11 = vpack.i.bf16 %v12587_v62, %v12584_v57  ;;  %v801_v16 = vsel %vm260_vm2, %v785_v5, 0.0  ;;  %v239_v54 = vsel %vm235_vm4, 0.0, %v222_v40 }
  0x3c   : > { %v11815_v23 = vpack.i.bf16 %v801_v16, %v800_v15 }
  0x3d   : > { %11766 = vrot.lane.b32.xlu1 %v11765_v63, %s12232_s29  ;;  %v11795_v63 = vpack.i.bf16 %v797_v52, %v796_v51  ;;  %v224_v52 = vrot.slane %v12355_v21, 7 }
  0x3f   : > { %638 = vrot.lane.b32.xlu0 %v12507_v59, %s12231_s28  ;;  %v241_v15 = vsel %vm235_vm4, 0.0, %v224_v52  ;;  %v402_v52 = vrot.slane %v12390_v43, 7 }
  0x41   : > { %11771 = vrot.lane.b32.xlu1 %v11770_v14, %s12231_s28  ;;  %v11810_v14 = vpack.i.bf16 %v12595_v4, %v12592_v3 }
  0x43   : > { %11781 = vrot.lane.b32.xlu0 %v11780_v32, %s12232_s29  ;;  %v220_v32 = vrot.slane %v12329_v9, 7 }
  0x45   : > { %11776 = vrot.lane.b32.xlu1 %v11775_v31, %s12232_s29  ;;  %v803_v31 = vsel %vm260_vm2, %v787_v17, 0.0  ;;  %v237_v46 = vsel %vm235_vm4, 0.0, %v220_v32 }
  0x47   : > { %672 = vrot.lane.b32.xlu0 %v625_v39, %s12232_s29  ;;  %v219_v39 = vrot.slane %v12326_v8, 7 }
  0x49   : > { %640 = vrot.lane.b32.xlu1 %v12544_v27, %s12231_s28 }
  0x4b   : > { %11791 = vrot.lane.b32.xlu0 %v11790_v50, %s12231_s28 }
  0x4d   : > { %11786 = vrot.lane.b32.xlu1 %v11785_v47, %s12231_s28  ;;  %v236_v47 = vsel %vm235_vm4, 0.0, %v219_v39 }
  0x4f   : > { %11801 = vrot.lane.b32.xlu0 %v11800_v1, %s12232_s29 }
  0x51   : > { %11796 = vrot.lane.b32.xlu1 %v11795_v63, %s12232_s29 }
  0x53   : > { %11811 = vrot.lane.b32.xlu0 %v11810_v14, %s12231_s28 }
  0x55   : > { %11806 = vrot.lane.b32.xlu1 %v11805_v11, %s12231_s28 }
  0x57   : > { %848 = vrot.lane.b32.xlu0 %v802_v26, %s12232_s29 }
  0x59   : > { %11816 = vrot.lane.b32.xlu1 %v11815_v23, %s12232_s29 }
  0x5d   : > { %850 = vrot.lane.b32.xlu1 %v803_v31, %s12232_s29 }
  0x85   : > { %v11682_v45 = vpop.permute.xlu0 %11681 }
  0x86   : > { %v11684_v50 = vunpack.i.h.bf16 %v11682_v45  ;;  %v11683_v51 = vunpack.i.l.bf16 %v11682_v45  ;;  %v226_v45 = vrot.slane %v12362_v25, 7 }
  0x88   : > { %v327_v8 = vsel %vm325_vm5, %v237_v46, %v11684_v50  ;;  %v326_v9 = vsel %vm325_vm5, %v236_v47, %v11683_v51  ;;  %v225_v46 = vrot.slane %v12359_v24, 7  ;;  %v401_v47 = vrot.slane %v12379_v36, 7 }
  0x89   : > { %v11687_v63 = vpop.permute.xlu0 %11686  ;;  %v400_v50 = vrot.slane %v12376_v35, 7  ;;  %v403_v51 = vrot.slane %v12393_v44, 7 }
  0x8a   : > { %v11689_v5 = vunpack.i.h.bf16 %v11687_v63  ;;  %v11688_v11 = vunpack.i.l.bf16 %v11687_v63  ;;  %v242_v43 = vsel %vm235_vm4, 0.0, %v225_v46 }
  0x8b   : > { %v11697_v13 = vpop.permute.xlu1 %11696 }
  0x8c   : > { %v11699_v1 = vunpack.i.h.bf16 %v11697_v13  ;;  %v11698_v6 = vunpack.i.l.bf16 %v11697_v13  ;;  %v329_v23 = vsel %vm325_vm5, %v239_v54, %v11689_v5  ;;  %v328_v26 = vsel %vm325_vm5, %v238_v10, %v11688_v11 }
  0x8d   : > { %v11692_v31 = vpop.permute.xlu0 %11691  ;;  %v405_v10 = vrot.slane %v12407_v56, 7  ;;  %v404_v54 = vrot.slane %v12404_v55, 7  ;;  %v416_v56 = vsel %vm235_vm4, 0.0, %v400_v50  ;;  %v417_v55 = vsel %vm235_vm4, 0.0, %v401_v47 }
  0x8e   : > { %v336_v14 = vsel %vm334_vm6, %v327_v8, %v11699_v1  ;;  %v335_v21 = vsel %vm334_vm6, %v326_v9, %v11698_v6  ;;  %v11694_v40 = vunpack.i.h.bf16 %v11692_v31  ;;  %v11693_v42 = vunpack.i.l.bf16 %v11692_v31 }
  0x8f   : > { %v10238_v16 = vpack.c.bf16 %v336_v14, %v336_v14  ;;  %v10237_v22 = vpack.c.bf16 %v335_v21, %v335_v21  ;;  %v11702_v17 = vpop.permute.xlu1 %11701  ;;  %v243_v1 = vsel %vm235_vm4, 0.0, %v226_v45  ;;  %v1259_v21 = vld [vmem:[#allocation2 + $0x28] sm:$0xf] }
  0x90   : > { %v11704_v32 = vunpack.i.h.bf16 %v11702_v17  ;;  %v11703_v39 = vunpack.i.l.bf16 %v11702_v17  ;;  %v331_v24 = vsel %vm325_vm5, %v241_v15, %v11694_v40  ;;  %v330_v36 = vsel %vm325_vm5, %v240_v18, %v11693_v42 }
  0x91   : > { %376 = vst.msk [vmem:[#allocation2 + $0x30] sm:$0xf] %vm172_vm1, %v10238_v16  ;;  %375 = vst.msk [vmem:[#allocation2 + $0x2c] sm:$0xf] %vm172_vm1, %v10237_v22  ;;  %v11712_v35 = vpop.permute.xlu0 %11711 }
  0x92   : > { %v338_v53 = vsel %vm334_vm6, %v329_v23, %v11704_v32  ;;  %v337_v8 = vsel %vm334_vm6, %v328_v26, %v11703_v39  ;;  %v11714_v63 = vunpack.i.h.bf16 %v11712_v35  ;;  %v11713_v44 = vunpack.i.l.bf16 %v11712_v35 }
  0x93   : > { %v10240_v9 = vpack.c.bf16 %v338_v53, %v338_v53  ;;  %v10239_v25 = vpack.c.bf16 %v337_v8, %v337_v8  ;;  %v11707_v13 = vpop.permute.xlu1 %11706  ;;  %v418_v23 = vsel %vm235_vm4, 0.0, %v402_v52  ;;  %v419_v26 = vsel %vm235_vm4, 0.0, %v403_v51 }
  0x94   : > { %v11709_v6 = vunpack.i.h.bf16 %v11707_v13  ;;  %v11708_v5 = vunpack.i.l.bf16 %v11707_v13  ;;  %v339_v11 = vsel %vm334_vm6, %v330_v36, %v11713_v44  ;;  %v340_v14 = vsel %vm334_vm6, %v331_v24, %v11714_v63 }
  0x95   : > { %378 = vst.msk [vmem:[#allocation2 + $0x38] sm:$0xf] %vm172_vm1, %v10240_v9  ;;  %377 = vst.msk [vmem:[#allocation2 + $0x34] sm:$0xf] %vm172_vm1, %v10239_v25  ;;  %v10241_v18 = vpack.c.bf16 %v339_v11, %v339_v11  ;;  %v10242_v15 = vpack.c.bf16 %v340_v14, %v340_v14  ;;  %v11722_v22 = vpop.permute.xlu0 %11721  ;;  %v12667_v8 = vsel %vm1004_vm0, %v12476_v41, 0  ;;  %v420_v35 = vsel %vm235_vm4, 0.0, %v404_v54 }
  0x96   : > { %v11724_v32 = vunpack.i.h.bf16 %v11722_v22  ;;  %v11723_v39 = vunpack.i.l.bf16 %v11722_v22  ;;  %v333_v45 = vsel %vm325_vm5, %v243_v1, %v11709_v6  ;;  %v332_v46 = vsel %vm325_vm5, %v242_v43, %v11708_v5 }
  0x97   : > { %v11717_v16 = vpop.permute.xlu1 %11716  ;;  %379 = vst.msk [vmem:[#allocation2 + $0x3c] sm:$0xf] %vm172_vm1, %v10241_v18  ;;  %380 = vst.msk [vmem:[#allocation2 + $0x40] sm:$0xf] %vm172_vm1, %v10242_v15  ;;  %v421_v14 = vsel %vm235_vm4, 0.0, %v405_v10  ;;  %v12685_v54 = vsel %vm1004_vm0, %v12532_v12, 0 }
  0x98   : > { %v11719_v17 = vunpack.i.h.bf16 %v11717_v16  ;;  %v11718_v31 = vunpack.i.l.bf16 %v11717_v16  ;;  %v1260_v40 = vld [vmem:[#allocation2 + $0x2c] sm:$0xf]  ;;  %v1261_v42 = vld [vmem:[#allocation2 + $0x30] sm:$0xf]  ;;  %v505_v53 = vsel %vm325_vm5, %v417_v55, %v11724_v32  ;;  %v504_v24 = vsel %vm325_vm5, %v416_v56, %v11723_v39  ;;  %v12681_v56 = vld [vmem:[%s15452_s1 + $0x3c] sm:$0xff]  }
  0x99   : > { %v9616_v47 = vcombine.low %v1259_v21, %v1260_v40  ;;  %v9626_v50 = vcombine.low %v1260_v40, %v1261_v42  ;;  %v11732_v13 = vpop.permute.xlu0 %11731  ;;  %v12690_v55 = vld [vmem:[%s15452_s1 + $0x48] sm:$0xff]   ;;  %v406_v15 = vrot.slane %v12437_v19, 7  ;;  %v407_v32 = vrot.slane %v12440_v20, 7  ;;  %v12712_v20 = vld [vmem:[%s15452_s1 + $0x5c] ss:$0 sps:$4 sm:$0xff]  }
  0x9a   : > { %v341_v52 = vsel %vm334_vm6, %v332_v46, %v11718_v31  ;;  %v342_v51 = vsel %vm334_vm6, %v333_v45, %v11719_v17  ;;  %v11734_v6 = vunpack.i.h.bf16 %v11732_v13  ;;  %v11733_v5 = vunpack.i.l.bf16 %v11732_v13 }
  0x9b   : > { %v10243_v9 = vpack.c.bf16 %v341_v52, %v341_v52  ;;  %v10244_v25 = vpack.c.bf16 %v342_v51, %v342_v51  ;;  %v11727_v36 = vpop.permute.xlu1 %11726  ;;  %10773 = vmatprep.mubr.msk.bf16.mxu1 %vm991_vm3, %v9616_v47  ;;  %10785 = vmatprep.mubr.msk.bf16.mxu0 %vm991_vm3, %v9626_v50  ;;  %v12717_v47 = vld [vmem:[%s15452_s1 + $0x68] ss:$0 sps:$4 sm:$0xff]  }
  0x9c   : > { %v11729_v63 = vunpack.i.h.bf16 %v11727_v36  ;;  %v11728_v44 = vunpack.i.l.bf16 %v11727_v36  ;;  %v1262_v43 = vld [vmem:[#allocation2 + $0x34] sm:$0xf]  ;;  %v1263_v1 = vld [vmem:[#allocation2 + $0x38] sm:$0xf]  ;;  %v512_v18 = vsel %vm334_vm6, %v504_v24, %v11733_v5  ;;  %v513_v10 = vsel %vm334_vm6, %v505_v53, %v11734_v6 }
  0x9d   : > { %381 = vst.msk [vmem:[#allocation2 + $0x44] sm:$0xf] %vm172_vm1, %v10243_v9  ;;  %382 = vst.msk [vmem:[#allocation2 + $0x48] sm:$0xf] %vm172_vm1, %v10244_v25  ;;  %v12675_v41 = vcombine.low %v1261_v42, %v1262_v43  ;;  %v9627_v11 = vcombine.low %v1262_v43, %v1263_v1  ;;  %v10245_v22 = vpack.c.bf16 %v512_v18, %v512_v18  ;;  %v11742_v12 = vpop.permute.xlu0 %11741  ;;  %v422_v53 = vsel %vm235_vm4, 0.0, %v406_v15 }
  0x9e   : > { %v507_v21 = vsel %vm325_vm5, %v419_v26, %v11729_v63  ;;  %v506_v16 = vsel %vm325_vm5, %v418_v23, %v11728_v44  ;;  %v10246_v17 = vpack.c.bf16 %v513_v10, %v513_v10  ;;  %v11744_v40 = vunpack.i.h.bf16 %v11742_v12  ;;  %v1264_v19 = vld [vmem:[#allocation2 + $0x3c] sm:$0xf]  ;;  %v1265_v45 = vld [vmem:[#allocation2 + $0x40] sm:$0xf]  ;;  %v1580_v15 = vld [vmem:[#allocation2 + $0x50] sm:$0xf] }
  0x9f   : > { %v11737_v31 = vpop.permute.xlu1 %11736  ;;  %10774 = vmatmul.mubr.msk.bf16.vlgmr.msra.gmra.mxu1 %vm991_vm3, %v12675_v41  ;;  %10786 = vmatmul.mubr.msk.bf16.vlgmr.msra.gmra.mxu0 %vm991_vm3, %v9627_v11  ;;  %v11743_v42 = vunpack.i.l.bf16 %v11742_v12  ;;  %553 = vst.msk [vmem:[#allocation2 + $0x54] sm:$0xf] %vm172_vm1, %v10245_v22  ;;  %v12705_v23 = vcombine.low %v1263_v1, %v1264_v19  ;;  %v9628_v46 = vcombine.low %v1264_v19, %v1265_v45  ;;  %v423_v63 = vsel %vm235_vm4, 0.0, %v407_v32 }
  0xa0   : > { %v11739_v26 = vunpack.i.h.bf16 %v11737_v31  ;;  %v11738_v39 = vunpack.i.l.bf16 %v11737_v31  ;;  %10794 = vmatpush3.bf16.msra.mxu1 %v12667_v8  ;;  %10806 = vmatpush3.bf16.msra.mxu0 %v12685_v54  ;;  %554 = vst.msk [vmem:[#allocation2 + $0x58] sm:$0xf] %vm172_vm1, %v10246_v17  ;;  %v509_v51 = vsel %vm325_vm5, %v421_v14, %v11744_v40  ;;  %v579_v22 = vrot.slane %v12462_v34, 7 }
  0xa1   : > { %10795 = vmatprep.subr.bf16.mxu1 %v12681_v56  ;;  %10807 = vmatprep.subr.bf16.mxu0 %v12690_v55  ;;  %v508_v24 = vsel %vm325_vm5, %v420_v35, %v11743_v42  ;;  %v11752_v13 = vpop.permute.xlu0 %11751  ;;  %v578_v17 = vrot.slane %v12459_v33, 7  ;;  %v580_v34 = vrot.slane %v12485_v48, 7 }
  0xa2   : > { %v514_v50 = vsel %vm334_vm6, %v506_v16, %v11738_v39  ;;  %v515_v52 = vsel %vm334_vm6, %v507_v21, %v11739_v26  ;;  %10777 = vmatprep.mubr.msk.bf16.mxu1 %vm991_vm3, %v12705_v23  ;;  %10789 = vmatprep.mubr.msk.bf16.mxu0 %vm991_vm3, %v9628_v46  ;;  %v11754_v1 = vunpack.i.h.bf16 %v11752_v13  ;;  %v11753_v6 = vunpack.i.l.bf16 %v11752_v13 }
  0xa3   : > { %v10247_v9 = vpack.c.bf16 %v514_v50, %v514_v50  ;;  %v10248_v25 = vpack.c.bf16 %v515_v52, %v515_v52  ;;  %v11747_v36 = vpop.permute.xlu1 %11746  ;;  %v595_v48 = vsel %vm235_vm4, 0.0, %v579_v22  ;;  %v582_v13 = vrot.slane %v12504_v58, 7  ;;  %v12795_v58 = vld [vmem:[%s15452_s1 + $0x60] sm:$0xff]  }
  0xa4   : > { %v11749_v44 = vunpack.i.h.bf16 %v11747_v36  ;;  %v11748_v43 = vunpack.i.l.bf16 %v11747_v36  ;;  %v1266_v5 = vld [vmem:[#allocation2 + $0x44] sm:$0xf]  ;;  %v12728_v11 = vld [vmem:[#allocation2 + $0x48] sm:$0xf]  ;;  %10796 = vmatpush3.bf16.msra.mxu1 %v12681_v56  ;;  %10808 = vmatpush3.bf16.msra.mxu0 %v12690_v55  ;;  %v516_v21 = vsel %vm334_vm6, %v508_v24, %v11753_v6  ;;  %v517_v18 = vsel %vm334_vm6, %v509_v51, %v11754_v1 }
  0xa5   : > { %555 = vst.msk [vmem:[#allocation2 + $0x5c] sm:$0xf] %vm172_vm1, %v10247_v9  ;;  %556 = vst.msk [vmem:[#allocation2 + $0x60] sm:$0xf] %vm172_vm1, %v10248_v25  ;;  %v9619_v35 = vcombine.low %v1265_v45, %v1266_v5  ;;  %v9629_v14 = vcombine.low %v1266_v5, %v12728_v11  ;;  %11604 = vmatprep.subr.msk.bf16.mxu1 %vm1004_vm0, %v12712_v20  ;;  %11605 = vmatprep.subr.msk.bf16.mxu0 %vm1004_vm0, %v12717_v47  ;;  %v495_v26 = vpop.permute.xlu0 %494  ;;  %v596_v24 = vsel %vm235_vm4, 0.0, %v580_v34 }
  0xa6   : > { %v510_v10 = vsel %vm325_vm5, %v422_v53, %v11748_v43  ;;  %v511_v16 = vsel %vm325_vm5, %v423_v63, %v11749_v44  ;;  %v10249_v31 = vpack.c.bf16 %v516_v21, %v516_v21  ;;  %v10250_v12 = vpack.c.bf16 %v517_v18, %v517_v18  ;;  %v12750_v40 = vld [vmem:[#allocation2 + $0x54] sm:$0xf] }
  0xa7   : > { %10778 = vmatmul.mubr.msk.bf16.gmra.mxu1 %vm991_vm3, %v9619_v35  ;;  %10790 = vmatmul.mubr.msk.bf16.gmra.mxu0 %vm991_vm3, %v9629_v14  ;;  %v493_v32 = vpop.permute.xlu1 %492  ;;  %v519_v42 = vsel %vm334_vm6, %v511_v16, %v495_v26  ;;  %v9643_v19 = vcombine.low %v1580_v15, %v12750_v40  ;;  %v12757_v46 = vld [vmem:[#allocation2 + $0x58] sm:$0xf]  ;;  %v581_v36 = vrot.slane %v12488_v49, 7  ;;  %v12778_v44 = vsel %vm1004_vm0, %v12712_v20, 0 }
  0xa8   : > { %10797 = vmatprep.mubr.msk.bf16.mxu1 %vm991_vm3, %v12675_v41  ;;  %v518_v39 = vsel %vm334_vm6, %v510_v10, %v493_v32  ;;  %557 = vst.msk [vmem:[#allocation2 + $0x64] sm:$0xf] %vm172_vm1, %v10249_v31  ;;  %558 = vst.msk [vmem:[#allocation2 + $0x68] sm:$0xf] %vm172_vm1, %v10250_v12  ;;  %v10252_v45 = vpack.c.bf16 %v519_v42, %v519_v42  ;;  %v594_v41 = vsel %vm235_vm4, 0.0, %v578_v17  ;;  %v12783_v43 = vld [vmem:[%s15452_s1 + $0x54] sm:$0xff]  }
  0xa9   : > { %v10251_v33 = vpack.c.bf16 %v518_v39, %v518_v39  ;;  %10809 = vmatprep.mubr.msk.bf16.mxu0 %vm991_vm3, %v9643_v19  ;;  %v12764_v52 = vpop.permute.xlu0 %11761  ;;  %v583_v1 = vrot.slane %v12517_v0, 7  ;;  %v12790_v49 = vsel %vm1004_vm0, %v12717_v47, 0  ;;  %v584_v5 = vrot.slane %v12507_v59, 7  ;;  %v1268_v12 = vld [vmem:[#allocation2 + $0x4c] sm:$0xf] }
  0xaa   : > { %560 = vst.msk [vmem:[#allocation2 + $0x70] sm:$0xf] %vm172_vm1, %v10252_v45  ;;  %v11763_v25 = vunpack.i.l.bf16 %v12764_v52  ;;  %15459 = vst [vmem:[#allocation4_spill] sm:$0xff] %v12790_v49  ;;  %v597_v31 = vsel %vm235_vm4, 0.0, %v581_v36  ;;  %v11764_v26 = vunpack.i.h.bf16 %v12764_v52  ;;  %v9653_v52 = vcombine.low %v12750_v40, %v12757_v46  ;;  %v12852_v40 = vld [vmem:[%s15452_s1 + $0x8] ss:$0 sps:$4 sm:$0xff]  }
  0xab   : > { %559 = vst.msk [vmem:[#allocation2 + $0x6c] sm:$0xf] %vm172_vm1, %v10251_v33  ;;  %v11757_v50 = vpop.permute.xlu1 %11756  ;;  %v599_v45 = vsel %vm235_vm4, 0.0, %v583_v1  ;;  %v9636_v36 = vcombine.low %v12728_v11, %v1268_v12 }
  0xac   : > { %v12766_v51 = vld [vmem:[#allocation2 + $0x5c] sm:$0xf]  ;;  %v11759_v53 = vunpack.i.h.bf16 %v11757_v50  ;;  %v11758_v9 = vunpack.i.l.bf16 %v11757_v50  ;;  %v12786_v6 = vld [vmem:[#allocation2 + $0x60] sm:$0xf]  ;;  %v684_v10 = vsel %vm325_vm5, %v596_v24, %v11763_v25  ;;  %v585_v24 = vrot.slane %v12544_v27, 7 }
  0xad   : > { %v12774_v63 = vcombine.low %v12757_v46, %v12766_v51  ;;  %v663_v18 = vpop.permute.xlu0 %662  ;;  %v685_v27 = vsel %vm325_vm5, %v597_v31, %v11764_v26 }
  0xae   : > { %v683_v0 = vsel %vm325_vm5, %v595_v48, %v11759_v53  ;;  %v682_v14 = vsel %vm325_vm5, %v594_v41, %v11758_v9  ;;  %v692_v22 = vsel %vm334_vm6, %v684_v10, %v663_v18  ;;  %v600_v48 = vsel %vm235_vm4, 0.0, %v584_v5 }
  0xaf   : > { %10798 = vmatmul.mubr.msk.bf16.vlgmr.msra.gmra.mxu1 %vm991_vm3, %v12705_v23  ;;  %10810 = vmatmul.mubr.msk.bf16.vlgmr.msra.gmra.mxu0 %vm991_vm3, %v12774_v63  ;;  %v11767_v21 = vpop.permute.xlu1 %11766  ;;  %v12807_v15 = vld [vmem:[#allocation2 + $0x64] sm:$0xf]  ;;  %v12809_v59 = vld [vmem:[#allocation2 + $0x68] sm:$0xf]  ;;  %v10255_v34 = vpack.c.bf16 %v692_v22, %v692_v22  ;;  %v601_v22 = vsel %vm235_vm4, 0.0, %v585_v24 }
  0xb0   : > { %10818 = vmatpush3.bf16.msra.mxu1 %v12778_v44  ;;  %10801 = vmatprep.mubr.msk.bf16.mxu1 %vm991_vm3, %v9619_v35  ;;  %v11769_v23 = vunpack.i.h.bf16 %v11767_v21  ;;  %v11768_v16 = vunpack.i.l.bf16 %v11767_v21  ;;  %v12814_v17 = vcombine.low %v12786_v6, %v12807_v15  ;;  %v598_v35 = vsel %vm235_vm4, 0.0, %v582_v13  ;;  %v12844_v13 = vld [vmem:[%s15452_s1 + $0x14] ss:$0 sps:$4 sm:$0xff]  }
  0xb1   : > { %10819 = vmatprep.subr.bf16.mxu1 %v12783_v43  ;;  %10830 = vmatpush3.bf16.msra.mxu0 %v12790_v49  ;;  %v639_v50 = vpop.permute.xlu0 %638  ;;  %733 = vst.msk [vmem:[#allocation2 + $0x84] sm:$0xf] %vm172_vm1, %v10255_v34 }
  0xb2   : > { %v12820_v32 = vld [vmem:[#allocation2 + $0x6c] sm:$0xf]  ;;  %10831 = vmatprep.subr.bf16.mxu0 %v12795_v58  ;;  %v690_v39 = vsel %vm334_vm6, %v682_v14, %v11768_v16  ;;  %v691_v42 = vsel %vm334_vm6, %v683_v0, %v11769_v23  ;;  %10813 = vmatprep.mubr.msk.bf16.mxu0 %vm991_vm3, %v12814_v17  ;;  %v688_v1 = vsel %vm325_vm5, %v600_v48, %v639_v50  ;;  %v757_v23 = vrot.slane %v12554_v30, 7 }
  0xb3   : > { %v12830_v33 = vcombine.low %v12809_v59, %v12820_v32  ;;  %v10253_v19 = vpack.c.bf16 %v690_v39, %v690_v39  ;;  %v11772_v41 = vpop.permute.xlu1 %11771  ;;  %v10254_v53 = vpack.c.bf16 %v691_v42, %v691_v42  ;;  %v756_v16 = vrot.slane %v12551_v28, 7 }
  0xb4   : > { %10820 = vmatpush3.bf16.msra.mxu1 %v12783_v43  ;;  %v11774_v9 = vunpack.i.h.bf16 %v11772_v41  ;;  %v11773_v25 = vunpack.i.l.bf16 %v11772_v41  ;;  %v758_v30 = vrot.slane %v12560_v37, 7  ;;  %v9655_v28 = vcombine.low %v12807_v15, %v12809_v59 }
  0xb5   : > { %10832 = vmatpush3.bf16.msra.mxu0 %v12795_v58  ;;  %11606 = vmatprep.subr.msk.bf16.mxu1 %vm1004_vm0, %v12844_v13  ;;  %731 = vst.msk [vmem:[#allocation2 + $0x7c] sm:$0xf] %vm172_vm1, %v10253_v19  ;;  %732 = vst.msk [vmem:[#allocation2 + $0x80] sm:$0xf] %vm172_vm1, %v10254_v53  ;;  %v11782_v0 = vpop.permute.xlu0 %11781  ;;  %v9654_v48 = vcombine.low %v12766_v51, %v12786_v6  ;;  %v759_v37 = vrot.slane %v12563_v38, 7  ;;  %v772_v51 = vsel %vm235_vm4, 0.0, %v756_v16 }
  0xb6   : > { %11607 = vmatprep.subr.msk.bf16.mxu0 %vm1004_vm0, %v12852_v40  ;;  %v687_v11 = vsel %vm325_vm5, %v599_v45, %v11774_v9  ;;  %v686_v46 = vsel %vm325_vm5, %v598_v35, %v11773_v25  ;;  %v11784_v18 = vunpack.i.h.bf16 %v11782_v0  ;;  %v11783_v10 = vunpack.i.l.bf16 %v11782_v0  ;;  %v1962_v53 = vld [vmem:[#allocation2 + $0x2c] sm:$0xf]  ;;  %v1961_v9 = vld [vmem:[#allocation2 + $0x28] sm:$0xf] }
  0xb7   : > { %10802 = vmatmul.mubr.msk.bf16.gmra.mxu1 %vm991_vm3, %v9636_v36  ;;  %10814 = vmatmul.mubr.msk.bf16.gmra.mxu0 %vm991_vm3, %v12830_v33  ;;  %v11777_v5 = vpop.permute.xlu1 %11776  ;;  %v773_v6 = vsel %vm235_vm4, 0.0, %v757_v23  ;;  %v774_v24 = vsel %vm235_vm4, 0.0, %v758_v30  ;;  %v775_v0 = vsel %vm235_vm4, 0.0, %v759_v37 }
  0xb8   : > { %10821 = vmatprep.mubr.msk.bf16.mxu1 %vm991_vm3, %v9653_v52  ;;  %10833 = vmatprep.mubr.msk.bf16.mxu0 %vm991_vm3, %v12774_v63  ;;  %v11779_v14 = vunpack.i.h.bf16 %v11777_v5  ;;  %v11778_v21 = vunpack.i.l.bf16 %v11777_v5  ;;  %v696_v12 = vsel %vm334_vm6, %v688_v1, %v11784_v18  ;;  %v695_v26 = vsel %vm334_vm6, %v687_v11, %v11783_v10  ;;  %v1588_v1 = vld [vmem:[#allocation2 + $0x70] sm:$0xf]  ;;  %v1589_v5 = vld [vmem:[#allocation2 + $0x74] sm:$0xf] }
  0xb9   : > { %v10259_v42 = vpack.c.bf16 %v696_v12, %v696_v12  ;;  %v10258_v34 = vpack.c.bf16 %v695_v26, %v695_v26  ;;  %v673_v45 = vpop.permute.xlu0 %672  ;;  %v9656_v12 = vcombine.low %v12820_v32, %v1588_v1  ;;  %v9663_v26 = vcombine.low %v1588_v1, %v1589_v5 }
  0xba   : > { %v693_v31 = vsel %vm334_vm6, %v685_v27, %v11778_v21  ;;  %v694_v35 = vsel %vm334_vm6, %v686_v46, %v11779_v14  ;;  %v12901_v27 = vld [vmem:[%s15452_s1 + $0xc] sm:$0xff]   ;;  %v760_v46 = vrot.slane %v12584_v57, 7  ;;  %v9678_v14 = vcombine.low %v1961_v9, %v1962_v53  ;;  %v1965_v9 = vld [vmem:[#allocation2 + $0x38] sm:$0xf] }
  0xbb   : > { %v10256_v39 = vpack.c.bf16 %v693_v31, %v693_v31  ;;  %v10257_v63 = vpack.c.bf16 %v694_v35, %v694_v35  ;;  %v641_v19 = vpop.permute.xlu1 %640  ;;  %737 = vst.msk [vmem:[#allocation2 + $0x94] sm:$0xf] %vm172_vm1, %v10259_v42  ;;  %736 = vst.msk [vmem:[#allocation2 + $0x90] sm:$0xf] %vm172_vm1, %v10258_v34  ;;  %v762_v42 = vrot.slane %v12592_v3, 7 }
  0xbc   : > { %v689_v41 = vsel %vm325_vm5, %v601_v22, %v641_v19 }
  0xbd   : > { %734 = vst.msk [vmem:[#allocation2 + $0x88] sm:$0xf] %vm172_vm1, %v10256_v39  ;;  %735 = vst.msk [vmem:[#allocation2 + $0x8c] sm:$0xf] %vm172_vm1, %v10257_v63  ;;  %v697_v50 = vsel %vm334_vm6, %v689_v41, %v673_v45  ;;  %v11792_v59 = vpop.permute.xlu0 %11791  ;;  %v12923_v39 = vld [vmem:[%s15452_s1 + $0x20] ss:$0 sps:$4 sm:$0xff]  }
  0xbe   : > { %v10260_v52 = vpack.c.bf16 %v697_v50, %v697_v50  ;;  %v11793_v36 = vunpack.i.l.bf16 %v11792_v59  ;;  %v11794_v11 = vunpack.i.h.bf16 %v11792_v59  ;;  %v763_v45 = vrot.slane %v12595_v4, 7  ;;  %v12944_v4 = vld [vmem:[%s15452_s1 + $0x2c] ss:$0 sps:$4 sm:$0xff]  }
  0xbf   : > { %10822 = vmatmul.mubr.msk.bf16.vlgmr.msra.gmra.mxu1 %vm991_vm3, %v9654_v48  ;;  %10834 = vmatmul.mubr.msk.bf16.vlgmr.msra.gmra.mxu0 %vm991_vm3, %v12814_v17  ;;  %v11787_v15 = vpop.permute.xlu1 %11786  ;;  %v761_v17 = vrot.slane %v12587_v62, 7  ;;  %v12907_v62 = vld [vmem:[#allocation2 + $0x30] sm:$0xf]  ;;  %v778_v59 = vsel %vm235_vm4, 0.0, %v762_v42 }
  0xc0   : > { %10842 = vmatpush3.bf16.msra.mxu1 %v12271_v2  ;;  %10825 = vmatprep.mubr.msk.bf16.mxu1 %vm991_vm3, %v9655_v28  ;;  %738 = vst.msk [vmem:[#allocation2 + $0x98] sm:$0xf] %vm172_vm1, %v10260_v52  ;;  %v11789_v38 = vunpack.i.h.bf16 %v11787_v15  ;;  %v11788_v25 = vunpack.i.l.bf16 %v11787_v15  ;;  %v862_v18 = vsel %vm325_vm5, %v774_v24, %v11793_v36  ;;  %v863_v63 = vsel %vm325_vm5, %v775_v0, %v11794_v11  ;;  %v1967_v11 = vld [vmem:[#allocation2 + $0x40] sm:$0xf] }
  0xc1   : > { %10837 = vmatprep.mubr.msk.bf16.mxu0 %vm991_vm3, %v12830_v33  ;;  %10843 = vmatprep.subr.bf16.mxu1 %v12901_v27  ;;  %v12912_v33 = vld [vmem:[%s15452_s1] sm:$0xff]   ;;  %v11802_v23 = vpop.permute.xlu0 %11801  ;;  %v9670_v34 = vcombine.low %v1962_v53, %v12907_v62  ;;  %v777_v37 = vsel %vm235_vm4, 0.0, %v761_v17  ;;  %v776_v15 = vsel %vm235_vm4, 0.0, %v760_v46  ;;  %v1964_v53 = vld [vmem:[#allocation2 + $0x34] sm:$0xf]  ;;  %v779_v36 = vsel %vm235_vm4, 0.0, %v763_v45 }
  0xc2   : > { %10854 = vmatpush3.bf16.msra.mxu0 %v12323_v7  ;;  %v861_v21 = vsel %vm325_vm5, %v773_v6, %v11789_v38  ;;  %v860_v57 = vsel %vm325_vm5, %v772_v51, %v11788_v25  ;;  %v11804_v31 = vunpack.i.h.bf16 %v11802_v23  ;;  %v11803_v35 = vunpack.i.l.bf16 %v11802_v23  ;;  %v1966_v17 = vld [vmem:[#allocation2 + $0x3c] sm:$0xf]  ;;  %v1968_v45 = vld [vmem:[#allocation2 + $0x44] sm:$0xf] }
  0xc3   : > { %10855 = vmatprep.subr.bf16.mxu0 %v12912_v33  ;;  %v11797_v10 = vpop.permute.xlu1 %11796 }
  0xc4   : > { %10844 = vmatpush3.bf16.msra.mxu1 %v12901_v27  ;;  %v11799_v16 = vunpack.i.h.bf16 %v11797_v10  ;;  %v11798_v22 = vunpack.i.l.bf16 %v11797_v10  ;;  %v870_v41 = vsel %vm334_vm6, %v862_v18, %v11803_v35  ;;  %v871_v50 = vsel %vm334_vm6, %v863_v63, %v11804_v31 }
  0xc5   : > { %11608 = vmatprep.subr.msk.bf16.mxu1 %vm1004_vm0, %v12923_v39  ;;  %v11812_v3 = vpop.permute.xlu0 %11811  ;;  %v10263_v51 = vpack.c.bf16 %v870_v41, %v870_v41  ;;  %v10264_v6 = vpack.c.bf16 %v871_v50, %v871_v50  ;;  %v9671_v18 = vcombine.low %v1964_v53, %v1965_v9  ;;  %v9679_v10 = vcombine.low %v12907_v62, %v1964_v53  ;;  %v2231_v41 = vld [vmem:[#allocation2 + $0x54] sm:$0xf]  ;;  %v2235_v53 = vld [vmem:[#allocation2 + $0x64] sm:$0xf] }
  0xc6   : > { %10856 = vmatpush3.bf16.msra.mxu0 %v12912_v33  ;;  %v868_v19 = vsel %vm334_vm6, %v860_v57, %v11798_v22  ;;  %v869_v32 = vsel %vm334_vm6, %v861_v21, %v11799_v16  ;;  %v11814_v25 = vunpack.i.h.bf16 %v11812_v3  ;;  %v11813_v24 = vunpack.i.l.bf16 %v11812_v3 }
  0xc7   : > { %10826 = vmatmul.mubr.msk.bf16.gmra.mxu1 %vm991_vm3, %v9656_v12  ;;  %10838 = vmatmul.mubr.msk.bf16.gmra.mxu0 %vm991_vm3, %v9663_v26  ;;  %v10261_v30 = vpack.c.bf16 %v868_v19, %v868_v19  ;;  %v10262_v28 = vpack.c.bf16 %v869_v32, %v869_v32  ;;  %v11807_v48 = vpop.permute.xlu1 %11806  ;;  %911 = vst.msk [vmem:[#allocation2 + $0xac] sm:$0xf] %vm172_vm1, %v10263_v51  ;;  %912 = vst.msk [vmem:[#allocation2 + $0xb0] sm:$0xf] %vm172_vm1, %v10264_v6  ;;  %v12973_v19 = vld [vmem:[%s15452_s1 + $0x18] sm:$0xff]  }
  0xc8   : > { %10845 = vmatprep.mubr.msk.bf16.mxu1 %vm991_vm3, %v9670_v34  ;;  %10857 = vmatprep.mubr.msk.bf16.mxu0 %vm991_vm3, %v9678_v14  ;;  %v11809_v52 = vunpack.i.h.bf16 %v11807_v48  ;;  %v11808_v38 = vunpack.i.l.bf16 %v11807_v48  ;;  %v866_v57 = vsel %vm325_vm5, %v778_v59, %v11813_v24  ;;  %v867_v16 = vsel %vm325_vm5, %v779_v36, %v11814_v25  ;;  %v12982_v48 = vld [vmem:[%s15452_s1 + $0x24] sm:$0xff]   ;;  %v2232_v6 = vld [vmem:[#allocation2 + $0x58] sm:$0xf]  ;;  %v2234_v59 = vld [vmem:[#allocation2 + $0x60] sm:$0xf] }
  0xc9   : > { %11609 = vmatprep.subr.msk.bf16.mxu0 %vm1004_vm0, %v12944_v4  ;;  %909 = vst.msk [vmem:[#allocation2 + $0xa4] sm:$0xf] %vm172_vm1, %v10261_v30  ;;  %910 = vst.msk [vmem:[#allocation2 + $0xa8] sm:$0xf] %vm172_vm1, %v10262_v28  ;;  %v849_v0 = vpop.permute.xlu0 %848  ;;  %v9672_v22 = vcombine.low %v1966_v17, %v1967_v11  ;;  %v9680_v26 = vcombine.low %v1965_v9, %v1966_v17  ;;  %v1969_v30 = vld [vmem:[#allocation2 + $0x48] sm:$0xf]  ;;  %v9681_v50 = vcombine.low %v1967_v11, %v1968_v45 }
  0xca   : > { %v865_v1 = vsel %vm325_vm5, %v777_v37, %v11809_v52  ;;  %v864_v46 = vsel %vm325_vm5, %v776_v15, %v11808_v38  ;;  %v874_v23 = vsel %vm334_vm6, %v866_v57, %v849_v0  ;;  %v2230_v28 = vld [vmem:[#allocation2 + $0x50] sm:$0xf]  ;;  %v9673_v3 = vcombine.low %v1968_v45, %v1969_v30  ;;  %v12990_v37 = vld [vmem:[%s15452_s1 + $0x38] ss:$0 sps:$4 sm:$0xff]   ;;  %v13002_v51 = vld [vmem:[%s15452_s1 + $0x44] ss:$0 sps:$4 sm:$0xff]  }
  0xcb   : > { %v11817_v5 = vpop.permute.xlu1 %11816  ;;  %v10267_v12 = vpack.c.bf16 %v874_v23, %v874_v23  ;;  %v9691_v52 = vcombine.low %v2230_v28, %v2231_v41  ;;  %v2233_v15 = vld [vmem:[#allocation2 + $0x5c] sm:$0xf]  ;;  %v9693_v38 = vcombine.low %v2234_v59, %v2235_v53  ;;  %v13014_v25 = vld [vmem:[%s15452_s1 + $0x30] sm:$0xff]   ;;  %v1970_v24 = vld [vmem:[#allocation2 + $0x4c] sm:$0xf]  ;;  %v9699_v0 = vcombine.low %v2231_v41, %v2232_v6 }
  0xcc   : > { %v11819_v14 = vunpack.i.h.bf16 %v11817_v5  ;;  %v11818_v21 = vunpack.i.l.bf16 %v11817_v5  ;;  %v9692_v9 = vcombine.low %v2232_v6, %v2233_v15  ;;  %v2236_v36 = vld [vmem:[#allocation2 + $0x68] sm:$0xf]  ;;  %v2237_v17 = vld [vmem:[#allocation2 + $0x6c] sm:$0xf]  ;;  %v9686_v11 = vcombine.low %v1969_v30, %v1970_v24  ;;  %v13023_v5 = vld [vmem:[%s15452_s1 + $0x50] ss:$0 sps:$4 sm:$0xff]  }
  0xcd   : > { %915 = vst.msk [vmem:[#allocation2 + $0xbc] sm:$0xf] %vm172_vm1, %v10267_v12  ;;  %v2516_v57 = vld [vmem:[#allocation2 + $0x7c] sm:$0xf]  ;;  %v2239_v23 = vld [vmem:[#allocation2 + $0x74] sm:$0xf] }
  0xce   : > { %v872_v31 = vsel %vm334_vm6, %v864_v46, %v11818_v21  ;;  %v873_v35 = vsel %vm334_vm6, %v865_v1, %v11819_v14  ;;  %v9694_v1 = vcombine.low %v2236_v36, %v2237_v17  ;;  %v9700_v46 = vcombine.low %v2233_v15, %v2234_v59  ;;  %v2515_v21 = vld [vmem:[#allocation2 + $0x78] sm:$0xf]  ;;  %v2518_v12 = vld [vmem:[#allocation2 + $0x84] sm:$0xf]  ;;  %v2522_v30 = vld [vmem:[#allocation2 + $0x94] sm:$0xf] }
  0xcf   : > { %10846 = vmatmul.mubr.msk.bf16.vlgmr.msra.gmra.mxu1 %vm991_vm3, %v9671_v18  ;;  %10858 = vmatmul.mubr.msk.bf16.vlgmr.msra.gmra.mxu0 %vm991_vm3, %v9679_v10  ;;  %v10265_v63 = vpack.c.bf16 %v872_v31, %v872_v31  ;;  %v10266_v42 = vpack.c.bf16 %v873_v35, %v873_v35  ;;  %v851_v34 = vpop.permute.xlu1 %850  ;;  %v9701_v14 = vcombine.low %v2235_v53, %v2236_v36  ;;  %v2517_v18 = vld [vmem:[#allocation2 + $0x80] sm:$0xf]  ;;  %v2523_v28 = vld [vmem:[#allocation2 + $0x98] sm:$0xf]  ;;  %v2862_v41 = vld [vmem:[#allocation2 + $0x54] sm:$0xf] }
  0xd0   : > { %10866 = vmatpush3.bf16.msra.mxu1 %v12416_v60  ;;  %10849 = vmatprep.mubr.msk.bf16.mxu1 %vm991_vm3, %v9672_v22  ;;  %v875_v62 = vsel %vm334_vm6, %v867_v16, %v851_v34  ;;  %v9712_v16 = vcombine.low %v2515_v21, %v2516_v57  ;;  %v9720_v22 = vcombine.low %v2516_v57, %v2517_v18  ;;  %v2864_v15 = vld [vmem:[#allocation2 + $0x5c] sm:$0xf]  ;;  %v2865_v59 = vld [vmem:[#allocation2 + $0x60] sm:$0xf]  ;;  %v2867_v53 = vld [vmem:[#allocation2 + $0x68] sm:$0xf] }
  0xd1   : > { %10861 = vmatprep.mubr.msk.bf16.mxu0 %vm991_vm3, %v9680_v26  ;;  %10867 = vmatprep.subr.bf16.mxu1 %v12973_v19  ;;  %913 = vst.msk [vmem:[#allocation2 + $0xb4] sm:$0xf] %vm172_vm1, %v10265_v63  ;;  %914 = vst.msk [vmem:[#allocation2 + $0xb8] sm:$0xf] %vm172_vm1, %v10266_v42  ;;  %v10268_v32 = vpack.c.bf16 %v875_v62, %v875_v62  ;;  %v2521_v63 = vld [vmem:[#allocation2 + $0x90] sm:$0xf]  ;;  %v9713_v34 = vcombine.low %v2517_v18, %v2518_v12 }
  0xd2   : > { %10878 = vmatpush3.bf16.msra.mxu0 %v12449_v29  ;;  %v2520_v42 = vld [vmem:[#allocation2 + $0x8c] sm:$0xf]  ;;  %v2524_v36 = vld [vmem:[#allocation2 + $0x9c] sm:$0xf] }
  0xd3   : > { %10879 = vmatprep.subr.bf16.mxu0 %v12982_v48  ;;  %916 = vst.msk [vmem:[#allocation2 + $0xc0] sm:$0xf] %vm172_vm1, %v10268_v32  ;;  %v9722_v32 = vcombine.low %v2520_v42, %v2521_v63 }
  0xd4   : > { %10868 = vmatpush3.bf16.msra.mxu1 %v12973_v19 }
  0xd5   : > { %11610 = vmatprep.subr.msk.bf16.mxu1 %vm1004_vm0, %v12990_v37 }
  0xd6   : > { %10880 = vmatpush3.bf16.msra.mxu0 %v12982_v48 }
  0xd7   : > { %10850 = vmatmul.mubr.msk.bf16.gmra.mxu1 %vm991_vm3, %v9673_v3  ;;  %10862 = vmatmul.mubr.msk.bf16.gmra.mxu0 %vm991_vm3, %v9681_v50  ;;  %v2863_v3 = vld [vmem:[#allocation2 + $0x58] sm:$0xf] }
  0xd8   : > { %10869 = vmatprep.mubr.msk.bf16.mxu1 %vm991_vm3, %v9679_v10  ;;  %10881 = vmatprep.mubr.msk.bf16.mxu0 %vm991_vm3, %v9691_v52  ;;  %v2238_v10 = vld [vmem:[#allocation2 + $0x70] sm:$0xf]  ;;  %v9723_v52 = vcombine.low %v2522_v30, %v2523_v28  ;;  %v9733_v6 = vcombine.low %v2862_v41, %v2863_v3  ;;  %v9742_v21 = vcombine.low %v2863_v3, %v2864_v15 }
  0xd9   : > { %11611 = vmatprep.subr.msk.bf16.mxu0 %vm1004_vm0, %v13002_v51  ;;  %v9702_v31 = vcombine.low %v2237_v17, %v2238_v10  ;;  %v9707_v35 = vcombine.low %v2238_v10, %v2239_v23  ;;  %v2869_v17 = vld [vmem:[#allocation2 + $0x70] sm:$0xf]  ;;  %v2870_v23 = vld [vmem:[#allocation2 + $0x74] sm:$0xf] }
  0xdf   : > { %10870 = vmatmul.mubr.msk.bf16.vlgmr.msra.gmra.mxu1 %vm991_vm3, %v9680_v26  ;;  %10882 = vmatmul.mubr.msk.bf16.vlgmr.msra.gmra.mxu0 %vm991_vm3, %v9692_v9  ;;  %v2519_v26 = vld [vmem:[#allocation2 + $0x88] sm:$0xf] }
  0xe0   : > { %10890 = vmatpush3.bf16.msra.mxu1 %v12511_v61  ;;  %10873 = vmatprep.mubr.msk.bf16.mxu1 %vm991_vm3, %v9681_v50  ;;  %v9721_v62 = vcombine.low %v2518_v12, %v2519_v26  ;;  %v9714_v45 = vcombine.low %v2519_v26, %v2520_v42  ;;  %v9715_v50 = vcombine.low %v2521_v63, %v2522_v30 }
  0xe1   : > { %10885 = vmatprep.mubr.msk.bf16.mxu0 %vm991_vm3, %v9693_v38  ;;  %10891 = vmatprep.subr.bf16.mxu1 %v13014_v25 }
  0xe2   : > { %10902 = vmatpush3.bf16.msra.mxu0 %v12667_v8  ;;  %v13094_v10 = vpop.f32.mrf.mxu0 }
  0xe3   : > { %10903 = vmatprep.subr.bf16.mxu0 %v12681_v56 }
  0xe4   : > { %10892 = vmatpush3.bf16.msra.mxu1 %v13014_v25  ;;  %v13101_v12 = vpop.f32.mrf.mxu0 }
  0xe5   : > { %11612 = vmatprep.subr.msk.bf16.mxu1 %vm1004_vm0, %v13023_v5 }
  0xe6   : > { %10904 = vmatpush3.bf16.msra.mxu0 %v12681_v56  ;;  %v13110_v42 = vpop.f32.mrf.mxu0 }
  0xe7   : > { %10874 = vmatmul.mubr.msk.bf16.gmra.mxu1 %vm991_vm3, %v9686_v11  ;;  %10886 = vmatmul.mubr.msk.bf16.gmra.mxu0 %vm991_vm3, %v9694_v1  ;;  %v2861_v11 = vld [vmem:[#allocation2 + $0x50] sm:$0xf] }
  0xe8   : > { %10893 = vmatprep.mubr.msk.bf16.mxu1 %vm991_vm3, %v9699_v0  ;;  %10905 = vmatprep.mubr.msk.bf16.mxu0 %vm991_vm3, %v9692_v9  ;;  %v9734_v9 = vcombine.low %v2864_v15, %v2865_v59  ;;  %v9728_v0 = vcombine.low %v2523_v28, %v2524_v36 }
  0xe9   : > { %11613 = vmatprep.subr.msk.bf16.mxu0 %vm1004_vm0, %v12712_v20 }
  0xef   : > { %10894 = vmatmul.mubr.msk.bf16.vlgmr.msra.gmra.mxu1 %vm991_vm3, %v9700_v46  ;;  %10906 = vmatmul.mubr.msk.bf16.vlgmr.msra.gmra.mxu0 %vm991_vm3, %v9693_v38  ;;  %v2866_v38 = vld [vmem:[#allocation2 + $0x64] sm:$0xf] }
  0xf0   : > { %10914 = vmatpush3.bf16.msra.mxu1 %v12685_v54  ;;  %10897 = vmatprep.mubr.msk.bf16.mxu1 %vm991_vm3, %v9701_v14  ;;  %v9735_v24 = vcombine.low %v2866_v38, %v2867_v53  ;;  %v9741_v14 = vcombine.low %v2861_v11, %v2862_v41  ;;  %v9743_v57 = vcombine.low %v2865_v59, %v2866_v38  ;;  %v13112_v41 = vpop.f32.mrf.mxu0  ;;  %v3137_v59 = vld [vmem:[#allocation2 + $0x94] sm:$0xf] }
  0xf1   : > { %10909 = vmatprep.mubr.msk.bf16.mxu0 %vm991_vm3, %v9694_v1  ;;  %10915 = vmatprep.subr.bf16.mxu1 %v12690_v55  ;;  %v2868_v1 = vld [vmem:[#allocation2 + $0x6c] sm:$0xf] }
  0xf2   : > { %10926 = vmatpush3.bf16.msra.mxu0 %v12778_v44  ;;  %v9736_v46 = vcombine.low %v2868_v1, %v2869_v17  ;;  %v9744_v18 = vcombine.low %v2867_v53, %v2868_v1  ;;  %v13120_v15 = vpop.f32.mrf.mxu0  ;;  %v3138_v53 = vld [vmem:[#allocation2 + $0x98] sm:$0xf]  ;;  %v3420_v1 = vld [vmem:[#allocation2 + $0xb4] sm:$0xf] }
  0xf3   : > { %10927 = vmatprep.subr.bf16.mxu0 %v12783_v43 }
  0xf4   : > { %10916 = vmatpush3.bf16.msra.mxu1 %v12690_v55  ;;  %v13127_v36 = vpop.f32.mrf.mxu0 }
  0xf5   : > { %11614 = vmatprep.subr.msk.bf16.mxu1 %vm1004_vm0, %v12717_v47 }
  0xf6   : > { %10928 = vmatpush3.bf16.msra.mxu0 %v12783_v43  ;;  %v13134_v11 = vpop.f32.mrf.mxu0 }
  0xf7   : > { %10898 = vmatmul.mubr.msk.bf16.gmra.mxu1 %vm991_vm3, %v9702_v31  ;;  %10910 = vmatmul.mubr.msk.bf16.gmra.mxu0 %vm991_vm3, %v9707_v35  ;;  %v3132_v31 = vld [vmem:[#allocation2 + $0x80] sm:$0xf]  ;;  %v9749_v35 = vcombine.low %v2869_v17, %v2870_v23  ;;  %v3417_v17 = vld [vmem:[#allocation2 + $0xa8] sm:$0xf] }
  0xf8   : > { %10917 = vmatprep.mubr.msk.bf16.mxu1 %vm991_vm3, %v9712_v16  ;;  %10929 = vmatprep.mubr.msk.bf16.mxu0 %vm991_vm3, %v9720_v22  ;;  %v3130_v16 = vld [vmem:[#allocation2 + $0x78] sm:$0xf]  ;;  %v3131_v22 = vld [vmem:[#allocation2 + $0x7c] sm:$0xf] }
  0xf9   : > { %11615 = vmatprep.subr.msk.bf16.mxu0 %vm1004_vm0, %v12844_v13  ;;  %v9754_v26 = vcombine.low %v3130_v16, %v3131_v22  ;;  %v9762_v63 = vcombine.low %v3131_v22, %v3132_v31 }
  0xff   : > { %10918 = vmatmul.mubr.msk.bf16.vlgmr.msra.gmra.mxu1 %vm991_vm3, %v9713_v34  ;;  %10930 = vmatmul.mubr.msk.bf16.vlgmr.msra.gmra.mxu0 %vm991_vm3, %v9721_v62  ;;  %v3134_v62 = vld [vmem:[#allocation2 + $0x88] sm:$0xf] }
 0x100   : > { %10938 = vmatpush3.bf16.msra.mxu1 %v12790_v49  ;;  %10921 = vmatprep.mubr.msk.bf16.mxu1 %vm991_vm3, %v9714_v45 }
 0x101   : > { %10933 = vmatprep.mubr.msk.bf16.mxu0 %vm991_vm3, %v9722_v32  ;;  %10939 = vmatprep.subr.bf16.mxu1 %v12795_v58  ;;  %v3135_v32 = vld [vmem:[#allocation2 + $0x8c] sm:$0xf] }
 0x102   : > { %10950 = vmatpush3.bf16.msra.mxu0 %v12271_v2  ;;  %v9756_v3 = vcombine.low %v3134_v62, %v3135_v32 }
 0x103   : > { %10951 = vmatprep.subr.bf16.mxu0 %v12901_v27 }
 0x104   : > { %10940 = vmatpush3.bf16.msra.mxu1 %v12795_v58 }
 0x105   : > { %11616 = vmatprep.subr.msk.bf16.mxu1 %vm1004_vm0, %v12852_v40 }
 0x106   : > { %10952 = vmatpush3.bf16.msra.mxu0 %v12901_v27 }
 0x107   : > { %10922 = vmatmul.mubr.msk.bf16.gmra.mxu1 %vm991_vm3, %v9715_v50  ;;  %10934 = vmatmul.mubr.msk.bf16.gmra.mxu0 %vm991_vm3, %v9723_v52  ;;  %v3415_v52 = vld [vmem:[#allocation2 + $0xa0] sm:$0xf] }
 0x108   : > { %10941 = vmatprep.mubr.msk.bf16.mxu1 %vm991_vm3, %v9713_v34  ;;  %10953 = vmatprep.mubr.msk.bf16.mxu0 %vm991_vm3, %v9733_v6  ;;  %v3133_v34 = vld [vmem:[#allocation2 + $0x84] sm:$0xf] }
 0x109   : > { %11617 = vmatprep.subr.msk.bf16.mxu0 %vm1004_vm0, %v12923_v39  ;;  %v9755_v30 = vcombine.low %v3132_v31, %v3133_v34  ;;  %v9763_v28 = vcombine.low %v3133_v34, %v3134_v62  ;;  %v3416_v6 = vld [vmem:[#allocation2 + $0xa4] sm:$0xf] }
 0x10a   : > { %v9783_v16 = vcombine.low %v3416_v6, %v3417_v17 }
 0x10f   : > { %10942 = vmatmul.mubr.msk.bf16.vlgmr.msra.gmra.mxu1 %vm991_vm3, %v9714_v45  ;;  %10954 = vmatmul.mubr.msk.bf16.vlgmr.msra.gmra.mxu0 %vm991_vm3, %v9734_v9  ;;  %v3136_v45 = vld [vmem:[#allocation2 + $0x90] sm:$0xf]  ;;  %v9775_v9 = vcombine.low %v3415_v52, %v3416_v6 }
 0x110   : > { %10962 = vmatpush3.bf16.msra.mxu1 %v12323_v7  ;;  %10945 = vmatprep.mubr.msk.bf16.mxu1 %vm991_vm3, %v9715_v50  ;;  %v9764_v50 = vcombine.low %v3135_v32, %v3136_v45  ;;  %v9757_v38 = vcombine.low %v3136_v45, %v3137_v59  ;;  %v3424_v45 = vld [vmem:[#allocation2 + $0xc4] sm:$0xf] }
 0x111   : > { %10957 = vmatprep.mubr.msk.bf16.mxu0 %vm991_vm3, %v9735_v24  ;;  %10963 = vmatprep.subr.bf16.mxu1 %v12912_v33  ;;  %v9765_v24 = vcombine.low %v3137_v59, %v3138_v53 }
 0x112   : > { %10974 = vmatpush3.bf16.msra.mxu0 %v12416_v60 }
 0x113   : > { %10975 = vmatprep.subr.bf16.mxu0 %v12973_v19 }
 0x114   : > { %10964 = vmatpush3.bf16.msra.mxu1 %v12912_v33 }
 0x115   : > { %11618 = vmatprep.subr.msk.bf16.mxu1 %vm1004_vm0, %v12944_v4 }
 0x116   : > { %10976 = vmatpush3.bf16.msra.mxu0 %v12973_v19 }
 0x117   : > { %10946 = vmatmul.mubr.msk.bf16.gmra.mxu1 %vm991_vm3, %v9728_v0  ;;  %10958 = vmatmul.mubr.msk.bf16.gmra.mxu0 %vm991_vm3, %v9736_v46 }
 0x118   : > { %10965 = vmatprep.mubr.msk.bf16.mxu1 %vm991_vm3, %v9741_v14  ;;  %10977 = vmatprep.mubr.msk.bf16.mxu0 %vm991_vm3, %v9742_v21  ;;  %v3421_v14 = vld [vmem:[#allocation2 + $0xb8] sm:$0xf] }
 0x119   : > { %11619 = vmatprep.subr.msk.bf16.mxu0 %vm1004_vm0, %v12990_v37 }
 0x11f   : > { %10966 = vmatmul.mubr.msk.bf16.vlgmr.msra.gmra.mxu1 %vm991_vm3, %v9742_v21  ;;  %10978 = vmatmul.mubr.msk.bf16.vlgmr.msra.gmra.mxu0 %vm991_vm3, %v9743_v57  ;;  %v3422_v21 = vld [vmem:[#allocation2 + $0xbc] sm:$0xf] }
 0x120   : > { %10986 = vmatpush3.bf16.msra.mxu1 %v12449_v29  ;;  %10969 = vmatprep.mubr.msk.bf16.mxu1 %vm991_vm3, %v9743_v57  ;;  %v9778_v23 = vcombine.low %v3421_v14, %v3422_v21 }
 0x121   : > { %10981 = vmatprep.mubr.msk.bf16.mxu0 %vm991_vm3, %v9744_v18  ;;  %10987 = vmatprep.subr.bf16.mxu1 %v12982_v48 }
 0x122   : > { %10998 = vmatpush3.bf16.msra.mxu0 %v12511_v61 }
 0x123   : > { %10999 = vmatprep.subr.bf16.mxu0 %v13014_v25 }
 0x124   : > { %10988 = vmatpush3.bf16.msra.mxu1 %v12982_v48 }
 0x125   : > { %11620 = vmatprep.subr.msk.bf16.mxu1 %vm1004_vm0, %v13002_v51 }
 0x126   : > { %11000 = vmatpush3.bf16.msra.mxu0 %v13014_v25 }
 0x127   : > { %10970 = vmatmul.mubr.msk.bf16.gmra.mxu1 %vm991_vm3, %v9744_v18  ;;  %10982 = vmatmul.mubr.msk.bf16.gmra.mxu0 %vm991_vm3, %v9749_v35  ;;  %v3139_v18 = vld [vmem:[#allocation2 + $0x9c] sm:$0xf] }
 0x128   : > { %10989 = vmatprep.mubr.msk.bf16.mxu1 %vm991_vm3, %v9754_v26  ;;  %11001 = vmatprep.mubr.msk.bf16.mxu0 %vm991_vm3, %v9762_v63  ;;  %v9770_v22 = vcombine.low %v3138_v53, %v3139_v18  ;;  %v9785_v63 = vcombine.low %v3420_v1, %v3421_v14  ;;  %v3768_v18 = vld [vmem:[#allocation2 + $0x94] sm:$0xf] }
 0x129   : > { %11621 = vmatprep.subr.msk.bf16.mxu0 %vm1004_vm0, %v13023_v5 }
 0x12f   : > { %10990 = vmatmul.mubr.msk.bf16.vlgmr.msra.gmra.mxu1 %vm991_vm3, %v9755_v30  ;;  %11002 = vmatmul.mubr.msk.bf16.vlgmr.msra.gmra.mxu0 %vm991_vm3, %v9763_v28  ;;  %v3763_v28 = vld [vmem:[#allocation2 + $0x80] sm:$0xf] }
 0x130   : > { %11010 = vmatpush3.bf16.msra.mxu1 %v12667_v8  ;;  %10993 = vmatprep.mubr.msk.bf16.mxu1 %vm991_vm3, %v9756_v3 }
 0x131   : > { %11005 = vmatprep.mubr.msk.bf16.mxu0 %vm991_vm3, %v9764_v50  ;;  %11011 = vmatprep.subr.bf16.mxu1 %v12681_v56 }
 0x132   : > { %11022 = vmatpush3.bf16.msra.mxu0 %v12685_v54 }
 0x133   : > { %11023 = vmatprep.subr.bf16.mxu0 %v12690_v55 }
 0x134   : > { %11012 = vmatpush3.bf16.msra.mxu1 %v12681_v56  ;;  %v3418_v56 = vld [vmem:[#allocation2 + $0xac] sm:$0xf] }
 0x135   : > { %11622 = vmatprep.subr.msk.bf16.mxu1 %vm1004_vm0, %v12712_v20  ;;  %v3419_v20 = vld [vmem:[#allocation2 + $0xb0] sm:$0xf]  ;;  %v9776_v0 = vcombine.low %v3417_v17, %v3418_v56 }
 0x136   : > { %11024 = vmatpush3.bf16.msra.mxu0 %v12690_v55  ;;  %v9777_v46 = vcombine.low %v3419_v20, %v3420_v1  ;;  %v13138_v55 = vpop.f32.mrf.mxu0  ;;  %v9784_v34 = vcombine.low %v3418_v56, %v3419_v20 }
 0x137   : > { %10994 = vmatmul.mubr.msk.bf16.gmra.mxu1 %vm991_vm3, %v9757_v38  ;;  %11006 = vmatmul.mubr.msk.bf16.gmra.mxu0 %vm991_vm3, %v9765_v24  ;;  %v3766_v24 = vld [vmem:[#allocation2 + $0x8c] sm:$0xf] }
 0x138   : > { %11013 = vmatprep.mubr.msk.bf16.mxu1 %vm991_vm3, %v9755_v30  ;;  %11025 = vmatprep.mubr.msk.bf16.mxu0 %vm991_vm3, %v9775_v9  ;;  %v13148_v57 = vpop.f32.mrf.mxu0  ;;  %v3762_v30 = vld [vmem:[#allocation2 + $0x7c] sm:$0xf]  ;;  %v3765_v9 = vld [vmem:[#allocation2 + $0x88] sm:$0xf] }
 0x139   : > { %11623 = vmatprep.subr.msk.bf16.mxu0 %vm1004_vm0, %v12717_v47  ;;  %v13146_v47 = vpop.f32.mrf.mxu1  ;;  %v9796_v59 = vcombine.low %v3762_v30, %v3763_v28 }
 0x13a   : > { %v13155_v35 = vpop.f32.mrf.mxu0 }
 0x13b   : > { %v13153_v31 = vpop.f32.mrf.mxu1 }
 0x13c   : > { %v13166_v26 = vpop.f32.mrf.mxu0 }
 0x13f   : > { %11014 = vmatmul.mubr.msk.bf16.vlgmr.msra.gmra.mxu1 %vm991_vm3, %v9756_v3  ;;  %11026 = vmatmul.mubr.msk.bf16.vlgmr.msra.gmra.mxu0 %vm991_vm3, %v9776_v0  ;;  %v3761_v3 = vld [vmem:[#allocation2 + $0x78] sm:$0xf] }
 0x140   : > { %11034 = vmatpush3.bf16.msra.mxu1 %v12778_v44  ;;  %11017 = vmatprep.mubr.msk.bf16.mxu1 %vm991_vm3, %v9757_v38  ;;  %v9804_v53 = vcombine.low %v3761_v3, %v3762_v30  ;;  %v3767_v38 = vld [vmem:[#allocation2 + $0x90] sm:$0xf] }
 0x141   : > { %11029 = vmatprep.mubr.msk.bf16.mxu0 %vm991_vm3, %v9777_v46  ;;  %11035 = vmatprep.subr.bf16.mxu1 %v12783_v43  ;;  %v9798_v1 = vcombine.low %v3766_v24, %v3767_v38  ;;  %v9807_v30 = vcombine.low %v3767_v38, %v3768_v18 }
 0x142   : > { %11046 = vmatpush3.bf16.msra.mxu0 %v12790_v49 }
 0x143   : > { %11047 = vmatprep.subr.bf16.mxu0 %v12795_v58 }
 0x144   : > { %11036 = vmatpush3.bf16.msra.mxu1 %v12783_v43  ;;  %v13164_v43 = vpop.f32.mrf.mxu1 }
 0x145   : > { %11624 = vmatprep.subr.msk.bf16.mxu1 %vm1004_vm0, %v12844_v13 }
 0x146   : > { %11048 = vmatpush3.bf16.msra.mxu0 %v12795_v58  ;;  %v13170_v13 = vpop.f32.mrf.mxu1  ;;  %v13172_v58 = vpop.f32.mrf.mxu0 }
 0x147   : > { %11018 = vmatmul.mubr.msk.bf16.gmra.mxu1 %vm991_vm3, %v9770_v22  ;;  %11030 = vmatmul.mubr.msk.bf16.gmra.mxu0 %vm991_vm3, %v9778_v23 }
 0x148   : > { %11037 = vmatprep.mubr.msk.bf16.mxu1 %vm991_vm3, %v9783_v16  ;;  %11049 = vmatprep.mubr.msk.bf16.mxu0 %vm991_vm3, %v9776_v0  ;;  %v13178_v62 = vpop.f32.mrf.mxu1  ;;  %v13180_v32 = vpop.f32.mrf.mxu0 }
 0x149   : > { %11625 = vmatprep.subr.msk.bf16.mxu0 %vm1004_vm0, %v12852_v40  ;;  %v3423_v40 = vld [vmem:[#allocation2 + $0xc0] sm:$0xf] }
 0x14a   : > { %v13189_v50 = vpop.f32.mrf.mxu0  ;;  %v9786_v52 = vcombine.low %v3422_v21, %v3423_v40  ;;  %v9791_v6 = vcombine.low %v3423_v40, %v3424_v45 }
 0x14f   : > { %11038 = vmatmul.mubr.msk.bf16.vlgmr.msra.gmra.mxu1 %vm991_vm3, %v9784_v34  ;;  %11050 = vmatmul.mubr.msk.bf16.vlgmr.msra.gmra.mxu0 %vm991_vm3, %v9777_v46 }
 0x150   : > { %11058 = vmatpush3.bf16.msra.mxu1 %v12271_v2  ;;  %11041 = vmatprep.mubr.msk.bf16.mxu1 %vm991_vm3, %v9785_v63  ;;  %v13187_v2 = vpop.f32.mrf.mxu1  ;;  %v13229_v63 = vld [vmem:[#allocation2 + $0xa4] sm:$0xf] }
 0x151   : > { %11053 = vmatprep.mubr.msk.bf16.mxu0 %vm991_vm3, %v9778_v23  ;;  %11059 = vmatprep.subr.bf16.mxu1 %v12901_v27  ;;  %v13222_v23 = vld [vmem:[#allocation2 + $0x98] sm:$0xf] }
 0x152   : > { %11070 = vmatpush3.bf16.msra.mxu0 %v12323_v7  ;;  %v13198_v7 = vpop.f32.mrf.mxu1  ;;  %v9799_v45 = vcombine.low %v3768_v18, %v13222_v23  ;;  %v1138_v18 = vadd.f32 %v13153_v31, %v13101_v12  ;;  %v13295_v12 = vld [vmem:[#allocation2 + $0xbc] sm:$0xf] }
 0x153   : > { %11071 = vmatprep.subr.bf16.mxu0 %v12912_v33 }
 0x154   : > { %11060 = vmatpush3.bf16.msra.mxu1 %v12901_v27  ;;  %v13200_v27 = vpop.f32.mrf.mxu0 }
 0x155   : > { %11626 = vmatprep.subr.msk.bf16.mxu1 %vm1004_vm0, %v12923_v39  ;;  %v3764_v39 = vld [vmem:[#allocation2 + $0x84] sm:$0xf] }
 0x156   : > { %11072 = vmatpush3.bf16.msra.mxu0 %v12912_v33  ;;  %v13204_v33 = vpop.f32.mrf.mxu1  ;;  %v13206_v17 = vpop.f32.mrf.mxu0  ;;  %v9797_v56 = vcombine.low %v3764_v39, %v3765_v9  ;;  %v9805_v20 = vcombine.low %v3763_v28, %v3764_v39  ;;  %v13264_v39 = vld [vmem:[#allocation2 + $0xb4] sm:$0xf] }
 0x157   : > { %11042 = vmatmul.mubr.msk.bf16.gmra.mxu1 %vm991_vm3, %v9786_v52  ;;  %11054 = vmatmul.mubr.msk.bf16.gmra.mxu0 %vm991_vm3, %v9791_v6 }
 0x158   : > { %11061 = vmatprep.mubr.msk.bf16.mxu1 %vm991_vm3, %v9796_v59  ;;  %11073 = vmatprep.mubr.msk.bf16.mxu0 %vm991_vm3, %v9804_v53  ;;  %v13262_v53 = vld [vmem:[#allocation2 + $0xb0] sm:$0xf] }
 0x159   : > { %11627 = vmatprep.subr.msk.bf16.mxu0 %vm1004_vm0, %v12944_v4  ;;  %v9806_v4 = vcombine.low %v3765_v9, %v3766_v24 }
 0x15f   : > { %v13208_v0 = vpop.f32.mrf.mxu1  ;;  %v13210_v46 = vpop.f32.mrf.mxu0  ;;  %11062 = vmatmul.mubr.msk.bf16.vlgmr.msra.gmra.mxu1 %vm991_vm3, %v9797_v56  ;;  %11074 = vmatmul.mubr.msk.bf16.vlgmr.msra.gmra.mxu0 %vm991_vm3, %v9805_v20 }
 0x160   : > { %11082 = vmatpush3.bf16.msra.mxu1 %v12416_v60  ;;  %11065 = vmatprep.mubr.msk.bf16.mxu1 %vm991_vm3, %v9798_v1  ;;  %v4030_v60 = vld [vmem:[#allocation2 + $0xa0] sm:$0xf]  ;;  %v13279_v1 = vcombine.low %v13262_v53, %v13264_v39 }
 0x161   : > { %11077 = vmatprep.mubr.msk.bf16.mxu0 %vm991_vm3, %v9806_v4  ;;  %v13217_v14 = vpop.f32.mrf.mxu1  ;;  %v13219_v21 = vpop.f32.mrf.mxu0  ;;  %11083 = vmatprep.subr.bf16.mxu1 %v12973_v19 }
 0x162   : > { %11094 = vmatpush3.bf16.msra.mxu0 %v12449_v29  ;;  %v9817_v29 = vcombine.low %v4030_v60, %v13229_v63  ;;  %v1149_v60 = vadd.f32 %v13164_v43, %v13110_v42  ;;  %v1141_v42 = vadd.f32 %v13170_v13, %v13112_v41 }
 0x163   : > { %v13225_v16 = vpop.f32.mrf.mxu1  ;;  %v13227_v22 = vpop.f32.mrf.mxu0  ;;  %11095 = vmatprep.subr.bf16.mxu0 %v12982_v48 }
 0x164   : > { %11084 = vmatpush3.bf16.msra.mxu1 %v12973_v19 }
 0x165   : > { %v13233_v34 = vpop.f32.mrf.mxu1  ;;  %v13235_v40 = vpop.f32.mrf.mxu0  ;;  %11628 = vmatprep.subr.msk.bf16.mxu1 %vm1004_vm0, %v12990_v37  ;;  %v13256_v37 = vld [vmem:[#allocation2 + $0xac] sm:$0xf] }
 0x166   : > { %11096 = vmatpush3.bf16.msra.mxu0 %v12982_v48  ;;  %v4032_v48 = vld [vmem:[#allocation2 + $0xa8] sm:$0xf] }
 0x167   : > { %v13242_v28 = vpop.f32.mrf.mxu1  ;;  %v13244_v3 = vpop.f32.mrf.mxu0  ;;  %11066 = vmatmul.mubr.msk.bf16.gmra.mxu1 %vm991_vm3, %v9799_v45  ;;  %11078 = vmatmul.mubr.msk.bf16.gmra.mxu0 %vm991_vm3, %v9807_v30  ;;  %v9818_v24 = vcombine.low %v4032_v48, %v13256_v37  ;;  %v3770_v45 = vld [vmem:[#allocation2 + $0x9c] sm:$0xf] }
 0x168   : > { %11085 = vmatprep.mubr.msk.bf16.mxu1 %vm991_vm3, %v9805_v20  ;;  %11097 = vmatprep.mubr.msk.bf16.mxu0 %vm991_vm3, %v9817_v29  ;;  %v13293_v29 = vld [vmem:[#allocation2 + $0xb8] sm:$0xf] }
 0x169   : > { %v13250_v19 = vpop.f32.mrf.mxu1  ;;  %v13252_v52 = vpop.f32.mrf.mxu0  ;;  %11629 = vmatprep.subr.msk.bf16.mxu0 %vm1004_vm0, %v13002_v51  ;;  %v1146_v51 = vadd.f32 %v13146_v47, %v13094_v10 }
 0x16b   : > { %v13258_v6 = vpop.f32.mrf.mxu1  ;;  %v13260_v59 = vpop.f32.mrf.mxu0 }
 0x16c   : > { %15460 = vst [vmem:[#allocation5_spill] sm:$0xff] %v13260_v59  ;;  %v9820_v59 = vcombine.low %v13293_v29, %v13295_v12 }
 0x16d   : > { %v13266_v9 = vpop.f32.mrf.mxu1  ;;  %v13268_v38 = vpop.f32.mrf.mxu0 }
 0x16e   : > { %15461 = vst [vmem:[#allocation6_spill] sm:$0xff] %v13268_v38  ;;  %v9812_v38 = vcombine.low %v13222_v23, %v3770_v45  ;;  %v12199_v23 = vld [vmem:[%s15452_s1 + $0x5c] ss:$0 sps:$4 sm:$0xff]  }
 0x16f   : > { %v10799_v56 = vpop.f32.mrf.mxu1  ;;  %v13273_v20 = vpop.f32.mrf.mxu0  ;;  %11086 = vmatmul.mubr.msk.bf16.vlgmr.msra.gmra.mxu1 %vm991_vm3, %v9806_v4  ;;  %11098 = vmatmul.mubr.msk.bf16.vlgmr.msra.gmra.mxu0 %vm991_vm3, %v9818_v24  ;;  %v1253_v4 = vadd.f32 %v13148_v57, %v1146_v51  ;;  %v1251_v57 = vadd.f32 %v13155_v35, %v1138_v18  ;;  %v1254_v35 = vadd.f32 %v13166_v26, %v1149_v60 }
 0x170   : > { %11106 = vmatpush3.bf16.msra.mxu1 %v12511_v61  ;;  %11089 = vmatprep.mubr.msk.bf16.mxu1 %vm991_vm3, %v9807_v30  ;;  %v12198_v30 = vld [vmem:[%s15452_s1 + $0x3c] sm:$0xff]  }
 0x171   : > { %11101 = vmatprep.mubr.msk.bf16.mxu0 %vm991_vm3, %v13279_v1  ;;  %v1541_v10 = vpop.f32.mrf.mxu1  ;;  %v13287_v47 = vpop.f32.mrf.mxu0  ;;  %11107 = vmatprep.subr.bf16.mxu1 %v13014_v25  ;;  %v1380_v51 = vadd.f32 %v13208_v0, %v1253_v4  ;;  %v1378_v41 = vadd.f32 %v13217_v14, %v1251_v57 }
 0x172   : > { %11118 = vmatpush3.bf16.msra.mxu0 %v12667_v8  ;;  %v1162_v8 = vadd.f32 %v13178_v62, %v13120_v15  ;;  %v9825_v15 = vcombine.low %v13229_v63, %v4032_v48 }
 0x173   : > { %v10800_v61 = vpop.f32.mrf.mxu1  ;;  %v13298_v31 = vpop.f32.mrf.mxu0  ;;  %11119 = vmatprep.subr.bf16.mxu0 %v12198_v30  ;;  %v1483_v0 = vadd.f32 %v13210_v46, %v1380_v51  ;;  %v1165_v46 = vadd.f32 %v13198_v7, %v13134_v11  ;;  %v1481_v63 = vadd.f32 %v13219_v21, %v1378_v41  ;;  %v4039_v51 = vld [vmem:[#allocation2 + $0xc4] sm:$0xf] }
 0x174   : > { %11108 = vmatpush3.bf16.msra.mxu1 %v13014_v25  ;;  %v1154_v25 = vadd.f32 %v13187_v2, %v13127_v36  ;;  %v1252_v36 = vadd.f32 %v13172_v58, %v1141_v42  ;;  %v1257_v26 = vadd.f32 %v13180_v32, %v1162_v8  ;;  %v1157_v58 = vadd.f32 %v13204_v33, %v13138_v55  ;;  %v12201_v42 = vld [vmem:[%s15452_s1 + $0x54] sm:$0xff]  }
 0x175   : > { %v1544_v43 = vpop.f32.mrf.mxu1  ;;  %v13310_v49 = vpop.f32.mrf.mxu0  ;;  %11630 = vmatprep.subr.msk.bf16.mxu1 %vm1004_vm0, %v13023_v5  ;;  %v1381_v5 = vadd.f32 %v13225_v16, %v1254_v35  ;;  %v1574_v48 = vadd.f32 %v10799_v56, %v1483_v0  ;;  %v1572_v7 = vadd.f32 %v1541_v10, %v1481_v63  ;;  %v1258_v55 = vadd.f32 %v13200_v27, %v1165_v46 }
 0x176   : > { %11120 = vmatpush3.bf16.msra.mxu0 %v12198_v30  ;;  %v1255_v16 = vadd.f32 %v13189_v50, %v1154_v25  ;;  %v1379_v32 = vadd.f32 %v13233_v34, %v1252_v36  ;;  %v9826_v50 = vcombine.low %v13256_v37, %v13262_v53  ;;  %v13387_v25 = vld [vmem:[#allocation2 + $0xd4] sm:$0xf] }
 0x177   : > { %v10803_v13 = vpop.f32.mrf.mxu1  ;;  %v13322_v62 = vpop.f32.mrf.mxu0  ;;  %11090 = vmatmul.mubr.msk.bf16.gmra.mxu1 %vm991_vm3, %v9812_v38  ;;  %11102 = vmatmul.mubr.msk.bf16.gmra.mxu0 %vm991_vm3, %v9820_v59  ;;  %v1384_v38 = vadd.f32 %v13242_v28, %v1257_v26  ;;  %v1484_v4 = vadd.f32 %v13227_v22, %v1381_v5  ;;  %v1701_v33 = vadd.f32 %v13273_v20, %v1574_v48  ;;  %v13399_v48 = vld [vmem:[#allocation2 + $0xdc] sm:$0xf] }
 0x178   : > { %11109 = vmatprep.mubr.msk.bf16.mxu1 %vm991_vm3, %v9825_v15  ;;  %11121 = vmatprep.mubr.msk.bf16.mxu0 %vm991_vm3, %v9818_v24  ;;  %v1382_v11 = vadd.f32 %v13250_v19, %v1255_v16  ;;  %v9827_v28 = vcombine.low %v13264_v39, %v13293_v29  ;;  %v1256_v22 = vadd.f32 %v13206_v17, %v1157_v58  ;;  %v4315_v17 = vld [vmem:[#allocation2 + $0xc8] sm:$0xf]  ;;  %v15462_v15 = vld [vmem:[#allocation5_spill] sm:$0xff] }
 0x179   : > { %v1557_v2 = vpop.f32.mrf.mxu1  ;;  %v13332_v14 = vpop.f32.mrf.mxu0  ;;  %11631 = vmatprep.subr.msk.bf16.mxu0 %vm1004_vm0, %v12199_v23  ;;  %v1575_v34 = vadd.f32 %v10800_v61, %v1484_v4  ;;  %v1482_v19 = vadd.f32 %v13235_v40, %v1379_v32  ;;  %v1487_v10 = vadd.f32 %v13244_v3, %v1384_v38  ;;  %v1699_v53 = vadd.f32 %v13287_v47, %v1572_v7  ;;  %v4316_v40 = vld [vmem:[#allocation2 + $0xcc] sm:$0xf]  ;;  %v4317_v47 = vld [vmem:[#allocation2 + $0xd0] sm:$0xf]  ;;  %v15463_v23 = vld [vmem:[#allocation6_spill] sm:$0xff] }
 0x17a   : > { %v1485_v27 = vadd.f32 %v13252_v52, %v1382_v11  ;;  %v1385_v3 = vadd.f32 %v13258_v6, %v1258_v55  ;;  %v1383_v39 = vadd.f32 %v13266_v9, %v1256_v22  ;;  %v12200_v52 = vld [vmem:[%s15452_s1 + $0x48] sm:$0xff]   ;;  %v4038_v6 = vld [vmem:[#allocation2 + $0xc0] sm:$0xf]  ;;  %v9838_v8 = vcombine.low %v4315_v17, %v4316_v40 }
 0x17b   : > { %v13346_v24 = vpop.f32.mrf.mxu1  ;;  %v13348_v18 = vpop.f32.mrf.mxu0  ;;  %v1573_v45 = vadd.f32 %v1544_v43, %v1482_v19  ;;  %v1578_v61 = vadd.f32 %v10803_v13, %v1487_v10  ;;  %v9846_v41 = vcombine.low %v4316_v40, %v4317_v47  ;;  %v9828_v36 = vcombine.low %v13295_v12, %v4038_v6 }
 0x17c   : > { %v1576_v43 = vadd.f32 %v1557_v2, %v1485_v27  ;;  %v9833_v26 = vcombine.low %v4038_v6, %v4039_v51  ;;  %v12202_v2 = vld [vmem:[%s15452_s1 + $0x68] ss:$0 sps:$4 sm:$0xff]   ;;  %v1486_v46 = vadd.f32 %v15463_v23, %v1383_v39  ;;  %v13405_v4 = vcombine.low %v4317_v47, %v13387_v25 }
 0x17d   : > { %v13354_v21 = vpop.f32.mrf.mxu1  ;;  %v13356_v56 = vpop.f32.mrf.mxu0  ;;  %v1700_v13 = vadd.f32 %v13310_v49, %v1573_v45  ;;  %v1705_v16 = vadd.f32 %v13322_v62, %v1578_v61  ;;  %v4319_v49 = vld [vmem:[#allocation2 + $0xd8] sm:$0xf]  ;;  %v13407_v62 = vld [vmem:[#allocation2 + $0xe0] sm:$0xf] }
 0x17e   : > { %v1703_v11 = vadd.f32 %v13332_v14, %v1576_v43  ;;  %v1577_v7 = vadd.f32 %v13354_v21, %v1486_v46  ;;  %v13416_v22 = vcombine.low %v4319_v49, %v13399_v48  ;;  %v9848_v10 = vcombine.low %v13399_v48, %v13407_v62  ;;  %v13442_v43 = vld [vmem:[#allocation2 + $0xe8] sm:$0xf] }
 0x17f   : > { %v10823_v60 = vpop.f32.mrf.mxu1  ;;  %v10835_v37 = vpop.f32.mrf.mxu0  ;;  %11110 = vmatmul.mubr.msk.bf16.vlgmr.msra.gmra.mxu1 %vm991_vm3, %v9826_v50  ;;  %11122 = vmatmul.mubr.msk.bf16.vlgmr.msra.gmra.mxu0 %vm991_vm3, %v13279_v1 }
 0x180   : > { %v1804_v20 = vadd.f32 %v10823_v60, %v1701_v33  ;;  %11130 = vmatpush3.bf16.msra.mxu1 %v12685_v54  ;;  %11113 = vmatprep.mubr.msk.bf16.mxu1 %vm991_vm3, %v9827_v28  ;;  %v1702_v54 = vadd.f32 %v13298_v31, %v1575_v34  ;;  %v9847_v28 = vcombine.low %v13387_v25, %v4319_v49  ;;  %v15464_v25 = vld [vmem:[#allocation4_spill] sm:$0xff] }
 0x181   : > { %11125 = vmatprep.mubr.msk.bf16.mxu0 %vm991_vm3, %v9820_v59  ;;  %v1771_v29 = vpop.f32.mrf.mxu1  ;;  %v1862_v1 = vpop.f32.mrf.mxu0  ;;  %11131 = vmatprep.subr.bf16.mxu1 %v12200_v52  ;;  %v1704_v40 = vadd.f32 %v13356_v56, %v1577_v7 }
 0x182   : > { %v13379_v30 = vadd.f32 %v10835_v37, %v1804_v20  ;;  %v1802_v57 = vadd.f32 %v1771_v29, %v1699_v53  ;;  %11142 = vmatpush3.bf16.msra.mxu0 %v12778_v44  ;;  %v1488_v44 = vadd.f32 %v15462_v15, %v1385_v3 }
 0x183   : > { %v10824_v9 = vpop.f32.mrf.mxu1  ;;  %v10836_v59 = vpop.f32.mrf.mxu0  ;;  %11143 = vmatprep.subr.bf16.mxu0 %v12201_v42 }
 0x184   : > { %1903 = vst.msk [vmem:[#allocation3 + $0x10] sm:$0xff] %vm325_vm5, %v13379_v30  ;;  %v1893_v31 = vadd.f32 %v1862_v1, %v1802_v57  ;;  %v1805_v35 = vadd.f32 %v10824_v9, %v1702_v54  ;;  %11132 = vmatpush3.bf16.msra.mxu1 %v12200_v52  ;;  %v1579_v12 = vadd.f32 %v13346_v24, %v1488_v44  ;;  %v1912_v3 = vsel %vm325_vm5, %v13379_v30, 0.0 }
 0x185   : > { %v1774_v0 = vpop.f32.mrf.mxu1  ;;  %v1865_v5 = vpop.f32.mrf.mxu0  ;;  %11632 = vmatprep.subr.msk.bf16.mxu1 %vm1004_vm0, %v12202_v2  ;;  %v1933_v14 = vmul.f32 %v13379_v30, %v13379_v30 }
 0x186   : > { %1901 = vst.msk [vmem:[#allocation3] sm:$0xff] %vm325_vm5, %v1893_v31  ;;  %v1896_v63 = vadd.f32 %v10836_v59, %v1805_v35  ;;  %11144 = vmatpush3.bf16.msra.mxu0 %v12201_v42  ;;  %v1803_v58 = vadd.f32 %v1774_v0, %v1700_v13  ;;  %v1931_v24 = vmul.f32 %v1893_v31, %v1893_v31  ;;  %v1909_v37 = vsel %vm325_vm5, %v1893_v31, 0.0 }
 0x187   : > { %v10827_v32 = vpop.f32.mrf.mxu1  ;;  %v10839_v38 = vpop.f32.mrf.mxu0  ;;  %11114 = vmatmul.mubr.msk.bf16.gmra.mxu1 %vm991_vm3, %v9828_v36  ;;  %11126 = vmatmul.mubr.msk.bf16.gmra.mxu0 %vm991_vm3, %v9833_v26  ;;  %v1706_v60 = vadd.f32 %v13348_v18, %v1579_v12  ;;  %v1942_v61 = vsel %vm325_vm5, %v1933_v14, 0.0 }
 0x188   : > { %1904 = vst.msk [vmem:[#allocation3 + $0x18] sm:$0xff] %vm325_vm5, %v1896_v63  ;;  %v1808_v50 = vadd.f32 %v10827_v32, %v1705_v16  ;;  %11133 = vmatprep.mubr.msk.bf16.mxu1 %vm991_vm3, %v9838_v8  ;;  %11145 = vmatprep.mubr.msk.bf16.mxu0 %vm991_vm3, %v9846_v41  ;;  %v1894_v55 = vadd.f32 %v1865_v5, %v1803_v58  ;;  %v1939_v18 = vsel %vm325_vm5, %v1931_v24, 0.0  ;;  %v1914_v56 = vsel %vm325_vm5, %v1896_v63, 0.0  ;;  %v4322_v8 = vld [vmem:[#allocation2 + $0xe4] sm:$0xf] }
 0x189   : > { %v1787_v33 = vpop.f32.mrf.mxu1  ;;  %v1878_v34 = vpop.f32.mrf.mxu0  ;;  %v1934_v29 = vmul.f32 %v1896_v63, %v1896_v63  ;;  %v12203_v5 = vld [vmem:[%s15452_s1 + $0x60] sm:$0xff]   ;;  %v9841_v2 = vcombine.low %v13407_v62, %v4322_v8  ;;  %v9849_v23 = vcombine.low %v4322_v8, %v13442_v43 }
 0x18a   : > { %v1899_v21 = vadd.f32 %v10839_v38, %v1808_v50  ;;  %v1806_v19 = vadd.f32 %v1787_v33, %v1703_v11  ;;  %1902 = vst.msk [vmem:[#allocation3 + $0x8] sm:$0xff] %vm325_vm5, %v1894_v55  ;;  %v1910_v27 = vsel %vm325_vm5, %v1894_v55, 0.0  ;;  %v1932_v53 = vmul.f32 %v1894_v55, %v1894_v55 }
 0x18b   : > { %v10828_v20 = vpop.f32.mrf.mxu1  ;;  %v10840_v17 = vpop.f32.mrf.mxu0  ;;  %v1911_v39 = vadd.f32 %v1910_v27, %v1909_v37  ;;  %v1944_v41 = vsel %vm325_vm5, %v1934_v29, 0.0 }
 0x18c   : > { %1907 = vst.msk [vmem:[#allocation3 + $0x30] sm:$0xff] %vm325_vm5, %v1899_v21  ;;  %v1897_v45 = vadd.f32 %v1878_v34, %v1806_v19  ;;  %v1940_v1 = vsel %vm325_vm5, %v1932_v53, 0.0  ;;  %v1809_v52 = vadd.f32 %v10828_v20, %v1706_v60  ;;  %v1937_v46 = vmul.f32 %v1899_v21, %v1899_v21 }
 0x18d   : > { %v1790_v47 = vpop.f32.mrf.mxu1  ;;  %v1881_v54 = vpop.f32.mrf.mxu0  ;;  %v1913_v57 = vadd.f32 %v1912_v3, %v1911_v39  ;;  %v1941_v6 = vadd.f32 %v1940_v1, %v1939_v18  ;;  %v1920_v38 = vsel %vm325_vm5, %v1899_v21, 0.0 }
 0x18e   : > { %1905 = vst.msk [vmem:[#allocation3 + $0x20] sm:$0xff] %vm325_vm5, %v1897_v45  ;;  %v1935_v30 = vmul.f32 %v1897_v45, %v1897_v45  ;;  %v1900_v51 = vadd.f32 %v10840_v17, %v1809_v52  ;;  %v1807_v9 = vadd.f32 %v1790_v47, %v1704_v40  ;;  %v1916_v15 = vsel %vm325_vm5, %v1897_v45, 0.0 }
 0x18f   : > { %v13435_v59 = vpop.f32.mrf.mxu1  ;;  %v13437_v42 = vpop.f32.mrf.mxu0  ;;  %11134 = vmatmul.mubr.msk.bf16.vlgmr.msra.gmra.mxu1 %vm991_vm3, %v13405_v4  ;;  %11146 = vmatmul.mubr.msk.bf16.vlgmr.msra.gmra.mxu0 %vm991_vm3, %v9847_v28  ;;  %v1943_v31 = vadd.f32 %v1942_v61, %v1941_v6  ;;  %v1915_v35 = vadd.f32 %v1914_v56, %v1913_v57  ;;  %v1950_v33 = vsel %vm325_vm5, %v1937_v46, 0.0 }
 0x190   : > { %11154 = vmatpush3.bf16.msra.mxu1 %v15464_v25  ;;  %11137 = vmatprep.mubr.msk.bf16.mxu1 %vm991_vm3, %v13416_v22  ;;  %1908 = vst.msk [vmem:[#allocation3 + $0x38] sm:$0xff] %vm325_vm5, %v1900_v51  ;;  %v1898_v44 = vadd.f32 %v1881_v54, %v1807_v9  ;;  %v1946_v16 = vsel %vm325_vm5, %v1935_v30, 0.0  ;;  %v1938_v62 = vmul.f32 %v1900_v51, %v1900_v51  ;;  %v1922_v34 = vsel %vm325_vm5, %v1900_v51, 0.0 }
 0x191   : > { %v13450_v13 = vpop.f32.mrf.mxu1  ;;  %v13452_v0 = vpop.f32.mrf.mxu0  ;;  %11155 = vmatprep.subr.bf16.mxu1 %v12203_v5  ;;  %11149 = vmatprep.mubr.msk.bf16.mxu0 %vm991_vm3, %v9848_v10  ;;  %v1917_v36 = vadd.f32 %v1916_v15, %v1915_v35  ;;  %v1945_v26 = vadd.f32 %v1944_v41, %v1943_v31 }
 0x192   : > { %1906 = vst.msk [vmem:[#allocation3 + $0x28] sm:$0xff] %vm325_vm5, %v1898_v44  ;;  %v1918_v63 = vsel %vm325_vm5, %v1898_v44, 0.0  ;;  %v1936_v49 = vmul.f32 %v1898_v44, %v1898_v44  ;;  %v1952_v10 = vsel %vm325_vm5, %v1938_v62, 0.0 }
 0x193   : > { %v13463_v48 = vpop.f32.mrf.mxu1  ;;  %v13465_v12 = vpop.f32.mrf.mxu0  ;;  %v1947_v58 = vadd.f32 %v1946_v16, %v1945_v26  ;;  %v1919_v32 = vadd.f32 %v1918_v63, %v1917_v36  ;;  %v2129_v16 = vadd.f32 %v13437_v42, %v13435_v59 }
 0x194   : > { %11156 = vmatpush3.bf16.msra.mxu1 %v12203_v5  ;;  %v1948_v11 = vsel %vm325_vm5, %v1936_v49, 0.0 }
 0x195   : > { %v13469_v7 = vpop.f32.mrf.mxu1  ;;  %v13471_v50 = vpop.f32.mrf.mxu0  ;;  %v1921_v24 = vadd.f32 %v1920_v38, %v1919_v32  ;;  %v1949_v55 = vadd.f32 %v1948_v11, %v1947_v58  ;;  %v2121_v58 = vadd.f32 %v13452_v0, %v13450_v13  ;;  %v2132_v11 = vadd.f32 %v13465_v12, %v13463_v48 }
 0x197   : > { %v13475_v28 = vpop.f32.mrf.mxu1  ;;  %v13477_v14 = vpop.f32.mrf.mxu0  ;;  %11138 = vmatmul.mubr.msk.bf16.gmra.mxu1 %vm991_vm3, %v9841_v2  ;;  %11150 = vmatmul.mubr.msk.bf16.gmra.mxu0 %vm991_vm3, %v9849_v23  ;;  %v13481_v21 = vadd.f32 %v1922_v34, %v1921_v24  ;;  %v1951_v19 = vadd.f32 %v1950_v33, %v1949_v55  ;;  %v2124_v34 = vadd.f32 %v13471_v50, %v13469_v7 }
 0x198   : > { %11157 = vmatprep.mubr.msk.bf16.mxu1 %vm991_vm3, %v13405_v4  ;;  %v4324_v4 = vld [vmem:[#allocation2 + $0xec] sm:$0xf] }
 0x199   : > { %v2053_v60 = vpop.f32.mrf.mxu1  ;;  %v2136_v37 = vpop.f32.mrf.mxu0  ;;  %v13486_v27 = vadd.f32 %v1952_v10, %v1951_v19  ;;  %v9854_v52 = vcombine.low %v13442_v43, %v4324_v4  ;;  %v2145_v4 = vadd.f32 %v13477_v14, %v13475_v28 }
 0x19b   : > { %15465 = vst [vmem:[#allocation5_spill] sm:$0xff] %v13486_v27  ;;  %v13488_v53 = vpop.f32.mrf.mxu1  ;;  %v13490_v20 = vpop.f32.mrf.mxu0 }
 0x19d   : > { %v13492_v17 = vpop.f32.mrf.mxu1  ;;  %v13494_v40 = vpop.f32.mrf.mxu0 }
 0x19e   : > { %v2140_v28 = vadd.f32 %v13494_v40, %v13492_v17 }
 0x19f   : > { %v10871_v3 = vpop.f32.mrf.mxu1  ;;  %v10883_v39 = vpop.f32.mrf.mxu0  ;;  %11158 = vmatmul.mubr.msk.bf16.vlgmr.msra.gmra.mxu1 %vm991_vm3, %v13416_v22 }
 0x1a0   : > { %11161 = vmatprep.mubr.msk.bf16.mxu1 %vm991_vm3, %v9841_v2  ;;  %v2224_v32 = vadd.f32 %v10871_v3, %v2129_v16 }
 0x1a1   : > { %v2191_v45 = vpop.f32.mrf.mxu1  ;;  %v2306_v18 = vpop.f32.mrf.mxu0 }
 0x1a2   : > { %v2222_v24 = vadd.f32 %v2191_v45, %v2121_v58  ;;  %v2339_v59 = vadd.f32 %v10883_v39, %v2224_v32  ;;  %v2148_v58 = vadd.f32 %v13490_v20, %v13488_v53 }
 0x1a3   : > { %v10872_v29 = vpop.f32.mrf.mxu1  ;;  %v10884_v1 = vpop.f32.mrf.mxu0 }
 0x1a4   : > { %v2225_v42 = vadd.f32 %v10872_v29, %v2132_v11  ;;  %v2337_v13 = vadd.f32 %v2306_v18, %v2222_v24 }
 0x1a5   : > { %v2194_v47 = vpop.f32.mrf.mxu1  ;;  %v2309_v54 = vpop.f32.mrf.mxu0 }
 0x1a6   : > { %v2223_v0 = vadd.f32 %v2194_v47, %v2124_v34  ;;  %v2340_v48 = vadd.f32 %v10884_v1, %v2225_v42 }
 0x1a7   : > { %v10875_v61 = vpop.f32.mrf.mxu1  ;;  %v10887_v57 = vpop.f32.mrf.mxu0  ;;  %11162 = vmatmul.mubr.msk.bf16.gmra.mxu1 %vm991_vm3, %v9854_v52  ;;  %v2137_v52 = vadd.f32 %v2136_v37, %v2053_v60 }
 0x1a8   : > { %v2228_v12 = vadd.f32 %v10875_v61, %v2145_v4  ;;  %v2338_v29 = vadd.f32 %v2309_v54, %v2223_v0 }
 0x1a9   : > { %v2207_v6 = vpop.f32.mrf.mxu1  ;;  %v2322_v56 = vpop.f32.mrf.mxu0 }
 0x1aa   : > { %v2226_v7 = vadd.f32 %v2207_v6, %v2137_v52  ;;  %v2343_v37 = vadd.f32 %v10887_v57, %v2228_v12 }
 0x1ab   : > { %v10876_v30 = vpop.f32.mrf.mxu1  ;;  %v13501_v51 = vpop.f32.mrf.mxu0 }
 0x1ac   : > { %v2229_v14 = vadd.f32 %v10876_v30, %v2148_v58 }
 0x1ad   : > { %v2210_v22 = vpop.f32.mrf.mxu1  ;;  %v13503_v9 = vpop.f32.mrf.mxu0 }
 0x1ae   : > { %v2344_v54 = vadd.f32 %v13501_v51, %v2229_v14 }
 0x1af   : > { %v10895_v8 = vpop.f32.mrf.mxu1  ;;  %v10907_v31 = vpop.f32.mrf.mxu0 }
 0x1b0   : > { %v2430_v3 = vadd.f32 %v10895_v8, %v2339_v59  ;;  %v2341_v8 = vadd.f32 %v2322_v56, %v2226_v7 }
 0x1b1   : > { %v2397_v35 = vpop.f32.mrf.mxu1  ;;  %v2476_v25 = vpop.f32.mrf.mxu0 }
 0x1b2   : > { %v2428_v45 = vadd.f32 %v2397_v35, %v2337_v13  ;;  %v2509_v32 = vadd.f32 %v10907_v31, %v2430_v3  ;;  %v2227_v35 = vadd.f32 %v2210_v22, %v2140_v28 }
 0x1b3   : > { %v10896_v41 = vpop.f32.mrf.mxu1  ;;  %v10908_v43 = vpop.f32.mrf.mxu0 }
 0x1b4   : > { %v2431_v11 = vadd.f32 %v10896_v41, %v2340_v48  ;;  %v2507_v47 = vadd.f32 %v2476_v25, %v2428_v45  ;;  %v2342_v57 = vadd.f32 %v13503_v9, %v2227_v35 }
 0x1b5   : > { %v2400_v15 = vpop.f32.mrf.mxu1  ;;  %v2479_v44 = vpop.f32.mrf.mxu0 }
 0x1b6   : > { %v2429_v1 = vadd.f32 %v2400_v15, %v2338_v29  ;;  %v2510_v20 = vadd.f32 %v10908_v43, %v2431_v11 }
 0x1b7   : > { %v10899_v5 = vpop.f32.mrf.mxu1  ;;  %v13505_v36 = vpop.f32.mrf.mxu0 }
 0x1b8   : > { %v2434_v6 = vadd.f32 %v10899_v5, %v2343_v37  ;;  %v2508_v17 = vadd.f32 %v2479_v44, %v2429_v1 }
 0x1b9   : > { %v2413_v26 = vpop.f32.mrf.mxu1  ;;  %v13507_v2 = vpop.f32.mrf.mxu0 }
 0x1ba   : > { %v2432_v31 = vadd.f32 %v2413_v26, %v2341_v8  ;;  %v2513_v56 = vadd.f32 %v13505_v36, %v2434_v6 }
 0x1bb   : > { %v10900_v23 = vpop.f32.mrf.mxu1  ;;  %v13509_v46 = vpop.f32.mrf.mxu0 }
 0x1bc   : > { %v2435_v25 = vadd.f32 %v10900_v23, %v2344_v54 }
 0x1bd   : > { %v13513_v63 = vpop.f32.mrf.mxu1  ;;  %v13515_v49 = vpop.f32.mrf.mxu0 }
 0x1be   : > { %v2433_v51 = vadd.f32 %v13513_v63, %v2342_v57  ;;  %v2514_v23 = vadd.f32 %v13509_v46, %v2435_v25  ;;  %v15466_v57 = vld [vmem:[#allocation5_spill] sm:$0xff] }
 0x1bf   : > { %v10919_v38 = vpop.f32.mrf.mxu1  ;;  %v10931_v62 = vpop.f32.mrf.mxu0  ;;  %v1954_v25 = vrot.slane %v15466_v57, 4 }
 0x1c0   : > { %v2624_v61 = vadd.f32 %v10919_v38, %v2509_v32  ;;  %v2512_v63 = vadd.f32 %v13515_v49, %v2433_v51 }
 0x1c1   : > { %v2591_v55 = vpop.f32.mrf.mxu1  ;;  %v2682_v33 = vpop.f32.mrf.mxu0 }
 0x1c2   : > { %v2622_v34 = vadd.f32 %v2591_v55, %v2507_v47  ;;  %v2715_v40 = vadd.f32 %v10931_v62, %v2624_v61  ;;  %v2511_v55 = vadd.f32 %v13507_v2, %v2432_v31 }
 0x1c3   : > { %v10920_v19 = vpop.f32.mrf.mxu1  ;;  %v10932_v10 = vpop.f32.mrf.mxu0 }
 0x1c4   : > { %v2625_v30 = vadd.f32 %v10920_v19, %v2510_v20  ;;  %v2713_v22 = vadd.f32 %v2682_v33, %v2622_v34  ;;  %v1924_v34 = vrot.slane %v13481_v21, 4 }
 0x1c5   : > { %v2594_v16 = vpop.f32.mrf.mxu1  ;;  %v2685_v27 = vpop.f32.mrf.mxu0 }
 0x1c6   : > { %v2623_v43 = vadd.f32 %v2594_v16, %v2508_v17  ;;  %v2716_v44 = vadd.f32 %v10932_v10, %v2625_v30 }
 0x1c7   : > { %v10923_v50 = vpop.f32.mrf.mxu1  ;;  %v10935_v39 = vpop.f32.mrf.mxu0 }
 0x1c8   : > { %v2628_v62 = vadd.f32 %v10923_v50, %v2513_v56  ;;  %v2714_v33 = vadd.f32 %v2685_v27, %v2623_v43 }
 0x1c9   : > { %v2607_v18 = vpop.f32.mrf.mxu1  ;;  %v2698_v60 = vpop.f32.mrf.mxu0 }
 0x1ca   : > { %v2626_v19 = vadd.f32 %v2607_v18, %v2511_v55  ;;  %v2719_v10 = vadd.f32 %v10935_v39, %v2628_v62 }
 0x1cb   : > { %v10924_v24 = vpop.f32.mrf.mxu1  ;;  %v10936_v53 = vpop.f32.mrf.mxu0 }
 0x1cc   : > { %v2629_v13 = vadd.f32 %v10924_v24, %v2514_v23  ;;  %v2717_v46 = vadd.f32 %v2698_v60, %v2626_v19 }
 0x1cd   : > { %v2610_v41 = vpop.f32.mrf.mxu1  ;;  %v2701_v59 = vpop.f32.mrf.mxu0 }
 0x1ce   : > { %v2627_v48 = vadd.f32 %v2610_v41, %v2512_v63  ;;  %v2720_v29 = vadd.f32 %v10936_v53, %v2629_v13  ;;  %v1955_v63 = vadd.f32 %v1954_v25, %v15466_v57 }
 0x1cf   : > { %v10943_v15 = vpop.f32.mrf.mxu1  ;;  %v13531_v38 = vpop.f32.mrf.mxu0 }
 0x1d0   : > { %v2794_v5 = vadd.f32 %v10943_v15, %v2715_v40  ;;  %v2718_v47 = vadd.f32 %v2701_v59, %v2627_v48 }
 0x1d1   : > { %v2761_v26 = vpop.f32.mrf.mxu1  ;;  %v13536_v42 = vpop.f32.mrf.mxu0 }
 0x1d2   : > { %2803 = vst.msk [vmem:[#allocation3 + $0x50] sm:$0xff] %vm325_vm5, %v2794_v5  ;;  %v2792_v9 = vadd.f32 %v2761_v26, %v2713_v22  ;;  %v2833_v12 = vmul.f32 %v2794_v5, %v2794_v5  ;;  %v2812_v39 = vsel %vm325_vm5, %v2794_v5, 0.0 }
 0x1d3   : > { %v10944_v4 = vpop.f32.mrf.mxu1  ;;  %v13540_v36 = vpop.f32.mrf.mxu0 }
 0x1d4   : > { %2801 = vst.msk [vmem:[#allocation3 + $0x40] sm:$0xff] %vm325_vm5, %v2792_v9  ;;  %v2795_v2 = vadd.f32 %v10944_v4, %v2716_v44  ;;  %v2831_v52 = vmul.f32 %v2792_v9, %v2792_v9  ;;  %v2809_v27 = vsel %vm325_vm5, %v2792_v9, 0.0  ;;  %v2842_v24 = vsel %vm325_vm5, %v2833_v12, 0.0 }
 0x1d5   : > { %v2764_v0 = vpop.f32.mrf.mxu1  ;;  %v13544_v3 = vpop.f32.mrf.mxu0  ;;  %v1925_v44 = vadd.f32 %v1924_v34, %v13481_v21 }
 0x1d6   : > { %2804 = vst.msk [vmem:[#allocation3 + $0x58] sm:$0xff] %vm325_vm5, %v2795_v2  ;;  %v2793_v16 = vadd.f32 %v2764_v0, %v2714_v33  ;;  %v2839_v14 = vsel %vm325_vm5, %v2831_v52, 0.0  ;;  %v2834_v18 = vmul.f32 %v2795_v2, %v2795_v2  ;;  %v2814_v53 = vsel %vm325_vm5, %v2795_v2, 0.0 }
 0x1d7   : > { %v10947_v45 = vpop.f32.mrf.mxu1  ;;  %v13547_v58 = vpop.f32.mrf.mxu0 }
 0x1d8   : > { %2802 = vst.msk [vmem:[#allocation3 + $0x48] sm:$0xff] %vm325_vm5, %v2793_v16  ;;  %v2810_v49 = vsel %vm325_vm5, %v2793_v16, 0.0  ;;  %v2832_v7 = vmul.f32 %v2793_v16, %v2793_v16  ;;  %v2798_v50 = vadd.f32 %v10947_v45, %v2719_v10  ;;  %v2844_v59 = vsel %vm325_vm5, %v2834_v18, 0.0 }
 0x1d9   : > { %v2811_v32 = vadd.f32 %v2810_v49, %v2809_v27  ;;  %v2777_v11 = vpop.f32.mrf.mxu1  ;;  %v13553_v28 = vpop.f32.mrf.mxu0 }
 0x1da   : > { %v2840_v60 = vsel %vm325_vm5, %v2832_v7, 0.0  ;;  %2807 = vst.msk [vmem:[#allocation3 + $0x70] sm:$0xff] %vm325_vm5, %v2798_v50  ;;  %v2796_v37 = vadd.f32 %v2777_v11, %v2717_v46  ;;  %v2837_v5 = vmul.f32 %v2798_v50, %v2798_v50  ;;  %v2820_v4 = vsel %vm325_vm5, %v2798_v50, 0.0 }
 0x1db   : > { %v2813_v1 = vadd.f32 %v2812_v39, %v2811_v32  ;;  %v2841_v61 = vadd.f32 %v2840_v60, %v2839_v14  ;;  %v10948_v8 = vpop.f32.mrf.mxu1  ;;  %v13558_v35 = vpop.f32.mrf.mxu0  ;;  %v1926_v46 = vrot.slane %v1925_v44, 2  ;;  %v1956_v7 = vrot.slane %v1955_v63, 2 }
 0x1dc   : > { %2805 = vst.msk [vmem:[#allocation3 + $0x60] sm:$0xff] %vm325_vm5, %v2796_v37  ;;  %v2835_v20 = vmul.f32 %v2796_v37, %v2796_v37  ;;  %v2799_v6 = vadd.f32 %v10948_v8, %v2720_v29  ;;  %v2816_v40 = vsel %vm325_vm5, %v2796_v37, 0.0  ;;  %v2850_v21 = vsel %vm325_vm5, %v2837_v5, 0.0 }
 0x1dd   : > { %v2843_v54 = vadd.f32 %v2842_v24, %v2841_v61  ;;  %v2815_v31 = vadd.f32 %v2814_v53, %v2813_v1  ;;  %v2780_v41 = vpop.f32.mrf.mxu1  ;;  %v13564_v17 = vpop.f32.mrf.mxu0  ;;  %v1927_v11 = vadd.f32 %v1926_v46, %v1925_v44 }
 0x1de   : > { %2808 = vst.msk [vmem:[#allocation3 + $0x78] sm:$0xff] %vm325_vm5, %v2799_v6  ;;  %v2797_v30 = vadd.f32 %v2780_v41, %v2718_v47  ;;  %v2846_v55 = vsel %vm325_vm5, %v2835_v20, 0.0  ;;  %v2838_v33 = vmul.f32 %v2799_v6, %v2799_v6  ;;  %v2822_v16 = vsel %vm325_vm5, %v2799_v6, 0.0 }
 0x1df   : > { %v2817_v15 = vadd.f32 %v2816_v40, %v2815_v31  ;;  %v2845_v56 = vadd.f32 %v2844_v59, %v2843_v54  ;;  %v13570_v22 = vpop.f32.mrf.mxu1  ;;  %v13572_v43 = vpop.f32.mrf.mxu0  ;;  %v1957_v47 = vadd.f32 %v1956_v7, %v1955_v63  ;;  %v1928_v53 = vrot.slane %v1927_v11, 1 }
 0x1e0   : > { %2806 = vst.msk [vmem:[#allocation3 + $0x68] sm:$0xff] %vm325_vm5, %v2797_v30  ;;  %v2818_v51 = vsel %vm325_vm5, %v2797_v30, 0.0  ;;  %v2836_v26 = vmul.f32 %v2797_v30, %v2797_v30  ;;  %v2852_v49 = vsel %vm325_vm5, %v2838_v33, 0.0 }
 0x1e1   : > { %v2847_v62 = vadd.f32 %v2846_v55, %v2845_v56  ;;  %v2819_v9 = vadd.f32 %v2818_v51, %v2817_v15  ;;  %v13578_v23 = vpop.f32.mrf.mxu1  ;;  %v13580_v19 = vpop.f32.mrf.mxu0  ;;  %v1958_v31 = vrot.slane %v1957_v47, 1  ;;  %v1929_v57 = vadd.f32 %v1928_v53, %v1927_v11 }
 0x1e2   : > { %v2848_v2 = vsel %vm325_vm5, %v2836_v26, 0.0 }
 0x1e3   : > { %v2821_v13 = vadd.f32 %v2820_v4, %v2819_v9  ;;  %v2849_v0 = vadd.f32 %v2848_v2, %v2847_v62  ;;  %v13585_v10 = vpop.f32.mrf.mxu1  ;;  %v13587_v52 = vpop.f32.mrf.mxu0  ;;  %v1959_v55 = vadd.f32 %v1958_v31, %v1957_v47 }
 0x1e5   : > { %v2823_v48 = vadd.f32 %v2822_v16, %v2821_v13  ;;  %v2851_v12 = vadd.f32 %v2850_v21, %v2849_v0  ;;  %v3023_v45 = vpop.f32.mrf.mxu1  ;;  %v13591_v27 = vpop.f32.mrf.mxu0 }
 0x1e7   : > { %v2824_v50 = vrot.slane %v2823_v48, 4  ;;  %v2853_v29 = vadd.f32 %v2852_v49, %v2851_v12  ;;  %v10971_v39 = vpop.f32.mrf.mxu1  ;;  %v13594_v32 = vpop.f32.mrf.mxu0  ;;  %v3029_v12 = vadd.f32 %v13570_v22, %v13531_v38 }
 0x1e9   : > { %v2825_v14 = vadd.f32 %v2824_v50, %v2823_v48  ;;  %v2854_v18 = vrot.slane %v2853_v29, 4  ;;  %v3036_v60 = vpop.f32.mrf.mxu1  ;;  %v13596_v37 = vpop.f32.mrf.mxu0  ;;  %v3021_v50 = vadd.f32 %v13578_v23, %v13536_v42  ;;  %v3045_v42 = vadd.f32 %v10971_v39, %v13547_v58 }
 0x1ea   : > { %v3037_v31 = vadd.f32 %v3036_v60, %v13553_v28 }
 0x1eb   : > { %v2826_v1 = vrot.slane %v2825_v14, 2  ;;  %v2855_v61 = vadd.f32 %v2854_v18, %v2853_v29  ;;  %v13598_v8 = vpop.f32.mrf.mxu1  ;;  %v13600_v24 = vpop.f32.mrf.mxu0  ;;  %v3032_v18 = vadd.f32 %v13585_v10, %v13540_v36 }
 0x1ec   : > { %v3048_v58 = vadd.f32 %v13598_v8, %v13558_v35 }
 0x1ed   : > { %v2827_v20 = vadd.f32 %v2826_v1, %v2825_v14  ;;  %v2856_v6 = vrot.slane %v2855_v61, 2  ;;  %v3039_v34 = vpop.f32.mrf.mxu1  ;;  %v13602_v54 = vpop.f32.mrf.mxu0  ;;  %v3124_v14 = vadd.f32 %v13572_v43, %v3029_v12 }
 0x1ef   : > { %v2828_v41 = vrot.slane %v2827_v20, 1  ;;  %v2857_v59 = vadd.f32 %v2856_v6, %v2855_v61  ;;  %v10991_v40 = vpop.f32.mrf.mxu1  ;;  %v11003_v30 = vpop.f32.mrf.mxu0  ;;  %v3122_v61 = vadd.f32 %v13580_v19, %v3021_v50  ;;  %v3125_v6 = vadd.f32 %v13587_v52, %v3032_v18 }
 0x1f0   : > { %v3239_v53 = vadd.f32 %v10991_v40, %v3124_v14  ;;  %v3128_v40 = vadd.f32 %v13594_v32, %v3045_v42  ;;  %v3040_v52 = vadd.f32 %v3039_v34, %v13564_v17 }
 0x1f1   : > { %v2829_v25 = vadd.f32 %v2828_v41, %v2827_v20  ;;  %v2858_v15 = vrot.slane %v2857_v59, 1  ;;  %v3206_v56 = vpop.f32.mrf.mxu1  ;;  %v3297_v5 = vpop.f32.mrf.mxu0  ;;  %v3024_v20 = vadd.f32 %v3023_v45, %v13544_v3 }
 0x1f2   : > { %v3237_v23 = vadd.f32 %v3206_v56, %v3122_v61 }
 0x1f3   : > { %v13604_v51 = vadd.f32 %v2829_v25, %v1929_v57  ;;  %v2859_v26 = vadd.f32 %v2858_v15, %v2857_v59  ;;  %v10992_v44 = vpop.f32.mrf.mxu1  ;;  %v11004_v62 = vpop.f32.mrf.mxu0  ;;  %v3330_v59 = vadd.f32 %v11003_v30, %v3239_v53  ;;  %v3123_v10 = vadd.f32 %v13591_v27, %v3024_v20 }
 0x1f4   : > { %v3240_v36 = vadd.f32 %v10992_v44, %v3125_v6  ;;  %v3328_v3 = vadd.f32 %v3297_v5, %v3237_v23  ;;  %v3126_v25 = vadd.f32 %v13596_v37, %v3037_v31  ;;  %v3129_v5 = vadd.f32 %v13600_v24, %v3048_v58 }
 0x1f5   : > { %v13606_v9 = vadd.f32 %v2859_v26, %v1959_v55  ;;  %v3209_v4 = vpop.f32.mrf.mxu1  ;;  %v3300_v33 = vpop.f32.mrf.mxu0  ;;  %v3127_v37 = vadd.f32 %v13602_v54, %v3040_v52 }
 0x1f6   : > { %v3238_v28 = vadd.f32 %v3209_v4, %v3123_v10  ;;  %v3331_v30 = vadd.f32 %v11004_v62, %v3240_v36 }
 0x1f7   : > { %v10995_v2 = vpop.f32.mrf.mxu1  ;;  %v11007_v63 = vpop.f32.mrf.mxu0 }
 0x1f8   : > { %v3243_v15 = vadd.f32 %v10995_v2, %v3128_v40  ;;  %v3329_v12 = vadd.f32 %v3300_v33, %v3238_v28 }
 0x1f9   : > { %v3222_v13 = vpop.f32.mrf.mxu1  ;;  %v3313_v0 = vpop.f32.mrf.mxu0 }
 0x1fa   : > { %v3241_v27 = vadd.f32 %v3222_v13, %v3126_v25  ;;  %v3334_v8 = vadd.f32 %v11007_v63, %v3243_v15 }
 0x1fb   : > { %v10996_v21 = vpop.f32.mrf.mxu1  ;;  %v13608_v16 = vpop.f32.mrf.mxu0 }
 0x1fc   : > { %v3332_v4 = vadd.f32 %v3313_v0, %v3241_v27  ;;  %v3244_v50 = vadd.f32 %v10996_v21, %v3129_v5 }
 0x1fd   : > { %v3225_v46 = vpop.f32.mrf.mxu1  ;;  %v13610_v48 = vpop.f32.mrf.mxu0 }
 0x1fe   : > { %v3242_v62 = vadd.f32 %v3225_v46, %v3127_v37  ;;  %v3335_v63 = vadd.f32 %v13608_v16, %v3244_v50 }
 0x1ff   : > { %v11015_v49 = vpop.f32.mrf.mxu1  ;;  %v11027_v7 = vpop.f32.mrf.mxu0 }
 0x200   : > { %v3409_v45 = vadd.f32 %v11015_v49, %v3330_v59  ;;  %v3333_v46 = vadd.f32 %v13610_v48, %v3242_v62 }
 0x201   : > { %v3376_v29 = vpop.f32.mrf.mxu1  ;;  %v3491_v11 = vpop.f32.mrf.mxu0 }
 0x202   : > { %v3407_v56 = vadd.f32 %v3376_v29, %v3328_v3  ;;  %v3524_v44 = vadd.f32 %v11027_v7, %v3409_v45 }
 0x203   : > { %v11016_v47 = vpop.f32.mrf.mxu1  ;;  %v11028_v1 = vpop.f32.mrf.mxu0 }
 0x204   : > { %v3410_v32 = vadd.f32 %v11016_v47, %v3331_v30  ;;  %v3522_v17 = vadd.f32 %v3491_v11, %v3407_v56 }
 0x205   : > { %v3379_v38 = vpop.f32.mrf.mxu1  ;;  %v3494_v22 = vpop.f32.mrf.mxu0 }
 0x206   : > { %v3408_v2 = vadd.f32 %v3379_v38, %v3329_v12  ;;  %v3525_v14 = vadd.f32 %v11028_v1, %v3410_v32 }
 0x207   : > { %v11019_v43 = vpop.f32.mrf.mxu1  ;;  %v11031_v41 = vpop.f32.mrf.mxu0 }
 0x208   : > { %v3413_v18 = vadd.f32 %v11019_v43, %v3334_v8  ;;  %v3523_v11 = vadd.f32 %v3494_v22, %v3408_v2 }
 0x209   : > { %v3392_v57 = vpop.f32.mrf.mxu1  ;;  %v3507_v19 = vpop.f32.mrf.mxu0 }
 0x20a   : > { %v3411_v53 = vadd.f32 %v3392_v57, %v3332_v4  ;;  %v3528_v20 = vadd.f32 %v11031_v41, %v3413_v18 }
 0x20b   : > { %v11020_v39 = vpop.f32.mrf.mxu1  ;;  %v11032_v60 = vpop.f32.mrf.mxu0 }
 0x20c   : > { %v3414_v38 = vadd.f32 %v11020_v39, %v3335_v63  ;;  %v3526_v31 = vadd.f32 %v3507_v19, %v3411_v53 }
 0x20d   : > { %v3395_v55 = vpop.f32.mrf.mxu1  ;;  %v3510_v26 = vpop.f32.mrf.mxu0 }
 0x20e   : > { %v3412_v43 = vadd.f32 %v3395_v55, %v3333_v46  ;;  %v3529_v41 = vadd.f32 %v11032_v60, %v3414_v38 }
 0x20f   : > { %v11039_v49 = vpop.f32.mrf.mxu1  ;;  %v11051_v35 = vpop.f32.mrf.mxu0 }
 0x210   : > { %v3615_v34 = vadd.f32 %v11039_v49, %v3524_v44  ;;  %v3527_v52 = vadd.f32 %v3510_v26, %v3412_v43 }
 0x211   : > { %v3582_v29 = vpop.f32.mrf.mxu1  ;;  %v3661_v13 = vpop.f32.mrf.mxu0 }
 0x212   : > { %v3694_v7 = vadd.f32 %v11051_v35, %v3615_v34  ;;  %v3613_v47 = vadd.f32 %v3582_v29, %v3522_v17 }
 0x213   : > { %v11040_v61 = vpop.f32.mrf.mxu1  ;;  %v11052_v24 = vpop.f32.mrf.mxu0 }
 0x214   : > { %3703 = vst.msk [vmem:[#allocation3 + $0x90] sm:$0xff] %vm325_vm5, %v3694_v7  ;;  %v3692_v54 = vadd.f32 %v3661_v13, %v3613_v47  ;;  %v3616_v33 = vadd.f32 %v11040_v61, %v3525_v14  ;;  %v3733_v57 = vmul.f32 %v3694_v7, %v3694_v7  ;;  %v3712_v28 = vsel %vm325_vm5, %v3694_v7, 0.0 }
 0x215   : > { %v3585_v0 = vpop.f32.mrf.mxu1  ;;  %v3664_v21 = vpop.f32.mrf.mxu0 }
 0x216   : > { %3701 = vst.msk [vmem:[#allocation3 + $0x80] sm:$0xff] %vm325_vm5, %v3692_v54  ;;  %v3695_v1 = vadd.f32 %v11052_v24, %v3616_v33  ;;  %v3614_v6 = vadd.f32 %v3585_v0, %v3523_v11  ;;  %v3731_v36 = vmul.f32 %v3692_v54, %v3692_v54  ;;  %v3709_v3 = vsel %vm325_vm5, %v3692_v54, 0.0 }
 0x217   : > { %v11043_v42 = vpop.f32.mrf.mxu1  ;;  %v11055_v23 = vpop.f32.mrf.mxu0  ;;  %v3742_v32 = vsel %vm325_vm5, %v3733_v57, 0.0 }
 0x218   : > { %3704 = vst.msk [vmem:[#allocation3 + $0x98] sm:$0xff] %vm325_vm5, %v3695_v1  ;;  %v3619_v59 = vadd.f32 %v11043_v42, %v3528_v20  ;;  %v3693_v16 = vadd.f32 %v3664_v21, %v3614_v6  ;;  %v3739_v15 = vsel %vm325_vm5, %v3731_v36, 0.0  ;;  %v3734_v56 = vmul.f32 %v3695_v1, %v3695_v1 }
 0x219   : > { %v3598_v22 = vpop.f32.mrf.mxu1  ;;  %v3677_v10 = vpop.f32.mrf.mxu0  ;;  %v3714_v26 = vsel %vm325_vm5, %v3695_v1, 0.0 }
 0x21a   : > { %v3698_v40 = vadd.f32 %v11055_v23, %v3619_v59  ;;  %v3617_v48 = vadd.f32 %v3598_v22, %v3526_v31  ;;  %3702 = vst.msk [vmem:[#allocation3 + $0x88] sm:$0xff] %vm325_vm5, %v3693_v16  ;;  %v3710_v45 = vsel %vm325_vm5, %v3693_v16, 0.0  ;;  %v3732_v25 = vmul.f32 %v3693_v16, %v3693_v16 }
 0x21b   : > { %v11044_v19 = vpop.f32.mrf.mxu1  ;;  %v11056_v58 = vpop.f32.mrf.mxu0  ;;  %v3711_v39 = vadd.f32 %v3710_v45, %v3709_v3  ;;  %v3744_v50 = vsel %vm325_vm5, %v3734_v56, 0.0 }
 0x21c   : > { %3707 = vst.msk [vmem:[#allocation3 + $0xb0] sm:$0xff] %vm325_vm5, %v3698_v40  ;;  %v3696_v30 = vadd.f32 %v3677_v10, %v3617_v48  ;;  %v3740_v60 = vsel %vm325_vm5, %v3732_v25, 0.0  ;;  %v3620_v27 = vadd.f32 %v11044_v19, %v3529_v41  ;;  %v3737_v7 = vmul.f32 %v3698_v40, %v3698_v40 }
 0x21d   : > { %v3601_v55 = vpop.f32.mrf.mxu1  ;;  %v3680_v44 = vpop.f32.mrf.mxu0  ;;  %v3713_v5 = vadd.f32 %v3712_v28, %v3711_v39  ;;  %v3741_v37 = vadd.f32 %v3740_v60, %v3739_v15  ;;  %v3720_v11 = vsel %vm325_vm5, %v3698_v40, 0.0 }
 0x21e   : > { %3705 = vst.msk [vmem:[#allocation3 + $0xa0] sm:$0xff] %vm325_vm5, %v3696_v30  ;;  %v3735_v12 = vmul.f32 %v3696_v30, %v3696_v30  ;;  %v3699_v49 = vadd.f32 %v11056_v58, %v3620_v27  ;;  %v3618_v35 = vadd.f32 %v3601_v55, %v3527_v52  ;;  %v3716_v62 = vsel %vm325_vm5, %v3696_v30, 0.0 }
 0x21f   : > { %v13647_v8 = vpop.f32.mrf.mxu1  ;;  %v13649_v17 = vpop.f32.mrf.mxu0  ;;  %v3743_v34 = vadd.f32 %v3742_v32, %v3741_v37  ;;  %v3715_v4 = vadd.f32 %v3714_v26, %v3713_v5  ;;  %v3750_v6 = vsel %vm325_vm5, %v3737_v7, 0.0 }
 0x220   : > { %3708 = vst.msk [vmem:[#allocation3 + $0xb8] sm:$0xff] %vm325_vm5, %v3699_v49  ;;  %v3697_v2 = vadd.f32 %v3680_v44, %v3618_v35  ;;  %v3746_v47 = vsel %vm325_vm5, %v3735_v12, 0.0  ;;  %v3738_v0 = vmul.f32 %v3699_v49, %v3699_v49  ;;  %v3722_v42 = vsel %vm325_vm5, %v3699_v49, 0.0 }
 0x221   : > { %v13654_v29 = vpop.f32.mrf.mxu1  ;;  %v13656_v13 = vpop.f32.mrf.mxu0  ;;  %v3717_v14 = vadd.f32 %v3716_v62, %v3715_v4  ;;  %v3745_v18 = vadd.f32 %v3744_v50, %v3743_v34 }
 0x222   : > { %3706 = vst.msk [vmem:[#allocation3 + $0xa8] sm:$0xff] %vm325_vm5, %v3697_v2  ;;  %v3718_v61 = vsel %vm325_vm5, %v3697_v2, 0.0  ;;  %v3736_v24 = vmul.f32 %v3697_v2, %v3697_v2  ;;  %v3752_v36 = vsel %vm325_vm5, %v3738_v0, 0.0 }
 0x223   : > { %v13661_v53 = vpop.f32.mrf.mxu1  ;;  %v13663_v54 = vpop.f32.mrf.mxu0  ;;  %v3747_v33 = vadd.f32 %v3746_v47, %v3745_v18  ;;  %v3719_v63 = vadd.f32 %v3718_v61, %v3717_v14 }
 0x224   : > { %v3748_v21 = vsel %vm325_vm5, %v3736_v24, 0.0 }
 0x225   : > { %v13667_v46 = vpop.f32.mrf.mxu1  ;;  %v13669_v20 = vpop.f32.mrf.mxu0  ;;  %v3721_v1 = vadd.f32 %v3720_v11, %v3719_v63  ;;  %v3749_v38 = vadd.f32 %v3748_v21, %v3747_v33 }
 0x227   : > { %v13673_v23 = vpop.f32.mrf.mxu1  ;;  %v13675_v31 = vpop.f32.mrf.mxu0  ;;  %v3723_v43 = vadd.f32 %v3722_v42, %v3721_v1  ;;  %v3751_v59 = vadd.f32 %v3750_v6, %v3749_v38 }
 0x229   : > { %v13678_v16 = vpop.f32.mrf.mxu1  ;;  %v13680_v22 = vpop.f32.mrf.mxu0  ;;  %v3724_v10 = vrot.slane %v3723_v43, 4  ;;  %v3753_v57 = vadd.f32 %v3752_v36, %v3751_v59 }
 0x22b   : > { %v13682_v40 = vpop.f32.mrf.mxu1  ;;  %v13684_v48 = vpop.f32.mrf.mxu0  ;;  %v3725_v41 = vadd.f32 %v3724_v10, %v3723_v43  ;;  %v3754_v3 = vrot.slane %v3753_v57, 4  ;;  %v3929_v43 = vadd.f32 %v13649_v17, %v13647_v8  ;;  %v3921_v10 = vadd.f32 %v13656_v13, %v13654_v29 }
 0x22d   : > { %v13686_v45 = vpop.f32.mrf.mxu1  ;;  %v13688_v25 = vpop.f32.mrf.mxu0  ;;  %v3726_v19 = vrot.slane %v3725_v41, 2  ;;  %v3755_v58 = vadd.f32 %v3754_v3, %v3753_v57 }
 0x22f   : > { %v11087_v52 = vpop.f32.mrf.mxu1  ;;  %v11099_v28 = vpop.f32.mrf.mxu0  ;;  %v3727_v39 = vadd.f32 %v3726_v19, %v3725_v41  ;;  %v3756_v30 = vrot.slane %v3755_v58, 2  ;;  %v3932_v19 = vadd.f32 %v13663_v54, %v13661_v53 }
 0x230   : > { %v4024_v57 = vadd.f32 %v11087_v52, %v3929_v43 }
 0x231   : > { %v3991_v15 = vpop.f32.mrf.mxu1  ;;  %v4106_v56 = vpop.f32.mrf.mxu0  ;;  %v3728_v60 = vrot.slane %v3727_v39, 1  ;;  %v3757_v27 = vadd.f32 %v3756_v30, %v3755_v58 }
 0x232   : > { %v4022_v58 = vadd.f32 %v3991_v15, %v3921_v10 }
 0x233   : > { %v11088_v55 = vpop.f32.mrf.mxu1  ;;  %v11100_v44 = vpop.f32.mrf.mxu0  ;;  %v3729_v32 = vadd.f32 %v3728_v60, %v3727_v39  ;;  %v3758_v5 = vrot.slane %v3757_v27, 1  ;;  %v3924_v60 = vadd.f32 %v13669_v20, %v13667_v46  ;;  %v3948_v46 = vadd.f32 %v13684_v48, %v13682_v40 }
 0x234   : > { %v4025_v8 = vadd.f32 %v11088_v55, %v3932_v19 }
 0x235   : > { %v3994_v37 = vpop.f32.mrf.mxu1  ;;  %v4109_v26 = vpop.f32.mrf.mxu0  ;;  %v13691_v12 = vadd.f32 %v3729_v32, %v13604_v51  ;;  %v3759_v49 = vadd.f32 %v3758_v5, %v3757_v27  ;;  %v4139_v27 = vadd.f32 %v11099_v28, %v4024_v57  ;;  %v3945_v32 = vadd.f32 %v13675_v31, %v13673_v23 }
 0x236   : > { %v4137_v5 = vadd.f32 %v4106_v56, %v4022_v58  ;;  %v4023_v29 = vadd.f32 %v3994_v37, %v3924_v60  ;;  %v4140_v54 = vadd.f32 %v11100_v44, %v4025_v8  ;;  %v3940_v31 = vadd.f32 %v13688_v25, %v13686_v45 }
 0x237   : > { %v11091_v35 = vpop.f32.mrf.mxu1  ;;  %v11103_v34 = vpop.f32.mrf.mxu0  ;;  %v13694_v4 = vadd.f32 %v3759_v49, %v13606_v9  ;;  %v3937_v49 = vadd.f32 %v13680_v22, %v13678_v16 }
 0x238   : > { %v4028_v15 = vadd.f32 %v11091_v35, %v3945_v32  ;;  %v4138_v55 = vadd.f32 %v4109_v26, %v4023_v29 }
 0x239   : > { %v4007_v50 = vpop.f32.mrf.mxu1  ;;  %v4122_v62 = vpop.f32.mrf.mxu0 }
 0x23a   : > { %v4026_v20 = vadd.f32 %v4007_v50, %v3937_v49 }
 0x23b   : > { %v11092_v2 = vpop.f32.mrf.mxu1  ;;  %v13696_v14 = vpop.f32.mrf.mxu0 }
 0x23c   : > { %v4029_v56 = vadd.f32 %v11092_v2, %v3948_v46  ;;  %v4141_v35 = vadd.f32 %v4122_v62, %v4026_v20 }
 0x23d   : > { %v4010_v18 = vpop.f32.mrf.mxu1  ;;  %v13698_v7 = vpop.f32.mrf.mxu0 }
 0x23e   : > { %v4144_v26 = vadd.f32 %v13696_v14, %v4029_v56 }
 0x23f   : > { %v11111_v47 = vpop.f32.mrf.mxu1  ;;  %v11123_v61 = vpop.f32.mrf.mxu0 }
 0x240   : > { %v4230_v13 = vadd.f32 %v11111_v47, %v4139_v27  ;;  %v4143_v47 = vadd.f32 %v11103_v34, %v4028_v15 }
 0x241   : > { %v4197_v24 = vpop.f32.mrf.mxu1  ;;  %v4276_v33 = vpop.f32.mrf.mxu0 }
 0x242   : > { %v4228_v43 = vadd.f32 %v4197_v24, %v4137_v5  ;;  %v4309_v10 = vadd.f32 %v11123_v61, %v4230_v13  ;;  %v4027_v24 = vadd.f32 %v4010_v18, %v3940_v31 }
 0x243   : > { %v11112_v51 = vpop.f32.mrf.mxu1  ;;  %v11124_v63 = vpop.f32.mrf.mxu0 }
 0x244   : > { %v4231_v57 = vadd.f32 %v11112_v51, %v4140_v54  ;;  %v4307_v16 = vadd.f32 %v4276_v33, %v4228_v43  ;;  %v4142_v25 = vadd.f32 %v13698_v7, %v4027_v24  ;;  %v12067_v24 = vld [vmem:[%s15453_s2 + $0xc] sm:$0xff]  }
 0x245   : > { %v4200_v11 = vpop.f32.mrf.mxu1  ;;  %v4279_v0 = vpop.f32.mrf.mxu0 }
 0x246   : > { %v4229_v22 = vadd.f32 %v4200_v11, %v4138_v55  ;;  %v4310_v58 = vadd.f32 %v11124_v63, %v4231_v57 }
 0x247   : > { %v11115_v21 = vpop.f32.mrf.mxu1  ;;  %v11127_v1 = vpop.f32.mrf.mxu0 }
 0x248   : > { %v4234_v40 = vadd.f32 %v11115_v21, %v4143_v47  ;;  %v4308_v60 = vadd.f32 %v4279_v0, %v4229_v22 }
 0x249   : > { %v4213_v9 = vpop.f32.mrf.mxu1  ;;  %v13700_v38 = vpop.f32.mrf.mxu0 }
 0x24a   : > { %v4232_v61 = vadd.f32 %v4213_v9, %v4141_v35  ;;  %v4313_v33 = vadd.f32 %v11127_v1, %v4234_v40 }
 0x24b   : > { %v11116_v6 = vpop.f32.mrf.mxu1  ;;  %v13702_v42 = vpop.f32.mrf.mxu0 }
 0x24c   : > { %v4235_v34 = vadd.f32 %v11116_v6, %v4144_v26  ;;  %v4311_v63 = vadd.f32 %v13700_v38, %v4232_v61 }
 0x24d   : > { %v4216_v59 = vpop.f32.mrf.mxu1  ;;  %v13706_v36 = vpop.f32.mrf.mxu0 }
 0x24e   : > { %v4233_v21 = vadd.f32 %v4216_v59, %v4142_v25  ;;  %v4314_v9 = vadd.f32 %v13702_v42, %v4235_v34  ;;  %v12071_v25 = vld [vmem:[%s15453_s2 + $0x8] ss:$0 sps:$4 sm:$0xff]   ;;  %v12077_v34 = vld [vmem:[%s15453_s2] sm:$0xff]  }
 0x24f   : > { %v11135_v41 = vpop.f32.mrf.mxu1  ;;  %v11147_v3 = vpop.f32.mrf.mxu0  ;;  %11634 = vmatprep.subr.msk.bf16.mxu1 %vm1004_vm0, %v12071_v25 }
 0x250   : > { %v4424_v44 = vadd.f32 %v11135_v41, %v4309_v10 }
 0x251   : > { %v4391_v39 = vpop.f32.mrf.mxu1  ;;  %v4482_v30 = vpop.f32.mrf.mxu0 }
 0x252   : > { %v4422_v48 = vadd.f32 %v4391_v39, %v4307_v16  ;;  %v4515_v27 = vadd.f32 %v11147_v3, %v4424_v44 }
 0x253   : > { %v11136_v17 = vpop.f32.mrf.mxu1  ;;  %v11148_v52 = vpop.f32.mrf.mxu0 }
 0x254   : > { %v4425_v45 = vadd.f32 %v11136_v17, %v4310_v58  ;;  %v4513_v11 = vadd.f32 %v4482_v30, %v4422_v48  ;;  %v4312_v30 = vadd.f32 %v13706_v36, %v4233_v21  ;;  %v5507_v58 = vld [vmem:[#allocation2 + $0x8] sm:$0xf]  ;;  %v5511_v21 = vld [vmem:[#allocation2 + $0x18] sm:$0xf] }
 0x255   : > { %v4394_v53 = vpop.f32.mrf.mxu1  ;;  %v4485_v23 = vpop.f32.mrf.mxu0 }
 0x256   : > { %v4423_v62 = vadd.f32 %v4394_v53, %v4308_v60  ;;  %v4516_v8 = vadd.f32 %v11148_v52, %v4425_v45 }
 0x257   : > { %v11139_v28 = vpop.f32.mrf.mxu1  ;;  %v11151_v50 = vpop.f32.mrf.mxu0 }
 0x258   : > { %v4428_v14 = vadd.f32 %v11139_v28, %v4313_v33  ;;  %v4514_v6 = vadd.f32 %v4485_v23, %v4423_v62  ;;  %v5508_v33 = vld [vmem:[#allocation2 + $0xc] sm:$0xf]  ;;  %v5510_v62 = vld [vmem:[#allocation2 + $0x14] sm:$0xf] }
 0x259   : > { %v4407_v37 = vpop.f32.mrf.mxu1  ;;  %v4498_v18 = vpop.f32.mrf.mxu0 }
 0x25a   : > { %v4426_v3 = vadd.f32 %v4407_v37, %v4311_v63  ;;  %v4519_v59 = vadd.f32 %v11151_v50, %v4428_v14  ;;  %v12066_v37 = vld [vmem:[%s15453_s2 + $0x14] ss:$0 sps:$4 sm:$0xff]   ;;  %v13765_v63 = vsel %vm1004_vm0, %v12071_v25, 0  ;;  %v4672_v25 = vld [vmem:[#allocation3 + $0x10] sm:$0xff] }
 0x25b   : > { %v11140_v19 = vpop.f32.mrf.mxu1  ;;  %v11152_v17 = vpop.f32.mrf.mxu0  ;;  %11633 = vmatprep.subr.msk.bf16.mxu0 %vm1004_vm0, %v12066_v37  ;;  %11178 = vmatpush3.bf16.msra.mxu1 %v13765_v63 }
 0x25c   : > { %v4429_v32 = vadd.f32 %v11140_v19, %v4314_v9  ;;  %v4517_v52 = vadd.f32 %v4498_v18, %v4426_v3  ;;  %v13745_v19 = vld [vmem:[#allocation2 + $0x4] sm:$0xf]  ;;  %v5505_v3 = vld [vmem:[#allocation2] sm:$0xf]  ;;  %11179 = vmatprep.subr.bf16.mxu1 %v12077_v34 }
 0x25d   : > { %v4410_v51 = vpop.f32.mrf.mxu1  ;;  %v4501_v54 = vpop.f32.mrf.mxu0  ;;  %v9915_v45 = vcombine.low %v13745_v19, %v5507_v58 }
 0x25e   : > { %v4427_v49 = vadd.f32 %v4410_v51, %v4312_v30  ;;  %v4520_v20 = vadd.f32 %v11152_v17, %v4429_v32 }
 0x25f   : > { %v11159_v2 = vpop.f32.mrf.mxu1  ;;  %11169 = vmatprep.mubr.msk.bf16.mxu0 %vm991_vm3, %v9915_v45  ;;  %11180 = vmatpush3.bf16.msra.mxu1 %v12077_v34 }
 0x260   : > { %v4594_v41 = vadd.f32 %v11159_v2, %v4515_v27  ;;  %v4518_v47 = vadd.f32 %v4501_v54, %v4427_v49  ;;  %v13752_v27 = vsel %vm1004_vm0, %v12066_v37, 0 }
 0x261   : > { %v4561_v39 = vpop.f32.mrf.mxu1  ;;  %11166 = vmatpush3.bf16.msra.mxu0 %v13752_v27 }
 0x262   : > { %4603 = vst.msk [vmem:[#allocation3 + $0xd0] sm:$0xff] %vm325_vm5, %v4594_v41  ;;  %v4592_v0 = vadd.f32 %v4561_v39, %v4513_v11  ;;  %v4633_v5 = vmul.f32 %v4594_v41, %v4594_v41  ;;  %v4612_v28 = vsel %vm325_vm5, %v4594_v41, 0.0  ;;  %v5509_v11 = vld [vmem:[#allocation2 + $0x10] sm:$0xf]  ;;  %11167 = vmatprep.subr.bf16.mxu0 %v12067_v24  ;;  %v12076_v39 = vld [vmem:[%s15453_s2 + $0x20] ss:$0 sps:$4 sm:$0xff]  }
 0x263   : > { %v11160_v7 = vpop.f32.mrf.mxu1  ;;  %v9916_v17 = vcombine.low %v5508_v33, %v5509_v11 }
 0x264   : > { %4601 = vst.msk [vmem:[#allocation3 + $0xc0] sm:$0xff] %vm325_vm5, %v4592_v0  ;;  %v4595_v1 = vadd.f32 %v11160_v7, %v4516_v8  ;;  %v4631_v29 = vmul.f32 %v4592_v0, %v4592_v0  ;;  %v4609_v42 = vsel %vm325_vm5, %v4592_v0, 0.0  ;;  %v4642_v57 = vsel %vm325_vm5, %v4633_v5, 0.0 }
 0x265   : > { %v4564_v38 = vpop.f32.mrf.mxu1  ;;  %11168 = vmatpush3.bf16.msra.mxu0 %v12067_v24 }
 0x266   : > { %4604 = vst.msk [vmem:[#allocation3 + $0xd8] sm:$0xff] %vm325_vm5, %v4595_v1  ;;  %v4593_v13 = vadd.f32 %v4564_v38, %v4514_v6  ;;  %v4634_v15 = vmul.f32 %v4595_v1, %v4595_v1  ;;  %v4639_v23 = vsel %vm325_vm5, %v4631_v29, 0.0  ;;  %v4614_v16 = vsel %vm325_vm5, %v4595_v1, 0.0  ;;  %11635 = vmatprep.subr.msk.bf16.mxu0 %vm1004_vm0, %v12076_v39 }
 0x267   : > { %v11163_v53 = vpop.f32.mrf.mxu1  ;;  %v9917_v38 = vcombine.low %v5510_v62, %v5511_v21  ;;  %v13779_v29 = vsel %vm1004_vm0, %v12076_v39, 0  ;;  %v4677_v39 = vld [vmem:[#allocation3 + $0x38] sm:$0xff] }
 0x268   : > { %4602 = vst.msk [vmem:[#allocation3 + $0xc8] sm:$0xff] %vm325_vm5, %v4593_v13  ;;  %v4610_v43 = vsel %vm325_vm5, %v4593_v13, 0.0  ;;  %v4632_v36 = vmul.f32 %v4593_v13, %v4593_v13  ;;  %v4598_v46 = vadd.f32 %v11163_v53, %v4519_v59  ;;  %v4644_v40 = vsel %vm325_vm5, %v4634_v15, 0.0  ;;  %v12078_v13 = vld [vmem:[%s15453_s2 + $0x18] sm:$0xff]   ;;  %11170 = vmatmul.mubr.msk.bf16.vlgmr.msra.gmra.mxu0 %vm991_vm3, %v9916_v17 }
 0x269   : > { %v4611_v55 = vadd.f32 %v4610_v43, %v4609_v42  ;;  %v4577_v10 = vpop.f32.mrf.mxu1  ;;  %v9926_v53 = vcombine.low %v5507_v58, %v5508_v33  ;;  %11173 = vmatprep.mubr.msk.bf16.mxu0 %vm991_vm3, %v9917_v38  ;;  %11190 = vmatpush3.bf16.msra.mxu0 %v13779_v29  ;;  %v4671_v33 = vld [vmem:[#allocation3 + $0x8] sm:$0xff] }
 0x26a   : > { %v4640_v31 = vsel %vm325_vm5, %v4632_v36, 0.0  ;;  %4607 = vst.msk [vmem:[#allocation3 + $0xf0] sm:$0xff] %vm325_vm5, %v4598_v46  ;;  %v4596_v56 = vadd.f32 %v4577_v10, %v4517_v52  ;;  %v4637_v8 = vmul.f32 %v4598_v46, %v4598_v46  ;;  %v4620_v1 = vsel %vm325_vm5, %v4598_v46, 0.0  ;;  %v5512_v36 = vld [vmem:[#allocation2 + $0x1c] sm:$0xf]  ;;  %11191 = vmatprep.subr.bf16.mxu0 %v12078_v13 }
 0x26b   : > { %v4613_v22 = vadd.f32 %v4612_v28, %v4611_v55  ;;  %v4641_v44 = vadd.f32 %v4640_v31, %v4639_v23  ;;  %v11164_v35 = vpop.f32.mrf.mxu1  ;;  %v9925_v52 = vcombine.low %v5505_v3, %v13745_v19  ;;  %v13789_v46 = vld [vmem:[#allocation2 + $0x20] sm:$0xf]  ;;  %v9927_v55 = vcombine.low %v5509_v11, %v5510_v62  ;;  %v4675_v3 = vld [vmem:[#allocation3 + $0x28] sm:$0xff] }
 0x26c   : > { %4605 = vst.msk [vmem:[#allocation3 + $0xe0] sm:$0xff] %vm325_vm5, %v4596_v56  ;;  %v4616_v48 = vsel %vm325_vm5, %v4596_v56, 0.0  ;;  %v4635_v50 = vmul.f32 %v4596_v56, %v4596_v56  ;;  %v4599_v26 = vadd.f32 %v11164_v35, %v4520_v20  ;;  %v4650_v49 = vsel %vm325_vm5, %v4637_v8, 0.0  ;;  %v4674_v8 = vld [vmem:[#allocation3 + $0x20] sm:$0xff] }
 0x26d   : > { %v4643_v61 = vadd.f32 %v4642_v57, %v4641_v44  ;;  %v4615_v51 = vadd.f32 %v4614_v16, %v4613_v22  ;;  %v4580_v60 = vpop.f32.mrf.mxu1  ;;  %11181 = vmatprep.mubr.msk.bf16.mxu1 %vm991_vm3, %v9925_v52  ;;  %v9918_v23 = vcombine.low %v5512_v36, %v13789_v46  ;;  %11192 = vmatpush3.bf16.msra.mxu0 %v12078_v13 }
 0x26e   : > { %4608 = vst.msk [vmem:[#allocation3 + $0xf8] sm:$0xff] %vm325_vm5, %v4599_v26  ;;  %v4597_v2 = vadd.f32 %v4580_v60, %v4518_v47  ;;  %v4646_v14 = vsel %vm325_vm5, %v4635_v50, 0.0  ;;  %v4638_v30 = vmul.f32 %v4599_v26, %v4599_v26  ;;  %v4622_v42 = vsel %vm325_vm5, %v4599_v26, 0.0  ;;  %11182 = vmatmul.mubr.msk.bf16.vlgmr.msra.gmra.mxu1 %vm991_vm3, %v9926_v53 }
 0x26f   : > { %v4617_v18 = vadd.f32 %v4616_v48, %v4615_v51  ;;  %v4645_v41 = vadd.f32 %v4644_v40, %v4643_v61  ;;  %11185 = vmatprep.mubr.msk.bf16.mxu1 %vm991_vm3, %v9927_v55  ;;  %v9928_v37 = vcombine.low %v5511_v21, %v5512_v36  ;;  %v4676_v21 = vld [vmem:[#allocation3 + $0x30] sm:$0xff] }
 0x270   : > { %4606 = vst.msk [vmem:[#allocation3 + $0xe8] sm:$0xff] %vm325_vm5, %v4597_v2  ;;  %v4618_v0 = vsel %vm325_vm5, %v4597_v2, 0.0  ;;  %v4636_v9 = vmul.f32 %v4597_v2, %v4597_v2  ;;  %v4652_v43 = vsel %vm325_vm5, %v4638_v30, 0.0  ;;  %11174 = vmatmul.mubr.msk.bf16.gmra.mxu0 %vm991_vm3, %v9918_v23  ;;  %v4670_v2 = vld [vmem:[#allocation3] sm:$0xff] }
 0x271   : > { %v4647_v7 = vadd.f32 %v4646_v14, %v4645_v41  ;;  %v4619_v6 = vadd.f32 %v4618_v0, %v4617_v18  ;;  %11193 = vmatprep.mubr.msk.bf16.mxu0 %vm991_vm3, %v9926_v53 }
 0x272   : > { %v4648_v32 = vsel %vm325_vm5, %v4636_v9, 0.0 }
 0x273   : > { %v4621_v59 = vadd.f32 %v4620_v1, %v4619_v6  ;;  %v4649_v5 = vadd.f32 %v4648_v32, %v4647_v7 }
 0x275   : > { %v4623_v54 = vadd.f32 %v4622_v42, %v4621_v59  ;;  %v4651_v15 = vadd.f32 %v4650_v49, %v4649_v5 }
 0x276   : > { %11186 = vmatmul.mubr.msk.bf16.gmra.mxu1 %vm991_vm3, %v9928_v37 }
 0x277   : > { %v4624_v20 = vrot.slane %v4623_v54, 4  ;;  %v4653_v28 = vadd.f32 %v4652_v43, %v4651_v15 }
 0x278   : > { %11194 = vmatmul.mubr.msk.bf16.vlgmr.msra.gmra.mxu0 %vm991_vm3, %v9927_v55 }
 0x279   : > { %v4625_v10 = vadd.f32 %v4624_v20, %v4623_v54  ;;  %v4654_v57 = vrot.slane %v4653_v28, 4  ;;  %11197 = vmatprep.mubr.msk.bf16.mxu0 %vm991_vm3, %v9928_v37 }
 0x27b   : > { %v4626_v31 = vrot.slane %v4625_v10, 2  ;;  %v4655_v56 = vadd.f32 %v4654_v57, %v4653_v28 }
 0x27d   : > { %v4627_v47 = vadd.f32 %v4626_v31, %v4625_v10  ;;  %v4656_v16 = vrot.slane %v4655_v56, 2 }
 0x27f   : > { %v4628_v22 = vrot.slane %v4627_v47, 1  ;;  %v4657_v44 = vadd.f32 %v4656_v16, %v4655_v56 }
 0x281   : > { %v4629_v35 = vadd.f32 %v4628_v22, %v4627_v47  ;;  %v4658_v24 = vrot.slane %v4657_v44, 1 }
 0x283   : > { %v4630_v19 = vadd.f32 %v4629_v35, %v13691_v12  ;;  %v4659_v58 = vadd.f32 %v4658_v24, %v4657_v44  ;;  %v13807_v12 = vld [vmem:[%s15453_s2 + $0x2c] ss:$0 sps:$4 sm:$0xff]  }
 0x284   : > { %11636 = vmatprep.subr.msk.bf16.mxu1 %vm1004_vm0, %v13807_v12 }
 0x285   : > { %v4660_v40 = vadd.f32 %v4659_v58, %v13694_v4  ;;  %v4661_v48 = vmul.f32 0.00390625, %v4630_v19  ;;  %v4673_v4 = vld [vmem:[#allocation3 + $0x18] sm:$0xff] }
 0x287   : > { %v4662_v50 = vmul.f32 0.00390625, %v4660_v40  ;;  %v4663_v26 = vmul.f32 %v4661_v48, %v4661_v48  ;;  %v4668_v45 = vsub.f32 0.0, %v4661_v48 }
 0x289   : > { %v4664_v61 = vsub.f32 %v4662_v50, %v4663_v26  ;;  %v4872_v50 = vld [vmem:[#allocation3 + $0x50] sm:$0xff]  ;;  %v4873_v26 = vld [vmem:[#allocation3 + $0x58] sm:$0xff] }
 0x28b   : > { %v4665_v51 = vmax.f32 %v4664_v61, 0.0  ;;  %v4870_v61 = vld [vmem:[#allocation3 + $0x40] sm:$0xff] }
 0x28d   : > { %v4666_v60 = vadd.f32 1e-05, %v4665_v51 }
 0x28f   : > { %12182 = vrsqrt.f32 %v4666_v60 }
 0x29c   : > { %v13809_v34 = vpop.eup %12182 }
 0x29d   : > { %v13812_v11 = vmul.f32 %v13809_v34, %v4668_v45  ;;  %v4680_v62 = vmul.f32 %v13809_v34, %v4672_v25  ;;  %v4681_v18 = vmul.f32 %v13809_v34, %v4673_v4  ;;  %v4678_v41 = vmul.f32 %v13809_v34, %v4670_v2  ;;  %v4871_v25 = vld [vmem:[#allocation3 + $0x48] sm:$0xff] }
 0x29e   : > { %v4679_v14 = vmul.f32 %v13809_v34, %v4671_v33  ;;  %v4684_v0 = vmul.f32 %v13809_v34, %v4676_v21  ;;  %v4685_v9 = vmul.f32 %v13809_v34, %v4677_v39  ;;  %v4682_v7 = vmul.f32 %v13809_v34, %v4674_v8 }
 0x29f   : > { %v4688_v6 = vadd.f32 %v4680_v62, %v13812_v11  ;;  %v4689_v17 = vadd.f32 %v4681_v18, %v13812_v11  ;;  %v4686_v1 = vadd.f32 %v4678_v41, %v13812_v11  ;;  %v4683_v30 = vmul.f32 %v13809_v34, %v4675_v3  ;;  %v4876_v41 = vld [vmem:[#allocation3 + $0x70] sm:$0xff]  ;;  %v13886_v3 = vld [vmem:[%s15453_s2 + $0x38] ss:$0 sps:$4 sm:$0xff]  }
 0x2a0   : > { %v4687_v32 = vadd.f32 %v4679_v14, %v13812_v11  ;;  %v4692_v38 = vadd.f32 %v4684_v0, %v13812_v11  ;;  %v4693_v59 = vadd.f32 %v4685_v9, %v13812_v11  ;;  %v4690_v5 = vadd.f32 %v4682_v7, %v13812_v11  ;;  %v4877_v0 = vld [vmem:[#allocation3 + $0x78] sm:$0xff]  ;;  %v4874_v9 = vld [vmem:[#allocation3 + $0x60] sm:$0xff]  ;;  %11637 = vmatprep.subr.msk.bf16.mxu0 %vm1004_vm0, %v13886_v3 }
 0x2a1   : > { %v13831_v13 = vmax.f32 %v4688_v6, 0.0  ;;  %v13833_v52 = vmax.f32 %v4689_v17, 0.0  ;;  %v13835_v49 = vmax.f32 %v4686_v1, 0.0  ;;  %v4691_v42 = vadd.f32 %v4683_v30, %v13812_v11  ;;  %v4875_v1 = vld [vmem:[#allocation3 + $0x68] sm:$0xff] }
 0x2a2   : > { %v13838_v53 = vmax.f32 %v4687_v32, 0.0  ;;  %v13840_v54 = vmax.f32 %v4692_v38, 0.0  ;;  %v13842_v15 = vmax.f32 %v4693_v59, 0.0  ;;  %v13844_v43 = vmax.f32 %v4690_v5, 0.0 }
 0x2a3   : > { %v11825_v36 = vpack.i.bf16 %v13833_v52, %v13831_v13  ;;  %v4736_v20 = vrot.slane %v13831_v13, 1  ;;  %v4737_v28 = vrot.slane %v13833_v52, 1  ;;  %v4734_v55 = vrot.slane %v13835_v49, 1 }
 0x2a4   : > { %v11820_v10 = vpack.i.bf16 %v13838_v53, %v13835_v49  ;;  %v4735_v57 = vrot.slane %v13838_v53, 1  ;;  %v11845_v23 = vpack.i.bf16 %v13842_v15, %v13840_v54  ;;  %v13856_v31 = vmax.f32 %v4691_v42, 0.0 }
 0x2a5   : > { %11826 = vrot.lane.b32.xlu1 %v11825_v36, %s12231_s28  ;;  %v4752_v56 = vsel %vm260_vm2, %v4736_v20, 0.0  ;;  %v4753_v37 = vsel %vm260_vm2, %v4737_v28, 0.0  ;;  %v4750_v47 = vsel %vm260_vm2, %v4734_v55, 0.0  ;;  %v4740_v16 = vrot.slane %v13840_v54, 1 }
 0x2a6   : > { %11821 = vrot.lane.b32.xlu0 %v11820_v10, %s12231_s28  ;;  %v11840_v22 = vpack.i.bf16 %v4753_v37, %v4752_v56  ;;  %v4751_v44 = vsel %vm260_vm2, %v4735_v57, 0.0  ;;  %v11835_v35 = vpack.i.bf16 %v13856_v31, %v13844_v43  ;;  %v4741_v24 = vrot.slane %v13842_v15, 1 }
 0x2a7   : > { %v11830_v19 = vpack.i.bf16 %v4751_v44, %v4750_v47  ;;  %v4756_v58 = vsel %vm260_vm2, %v4740_v16, 0.0  ;;  %v4738_v40 = vrot.slane %v13844_v43, 1  ;;  %v4739_v48 = vrot.slane %v13856_v31, 1 }
 0x2a8   : > { %v4757_v51 = vsel %vm260_vm2, %v4741_v24, 0.0  ;;  %v4880_v60 = vmul.f32 %v13809_v34, %v4872_v50  ;;  %v4881_v45 = vmul.f32 %v13809_v34, %v4873_v26  ;;  %v4878_v4 = vmul.f32 %v13809_v34, %v4870_v61  ;;  %v5070_v50 = vld [vmem:[#allocation3 + $0x80] sm:$0xff] }
 0x2a9   : > { %11841 = vrot.lane.b32.xlu1 %v11840_v22, %s12232_s29  ;;  %v11855_v2 = vpack.i.bf16 %v4757_v51, %v4756_v58  ;;  %v4754_v33 = vsel %vm260_vm2, %v4738_v40, 0.0  ;;  %v4755_v62 = vsel %vm260_vm2, %v4739_v48, 0.0  ;;  %v4879_v18 = vmul.f32 %v13809_v34, %v4871_v25  ;;  %v5071_v51 = vld [vmem:[#allocation3 + $0x88] sm:$0xff] }
 0x2aa   : > { %11831 = vrot.lane.b32.xlu0 %v11830_v19, %s12232_s29  ;;  %v11850_v21 = vpack.i.bf16 %v4755_v62, %v4754_v33  ;;  %v4888_v39 = vadd.f32 %v4880_v60, %v13812_v11  ;;  %v4889_v8 = vadd.f32 %v4881_v45, %v13812_v11  ;;  %v4886_v14 = vadd.f32 %v4878_v4, %v13812_v11  ;;  %v5072_v45 = vld [vmem:[#allocation3 + $0x90] sm:$0xff] }
 0x2ab   : > { %v4887_v7 = vadd.f32 %v4879_v18, %v13812_v11  ;;  %v4884_v6 = vmul.f32 %v13809_v34, %v4876_v41  ;;  %v4885_v17 = vmul.f32 %v13809_v34, %v4877_v0  ;;  %v4882_v30 = vmul.f32 %v13809_v34, %v4874_v9  ;;  %v5073_v41 = vld [vmem:[#allocation3 + $0x98] sm:$0xff]  ;;  %v5074_v0 = vld [vmem:[#allocation3 + $0xa0] sm:$0xff] }
 0x2ac   : > { %v13892_v32 = vmax.f32 %v4888_v39, 0.0  ;;  %v13894_v38 = vmax.f32 %v4889_v8, 0.0  ;;  %v13896_v59 = vmax.f32 %v4886_v14, 0.0  ;;  %v4883_v5 = vmul.f32 %v13809_v34, %v4875_v1 }
 0x2ad   : > { %11846 = vrot.lane.b32.xlu1 %v11845_v23, %s12231_s28  ;;  %v13902_v42 = vmax.f32 %v4887_v7, 0.0  ;;  %v4892_v36 = vadd.f32 %v4884_v6, %v13812_v11  ;;  %v4893_v20 = vadd.f32 %v4885_v17, %v13812_v11  ;;  %v4890_v28 = vadd.f32 %v4882_v30, %v13812_v11  ;;  %v5075_v17 = vld [vmem:[#allocation3 + $0xa8] sm:$0xff] }
 0x2ae   : > { %11836 = vrot.lane.b32.xlu0 %v11835_v35, %s12231_s28  ;;  %v11865_v55 = vpack.i.bf16 %v13894_v38, %v13892_v32  ;;  %v4936_v10 = vrot.slane %v13892_v32, 1  ;;  %v4937_v57 = vrot.slane %v13894_v38, 1  ;;  %v4934_v56 = vrot.slane %v13896_v59, 1 }
 0x2af   : > { %v11860_v23 = vpack.i.bf16 %v13902_v42, %v13896_v59  ;;  %v4935_v37 = vrot.slane %v13902_v42, 1  ;;  %v13916_v47 = vmax.f32 %v4892_v36, 0.0  ;;  %v13918_v16 = vmax.f32 %v4893_v20, 0.0 }
 0x2b0   : > { %v4952_v22 = vsel %vm260_vm2, %v4936_v10, 0.0  ;;  %v4953_v44 = vsel %vm260_vm2, %v4937_v57, 0.0  ;;  %v4950_v35 = vsel %vm260_vm2, %v4934_v56, 0.0  ;;  %v4891_v24 = vadd.f32 %v4883_v5, %v13812_v11 }
 0x2b1   : > { %11856 = vrot.lane.b32.xlu1 %v11855_v2, %s12232_s29  ;;  %v11880_v19 = vpack.i.bf16 %v4953_v44, %v4952_v22  ;;  %v4951_v58 = vsel %vm260_vm2, %v4935_v37, 0.0  ;;  %v11885_v40 = vpack.i.bf16 %v13918_v16, %v13916_v47  ;;  %v13928_v48 = vmax.f32 %v4890_v28, 0.0  ;;  %v5076_v28 = vld [vmem:[#allocation3 + $0xb0] sm:$0xff] }
 0x2b2   : > { %11851 = vrot.lane.b32.xlu0 %v11850_v21, %s12232_s29  ;;  %v11870_v26 = vpack.i.bf16 %v4951_v58, %v4950_v35  ;;  %v13931_v61 = vmax.f32 %v4891_v24, 0.0  ;;  %v5078_v60 = vmul.f32 %v13809_v34, %v5070_v50  ;;  %v5079_v4 = vmul.f32 %v13809_v34, %v5071_v51 }
 0x2b3   : > { %v4938_v25 = vrot.slane %v13928_v48, 1  ;;  %v5080_v2 = vmul.f32 %v13809_v34, %v5072_v45  ;;  %v4940_v21 = vrot.slane %v13916_v47, 1  ;;  %v5081_v14 = vmul.f32 %v13809_v34, %v5073_v41 }
 0x2b4   : > { %v11875_v33 = vpack.i.bf16 %v13931_v61, %v13928_v48  ;;  %v4939_v62 = vrot.slane %v13931_v61, 1  ;;  %v5086_v18 = vadd.f32 %v5078_v60, %v13812_v11  ;;  %v5087_v8 = vadd.f32 %v5079_v4, %v13812_v11 }
 0x2b5   : > { %11866 = vrot.lane.b32.xlu1 %v11865_v55, %s12231_s28  ;;  %v13944_v39 = vsel %vm260_vm2, %v4938_v25, 0.0  ;;  %v5088_v6 = vadd.f32 %v5080_v2, %v13812_v11  ;;  %v5082_v1 = vmul.f32 %v13809_v34, %v5074_v0  ;;  %v5089_v36 = vadd.f32 %v5081_v14, %v13812_v11  ;;  %v5077_v2 = vld [vmem:[#allocation3 + $0xb8] sm:$0xff] }
 0x2b6   : > { %11861 = vrot.lane.b32.xlu0 %v11860_v23, %s12231_s28  ;;  %v4955_v9 = vsel %vm260_vm2, %v4939_v62, 0.0  ;;  %v13950_v7 = vmax.f32 %v5086_v18, 0.0  ;;  %v13955_v5 = vmax.f32 %v5087_v8, 0.0  ;;  %v5083_v20 = vmul.f32 %v13809_v34, %v5075_v17  ;;  %v5271_v8 = vld [vmem:[#allocation3 + $0xc8] sm:$0xff] }
 0x2b7   : > { %v11890_v30 = vpack.i.bf16 %v4955_v9, %v13944_v39  ;;  %v13960_v10 = vmax.f32 %v5088_v6, 0.0  ;;  %v5090_v57 = vadd.f32 %v5082_v1, %v13812_v11  ;;  %v5084_v56 = vmul.f32 %v13809_v34, %v5076_v28  ;;  %v5270_v39 = vld [vmem:[#allocation3 + $0xc0] sm:$0xff]  ;;  %v5272_v6 = vld [vmem:[#allocation3 + $0xd0] sm:$0xff] }
 0x2b8   : > { %v5134_v55 = vrot.slane %v13950_v7, 1  ;;  %v11895_v23 = vpack.i.bf16 %v13955_v5, %v13950_v7  ;;  %v5135_v37 = vrot.slane %v13955_v5, 1  ;;  %v13968_v22 = vmax.f32 %v5089_v36, 0.0 }
 0x2b9   : > { %11881 = vrot.lane.b32.xlu1 %v11880_v19, %s12232_s29  ;;  %v5091_v44 = vadd.f32 %v5083_v20, %v13812_v11  ;;  %v13975_v24 = vmax.f32 %v5090_v57, 0.0  ;;  %v5092_v58 = vadd.f32 %v5084_v56, %v13812_v11  ;;  %v4956_v45 = vsel %vm260_vm2, %v4940_v21, 0.0 }
 0x2ba   : > { %11871 = vrot.lane.b32.xlu0 %v11870_v26, %s12232_s29  ;;  %v13973_v35 = vsel %vm260_vm2, %v5134_v55, 0.0  ;;  %v13979_v19 = vsel %vm260_vm2, %v5135_v37, 0.0  ;;  %v11900_v50 = vpack.i.bf16 %v13968_v22, %v13960_v10  ;;  %v5137_v60 = vrot.slane %v13968_v22, 1  ;;  %v5274_v37 = vld [vmem:[#allocation3 + $0xe0] sm:$0xff] }
 0x2bb   : > { %v13983_v51 = vmax.f32 %v5091_v44, 0.0  ;;  %v11905_v26 = vpack.i.bf16 %v13979_v19, %v13973_v35  ;;  %v5138_v25 = vrot.slane %v13975_v24, 1  ;;  %v13990_v4 = vmax.f32 %v5092_v58, 0.0  ;;  %v5514_v19 = vld [vmem:[#allocation2 + $0x24] sm:$0xf] }
 0x2bc   : > { %v13996_v18 = vsel %vm260_vm2, %v5137_v60, 0.0  ;;  %v5085_v41 = vmul.f32 %v13809_v34, %v5077_v2  ;;  %v5279_v9 = vmul.f32 %v13809_v34, %v5271_v8  ;;  %v5280_v20 = vmul.f32 %v13809_v34, %v5272_v6  ;;  %v5276_v8 = vld [vmem:[#allocation3 + $0xf0] sm:$0xff] }
 0x2bd   : > { %11886 = vrot.lane.b32.xlu1 %v11885_v40, %s12231_s28  ;;  %v11910_v62 = vpack.i.bf16 %v13983_v51, %v13975_v24  ;;  %v5139_v21 = vrot.slane %v13983_v51, 1  ;;  %v14002_v14 = vsel %vm260_vm2, %v5138_v25, 0.0  ;;  %v5140_v0 = vrot.slane %v13990_v4, 1  ;;  %v5275_v25 = vld [vmem:[#allocation3 + $0xe8] sm:$0xff] }
 0x2be   : > { %11876 = vrot.lane.b32.xlu0 %v11875_v33, %s12231_s28  ;;  %v5278_v40 = vmul.f32 %v13809_v34, %v5270_v39  ;;  %v11915_v17 = vpack.i.bf16 %v14002_v14, %v13996_v18  ;;  %v14010_v1 = vadd.f32 %v5085_v41, %v13812_v11  ;;  %v5273_v33 = vld [vmem:[#allocation3 + $0xd8] sm:$0xff]  ;;  %v5287_v57 = vadd.f32 %v5279_v9, %v13812_v11 }
 0x2bf   : > { %v14013_v36 = vsel %vm260_vm2, %v5139_v21, 0.0  ;;  %v14017_v28 = vsel %vm260_vm2, %v5140_v0, 0.0  ;;  %v5281_v56 = vmul.f32 %v13809_v34, %v5273_v33  ;;  %v4941_v44 = vrot.slane %v13918_v16, 1 }
 0x2c0   : > { %v5286_v55 = vadd.f32 %v5278_v40, %v13812_v11  ;;  %v5288_v60 = vadd.f32 %v5280_v20, %v13812_v11  ;;  %v5282_v2 = vmul.f32 %v13809_v34, %v5274_v37  ;;  %v14031_v21 = vmax.f32 %v5287_v57, 0.0 }
 0x2c1   : > { %5002 = vrot.lane.b32.xlu1 %v4956_v45, %s12232_s29  ;;  %v5289_v39 = vadd.f32 %v5281_v56, %v13812_v11  ;;  %v5283_v45 = vmul.f32 %v13809_v34, %v5275_v25  ;;  %v5284_v9 = vmul.f32 %v13809_v34, %v5276_v8  ;;  %v5136_v58 = vrot.slane %v13960_v10, 1 }
 0x2c2   : > { %11891 = vrot.lane.b32.xlu0 %v11890_v30, %s12232_s29  ;;  %v14029_v41 = vmax.f32 %v5286_v55, 0.0  ;;  %v14035_v0 = vmax.f32 %v5288_v60, 0.0  ;;  %v5290_v40 = vadd.f32 %v5282_v2, %v13812_v11  ;;  %v5335_v33 = vrot.slane %v14031_v21, 1 }
 0x2c3   : > { %v14043_v20 = vmax.f32 %v5289_v39, 0.0  ;;  %v4957_v55 = vsel %vm260_vm2, %v4941_v44, 0.0  ;;  %v5291_v57 = vadd.f32 %v5283_v45, %v13812_v11  ;;  %v15467_v18 = vpack.i.bf16 %v14017_v28, %v14013_v36 }
 0x2c4   : > { %v11925_v6 = vpack.i.bf16 %v14031_v21, %v14029_v41  ;;  %v5334_v30 = vrot.slane %v14029_v41, 1  ;;  %v14048_v56 = vmax.f32 %v5290_v40, 0.0  ;;  %v5336_v37 = vrot.slane %v14035_v0, 1  ;;  %v5277_v40 = vld [vmem:[#allocation3 + $0xf8] sm:$0xff] }
 0x2c5   : > { %11896 = vrot.lane.b32.xlu1 %v11895_v23, %s12231_s28  ;;  %v5351_v25 = vsel %vm260_vm2, %v5335_v33, 0.0  ;;  %v11930_v2 = vpack.i.bf16 %v14043_v20, %v14035_v0  ;;  %v5337_v39 = vrot.slane %v14043_v20, 1  ;;  %v14057_v8 = vmax.f32 %v5291_v57, 0.0 }
 0x2c6   : > { %5004 = vrot.lane.b32.xlu0 %v4957_v55, %s12232_s29  ;;  %v5350_v60 = vsel %vm260_vm2, %v5334_v30, 0.0  ;;  %v5352_v44 = vsel %vm260_vm2, %v5336_v37, 0.0  ;;  %v5338_v45 = vrot.slane %v14048_v56, 1  ;;  %v5285_v30 = vmul.f32 %v13809_v34, %v5277_v40 }
 0x2c7   : > { %v11935_v23 = vpack.i.bf16 %v5351_v25, %v5350_v60  ;;  %v5353_v55 = vsel %vm260_vm2, %v5337_v39, 0.0  ;;  %v5292_v33 = vadd.f32 %v5284_v9, %v13812_v11  ;;  %v11940_v57 = vpack.i.bf16 %v14057_v8, %v14048_v56  ;;  %v14076_v39 = vld [vmem:[%s15453_s2 + $0x24] sm:$0xff]  }
 0x2c8   : > { %v11945_v37 = vpack.i.bf16 %v5353_v55, %v5352_v44  ;;  %v5339_v60 = vrot.slane %v14057_v8, 1  ;;  %v5354_v25 = vsel %vm260_vm2, %v5338_v45, 0.0  ;;  %v5293_v34 = vadd.f32 %v5285_v30, %v13812_v11  ;;  %v14131_v55 = vld [vmem:[%s15453_s2 + $0x50] ss:$0 sps:$4 sm:$0xff]  }
 0x2c9   : > { %11906 = vrot.lane.b32.xlu1 %v11905_v26, %s12232_s29  ;;  %v14083_v35 = vmax.f32 %v5292_v33, 0.0  ;;  %v14088_v9 = vsel %vm1004_vm0, %v13807_v12, 0  ;;  %v5152_v11 = vsel %vm260_vm2, %v5136_v58, 0.0  ;;  %v14103_v12 = vld [vmem:[%s15453_s2 + $0x30] sm:$0xff]   ;;  %v14125_v58 = vmax.f32 %v14010_v1, 0.0 }
 0x2ca   : > { %11901 = vrot.lane.b32.xlu0 %v11900_v50, %s12231_s28  ;;  %v5355_v26 = vsel %vm260_vm2, %v5339_v60, 0.0  ;;  %v14090_v45 = vmax.f32 %v5293_v34, 0.0  ;;  %11202 = vmatpush3.bf16.msra.mxu1 %v14088_v9  ;;  %v9935_v50 = vcombine.low %v13789_v46, %v5514_v19  ;;  %v14116_v46 = vsel %vm1004_vm0, %v13886_v3, 0 }
 0x2cb   : > { %v11955_v44 = vpack.i.bf16 %v5355_v26, %v5354_v25  ;;  %11203 = vmatprep.subr.bf16.mxu1 %v14076_v39  ;;  %11214 = vmatpush3.bf16.msra.mxu0 %v14116_v46  ;;  %v5141_v3 = vrot.slane %v14125_v58, 1  ;;  %v5340_v1 = vrot.slane %v14083_v35, 1  ;;  %v4711_v30 = vrot.slane %v13838_v53, 7 }
 0x2cc   : > { %v11950_v40 = vpack.i.bf16 %v14090_v45, %v14083_v35  ;;  %11198 = vmatmul.mubr.msk.bf16.gmra.mxu0 %vm991_vm3, %v9935_v50  ;;  %11215 = vmatprep.subr.bf16.mxu0 %v14103_v12  ;;  %v4710_v33 = vrot.slane %v13835_v49, 7  ;;  %v4717_v53 = vrot.slane %v13842_v15, 7 }
 0x2cd   : > { %11911 = vrot.lane.b32.xlu1 %v11910_v62, %s12231_s28  ;;  %v14111_v62 = vld [vmem:[%s15453_s2 + $0x44] ss:$0 sps:$4 sm:$0xff]   ;;  %v5157_v14 = vsel %vm260_vm2, %v5141_v3, 0.0  ;;  %v5356_v28 = vsel %vm260_vm2, %v5340_v1, 0.0  ;;  %v4714_v3 = vrot.slane %v13844_v43, 7 }
 0x2ce   : > { %5194 = vrot.lane.b32.xlu0 %v5152_v11, %s12232_s29  ;;  %11204 = vmatpush3.bf16.msra.mxu1 %v14076_v39 }
 0x2cf   : > { %11638 = vmatprep.subr.msk.bf16.mxu1 %vm1004_vm0, %v14111_v62  ;;  %11216 = vmatpush3.bf16.msra.mxu0 %v14103_v12 }
 0x2d0   : > { %11639 = vmatprep.subr.msk.bf16.mxu0 %vm1004_vm0, %v14131_v55 }
 0x2d1   : > { %11916 = vrot.lane.b32.xlu1 %v11915_v17, %s12232_s29  ;;  %v5341_v17 = vrot.slane %v14090_v45, 1 }
 0x2d2   : > { %5170 = vrot.lane.b32.xlu0 %v13990_v4, %s12231_s28 }
 0x2d3   : > { %v5357_v36 = vsel %vm260_vm2, %v5341_v17, 0.0 }
 0x2d5   : > { %5172 = vrot.lane.b32.xlu1 %v14125_v58, %s12231_s28 }
 0x2d6   : > { %11921 = vrot.lane.b32.xlu0 %v15467_v18, %s12232_s29  ;;  %v4715_v18 = vrot.slane %v13856_v31, 7 }
 0x2d9   : > { %11926 = vrot.lane.b32.xlu1 %v11925_v6, %s12231_s28  ;;  %v4713_v6 = vrot.slane %v13833_v52, 7  ;;  %v4726_v52 = vsel %vm235_vm4, 0.0, %v4710_v33 }
 0x2da   : > { %5204 = vrot.lane.b32.xlu0 %v5157_v14, %s12232_s29 }
 0x2db   : > { %v4729_v25 = vsel %vm235_vm4, 0.0, %v4713_v6 }
 0x2dd   : > { %11936 = vrot.lane.b32.xlu1 %v11935_v23, %s12232_s29 }
 0x2de   : > { %11931 = vrot.lane.b32.xlu0 %v11930_v2, %s12231_s28  ;;  %v4712_v2 = vrot.slane %v13831_v13, 7  ;;  %v4716_v13 = vrot.slane %v13840_v54, 7 }
 0x2e0   : > { %v4728_v34 = vsel %vm235_vm4, 0.0, %v4712_v2 }
 0x2e1   : > { %11941 = vrot.lane.b32.xlu1 %v11940_v57, %s12231_s28 }
 0x2e2   : > { %11946 = vrot.lane.b32.xlu0 %v11945_v37, %s12232_s29 }
 0x2e5   : > { %11956 = vrot.lane.b32.xlu1 %v11955_v44, %s12232_s29  ;;  %v4727_v44 = vsel %vm235_vm4, 0.0, %v4711_v30 }
 0x2e6   : > { %11951 = vrot.lane.b32.xlu0 %v11950_v40, %s12231_s28 }
 0x2e9   : > { %5404 = vrot.lane.b32.xlu1 %v5357_v36, %s12232_s29 }
 0x2ea   : > { %5402 = vrot.lane.b32.xlu0 %v5356_v28, %s12232_s29 }
 0x317   : > { %v11827_v23 = vpop.permute.xlu1 %11826 }
 0x318   : > { %v11822_v57 = vpop.permute.xlu0 %11821  ;;  %v11829_v37 = vunpack.i.h.bf16 %v11827_v23  ;;  %v11828_v60 = vunpack.i.l.bf16 %v11827_v23 }
 0x319   : > { %v11824_v19 = vunpack.i.h.bf16 %v11822_v57  ;;  %v11823_v26 = vunpack.i.l.bf16 %v11822_v57 }
 0x31a   : > { %v4817_v14 = vsel %vm325_vm5, %v4729_v25, %v11829_v37  ;;  %v4816_v17 = vsel %vm325_vm5, %v4728_v34, %v11828_v60  ;;  %v4732_v34 = vsel %vm235_vm4, 0.0, %v4716_v13  ;;  %v4911_v13 = vrot.slane %v13902_v42, 7 }
 0x31b   : > { %v11842_v11 = vpop.permute.xlu1 %11841  ;;  %v4815_v28 = vsel %vm325_vm5, %v4727_v44, %v11824_v19  ;;  %v4814_v6 = vsel %vm325_vm5, %v4726_v52, %v11823_v26  ;;  %v4733_v19 = vsel %vm235_vm4, 0.0, %v4717_v53  ;;  %v4730_v52 = vsel %vm235_vm4, 0.0, %v4714_v3 }
 0x31c   : > { %v11844_v50 = vunpack.i.h.bf16 %v11842_v11  ;;  %v11843_v49 = vunpack.i.l.bf16 %v11842_v11  ;;  %v11832_v40 = vpop.permute.xlu0 %11831  ;;  %v4731_v11 = vsel %vm235_vm4, 0.0, %v4715_v18 }
 0x31d   : > { %v11834_v1 = vunpack.i.h.bf16 %v11832_v40  ;;  %v11833_v36 = vunpack.i.l.bf16 %v11832_v40  ;;  %v4913_v40 = vrot.slane %v13894_v38, 7 }
 0x31e   : > { %v4825_v54 = vsel %vm334_vm6, %v4817_v14, %v11844_v50  ;;  %v4824_v15 = vsel %vm334_vm6, %v4816_v17, %v11843_v49  ;;  %v4912_v49 = vrot.slane %v13892_v32, 7 }
 0x31f   : > { %v10272_v2 = vpack.c.bf16 %v4825_v54, %v4825_v54  ;;  %v10271_v23 = vpack.c.bf16 %v4824_v15, %v4824_v15  ;;  %v4823_v43 = vsel %vm334_vm6, %v4815_v28, %v11834_v1  ;;  %v4822_v31 = vsel %vm334_vm6, %v4814_v6, %v11833_v36  ;;  %v11847_v30 = vpop.permute.xlu1 %11846 }
 0x320   : > { %v10270_v33 = vpack.c.bf16 %v4823_v43, %v4823_v43  ;;  %v10269_v57 = vpack.c.bf16 %v4822_v31, %v4822_v31  ;;  %v11837_v37 = vpop.permute.xlu0 %11836  ;;  %v11849_v60 = vunpack.i.h.bf16 %v11847_v30  ;;  %v11848_v25 = vunpack.i.l.bf16 %v11847_v30  ;;  %v5810_v43 = vld [vmem:[#allocation2 + $0x28] sm:$0xf] }
 0x321   : > { %4865 = vst.msk [vmem:[#allocation2 + $0x38] sm:$0xf] %vm172_vm1, %v10272_v2  ;;  %4864 = vst.msk [vmem:[#allocation2 + $0x34] sm:$0xf] %vm172_vm1, %v10271_v23  ;;  %v11839_v26 = vunpack.i.h.bf16 %v11837_v37  ;;  %v11838_v44 = vunpack.i.l.bf16 %v11837_v37  ;;  %v4910_v36 = vrot.slane %v13896_v59, 7 }
 0x322   : > { %4863 = vst.msk [vmem:[#allocation2 + $0x30] sm:$0xf] %vm172_vm1, %v10270_v33  ;;  %4862 = vst.msk [vmem:[#allocation2 + $0x2c] sm:$0xf] %vm172_vm1, %v10269_v57  ;;  %v4821_v53 = vsel %vm325_vm5, %v4733_v19, %v11849_v60  ;;  %v4820_v28 = vsel %vm325_vm5, %v4732_v34, %v11848_v25  ;;  %v4928_v33 = vsel %vm235_vm4, 0.0, %v4912_v49  ;;  %v4929_v34 = vsel %vm235_vm4, 0.0, %v4913_v40 }
 0x323   : > { %v11857_v50 = vpop.permute.xlu1 %11856  ;;  %v4818_v18 = vsel %vm325_vm5, %v4730_v52, %v11838_v44  ;;  %v4819_v54 = vsel %vm325_vm5, %v4731_v11, %v11839_v26  ;;  %v14210_v11 = vsel %vm1004_vm0, %v14111_v62, 0  ;;  %v4926_v40 = vsel %vm235_vm4, 0.0, %v4910_v36 }
 0x324   : > { %v11859_v14 = vunpack.i.h.bf16 %v11857_v50  ;;  %v11858_v17 = vunpack.i.l.bf16 %v11857_v50  ;;  %v11852_v1 = vpop.permute.xlu0 %11851  ;;  %v14229_v36 = vsel %vm1004_vm0, %v14131_v55, 0 }
 0x325   : > { %v11854_v6 = vunpack.i.h.bf16 %v11852_v1  ;;  %v11853_v3 = vunpack.i.l.bf16 %v11852_v1  ;;  %v4927_v1 = vsel %vm235_vm4, 0.0, %v4911_v13 }
 0x326   : > { %v4828_v32 = vsel %vm334_vm6, %v4820_v28, %v11858_v17  ;;  %v4829_v38 = vsel %vm334_vm6, %v4821_v53, %v11859_v14 }
 0x327   : > { %v10275_v15 = vpack.c.bf16 %v4828_v32, %v4828_v32  ;;  %v10276_v2 = vpack.c.bf16 %v4829_v38, %v4829_v38  ;;  %v4826_v59 = vsel %vm334_vm6, %v4818_v18, %v11853_v3  ;;  %v4827_v42 = vsel %vm334_vm6, %v4819_v54, %v11854_v6  ;;  %v11867_v23 = vpop.permute.xlu1 %11866  ;;  %v14223_v3 = vld [vmem:[%s15453_s2 + $0x3c] sm:$0xff]  }
 0x328   : > { %v10273_v31 = vpack.c.bf16 %v4826_v59, %v4826_v59  ;;  %v10274_v30 = vpack.c.bf16 %v4827_v42, %v4827_v42  ;;  %v11869_v57 = vunpack.i.h.bf16 %v11867_v23  ;;  %v11862_v37 = vpop.permute.xlu0 %11861  ;;  %v5813_v60 = vld [vmem:[#allocation2 + $0x34] sm:$0xf]  ;;  %v14203_v25 = vld [vmem:[#allocation2 + $0x38] sm:$0xf]  ;;  %v11868_v19 = vunpack.i.l.bf16 %v11867_v23  ;;  %v14239_v59 = vld [vmem:[%s15453_s2 + $0x48] sm:$0xff]  }
 0x329   : > { %4868 = vst.msk [vmem:[#allocation2 + $0x44] sm:$0xf] %vm172_vm1, %v10275_v15  ;;  %4869 = vst.msk [vmem:[#allocation2 + $0x48] sm:$0xf] %vm172_vm1, %v10276_v2  ;;  %v11864_v26 = vunpack.i.h.bf16 %v11862_v37  ;;  %v5811_v44 = vld [vmem:[#allocation2 + $0x2c] sm:$0xf]  ;;  %v11863_v50 = vunpack.i.l.bf16 %v11862_v37  ;;  %v9953_v17 = vcombine.low %v5813_v60, %v14203_v25 }
 0x32a   : > { %v5812_v52 = vld [vmem:[#allocation2 + $0x30] sm:$0xf]  ;;  %4866 = vst.msk [vmem:[#allocation2 + $0x3c] sm:$0xf] %vm172_vm1, %v10273_v31  ;;  %4867 = vst.msk [vmem:[#allocation2 + $0x40] sm:$0xf] %vm172_vm1, %v10274_v30  ;;  %v9942_v49 = vcombine.low %v5810_v43, %v5811_v44  ;;  %v5017_v18 = vsel %vm325_vm5, %v4929_v34, %v11869_v57  ;;  %v5016_v13 = vsel %vm325_vm5, %v4928_v33, %v11868_v19 }
 0x32b   : > { %v14214_v14 = vcombine.low %v5812_v52, %v5813_v60  ;;  %v11882_v53 = vpop.permute.xlu1 %11881  ;;  %v9952_v28 = vcombine.low %v5811_v44, %v5812_v52  ;;  %v4916_v6 = vrot.slane %v13916_v47, 7  ;;  %v5015_v47 = vsel %vm325_vm5, %v4927_v1, %v11864_v26  ;;  %v14253_v34 = vld [vmem:[%s15453_s2 + $0x5c] ss:$0 sps:$4 sm:$0xff]  }
 0x32c   : > { %v11884_v54 = vunpack.i.h.bf16 %v11882_v53  ;;  %v11883_v32 = vunpack.i.l.bf16 %v11882_v53  ;;  %11205 = vmatprep.mubr.msk.bf16.mxu1 %vm991_vm3, %v9942_v49  ;;  %v11872_v38 = vpop.permute.xlu0 %11871  ;;  %v5014_v42 = vsel %vm325_vm5, %v4926_v40, %v11863_v50  ;;  %v4914_v31 = vrot.slane %v13928_v48, 7 }
 0x32d   : > { %11217 = vmatprep.mubr.msk.bf16.mxu0 %vm991_vm3, %v9952_v28  ;;  %v11874_v15 = vunpack.i.h.bf16 %v11872_v38  ;;  %v11873_v2 = vunpack.i.l.bf16 %v11872_v38  ;;  %11206 = vmatmul.mubr.msk.bf16.vlgmr.msra.gmra.mxu1 %vm991_vm3, %v14214_v14  ;;  %v4915_v52 = vrot.slane %v13931_v61, 7  ;;  %v4932_v1 = vsel %vm235_vm4, 0.0, %v4916_v6 }
 0x32e   : > { %v5024_v23 = vsel %vm334_vm6, %v5016_v13, %v11883_v32  ;;  %v5025_v43 = vsel %vm334_vm6, %v5017_v18, %v11884_v54  ;;  %11218 = vmatmul.mubr.msk.bf16.vlgmr.msra.gmra.mxu0 %vm991_vm3, %v9953_v17  ;;  %11226 = vmatpush3.bf16.msra.mxu1 %v14210_v11  ;;  %v4917_v13 = vrot.slane %v13918_v16, 7 }
 0x32f   : > { %v10279_v30 = vpack.c.bf16 %v5024_v23, %v5024_v23  ;;  %v10280_v33 = vpack.c.bf16 %v5025_v43, %v5025_v43  ;;  %v5022_v57 = vsel %vm334_vm6, %v5014_v42, %v11873_v2  ;;  %v5023_v37 = vsel %vm334_vm6, %v5015_v47, %v11874_v15  ;;  %v11887_v60 = vpop.permute.xlu1 %11886  ;;  %11227 = vmatprep.subr.bf16.mxu1 %v14223_v3  ;;  %v14277_v47 = vld [vmem:[%s15453_s2 + $0x68] ss:$0 sps:$4 sm:$0xff]  }
 0x330   : > { %v10277_v19 = vpack.c.bf16 %v5022_v57, %v5022_v57  ;;  %v10278_v26 = vpack.c.bf16 %v5023_v37, %v5023_v37  ;;  %v11888_v44 = vunpack.i.l.bf16 %v11887_v60  ;;  %v11877_v48 = vpop.permute.xlu0 %11876  ;;  %v5817_v50 = vld [vmem:[#allocation2 + $0x44] sm:$0xf]  ;;  %v14256_v49 = vld [vmem:[#allocation2 + $0x48] sm:$0xf]  ;;  %11238 = vmatpush3.bf16.msra.mxu0 %v14229_v36  ;;  %v11889_v15 = vunpack.i.h.bf16 %v11887_v60 }
 0x331   : > { %5064 = vst.msk [vmem:[#allocation2 + $0x5c] sm:$0xf] %vm172_vm1, %v10279_v30  ;;  %5065 = vst.msk [vmem:[#allocation2 + $0x60] sm:$0xf] %vm172_vm1, %v10280_v33  ;;  %v11879_v17 = vunpack.i.h.bf16 %v11877_v48  ;;  %v11878_v40 = vunpack.i.l.bf16 %v11877_v48  ;;  %v5815_v53 = vld [vmem:[#allocation2 + $0x3c] sm:$0xf]  ;;  %v9955_v18 = vcombine.low %v5817_v50, %v14256_v49  ;;  %11239 = vmatprep.subr.bf16.mxu0 %v14239_v59 }
 0x332   : > { %v5816_v28 = vld [vmem:[#allocation2 + $0x40] sm:$0xf]  ;;  %5062 = vst.msk [vmem:[#allocation2 + $0x54] sm:$0xf] %vm172_vm1, %v10277_v19  ;;  %5063 = vst.msk [vmem:[#allocation2 + $0x58] sm:$0xf] %vm172_vm1, %v10278_v26  ;;  %v5020_v61 = vsel %vm325_vm5, %v4932_v1, %v11888_v44  ;;  %v9944_v54 = vcombine.low %v14203_v25, %v5815_v53  ;;  %11228 = vmatpush3.bf16.msra.mxu1 %v14223_v3 }
 0x333   : > { %v14268_v32 = vcombine.low %v5816_v28, %v5817_v50  ;;  %v9954_v38 = vcombine.low %v5815_v53, %v5816_v28  ;;  %v5003_v6 = vpop.permute.xlu1 %5002  ;;  %11640 = vmatprep.subr.msk.bf16.mxu1 %vm1004_vm0, %v14253_v34  ;;  %v4930_v2 = vsel %vm235_vm4, 0.0, %v4914_v31  ;;  %v4931_v16 = vsel %vm235_vm4, 0.0, %v4915_v52  ;;  %v6131_v44 = vld [vmem:[#allocation2 + $0x50] sm:$0xf] }
 0x334   : > { %v5028_v25 = vsel %vm334_vm6, %v5020_v61, %v5003_v6  ;;  %v11892_v42 = vpop.permute.xlu0 %11891  ;;  %11209 = vmatprep.mubr.msk.bf16.mxu1 %vm991_vm3, %v9944_v54  ;;  %11240 = vmatpush3.bf16.msra.mxu0 %v14239_v59  ;;  %v5019_v33 = vsel %vm325_vm5, %v4931_v16, %v11879_v17  ;;  %v5018_v31 = vsel %vm325_vm5, %v4930_v2, %v11878_v40  ;;  %v5110_v60 = vrot.slane %v13950_v7, 7 }
 0x335   : > { %11221 = vmatprep.mubr.msk.bf16.mxu0 %vm991_vm3, %v9954_v38  ;;  %v10283_v23 = vpack.c.bf16 %v5028_v25, %v5028_v25  ;;  %v11894_v43 = vunpack.i.h.bf16 %v11892_v42  ;;  %v11893_v30 = vunpack.i.l.bf16 %v11892_v42  ;;  %11210 = vmatmul.mubr.msk.bf16.gmra.mxu1 %vm991_vm3, %v14268_v32  ;;  %v4933_v26 = vsel %vm235_vm4, 0.0, %v4917_v13 }
 0x336   : > { %11222 = vmatmul.mubr.msk.bf16.gmra.mxu0 %vm991_vm3, %v9955_v18  ;;  %11229 = vmatprep.mubr.msk.bf16.mxu1 %vm991_vm3, %v14214_v14  ;;  %v5111_v50 = vrot.slane %v13955_v5, 7  ;;  %v5021_v14 = vsel %vm325_vm5, %v4933_v26, %v11889_v15  ;;  %v5112_v38 = vrot.slane %v13960_v10, 7  ;;  %v14318_v15 = vsel %vm1004_vm0, %v14253_v34, 0  ;;  %v14327_v10 = vld [vmem:[%s15453_s2 + $0x54] sm:$0xff]  }
 0x337   : > { %5068 = vst.msk [vmem:[#allocation2 + $0x6c] sm:$0xf] %vm172_vm1, %v10283_v23  ;;  %v5026_v57 = vsel %vm334_vm6, %v5018_v31, %v11893_v30  ;;  %v5027_v37 = vsel %vm334_vm6, %v5019_v33, %v11894_v43  ;;  %v11897_v19 = vpop.permute.xlu1 %11896  ;;  %11641 = vmatprep.subr.msk.bf16.mxu0 %vm1004_vm0, %v14277_v47  ;;  %v5126_v2 = vsel %vm235_vm4, 0.0, %v5110_v60  ;;  %v14334_v31 = vsel %vm1004_vm0, %v14277_v47, 0 }
 0x338   : > { %v10281_v52 = vpack.c.bf16 %v5026_v57, %v5026_v57  ;;  %v10282_v48 = vpack.c.bf16 %v5027_v37, %v5027_v37  ;;  %v5005_v17 = vpop.permute.xlu0 %5004  ;;  %v14301_v40 = vld [vmem:[#allocation2 + $0x5c] sm:$0xf]  ;;  %v11899_v1 = vunpack.i.h.bf16 %v11897_v19  ;;  %v11898_v53 = vunpack.i.l.bf16 %v11897_v19  ;;  %15468 = vst [vmem:[#allocation6_spill] sm:$0xff] %v14334_v31  ;;  %v14339_v57 = vld [vmem:[%s15453_s2 + $0x60] sm:$0xff]  }
 0x339   : > { %v5029_v7 = vsel %vm334_vm6, %v5021_v14, %v5005_v17  ;;  %v14304_v28 = vld [vmem:[#allocation2 + $0x54] sm:$0xf]  ;;  %v14306_v18 = vld [vmem:[#allocation2 + $0x58] sm:$0xf]  ;;  %v5127_v25 = vsel %vm235_vm4, 0.0, %v5111_v50  ;;  %v5114_v50 = vrot.slane %v13975_v24, 7 }
 0x33a   : > { %5066 = vst.msk [vmem:[#allocation2 + $0x64] sm:$0xf] %vm172_vm1, %v10281_v52  ;;  %5067 = vst.msk [vmem:[#allocation2 + $0x68] sm:$0xf] %vm172_vm1, %v10282_v48  ;;  %v10284_v61 = vpack.c.bf16 %v5029_v7, %v5029_v7  ;;  %v9969_v5 = vcombine.low %v6131_v44, %v14304_v28  ;;  %v14314_v13 = vcombine.low %v14306_v18, %v14301_v40  ;;  %v5113_v44 = vrot.slane %v13968_v22, 7 }
 0x33b   : > { %v11907_v6 = vpop.permute.xlu1 %11906  ;;  %v5215_v43 = vsel %vm325_vm5, %v5127_v25, %v11899_v1  ;;  %v5214_v30 = vsel %vm325_vm5, %v5126_v2, %v11898_v53  ;;  %v5819_v17 = vld [vmem:[#allocation2 + $0x4c] sm:$0xf] }
 0x33c   : > { %5069 = vst.msk [vmem:[#allocation2 + $0x70] sm:$0xf] %vm172_vm1, %v10284_v61  ;;  %v11909_v42 = vunpack.i.h.bf16 %v11907_v6  ;;  %v11908_v16 = vunpack.i.l.bf16 %v11907_v6  ;;  %v11902_v23 = vpop.permute.xlu0 %11901  ;;  %11241 = vmatprep.mubr.msk.bf16.mxu0 %vm991_vm3, %v9969_v5  ;;  %v5129_v6 = vsel %vm235_vm4, 0.0, %v5113_v44  ;;  %v9962_v25 = vcombine.low %v14256_v49, %v5819_v17 }
 0x33d   : > { %v11903_v33 = vunpack.i.l.bf16 %v11902_v23  ;;  %11230 = vmatmul.mubr.msk.bf16.vlgmr.msra.gmra.mxu1 %vm991_vm3, %v9944_v54  ;;  %v5128_v54 = vsel %vm235_vm4, 0.0, %v5112_v38  ;;  %v11904_v1 = vunpack.i.h.bf16 %v11902_v23  ;;  %v5130_v23 = vsel %vm235_vm4, 0.0, %v5114_v50 }
 0x33e   : > { %v5222_v37 = vsel %vm334_vm6, %v5214_v30, %v11908_v16  ;;  %v5223_v60 = vsel %vm334_vm6, %v5215_v43, %v11909_v42  ;;  %11242 = vmatmul.mubr.msk.bf16.vlgmr.msra.gmra.mxu0 %vm991_vm3, %v14314_v13  ;;  %11250 = vmatpush3.bf16.msra.mxu1 %v14318_v15  ;;  %v14368_v38 = vld [vmem:[#allocation2 + $0x6c] sm:$0xf]  ;;  %v14378_v16 = vld [vmem:[%s15453_s2 + $0x14] ss:$0 sps:$4 sm:$0xff]   ;;  %v9979_v49 = vcombine.low %v14304_v28, %v14306_v18 }
 0x33f   : > { %v10285_v19 = vpack.c.bf16 %v5222_v37, %v5222_v37  ;;  %v10286_v26 = vpack.c.bf16 %v5223_v60, %v5223_v60  ;;  %11233 = vmatprep.mubr.msk.bf16.mxu1 %vm991_vm3, %v14268_v32  ;;  %v11912_v52 = vpop.permute.xlu1 %11911  ;;  %v5216_v48 = vsel %vm325_vm5, %v5128_v54, %v11903_v33  ;;  %11251 = vmatprep.subr.bf16.mxu1 %v14327_v10  ;;  %v14357_v32 = vld [vmem:[#allocation2 + $0x60] sm:$0xf]  ;;  %v5115_v60 = vrot.slane %v13983_v51, 7 }
 0x340   : > { %v5195_v14 = vpop.permute.xlu0 %5194  ;;  %11262 = vmatpush3.bf16.msra.mxu0 %v14334_v31  ;;  %v11913_v22 = vunpack.i.l.bf16 %v11912_v52  ;;  %v5217_v37 = vsel %vm325_vm5, %v5129_v6, %v11904_v1  ;;  %v11914_v28 = vunpack.i.h.bf16 %v11912_v52  ;;  %v9980_v6 = vcombine.low %v14301_v40, %v14357_v32 }
 0x341   : > { %5262 = vst.msk [vmem:[#allocation2 + $0x7c] sm:$0xf] %vm172_vm1, %v10285_v19  ;;  %5263 = vst.msk [vmem:[#allocation2 + $0x80] sm:$0xf] %vm172_vm1, %v10286_v26  ;;  %v5224_v53 = vsel %vm334_vm6, %v5216_v48, %v5195_v14  ;;  %v14359_v7 = vld [vmem:[#allocation2 + $0x64] sm:$0xf]  ;;  %11263 = vmatprep.subr.bf16.mxu0 %v14339_v57 }
 0x342   : > { %v14361_v61 = vld [vmem:[#allocation2 + $0x68] sm:$0xf]  ;;  %v10287_v24 = vpack.c.bf16 %v5224_v53, %v5224_v53  ;;  %v14366_v5 = vcombine.low %v14357_v32, %v14359_v7  ;;  %11252 = vmatpush3.bf16.msra.mxu1 %v14327_v10  ;;  %v5218_v54 = vsel %vm325_vm5, %v5130_v23, %v11913_v22  ;;  %v5116_v19 = vrot.slane %v13990_v4, 7 }
 0x343   : > { %v11917_v2 = vpop.permute.xlu1 %11916  ;;  %v9972_v42 = vcombine.low %v14361_v61, %v14368_v38  ;;  %11642 = vmatprep.subr.msk.bf16.mxu1 %vm1004_vm0, %v14378_v16  ;;  %v14397_v26 = vld [vmem:[%s15453_s2 + $0x8] ss:$0 sps:$4 sm:$0xff]   ;;  %v5117_v48 = vrot.slane %v14125_v58, 7  ;;  %v5131_v17 = vsel %vm235_vm4, 0.0, %v5115_v60  ;;  %v5311_v58 = vrot.slane %v14031_v21, 7 }
 0x344   : > { %5264 = vst.msk [vmem:[#allocation2 + $0x84] sm:$0xf] %vm172_vm1, %v10287_v24  ;;  %v11919_v43 = vunpack.i.h.bf16 %v11917_v2  ;;  %v11918_v30 = vunpack.i.l.bf16 %v11917_v2  ;;  %v5171_v33 = vpop.permute.xlu0 %5170  ;;  %11245 = vmatprep.mubr.msk.bf16.mxu0 %vm991_vm3, %v14366_v5  ;;  %11264 = vmatpush3.bf16.msra.mxu0 %v14339_v57  ;;  %v5132_v52 = vsel %vm235_vm4, 0.0, %v5116_v19  ;;  %v5219_v53 = vsel %vm325_vm5, %v5131_v17, %v11914_v28 }
 0x345   : > { %11234 = vmatmul.mubr.msk.bf16.gmra.mxu1 %vm991_vm3, %v9962_v25  ;;  %11643 = vmatprep.subr.msk.bf16.mxu0 %vm1004_vm0, %v14397_v26  ;;  %v5220_v24 = vsel %vm325_vm5, %v5132_v52, %v5171_v33  ;;  %v5133_v2 = vsel %vm235_vm4, 0.0, %v5117_v48  ;;  %v5312_v33 = vrot.slane %v14035_v0, 7  ;;  %v9981_v40 = vcombine.low %v14359_v7, %v14361_v61  ;;  %v6140_v7 = vld [vmem:[#allocation2 + $0x74] sm:$0xf]  ;;  %v14450_v52 = vld [vmem:[#allocation2 + $0x30] sm:$0xf] }
 0x346   : > { %v5225_v18 = vsel %vm334_vm6, %v5217_v37, %v11918_v30  ;;  %v5226_v44 = vsel %vm334_vm6, %v5218_v54, %v11919_v43  ;;  %11246 = vmatmul.mubr.msk.bf16.gmra.mxu0 %vm991_vm3, %v9972_v42  ;;  %11253 = vmatprep.mubr.msk.bf16.mxu1 %vm991_vm3, %v9979_v49  ;;  %v5313_v28 = vrot.slane %v14043_v20, 7  ;;  %v5327_v61 = vsel %vm235_vm4, 0.0, %v5311_v58  ;;  %v6512_v20 = vld [vmem:[#allocation2 + $0x28] sm:$0xf] }
 0x347   : > { %v10288_v51 = vpack.c.bf16 %v5225_v18, %v5225_v18  ;;  %v10289_v4 = vpack.c.bf16 %v5226_v44, %v5226_v44  ;;  %11265 = vmatprep.mubr.msk.bf16.mxu0 %vm991_vm3, %v14314_v13  ;;  %v5173_v50 = vpop.permute.xlu1 %5172  ;;  %v5310_v13 = vrot.slane %v14029_v41, 7  ;;  %v5315_v17 = vrot.slane %v14057_v8, 7 }
 0x348   : > { %v11922_v14 = vpop.permute.xlu0 %11921  ;;  %v5221_v30 = vsel %vm325_vm5, %v5133_v2, %v5173_v50 }
 0x349   : > { %5265 = vst.msk [vmem:[#allocation2 + $0x88] sm:$0xf] %vm172_vm1, %v10288_v51  ;;  %5266 = vst.msk [vmem:[#allocation2 + $0x8c] sm:$0xf] %vm172_vm1, %v10289_v4  ;;  %v11924_v1 = vunpack.i.h.bf16 %v11922_v14  ;;  %v11923_v22 = vunpack.i.l.bf16 %v11922_v14  ;;  %v5326_v0 = vsel %vm235_vm4, 0.0, %v5310_v13  ;;  %v14442_v4 = vld [vmem:[%s15453_s2 + $0xc] sm:$0xff]  }
 0x34a   : > { %v5328_v14 = vsel %vm235_vm4, 0.0, %v5312_v33 }
 0x34b   : > { %v5228_v25 = vsel %vm334_vm6, %v5220_v24, %v11924_v1  ;;  %v5227_v23 = vsel %vm334_vm6, %v5219_v53, %v11923_v22  ;;  %v11927_v43 = vpop.permute.xlu1 %11926  ;;  %v14455_v1 = vld [vmem:[%s15453_s2] sm:$0xff]  }
 0x34c   : > { %v10291_v49 = vpack.c.bf16 %v5228_v25, %v5228_v25  ;;  %v10290_v37 = vpack.c.bf16 %v5227_v23, %v5227_v23  ;;  %v5205_v60 = vpop.permute.xlu0 %5204  ;;  %v11929_v41 = vunpack.i.h.bf16 %v11927_v43  ;;  %v11928_v54 = vunpack.i.l.bf16 %v11927_v43  ;;  %v14466_v23 = vld [vmem:[%s15453_s2 + $0x20] ss:$0 sps:$4 sm:$0xff]  }
 0x34d   : > { %v5229_v21 = vsel %vm334_vm6, %v5221_v30, %v5205_v60  ;;  %11254 = vmatmul.mubr.msk.bf16.vlgmr.msra.gmra.mxu1 %vm991_vm3, %v9980_v6  ;;  %v5317_v25 = vrot.slane %v14090_v45, 7  ;;  %v5329_v43 = vsel %vm235_vm4, 0.0, %v5313_v28 }
 0x34e   : > { %5268 = vst.msk [vmem:[#allocation2 + $0x94] sm:$0xf] %vm172_vm1, %v10291_v49  ;;  %5267 = vst.msk [vmem:[#allocation2 + $0x90] sm:$0xf] %vm172_vm1, %v10290_v37  ;;  %v10292_v32 = vpack.c.bf16 %v5229_v21, %v5229_v21  ;;  %11266 = vmatmul.mubr.msk.bf16.vlgmr.msra.gmra.mxu0 %vm991_vm3, %v14366_v5  ;;  %11274 = vmatpush3.bf16.msra.mxu1 %v13752_v27  ;;  %v5314_v5 = vrot.slane %v14048_v56, 7  ;;  %v5415_v48 = vsel %vm325_vm5, %v5327_v61, %v11929_v41 }
 0x34f   : > { %11257 = vmatprep.mubr.msk.bf16.mxu1 %vm991_vm3, %v9981_v40  ;;  %11269 = vmatprep.mubr.msk.bf16.mxu0 %vm991_vm3, %v9972_v42  ;;  %v11937_v19 = vpop.permute.xlu1 %11936  ;;  %v6139_v42 = vld [vmem:[#allocation2 + $0x70] sm:$0xf]  ;;  %v5414_v50 = vsel %vm325_vm5, %v5326_v0, %v11928_v54  ;;  %v6513_v56 = vld [vmem:[#allocation2 + $0x2c] sm:$0xf]  ;;  %v5316_v0 = vrot.slane %v14083_v35, 7 }
 0x350   : > { %5269 = vst.msk [vmem:[#allocation2 + $0x98] sm:$0xf] %vm172_vm1, %v10292_v32  ;;  %v11939_v18 = vunpack.i.h.bf16 %v11937_v19  ;;  %v11938_v44 = vunpack.i.l.bf16 %v11937_v19  ;;  %v11932_v51 = vpop.permute.xlu0 %11931  ;;  %11275 = vmatprep.subr.bf16.mxu1 %v14442_v4  ;;  %11286 = vmatpush3.bf16.msra.mxu0 %v13765_v63  ;;  %v9982_v2 = vcombine.low %v14368_v38, %v6139_v42  ;;  %v9989_v49 = vcombine.low %v6139_v42, %v6140_v7  ;;  %v14479_v54 = vld [vmem:[%s15453_s2 + $0x2c] ss:$0 sps:$4 sm:$0xff]   ;;  %v6515_v61 = vld [vmem:[#allocation2 + $0x34] sm:$0xf] }
 0x351   : > { %11287 = vmatprep.subr.bf16.mxu0 %v14455_v1  ;;  %v11934_v24 = vunpack.i.h.bf16 %v11932_v51  ;;  %v11933_v13 = vunpack.i.l.bf16 %v11932_v51  ;;  %v9996_v37 = vcombine.low %v6513_v56, %v14450_v52  ;;  %v10004_v60 = vcombine.low %v6512_v20, %v6513_v56 }
 0x352   : > { %v5422_v22 = vsel %vm334_vm6, %v5414_v50, %v11938_v44  ;;  %v5423_v53 = vsel %vm334_vm6, %v5415_v48, %v11939_v18  ;;  %11276 = vmatpush3.bf16.msra.mxu1 %v14442_v4  ;;  %v5330_v32 = vsel %vm235_vm4, 0.0, %v5314_v5  ;;  %v5331_v19 = vsel %vm235_vm4, 0.0, %v5315_v17  ;;  %v6516_v18 = vld [vmem:[#allocation2 + $0x38] sm:$0xf] }
 0x353   : > { %v10293_v58 = vpack.c.bf16 %v5422_v22, %v5422_v22  ;;  %v10294_v8 = vpack.c.bf16 %v5423_v53, %v5423_v53  ;;  %v11942_v6 = vpop.permute.xlu1 %11941  ;;  %11644 = vmatprep.subr.msk.bf16.mxu1 %vm1004_vm0, %v14466_v23  ;;  %v5417_v21 = vsel %vm325_vm5, %v5329_v43, %v11934_v24  ;;  %v5416_v40 = vsel %vm325_vm5, %v5328_v14, %v11933_v13 }
 0x354   : > { %v11947_v30 = vpop.permute.xlu0 %11946  ;;  %11288 = vmatpush3.bf16.msra.mxu0 %v14455_v1  ;;  %v11944_v45 = vunpack.i.h.bf16 %v11942_v6  ;;  %v11943_v38 = vunpack.i.l.bf16 %v11942_v6  ;;  %v5333_v51 = vsel %vm235_vm4, 0.0, %v5317_v25  ;;  %v9997_v22 = vcombine.low %v6515_v61, %v6516_v18 }
 0x355   : > { %5462 = vst.msk [vmem:[#allocation2 + $0xa4] sm:$0xf] %vm172_vm1, %v10293_v58  ;;  %5463 = vst.msk [vmem:[#allocation2 + $0xa8] sm:$0xf] %vm172_vm1, %v10294_v8  ;;  %v11949_v33 = vunpack.i.h.bf16 %v11947_v30  ;;  %v11948_v41 = vunpack.i.l.bf16 %v11947_v30  ;;  %11258 = vmatmul.mubr.msk.bf16.gmra.mxu1 %vm991_vm3, %v9982_v2  ;;  %11645 = vmatprep.subr.msk.bf16.mxu0 %vm1004_vm0, %v14479_v54  ;;  %v5332_v13 = vsel %vm235_vm4, 0.0, %v5316_v0 }
 0x356   : > { %11270 = vmatmul.mubr.msk.bf16.gmra.mxu0 %vm991_vm3, %v9989_v49  ;;  %11277 = vmatprep.mubr.msk.bf16.mxu1 %vm991_vm3, %v9996_v37  ;;  %v5419_v35 = vsel %vm325_vm5, %v5331_v19, %v11944_v45  ;;  %v5418_v14 = vsel %vm325_vm5, %v5330_v32, %v11943_v38  ;;  %v6517_v58 = vld [vmem:[#allocation2 + $0x3c] sm:$0xf]  ;;  %v6518_v8 = vld [vmem:[#allocation2 + $0x40] sm:$0xf]  ;;  %v10005_v49 = vcombine.low %v14450_v52, %v6515_v61  ;;  %v6519_v52 = vld [vmem:[#allocation2 + $0x44] sm:$0xf] }
 0x357   : > { %v5424_v28 = vsel %vm334_vm6, %v5416_v40, %v11948_v41  ;;  %v5425_v7 = vsel %vm334_vm6, %v5417_v21, %v11949_v33  ;;  %11289 = vmatprep.mubr.msk.bf16.mxu0 %vm991_vm3, %v10004_v60  ;;  %v11957_v44 = vpop.permute.xlu1 %11956  ;;  %v9998_v33 = vcombine.low %v6517_v58, %v6518_v8  ;;  %v10006_v41 = vcombine.low %v6516_v18, %v6517_v58  ;;  %v6520_v40 = vld [vmem:[#allocation2 + $0x48] sm:$0xf]  ;;  %v14518_v32 = vld [vmem:[%s15453_s2 + $0x18] sm:$0xff]   ;;  %v6781_v0 = vld [vmem:[#allocation2 + $0x50] sm:$0xf] }
 0x358   : > { %v10295_v5 = vpack.c.bf16 %v5424_v28, %v5424_v28  ;;  %v10296_v42 = vpack.c.bf16 %v5425_v7, %v5425_v7  ;;  %v11959_v20 = vunpack.i.h.bf16 %v11957_v44  ;;  %v11958_v48 = vunpack.i.l.bf16 %v11957_v44  ;;  %v11952_v50 = vpop.permute.xlu0 %11951  ;;  %v6782_v19 = vld [vmem:[#allocation2 + $0x54] sm:$0xf]  ;;  %v14527_v7 = vld [vmem:[%s15453_s2 + $0x38] ss:$0 sps:$4 sm:$0xff]  }
 0x359   : > { %v11954_v17 = vunpack.i.h.bf16 %v11952_v50  ;;  %v11953_v56 = vunpack.i.l.bf16 %v11952_v50  ;;  %v9999_v28 = vcombine.low %v6519_v52, %v6520_v40  ;;  %v10007_v61 = vcombine.low %v6518_v8, %v6519_v52  ;;  %v6783_v44 = vld [vmem:[#allocation2 + $0x58] sm:$0xf] }
 0x35a   : > { %5464 = vst.msk [vmem:[#allocation2 + $0xac] sm:$0xf] %vm172_vm1, %v10295_v5  ;;  %5465 = vst.msk [vmem:[#allocation2 + $0xb0] sm:$0xf] %vm172_vm1, %v10296_v42  ;;  %v5426_v53 = vsel %vm334_vm6, %v5418_v14, %v11958_v48  ;;  %v5427_v24 = vsel %vm334_vm6, %v5419_v35, %v11959_v20  ;;  %v10017_v18 = vcombine.low %v6781_v0, %v6782_v19  ;;  %v6786_v5 = vld [vmem:[#allocation2 + $0x64] sm:$0xf] }
 0x35b   : > { %v10297_v6 = vpack.c.bf16 %v5426_v53, %v5426_v53  ;;  %v10298_v2 = vpack.c.bf16 %v5427_v24, %v5427_v24  ;;  %v5405_v25 = vpop.permute.xlu1 %5404  ;;  %v5421_v43 = vsel %vm325_vm5, %v5333_v51, %v11954_v17  ;;  %v5420_v30 = vsel %vm325_vm5, %v5332_v13, %v11953_v56  ;;  %v6784_v51 = vld [vmem:[#allocation2 + $0x5c] sm:$0xf]  ;;  %v6785_v20 = vld [vmem:[#allocation2 + $0x60] sm:$0xf]  ;;  %v6787_v48 = vld [vmem:[#allocation2 + $0x68] sm:$0xf] }
 0x35c   : > { %v5429_v37 = vsel %vm334_vm6, %v5421_v43, %v5405_v25  ;;  %v5403_v60 = vpop.permute.xlu0 %5402  ;;  %v10018_v42 = vcombine.low %v6783_v44, %v6784_v51  ;;  %v6788_v35 = vld [vmem:[#allocation2 + $0x6c] sm:$0xf]  ;;  %v10025_v17 = vcombine.low %v6782_v19, %v6783_v44  ;;  %v10027_v56 = vcombine.low %v6786_v5, %v6787_v48  ;;  %v7066_v53 = vld [vmem:[#allocation2 + $0x78] sm:$0xf]  ;;  %v7067_v24 = vld [vmem:[#allocation2 + $0x7c] sm:$0xf] }
 0x35d   : > { %5466 = vst.msk [vmem:[#allocation2 + $0xb4] sm:$0xf] %vm172_vm1, %v10297_v6  ;;  %5467 = vst.msk [vmem:[#allocation2 + $0xb8] sm:$0xf] %vm172_vm1, %v10298_v2  ;;  %v10300_v45 = vpack.c.bf16 %v5429_v37, %v5429_v37  ;;  %v5428_v38 = vsel %vm334_vm6, %v5420_v30, %v5403_v60  ;;  %11278 = vmatmul.mubr.msk.bf16.vlgmr.msra.gmra.mxu1 %vm991_vm3, %v9997_v22  ;;  %v10020_v14 = vcombine.low %v6787_v48, %v6788_v35  ;;  %v6790_v22 = vld [vmem:[#allocation2 + $0x74] sm:$0xf] }
 0x35e   : > { %v10299_v21 = vpack.c.bf16 %v5428_v38, %v5428_v38  ;;  %11290 = vmatmul.mubr.msk.bf16.vlgmr.msra.gmra.mxu0 %vm991_vm3, %v10005_v49  ;;  %11298 = vmatpush3.bf16.msra.mxu1 %v13779_v29  ;;  %v7068_v13 = vld [vmem:[#allocation2 + $0x80] sm:$0xf]  ;;  %v10038_v6 = vcombine.low %v7066_v53, %v7067_v24  ;;  %v7069_v25 = vld [vmem:[#allocation2 + $0x84] sm:$0xf]  ;;  %v7070_v43 = vld [vmem:[#allocation2 + $0x88] sm:$0xf] }
 0x35f   : > { %5469 = vst.msk [vmem:[#allocation2 + $0xc0] sm:$0xf] %vm172_vm1, %v10300_v45  ;;  %11281 = vmatprep.mubr.msk.bf16.mxu1 %vm991_vm3, %v9998_v33  ;;  %11293 = vmatprep.mubr.msk.bf16.mxu0 %vm991_vm3, %v10006_v41  ;;  %v10046_v2 = vcombine.low %v7067_v24, %v7068_v13  ;;  %v7071_v30 = vld [vmem:[#allocation2 + $0x8c] sm:$0xf]  ;;  %v10039_v37 = vcombine.low %v7068_v13, %v7069_v25  ;;  %v7073_v33 = vld [vmem:[#allocation2 + $0x94] sm:$0xf] }
 0x360   : > { %5468 = vst.msk [vmem:[#allocation2 + $0xbc] sm:$0xf] %vm172_vm1, %v10299_v21  ;;  %11299 = vmatprep.subr.bf16.mxu1 %v14518_v32  ;;  %11310 = vmatpush3.bf16.msra.mxu0 %v14088_v9  ;;  %v10047_v60 = vcombine.low %v7069_v25, %v7070_v43  ;;  %v10040_v45 = vcombine.low %v7070_v43, %v7071_v30  ;;  %v7412_v21 = vld [vmem:[#allocation2 + $0x54] sm:$0xf]  ;;  %v7413_v52 = vld [vmem:[#allocation2 + $0x58] sm:$0xf] }
 0x361   : > { %11311 = vmatprep.subr.bf16.mxu0 %v14076_v39  ;;  %v10059_v19 = vcombine.low %v7412_v21, %v7413_v52  ;;  %v7417_v44 = vld [vmem:[#allocation2 + $0x68] sm:$0xf]  ;;  %v7418_v48 = vld [vmem:[#allocation2 + $0x6c] sm:$0xf]  ;;  %v7680_v53 = vld [vmem:[#allocation2 + $0x78] sm:$0xf] }
 0x362   : > { %11300 = vmatpush3.bf16.msra.mxu1 %v14518_v32  ;;  %v7681_v24 = vld [vmem:[#allocation2 + $0x7c] sm:$0xf]  ;;  %v14627_v13 = vld [vmem:[%s15453_s2 + $0x30] sm:$0xff]  }
 0x363   : > { %11646 = vmatprep.subr.msk.bf16.mxu1 %vm1004_vm0, %v14527_v7 }
 0x364   : > { %11312 = vmatpush3.bf16.msra.mxu0 %v14076_v39  ;;  %v10019_v39 = vcombine.low %v6785_v20, %v6786_v5 }
 0x365   : > { %11282 = vmatmul.mubr.msk.bf16.gmra.mxu1 %vm991_vm3, %v9999_v28  ;;  %11647 = vmatprep.subr.msk.bf16.mxu0 %vm1004_vm0, %v14111_v62  ;;  %v6521_v62 = vld [vmem:[#allocation2 + $0x4c] sm:$0xf]  ;;  %v7414_v28 = vld [vmem:[#allocation2 + $0x5c] sm:$0xf] }
 0x366   : > { %11294 = vmatmul.mubr.msk.bf16.gmra.mxu0 %vm991_vm3, %v10007_v61  ;;  %11301 = vmatprep.mubr.msk.bf16.mxu1 %vm991_vm3, %v10005_v49  ;;  %v10012_v50 = vcombine.low %v6520_v40, %v6521_v62  ;;  %v7072_v49 = vld [vmem:[#allocation2 + $0x90] sm:$0xf] }
 0x367   : > { %11313 = vmatprep.mubr.msk.bf16.mxu0 %vm991_vm3, %v10017_v18  ;;  %v10048_v38 = vcombine.low %v7071_v30, %v7072_v49  ;;  %v10041_v40 = vcombine.low %v7072_v49, %v7073_v33  ;;  %v7416_v18 = vld [vmem:[#allocation2 + $0x64] sm:$0xf]  ;;  %v14645_v30 = vld [vmem:[%s15453_s2 + $0x50] ss:$0 sps:$4 sm:$0xff]  }
 0x368   : > { %v10061_v5 = vcombine.low %v7416_v18, %v7417_v44  ;;  %v7683_v49 = vld [vmem:[#allocation2 + $0x84] sm:$0xf] }
 0x36d   : > { %11302 = vmatmul.mubr.msk.bf16.vlgmr.msra.gmra.mxu1 %vm991_vm3, %v10006_v41  ;;  %v7074_v41 = vld [vmem:[#allocation2 + $0x98] sm:$0xf] }
 0x36e   : > { %11314 = vmatmul.mubr.msk.bf16.vlgmr.msra.gmra.mxu0 %vm991_vm3, %v10018_v42  ;;  %11322 = vmatpush3.bf16.msra.mxu1 %v14116_v46  ;;  %v10049_v0 = vcombine.low %v7073_v33, %v7074_v41 }
 0x36f   : > { %11305 = vmatprep.mubr.msk.bf16.mxu1 %vm991_vm3, %v10007_v61  ;;  %11317 = vmatprep.mubr.msk.bf16.mxu0 %vm991_vm3, %v10019_v39  ;;  %v7415_v61 = vld [vmem:[#allocation2 + $0x60] sm:$0xf] }
 0x370   : > { %11323 = vmatprep.subr.bf16.mxu1 %v14103_v12  ;;  %11334 = vmatpush3.bf16.msra.mxu0 %v14210_v11 }
 0x371   : > { %11335 = vmatprep.subr.bf16.mxu0 %v14223_v3 }
 0x372   : > { %11324 = vmatpush3.bf16.msra.mxu1 %v14103_v12  ;;  %v10026_v12 = vcombine.low %v6784_v51, %v6785_v20  ;;  %v10060_v51 = vcombine.low %v7414_v28, %v7415_v61  ;;  %v7419_v20 = vld [vmem:[#allocation2 + $0x70] sm:$0xf] }
 0x373   : > { %11648 = vmatprep.subr.msk.bf16.mxu1 %vm1004_vm0, %v14131_v55  ;;  %v6789_v55 = vld [vmem:[#allocation2 + $0x70] sm:$0xf] }
 0x374   : > { %11336 = vmatpush3.bf16.msra.mxu0 %v14223_v3  ;;  %v10028_v58 = vcombine.low %v6788_v35, %v6789_v55  ;;  %v10033_v8 = vcombine.low %v6789_v55, %v6790_v22  ;;  %v14622_v55 = vpop.f32.mrf.mxu0  ;;  %v7420_v22 = vld [vmem:[#allocation2 + $0x74] sm:$0xf] }
 0x375   : > { %11306 = vmatmul.mubr.msk.bf16.gmra.mxu1 %vm991_vm3, %v10012_v50  ;;  %11649 = vmatprep.subr.msk.bf16.mxu0 %vm1004_vm0, %v14253_v34  ;;  %v10062_v50 = vcombine.low %v7418_v48, %v7419_v20 }
 0x376   : > { %11318 = vmatmul.mubr.msk.bf16.gmra.mxu0 %vm991_vm3, %v10020_v14  ;;  %11325 = vmatprep.mubr.msk.bf16.mxu1 %vm991_vm3, %v10025_v17  ;;  %v10069_v17 = vcombine.low %v7415_v61, %v7416_v18  ;;  %v14639_v25 = vpop.f32.mrf.mxu0  ;;  %v7965_v61 = vld [vmem:[#allocation2 + $0xa0] sm:$0xf]  ;;  %v7966_v18 = vld [vmem:[#allocation2 + $0xa4] sm:$0xf] }
 0x377   : > { %11337 = vmatprep.mubr.msk.bf16.mxu0 %vm991_vm3, %v10018_v42  ;;  %v7075_v42 = vld [vmem:[#allocation2 + $0x9c] sm:$0xf] }
 0x378   : > { %v10054_v62 = vcombine.low %v7074_v41, %v7075_v42  ;;  %v10101_v42 = vcombine.low %v7965_v61, %v7966_v18 }
 0x37d   : > { %11326 = vmatmul.mubr.msk.bf16.vlgmr.msra.gmra.mxu1 %vm991_vm3, %v10026_v12  ;;  %v10070_v12 = vcombine.low %v7417_v44, %v7418_v48 }
 0x37e   : > { %11338 = vmatmul.mubr.msk.bf16.vlgmr.msra.gmra.mxu0 %vm991_vm3, %v10019_v39  ;;  %11346 = vmatpush3.bf16.msra.mxu1 %v14229_v36  ;;  %v7411_v39 = vld [vmem:[#allocation2 + $0x50] sm:$0xf] }
 0x37f   : > { %11329 = vmatprep.mubr.msk.bf16.mxu1 %vm991_vm3, %v10027_v56  ;;  %11341 = vmatprep.mubr.msk.bf16.mxu0 %vm991_vm3, %v10020_v14  ;;  %v10067_v35 = vcombine.low %v7411_v39, %v7412_v21  ;;  %v10068_v14 = vcombine.low %v7413_v52, %v7414_v28  ;;  %v14618_v56 = vld [vmem:[%s15453_s2 + $0x24] sm:$0xff]   ;;  %v7688_v28 = vld [vmem:[#allocation2 + $0x98] sm:$0xf] }
 0x380   : > { %11347 = vmatprep.subr.bf16.mxu1 %v14239_v59  ;;  %11358 = vmatpush3.bf16.msra.mxu0 %v14318_v15  ;;  %v7967_v39 = vld [vmem:[#allocation2 + $0xa8] sm:$0xf] }
 0x381   : > { %11359 = vmatprep.subr.bf16.mxu0 %v14327_v10 }
 0x382   : > { %11348 = vmatpush3.bf16.msra.mxu1 %v14239_v59 }
 0x383   : > { %11650 = vmatprep.subr.msk.bf16.mxu1 %vm1004_vm0, %v14277_v47 }
 0x384   : > { %11360 = vmatpush3.bf16.msra.mxu0 %v14327_v10 }
 0x385   : > { %11330 = vmatmul.mubr.msk.bf16.gmra.mxu1 %vm991_vm3, %v10028_v58  ;;  %11651 = vmatprep.subr.msk.bf16.mxu0 %vm1004_vm0, %v14378_v16  ;;  %v7682_v58 = vld [vmem:[#allocation2 + $0x80] sm:$0xf] }
 0x386   : > { %11342 = vmatmul.mubr.msk.bf16.gmra.mxu0 %vm991_vm3, %v10033_v8  ;;  %11349 = vmatprep.mubr.msk.bf16.mxu1 %vm991_vm3, %v10038_v6  ;;  %v14634_v8 = vld [vmem:[%s15453_s2 + $0x44] ss:$0 sps:$4 sm:$0xff]   ;;  %v10075_v6 = vcombine.low %v7419_v20, %v7420_v22  ;;  %v10088_v43 = vcombine.low %v7681_v24, %v7682_v58  ;;  %v10081_v33 = vcombine.low %v7682_v58, %v7683_v49  ;;  %v7970_v20 = vld [vmem:[#allocation2 + $0xb4] sm:$0xf]  ;;  %v7971_v22 = vld [vmem:[#allocation2 + $0xb8] sm:$0xf] }
 0x387   : > { %11361 = vmatprep.mubr.msk.bf16.mxu0 %vm991_vm3, %v10046_v2  ;;  %v10080_v2 = vcombine.low %v7680_v53, %v7681_v24  ;;  %v10109_v58 = vcombine.low %v7966_v18, %v7967_v39  ;;  %v8314_v18 = vld [vmem:[#allocation2 + $0x88] sm:$0xf] }
 0x38d   : > { %11350 = vmatmul.mubr.msk.bf16.vlgmr.msra.gmra.mxu1 %vm991_vm3, %v10039_v37 }
 0x38e   : > { %11362 = vmatmul.mubr.msk.bf16.vlgmr.msra.gmra.mxu0 %vm991_vm3, %v10047_v60  ;;  %11370 = vmatpush3.bf16.msra.mxu1 %v14334_v31  ;;  %v7684_v60 = vld [vmem:[#allocation2 + $0x88] sm:$0xf] }
 0x38f   : > { %11353 = vmatprep.mubr.msk.bf16.mxu1 %vm991_vm3, %v10040_v45  ;;  %11365 = vmatprep.mubr.msk.bf16.mxu0 %vm991_vm3, %v10048_v38  ;;  %v7686_v38 = vld [vmem:[#allocation2 + $0x90] sm:$0xf]  ;;  %v10089_v41 = vcombine.low %v7683_v49, %v7684_v60 }
 0x390   : > { %11371 = vmatprep.subr.bf16.mxu1 %v14339_v57  ;;  %11382 = vmatpush3.bf16.msra.mxu0 %v13752_v27 }
 0x391   : > { %11383 = vmatprep.subr.bf16.mxu0 %v14442_v4 }
 0x392   : > { %11372 = vmatpush3.bf16.msra.mxu1 %v14339_v57 }
 0x393   : > { %11652 = vmatprep.subr.msk.bf16.mxu1 %vm1004_vm0, %v14397_v26 }
 0x394   : > { %11384 = vmatpush3.bf16.msra.mxu0 %v14442_v4 }
 0x395   : > { %11354 = vmatmul.mubr.msk.bf16.gmra.mxu1 %vm991_vm3, %v10041_v40  ;;  %11653 = vmatprep.subr.msk.bf16.mxu0 %vm1004_vm0, %v14466_v23 }
 0x396   : > { %11366 = vmatmul.mubr.msk.bf16.gmra.mxu0 %vm991_vm3, %v10049_v0  ;;  %11373 = vmatprep.mubr.msk.bf16.mxu1 %vm991_vm3, %v10039_v37  ;;  %v14652_v37 = vpop.f32.mrf.mxu0  ;;  %v7687_v0 = vld [vmem:[#allocation2 + $0x94] sm:$0xf] }
 0x397   : > { %11385 = vmatprep.mubr.msk.bf16.mxu0 %vm991_vm3, %v10059_v19  ;;  %v10083_v44 = vcombine.low %v7686_v38, %v7687_v0 }
 0x398   : > { %v14654_v21 = vpop.f32.mrf.mxu0 }
 0x39a   : > { %v14663_v19 = vpop.f32.mrf.mxu0 }
 0x39d   : > { %11374 = vmatmul.mubr.msk.bf16.vlgmr.msra.gmra.mxu1 %vm991_vm3, %v10040_v45  ;;  %v7685_v45 = vld [vmem:[#allocation2 + $0x8c] sm:$0xf] }
 0x39e   : > { %11386 = vmatmul.mubr.msk.bf16.vlgmr.msra.gmra.mxu0 %vm991_vm3, %v10060_v51  ;;  %11394 = vmatpush3.bf16.msra.mxu1 %v13765_v63  ;;  %v10082_v52 = vcombine.low %v7684_v60, %v7685_v45  ;;  %v10091_v51 = vcombine.low %v7687_v0, %v7688_v28 }
 0x39f   : > { %11377 = vmatprep.mubr.msk.bf16.mxu1 %vm991_vm3, %v10041_v40  ;;  %11389 = vmatprep.mubr.msk.bf16.mxu0 %vm991_vm3, %v10061_v5  ;;  %v10090_v40 = vcombine.low %v7685_v45, %v7686_v38  ;;  %v14670_v5 = vpop.f32.mrf.mxu0  ;;  %v7973_v45 = vld [vmem:[#allocation2 + $0xc0] sm:$0xf]  ;;  %v7974_v38 = vld [vmem:[#allocation2 + $0xc4] sm:$0xf] }
 0x3a0   : > { %11395 = vmatprep.subr.bf16.mxu1 %v14455_v1  ;;  %11406 = vmatpush3.bf16.msra.mxu0 %v13779_v29 }
 0x3a1   : > { %11407 = vmatprep.subr.bf16.mxu0 %v14518_v32 }
 0x3a2   : > { %11396 = vmatpush3.bf16.msra.mxu1 %v14455_v1 }
 0x3a3   : > { %11654 = vmatprep.subr.msk.bf16.mxu1 %vm1004_vm0, %v14479_v54 }
 0x3a4   : > { %11408 = vmatpush3.bf16.msra.mxu0 %v14518_v32 }
 0x3a5   : > { %11378 = vmatmul.mubr.msk.bf16.gmra.mxu1 %vm991_vm3, %v10054_v62  ;;  %11655 = vmatprep.subr.msk.bf16.mxu0 %vm1004_vm0, %v14527_v7  ;;  %v7969_v62 = vld [vmem:[#allocation2 + $0xb0] sm:$0xf] }
 0x3a6   : > { %11390 = vmatmul.mubr.msk.bf16.gmra.mxu0 %vm991_vm3, %v10062_v50  ;;  %11397 = vmatprep.mubr.msk.bf16.mxu1 %vm991_vm3, %v10067_v35  ;;  %v10103_v50 = vcombine.low %v7969_v62, %v7970_v20  ;;  %v7689_v35 = vld [vmem:[#allocation2 + $0x9c] sm:$0xf] }
 0x3a7   : > { %11409 = vmatprep.mubr.msk.bf16.mxu0 %vm991_vm3, %v10068_v14 }
 0x3ad   : > { %11398 = vmatmul.mubr.msk.bf16.vlgmr.msra.gmra.mxu1 %vm991_vm3, %v10068_v14 }
 0x3ae   : > { %11410 = vmatmul.mubr.msk.bf16.vlgmr.msra.gmra.mxu0 %vm991_vm3, %v10069_v17  ;;  %11418 = vmatpush3.bf16.msra.mxu1 %v14088_v9 }
 0x3af   : > { %11401 = vmatprep.mubr.msk.bf16.mxu1 %vm991_vm3, %v10069_v17  ;;  %11413 = vmatprep.mubr.msk.bf16.mxu0 %vm991_vm3, %v10070_v12  ;;  %v7972_v17 = vld [vmem:[#allocation2 + $0xbc] sm:$0xf] }
 0x3b0   : > { %11419 = vmatprep.subr.bf16.mxu1 %v14618_v56  ;;  %11430 = vmatpush3.bf16.msra.mxu0 %v14116_v46  ;;  %v10104_v24 = vcombine.low %v7971_v22, %v7972_v17 }
 0x3b1   : > { %11431 = vmatprep.subr.bf16.mxu0 %v14627_v13 }
 0x3b2   : > { %11420 = vmatpush3.bf16.msra.mxu1 %v14618_v56 }
 0x3b3   : > { %11656 = vmatprep.subr.msk.bf16.mxu1 %vm1004_vm0, %v14634_v8 }
 0x3b4   : > { %11432 = vmatpush3.bf16.msra.mxu0 %v14627_v13 }
 0x3b5   : > { %11402 = vmatmul.mubr.msk.bf16.gmra.mxu1 %vm991_vm3, %v10070_v12  ;;  %11657 = vmatprep.subr.msk.bf16.mxu0 %vm1004_vm0, %v14645_v30  ;;  %v10096_v12 = vcombine.low %v7688_v28, %v7689_v35  ;;  %v10117_v28 = vcombine.low %v7973_v45, %v7974_v38 }
 0x3b6   : > { %11414 = vmatmul.mubr.msk.bf16.gmra.mxu0 %vm991_vm3, %v10075_v6  ;;  %11421 = vmatprep.mubr.msk.bf16.mxu1 %vm991_vm3, %v10080_v2 }
 0x3b7   : > { %11433 = vmatprep.mubr.msk.bf16.mxu0 %vm991_vm3, %v10088_v43 }
 0x3bd   : > { %11422 = vmatmul.mubr.msk.bf16.vlgmr.msra.gmra.mxu1 %vm991_vm3, %v10081_v33 }
 0x3be   : > { %11434 = vmatmul.mubr.msk.bf16.vlgmr.msra.gmra.mxu0 %vm991_vm3, %v10089_v41  ;;  %11442 = vmatpush3.bf16.msra.mxu1 %v14210_v11  ;;  %v8312_v41 = vld [vmem:[#allocation2 + $0x80] sm:$0xf] }
 0x3bf   : > { %11425 = vmatprep.mubr.msk.bf16.mxu1 %vm991_vm3, %v10082_v52  ;;  %11437 = vmatprep.mubr.msk.bf16.mxu0 %vm991_vm3, %v10090_v40  ;;  %v10112_v40 = vcombine.low %v7972_v17, %v7973_v45  ;;  %v14761_v17 = vld [vmem:[#allocation2 + $0x98] sm:$0xf] }
 0x3c0   : > { %11443 = vmatprep.subr.bf16.mxu1 %v14223_v3  ;;  %11454 = vmatpush3.bf16.msra.mxu0 %v14229_v36 }
 0x3c1   : > { %11455 = vmatprep.subr.bf16.mxu0 %v14239_v59 }
 0x3c2   : > { %11444 = vmatpush3.bf16.msra.mxu1 %v14223_v3  ;;  %v14678_v3 = vpop.f32.mrf.mxu0 }
 0x3c3   : > { %11658 = vmatprep.subr.msk.bf16.mxu1 %vm1004_vm0, %v14253_v34  ;;  %v7968_v34 = vld [vmem:[#allocation2 + $0xac] sm:$0xf] }
 0x3c4   : > { %11456 = vmatpush3.bf16.msra.mxu0 %v14239_v59  ;;  %v10102_v59 = vcombine.low %v7967_v39, %v7968_v34  ;;  %v14680_v48 = vpop.f32.mrf.mxu0  ;;  %v10110_v2 = vcombine.low %v7968_v34, %v7969_v62 }
 0x3c5   : > { %11426 = vmatmul.mubr.msk.bf16.gmra.mxu1 %vm991_vm3, %v10083_v44  ;;  %11659 = vmatprep.subr.msk.bf16.mxu0 %vm1004_vm0, %v14277_v47  ;;  %v14687_v47 = vpop.f32.mrf.mxu1 }
 0x3c6   : > { %11438 = vmatmul.mubr.msk.bf16.gmra.mxu0 %vm991_vm3, %v10091_v51  ;;  %11445 = vmatprep.mubr.msk.bf16.mxu1 %vm991_vm3, %v10081_v33  ;;  %v14691_v14 = vpop.f32.mrf.mxu0  ;;  %v8311_v33 = vld [vmem:[#allocation2 + $0x7c] sm:$0xf]  ;;  %v8315_v51 = vld [vmem:[#allocation2 + $0x8c] sm:$0xf] }
 0x3c7   : > { %11457 = vmatprep.mubr.msk.bf16.mxu0 %vm991_vm3, %v10101_v42  ;;  %v14695_v53 = vpop.f32.mrf.mxu1  ;;  %v10122_v61 = vcombine.low %v8311_v33, %v8312_v41  ;;  %v10132_v62 = vcombine.low %v8314_v18, %v8315_v51 }
 0x3c8   : > { %v14699_v6 = vpop.f32.mrf.mxu0 }
 0x3cd   : > { %11446 = vmatmul.mubr.msk.bf16.vlgmr.msra.gmra.mxu1 %vm991_vm3, %v10082_v52 }
 0x3ce   : > { %11458 = vmatmul.mubr.msk.bf16.vlgmr.msra.gmra.mxu0 %vm991_vm3, %v10102_v59  ;;  %11466 = vmatpush3.bf16.msra.mxu1 %v14318_v15 }
 0x3cf   : > { %11449 = vmatprep.mubr.msk.bf16.mxu1 %vm991_vm3, %v10083_v44  ;;  %11461 = vmatprep.mubr.msk.bf16.mxu0 %vm991_vm3, %v10103_v50  ;;  %v8313_v44 = vld [vmem:[#allocation2 + $0x84] sm:$0xf] }
 0x3d0   : > { %11467 = vmatprep.subr.bf16.mxu1 %v14327_v10  ;;  %11478 = vmatpush3.bf16.msra.mxu0 %v14334_v31  ;;  %v10123_v34 = vcombine.low %v8313_v44, %v8314_v18  ;;  %v5697_v18 = vadd.f32 %v14687_v47, %v14622_v55 }
 0x3d1   : > { %11479 = vmatprep.subr.bf16.mxu0 %v14339_v57 }
 0x3d2   : > { %11468 = vmatpush3.bf16.msra.mxu1 %v14327_v10  ;;  %v14708_v10 = vpop.f32.mrf.mxu1 }
 0x3d3   : > { %11660 = vmatprep.subr.msk.bf16.mxu1 %vm1004_vm0, %v14378_v16  ;;  %v14710_v16 = vpop.f32.mrf.mxu0  ;;  %v5700_v55 = vadd.f32 %v14708_v10, %v14652_v37  ;;  %v12216_v37 = vld [vmem:[%s15453_s2 + $0x3c] sm:$0xff]  }
 0x3d4   : > { %11480 = vmatpush3.bf16.msra.mxu0 %v14339_v57  ;;  %v14712_v43 = vpop.f32.mrf.mxu1  ;;  %v10111_v57 = vcombine.low %v7970_v20, %v7971_v22  ;;  %v8317_v22 = vld [vmem:[#allocation2 + $0x94] sm:$0xf] }
 0x3d5   : > { %11450 = vmatmul.mubr.msk.bf16.gmra.mxu1 %vm991_vm3, %v10096_v12  ;;  %11661 = vmatprep.subr.msk.bf16.mxu0 %vm1004_vm0, %v14397_v26  ;;  %v14714_v49 = vpop.f32.mrf.mxu0 }
 0x3d6   : > { %11462 = vmatmul.mubr.msk.bf16.gmra.mxu0 %vm991_vm3, %v10104_v24  ;;  %11469 = vmatprep.mubr.msk.bf16.mxu1 %vm991_vm3, %v10109_v58  ;;  %v14719_v26 = vpop.f32.mrf.mxu1  ;;  %v8579_v58 = vld [vmem:[#allocation2 + $0xa0] sm:$0xf] }
 0x3d7   : > { %11481 = vmatprep.mubr.msk.bf16.mxu0 %vm991_vm3, %v10102_v59  ;;  %v14723_v60 = vpop.f32.mrf.mxu0 }
 0x3d8   : > { %v14729_v52 = vpop.f32.mrf.mxu1 }
 0x3d9   : > { %v14733_v0 = vpop.f32.mrf.mxu0 }
 0x3dd   : > { %11470 = vmatmul.mubr.msk.bf16.vlgmr.msra.gmra.mxu1 %vm991_vm3, %v10110_v2  ;;  %v14773_v2 = vld [vmem:[#allocation2 + $0xa4] sm:$0xf] }
 0x3de   : > { %11482 = vmatmul.mubr.msk.bf16.vlgmr.msra.gmra.mxu0 %vm991_vm3, %v10103_v50  ;;  %11490 = vmatpush3.bf16.msra.mxu1 %v13752_v27  ;;  %v8310_v27 = vld [vmem:[#allocation2 + $0x78] sm:$0xf] }
 0x3df   : > { %11473 = vmatprep.mubr.msk.bf16.mxu1 %vm991_vm3, %v10111_v57  ;;  %11485 = vmatprep.mubr.msk.bf16.mxu0 %vm991_vm3, %v10104_v24  ;;  %v10125_v57 = vcombine.low %v8317_v22, %v14761_v17 }
 0x3e0   : > { %11491 = vmatprep.subr.bf16.mxu1 %v14442_v4  ;;  %11502 = vmatpush3.bf16.msra.mxu0 %v13765_v63  ;;  %v10130_v63 = vcombine.low %v8310_v27, %v8311_v33 }
 0x3e1   : > { %11503 = vmatprep.subr.bf16.mxu0 %v14455_v1 }
 0x3e2   : > { %11492 = vmatpush3.bf16.msra.mxu1 %v14442_v4  ;;  %v14741_v4 = vpop.f32.mrf.mxu1 }
 0x3e3   : > { %11662 = vmatprep.subr.msk.bf16.mxu1 %vm1004_vm0, %v14466_v23  ;;  %v14744_v23 = vpop.f32.mrf.mxu0 }
 0x3e4   : > { %11504 = vmatpush3.bf16.msra.mxu0 %v14455_v1  ;;  %v8316_v1 = vld [vmem:[#allocation2 + $0x90] sm:$0xf]  ;;  %v14746_v42 = vpop.f32.mrf.mxu1 }
 0x3e5   : > { %11474 = vmatmul.mubr.msk.bf16.gmra.mxu1 %vm991_vm3, %v10112_v40  ;;  %11663 = vmatprep.subr.msk.bf16.mxu0 %vm1004_vm0, %v14479_v54  ;;  %v14748_v20 = vpop.f32.mrf.mxu0  ;;  %v10131_v54 = vcombine.low %v8312_v41, %v8313_v44  ;;  %v10124_v59 = vcombine.low %v8315_v51, %v8316_v1  ;;  %v14800_v40 = vld [vmem:[#allocation2 + $0xac] sm:$0xf] }
 0x3e6   : > { %11486 = vmatmul.mubr.msk.bf16.gmra.mxu0 %vm991_vm3, %v10117_v28  ;;  %11493 = vmatprep.mubr.msk.bf16.mxu1 %vm991_vm3, %v10122_v61  ;;  %v14804_v61 = vld [vmem:[#allocation2 + $0xb4] sm:$0xf] }
 0x3e7   : > { %11505 = vmatprep.mubr.msk.bf16.mxu0 %vm991_vm3, %v10130_v63  ;;  %v8581_v63 = vld [vmem:[#allocation2 + $0xa8] sm:$0xf] }
 0x3e8   : > { %v10144_v51 = vcombine.low %v8581_v63, %v14800_v40 }
 0x3ed   : > { %v14750_v39 = vpop.f32.mrf.mxu1  ;;  %11494 = vmatmul.mubr.msk.bf16.vlgmr.msra.gmra.mxu1 %vm991_vm3, %v10123_v34 }
 0x3ee   : > { %v14753_v50 = vpop.f32.mrf.mxu0  ;;  %11506 = vmatmul.mubr.msk.bf16.vlgmr.msra.gmra.mxu0 %vm991_vm3, %v10131_v54  ;;  %11514 = vmatpush3.bf16.msra.mxu1 %v13779_v29 }
 0x3ef   : > { %11497 = vmatprep.mubr.msk.bf16.mxu1 %vm991_vm3, %v10124_v59  ;;  %11509 = vmatprep.mubr.msk.bf16.mxu0 %vm991_vm3, %v10132_v62  ;;  %v14759_v35 = vpop.f32.mrf.mxu1  ;;  %v5689_v59 = vadd.f32 %v14695_v53, %v14639_v25  ;;  %v8319_v25 = vld [vmem:[#allocation2 + $0x9c] sm:$0xf] }
 0x3f0   : > { %v14763_v12 = vpop.f32.mrf.mxu0  ;;  %11515 = vmatprep.subr.bf16.mxu1 %v14518_v32  ;;  %11526 = vmatpush3.bf16.msra.mxu0 %v14088_v9  ;;  %v10133_v9 = vcombine.low %v8316_v1, %v8317_v22  ;;  %v14813_v1 = vld [vmem:[#allocation2 + $0xb0] sm:$0xf] }
 0x3f1   : > { %v14767_v24 = vpop.f32.mrf.mxu1  ;;  %11527 = vmatprep.subr.bf16.mxu0 %v14618_v56  ;;  %v5802_v10 = vadd.f32 %v14699_v6, %v5689_v59  ;;  %v8585_v6 = vld [vmem:[#allocation2 + $0xb8] sm:$0xf] }
 0x3f2   : > { %v14770_v29 = vpop.f32.mrf.mxu0  ;;  %11516 = vmatpush3.bf16.msra.mxu1 %v14518_v32  ;;  %v10143_v32 = vcombine.low %v8579_v58, %v14773_v2 }
 0x3f3   : > { %v14776_v45 = vpop.f32.mrf.mxu1  ;;  %11664 = vmatprep.subr.msk.bf16.mxu1 %vm1004_vm0, %v14527_v7 }
 0x3f4   : > { %v14780_v38 = vpop.f32.mrf.mxu0  ;;  %11528 = vmatpush3.bf16.msra.mxu0 %v14618_v56 }
 0x3f5   : > { %v14783_v33 = vpop.f32.mrf.mxu1  ;;  %11498 = vmatmul.mubr.msk.bf16.gmra.mxu1 %vm991_vm3, %v10125_v57  ;;  %11665 = vmatprep.subr.msk.bf16.mxu0 %vm1004_vm0, %v14634_v8 }
 0x3f6   : > { %v14789_v41 = vpop.f32.mrf.mxu0  ;;  %11510 = vmatmul.mubr.msk.bf16.gmra.mxu0 %vm991_vm3, %v10133_v9  ;;  %11517 = vmatprep.mubr.msk.bf16.mxu1 %vm991_vm3, %v10131_v54  ;;  %v14818_v54 = vcombine.low %v14813_v1, %v14804_v61 }
 0x3f7   : > { %11529 = vmatprep.mubr.msk.bf16.mxu0 %vm991_vm3, %v10143_v32  ;;  %v14794_v7 = vpop.f32.mrf.mxu1  ;;  %v5713_v32 = vadd.f32 %v14719_v26, %v14663_v19 }
 0x3f8   : > { %v14796_v56 = vpop.f32.mrf.mxu0 }
 0x3f9   : > { %v14798_v27 = vpop.f32.mrf.mxu1 }
 0x3fa   : > { %v14802_v28 = vpop.f32.mrf.mxu0 }
 0x3fb   : > { %v14806_v8 = vpop.f32.mrf.mxu1 }
 0x3fc   : > { %v14810_v44 = vpop.f32.mrf.mxu0 }
 0x3fd   : > { %15469 = vst [vmem:[#allocation4_spill] sm:$0xff] %v14810_v44  ;;  %v11231_v34 = vpop.f32.mrf.mxu1  ;;  %11518 = vmatmul.mubr.msk.bf16.vlgmr.msra.gmra.mxu1 %vm991_vm3, %v10132_v62  ;;  %v5804_v62 = vadd.f32 %v14691_v14, %v5697_v18  ;;  %v5692_v14 = vadd.f32 %v14712_v43, %v14654_v21  ;;  %v5705_v18 = vadd.f32 %v14729_v52, %v14670_v5  ;;  %v12217_v5 = vld [vmem:[%s15453_s2 + $0x5c] ss:$0 sps:$4 sm:$0xff]  }
 0x3fe   : > { %v14822_v22 = vpop.f32.mrf.mxu0  ;;  %11530 = vmatmul.mubr.msk.bf16.vlgmr.msra.gmra.mxu0 %vm991_vm3, %v10144_v51  ;;  %11538 = vmatpush3.bf16.msra.mxu1 %v14116_v46  ;;  %v14836_v46 = vld [vmem:[#allocation2 + $0xbc] sm:$0xf]  ;;  %v10138_v44 = vcombine.low %v14761_v17, %v8319_v25  ;;  %v5929_v21 = vadd.f32 %v14759_v35, %v5802_v10  ;;  %v5808_v35 = vadd.f32 %v14723_v60, %v5713_v32 }
 0x3ff   : > { %11521 = vmatprep.mubr.msk.bf16.mxu1 %vm991_vm3, %v10133_v9  ;;  %11533 = vmatprep.mubr.msk.bf16.mxu0 %vm991_vm3, %v14818_v54  ;;  %v6092_v47 = vpop.f32.mrf.mxu1  ;;  %v5931_v57 = vadd.f32 %v14750_v39, %v5804_v62  ;;  %v5803_v39 = vadd.f32 %v14714_v49, %v5692_v14  ;;  %v5806_v17 = vadd.f32 %v14733_v0, %v5705_v18 }
 0x400   : > { %v14832_v58 = vpop.f32.mrf.mxu0  ;;  %11539 = vmatprep.subr.bf16.mxu1 %v14627_v13  ;;  %11550 = vmatpush3.bf16.msra.mxu0 %v14210_v11  ;;  %v5805_v11 = vadd.f32 %v14710_v16, %v5700_v55  ;;  %v10151_v16 = vcombine.low %v14773_v2, %v8581_v63  ;;  %v5716_v2 = vadd.f32 %v14741_v4, %v14678_v3 }
 0x401   : > { %v11232_v53 = vpop.f32.mrf.mxu1  ;;  %11551 = vmatprep.subr.bf16.mxu0 %v12216_v37  ;;  %v6032_v63 = vadd.f32 %v14763_v12, %v5929_v21  ;;  %v5930_v60 = vadd.f32 %v14776_v45, %v5803_v39  ;;  %v5935_v0 = vadd.f32 %v14783_v33, %v5808_v35  ;;  %v10153_v33 = vcombine.low %v14804_v61, %v8585_v6  ;;  %v8864_v61 = vld [vmem:[#allocation2 + $0xc8] sm:$0xf] }
 0x402   : > { %v11244_v9 = vpop.f32.mrf.mxu0  ;;  %11540 = vmatpush3.bf16.msra.mxu1 %v14627_v13  ;;  %v10146_v13 = vcombine.low %v8585_v6, %v14836_v46  ;;  %v5932_v19 = vadd.f32 %v14767_v24, %v5805_v11  ;;  %v5809_v12 = vadd.f32 %v14744_v23, %v5716_v2  ;;  %v8868_v2 = vld [vmem:[#allocation2 + $0xd8] sm:$0xf] }
 0x403   : > { %v6095_v31 = vpop.f32.mrf.mxu1  ;;  %11666 = vmatprep.subr.msk.bf16.mxu1 %vm1004_vm0, %v14645_v30  ;;  %v6034_v30 = vadd.f32 %v14753_v50, %v5931_v57  ;;  %v5708_v50 = vadd.f32 %v14746_v42, %v14680_v48  ;;  %v6123_v62 = vadd.f32 %v6092_v47, %v6032_v63  ;;  %v10152_v48 = vcombine.low %v14800_v40, %v14813_v1  ;;  %v8588_v57 = vld [vmem:[#allocation2 + $0xc4] sm:$0xf] }
 0x404   : > { %v14855_v43 = vpop.f32.mrf.mxu0  ;;  %11552 = vmatpush3.bf16.msra.mxu0 %v12216_v37  ;;  %v6035_v49 = vadd.f32 %v14770_v29, %v5932_v19  ;;  %v6038_v47 = vadd.f32 %v14789_v41, %v5935_v0  ;;  %v5936_v1 = vadd.f32 %v14798_v27, %v5809_v12  ;;  %v8865_v27 = vld [vmem:[#allocation2 + $0xcc] sm:$0xf] }
 0x405   : > { %v11235_v26 = vpop.f32.mrf.mxu1  ;;  %11522 = vmatmul.mubr.msk.bf16.gmra.mxu1 %vm991_vm3, %v10138_v44  ;;  %11667 = vmatprep.subr.msk.bf16.mxu0 %vm1004_vm0, %v12217_v5  ;;  %v6125_v44 = vadd.f32 %v11231_v34, %v6034_v30  ;;  %v6033_v34 = vadd.f32 %v14780_v38, %v5930_v60  ;;  %v6250_v23 = vadd.f32 %v14832_v58, %v6123_v62  ;;  %v15470_v30 = vld [vmem:[#allocation4_spill] sm:$0xff] }
 0x406   : > { %v14866_v52 = vpop.f32.mrf.mxu0  ;;  %11534 = vmatmul.mubr.msk.bf16.gmra.mxu0 %vm991_vm3, %v10146_v13  ;;  %11541 = vmatprep.mubr.msk.bf16.mxu1 %vm991_vm3, %v10151_v16  ;;  %v6126_v4 = vadd.f32 %v11232_v53, %v6035_v49  ;;  %v6129_v37 = vadd.f32 %v11235_v26, %v6038_v47  ;;  %v10164_v21 = vcombine.low %v8864_v61, %v8865_v27  ;;  %v12220_v26 = vld [vmem:[%s15453_s2 + $0x68] ss:$0 sps:$4 sm:$0xff]  }
 0x407   : > { %11553 = vmatprep.mubr.msk.bf16.mxu0 %vm991_vm3, %v10144_v51  ;;  %v6108_v24 = vpop.f32.mrf.mxu1  ;;  %v5933_v51 = vadd.f32 %v14794_v7, %v5806_v17  ;;  %v6252_v29 = vadd.f32 %v14822_v22, %v6125_v44  ;;  %v5807_v7 = vadd.f32 %v14748_v20, %v5708_v50  ;;  %v6124_v41 = vadd.f32 %v6095_v31, %v6033_v34  ;;  %v8866_v31 = vld [vmem:[#allocation2 + $0xd0] sm:$0xf]  ;;  %v14934_v44 = vld [vmem:[#allocation2 + $0xdc] sm:$0xf] }
 0x408   : > { %v14879_v59 = vpop.f32.mrf.mxu0  ;;  %v6253_v38 = vadd.f32 %v11244_v9, %v6126_v4  ;;  %v12219_v9 = vld [vmem:[%s15453_s2 + $0x54] sm:$0xff]   ;;  %v10172_v5 = vcombine.low %v8865_v27, %v8866_v31  ;;  %v6256_v35 = vadd.f32 %v14866_v52, %v6129_v37 }
 0x409   : > { %v14885_v55 = vpop.f32.mrf.mxu1  ;;  %v6036_v25 = vadd.f32 %v14796_v56, %v5933_v51  ;;  %v5934_v20 = vadd.f32 %v14806_v8, %v5807_v7  ;;  %v8587_v8 = vld [vmem:[#allocation2 + $0xc0] sm:$0xf] }
 0x40a   : > { %v14887_v3 = vpop.f32.mrf.mxu0  ;;  %v10154_v19 = vcombine.low %v14836_v46, %v8587_v8 }
 0x40b   : > { %v14891_v42 = vpop.f32.mrf.mxu1  ;;  %v6127_v11 = vadd.f32 %v6108_v24, %v6036_v25  ;;  %v6037_v39 = vadd.f32 %v15470_v30, %v5934_v20  ;;  %v10159_v24 = vcombine.low %v8587_v8, %v8588_v57 }
 0x40c   : > { %v14895_v45 = vpop.f32.mrf.mxu0 }
 0x40d   : > { %v11255_v40 = vpop.f32.mrf.mxu1  ;;  %11542 = vmatmul.mubr.msk.bf16.vlgmr.msra.gmra.mxu1 %vm991_vm3, %v10152_v48  ;;  %v6254_v49 = vadd.f32 %v14879_v59, %v6127_v11  ;;  %v6128_v52 = vadd.f32 %v14891_v42, %v6037_v39 }
 0x40e   : > { %v6355_v22 = vadd.f32 %v11255_v40, %v6252_v29  ;;  %v11267_v53 = vpop.f32.mrf.mxu0  ;;  %11554 = vmatmul.mubr.msk.bf16.vlgmr.msra.gmra.mxu0 %vm991_vm3, %v14818_v54  ;;  %11562 = vmatpush3.bf16.msra.mxu1 %v14229_v36  ;;  %v12218_v36 = vld [vmem:[%s15453_s2 + $0x48] sm:$0xff]  }
 0x40f   : > { %11545 = vmatprep.mubr.msk.bf16.mxu1 %vm991_vm3, %v10153_v33  ;;  %11557 = vmatprep.mubr.msk.bf16.mxu0 %vm991_vm3, %v10146_v13  ;;  %v6322_v56 = vpop.f32.mrf.mxu1  ;;  %v6039_v13 = vadd.f32 %v14802_v28, %v5936_v1  ;;  %v14949_v33 = vcombine.low %v8868_v2, %v14934_v44  ;;  %v8870_v1 = vld [vmem:[#allocation2 + $0xe0] sm:$0xf] }
 0x410   : > { %v14911_v58 = vadd.f32 %v11267_v53, %v6355_v22  ;;  %v6353_v10 = vadd.f32 %v6322_v56, %v6250_v23  ;;  %v6413_v14 = vpop.f32.mrf.mxu0  ;;  %11563 = vmatprep.subr.bf16.mxu1 %v12218_v36  ;;  %11574 = vmatpush3.bf16.msra.mxu0 %v14318_v15  ;;  %v6251_v15 = vadd.f32 %v14855_v43, %v6124_v41  ;;  %v8867_v43 = vld [vmem:[#allocation2 + $0xd4] sm:$0xf] }
 0x411   : > { %v11256_v54 = vpop.f32.mrf.mxu1  ;;  %11575 = vmatprep.subr.bf16.mxu0 %v12219_v9  ;;  %v6130_v46 = vadd.f32 %v14885_v55, %v6039_v13  ;;  %v14941_v48 = vcombine.low %v8866_v31, %v8867_v43  ;;  %v10173_v4 = vcombine.low %v8867_v43, %v8868_v2  ;;  %v6255_v23 = vadd.f32 %v14895_v45, %v6128_v52 }
 0x412   : > { %6454 = vst.msk [vmem:[#allocation3 + $0x10] sm:$0xff] %vm325_vm5, %v14911_v58  ;;  %v6444_v32 = vadd.f32 %v6413_v14, %v6353_v10  ;;  %v6356_v18 = vadd.f32 %v11256_v54, %v6253_v38  ;;  %v11268_v6 = vpop.f32.mrf.mxu0  ;;  %11564 = vmatpush3.bf16.msra.mxu1 %v12218_v36  ;;  %v6484_v59 = vmul.f32 %v14911_v58, %v14911_v58  ;;  %v6463_v22 = vsel %vm325_vm5, %v14911_v58, 0.0 }
 0x413   : > { %v6325_v16 = vpop.f32.mrf.mxu1  ;;  %11668 = vmatprep.subr.msk.bf16.mxu1 %vm1004_vm0, %v12220_v26  ;;  %v6257_v7 = vadd.f32 %v14887_v3, %v6130_v46  ;;  %v10174_v14 = vcombine.low %v14934_v44, %v8870_v1  ;;  %v8872_v26 = vld [vmem:[#allocation2 + $0xe8] sm:$0xf] }
 0x414   : > { %6452 = vst.msk [vmem:[#allocation3] sm:$0xff] %vm325_vm5, %v6444_v32  ;;  %v6447_v17 = vadd.f32 %v11268_v6, %v6356_v18  ;;  %v6416_v28 = vpop.f32.mrf.mxu0  ;;  %11576 = vmatpush3.bf16.msra.mxu0 %v12219_v9  ;;  %v6354_v50 = vadd.f32 %v6325_v16, %v6251_v15  ;;  %v6482_v51 = vmul.f32 %v6444_v32, %v6444_v32  ;;  %v6460_v34 = vsel %vm325_vm5, %v6444_v32, 0.0  ;;  %v8871_v9 = vld [vmem:[#allocation2 + $0xe4] sm:$0xf] }
 0x415   : > { %v11259_v63 = vpop.f32.mrf.mxu1  ;;  %11546 = vmatmul.mubr.msk.bf16.gmra.mxu1 %vm991_vm3, %v10154_v19  ;;  %v6493_v37 = vsel %vm325_vm5, %v6484_v59, 0.0  ;;  %v15471_v6 = vld [vmem:[#allocation6_spill] sm:$0xff]  ;;  %v10175_v44 = vcombine.low %v8871_v9, %v8872_v26 }
 0x416   : > { %6455 = vst.msk [vmem:[#allocation3 + $0x18] sm:$0xff] %vm325_vm5, %v6447_v17  ;;  %v6359_v60 = vadd.f32 %v11259_v63, %v6256_v35  ;;  %v11271_v0 = vpop.f32.mrf.mxu0  ;;  %11558 = vmatmul.mubr.msk.bf16.gmra.mxu0 %vm991_vm3, %v10159_v24  ;;  %11565 = vmatprep.mubr.msk.bf16.mxu1 %vm991_vm3, %v10164_v21  ;;  %v6445_v55 = vadd.f32 %v6416_v28, %v6354_v50  ;;  %v6490_v38 = vsel %vm325_vm5, %v6482_v51, 0.0  ;;  %v6465_v36 = vsel %vm325_vm5, %v6447_v17, 0.0  ;;  %v12221_v19 = vld [vmem:[%s15453_s2 + $0x60] sm:$0xff]  }
 0x417   : > { %v6338_v62 = vpop.f32.mrf.mxu1  ;;  %11577 = vmatprep.mubr.msk.bf16.mxu0 %vm991_vm3, %v10172_v5  ;;  %v6485_v41 = vmul.f32 %v6447_v17, %v6447_v17  ;;  %v10167_v35 = vcombine.low %v8870_v1, %v8871_v9 }
 0x418   : > { %v14946_v42 = vadd.f32 %v11271_v0, %v6359_v60  ;;  %v6357_v12 = vadd.f32 %v6338_v62, %v6254_v49  ;;  %v6429_v29 = vpop.f32.mrf.mxu0  ;;  %6453 = vst.msk [vmem:[#allocation3 + $0x8] sm:$0xff] %vm325_vm5, %v6445_v55  ;;  %v6461_v47 = vsel %vm325_vm5, %v6445_v55, 0.0  ;;  %v6483_v25 = vmul.f32 %v6445_v55, %v6445_v55 }
 0x419   : > { %v11260_v40 = vpop.f32.mrf.mxu1  ;;  %v6462_v53 = vadd.f32 %v6461_v47, %v6460_v34  ;;  %v6495_v21 = vsel %vm325_vm5, %v6485_v41, 0.0 }
 0x41a   : > { %6458 = vst.msk [vmem:[#allocation3 + $0x30] sm:$0xff] %vm325_vm5, %v14946_v42  ;;  %v6448_v20 = vadd.f32 %v6429_v29, %v6357_v12  ;;  %v11272_v3 = vpop.f32.mrf.mxu0  ;;  %v6491_v56 = vsel %vm325_vm5, %v6483_v25, 0.0  ;;  %v6360_v61 = vadd.f32 %v11260_v40, %v6257_v7  ;;  %v6488_v17 = vmul.f32 %v14946_v42, %v14946_v42 }
 0x41b   : > { %v6341_v27 = vpop.f32.mrf.mxu1  ;;  %v6464_v10 = vadd.f32 %v6463_v22, %v6462_v53  ;;  %v6492_v45 = vadd.f32 %v6491_v56, %v6490_v38  ;;  %v6471_v49 = vsel %vm325_vm5, %v14946_v42, 0.0 }
 0x41c   : > { %6456 = vst.msk [vmem:[#allocation3 + $0x20] sm:$0xff] %vm325_vm5, %v6448_v20  ;;  %v6432_v58 = vpop.f32.mrf.mxu0  ;;  %v6486_v8 = vmul.f32 %v6448_v20, %v6448_v20  ;;  %v6451_v31 = vadd.f32 %v11272_v3, %v6360_v61  ;;  %v6358_v54 = vadd.f32 %v6341_v27, %v6255_v23  ;;  %v6467_v13 = vsel %vm325_vm5, %v6448_v20, 0.0 }
 0x41d   : > { %v14966_v57 = vpop.f32.mrf.mxu1  ;;  %11566 = vmatmul.mubr.msk.bf16.vlgmr.msra.gmra.mxu1 %vm991_vm3, %v14941_v48  ;;  %v6494_v11 = vadd.f32 %v6493_v37, %v6492_v45  ;;  %v6466_v32 = vadd.f32 %v6465_v36, %v6464_v10 }
 0x41e   : > { %v14970_v18 = vpop.f32.mrf.mxu0  ;;  %11586 = vmatpush3.bf16.msra.mxu1 %v15471_v6  ;;  %11578 = vmatmul.mubr.msk.bf16.vlgmr.msra.gmra.mxu0 %vm991_vm3, %v10173_v4  ;;  %6459 = vst.msk [vmem:[#allocation3 + $0x38] sm:$0xff] %vm325_vm5, %v6451_v31  ;;  %v6449_v15 = vadd.f32 %v6432_v58, %v6358_v54  ;;  %v6497_v28 = vsel %vm325_vm5, %v6486_v8, 0.0  ;;  %v6489_v52 = vmul.f32 %v6451_v31, %v6451_v31  ;;  %v6501_v4 = vsel %vm325_vm5, %v6488_v17, 0.0 }
 0x41f   : > { %v14977_v16 = vpop.f32.mrf.mxu1  ;;  %11569 = vmatprep.mubr.msk.bf16.mxu1 %vm991_vm3, %v14949_v33  ;;  %11587 = vmatprep.subr.bf16.mxu1 %v12221_v19  ;;  %v6468_v5 = vadd.f32 %v6467_v13, %v6466_v32  ;;  %v6496_v30 = vadd.f32 %v6495_v21, %v6494_v11  ;;  %v6473_v59 = vsel %vm325_vm5, %v6451_v31, 0.0 }
 0x420   : > { %v14984_v39 = vpop.f32.mrf.mxu0  ;;  %11581 = vmatprep.mubr.msk.bf16.mxu0 %vm991_vm3, %v10174_v14  ;;  %6457 = vst.msk [vmem:[#allocation3 + $0x28] sm:$0xff] %vm325_vm5, %v6449_v15  ;;  %v6469_v24 = vsel %vm325_vm5, %v6449_v15, 0.0  ;;  %v6487_v43 = vmul.f32 %v6449_v15, %v6449_v15  ;;  %v6503_v34 = vsel %vm325_vm5, %v6489_v52, 0.0 }
 0x421   : > { %v14992_v2 = vpop.f32.mrf.mxu1  ;;  %v6498_v46 = vadd.f32 %v6497_v28, %v6496_v30  ;;  %v6470_v50 = vadd.f32 %v6469_v24, %v6468_v5  ;;  %v6680_v28 = vadd.f32 %v14970_v18, %v14966_v57 }
 0x422   : > { %v14994_v63 = vpop.f32.mrf.mxu0  ;;  %11588 = vmatpush3.bf16.msra.mxu1 %v12221_v19  ;;  %v6499_v60 = vsel %vm325_vm5, %v6487_v43, 0.0 }
 0x423   : > { %v14999_v0 = vpop.f32.mrf.mxu1  ;;  %v6472_v51 = vadd.f32 %v6471_v49, %v6470_v50  ;;  %v6500_v55 = vadd.f32 %v6499_v60, %v6498_v46  ;;  %v6672_v46 = vadd.f32 %v14984_v39, %v14977_v16  ;;  %v6683_v52 = vadd.f32 %v14994_v63, %v14992_v2 }
 0x424   : > { %v15001_v62 = vpop.f32.mrf.mxu0 }
 0x425   : > { %v15005_v12 = vpop.f32.mrf.mxu1  ;;  %11570 = vmatmul.mubr.msk.bf16.gmra.mxu1 %vm991_vm3, %v10167_v35  ;;  %v15008_v29 = vadd.f32 %v6473_v59, %v6472_v51  ;;  %v6502_v42 = vadd.f32 %v6501_v4, %v6500_v55  ;;  %v6675_v57 = vadd.f32 %v15001_v62, %v14999_v0 }
 0x426   : > { %v11295_v7 = vpop.f32.mrf.mxu0  ;;  %11582 = vmatmul.mubr.msk.bf16.gmra.mxu0 %vm991_vm3, %v10175_v44  ;;  %11589 = vmatprep.mubr.msk.bf16.mxu1 %vm991_vm3, %v14941_v48  ;;  %v8873_v48 = vld [vmem:[#allocation2 + $0xec] sm:$0xf] }
 0x427   : > { %v6604_v47 = vpop.f32.mrf.mxu1  ;;  %v15014_v25 = vadd.f32 %v6503_v34, %v6502_v42  ;;  %v10180_v61 = vcombine.low %v8872_v26, %v8873_v48  ;;  %v6696_v34 = vadd.f32 %v11295_v7, %v15005_v12 }
 0x428   : > { %v6687_v40 = vpop.f32.mrf.mxu0 }
 0x429   : > { %15472 = vst [vmem:[#allocation5_spill] sm:$0xff] %v15014_v25  ;;  %v15016_v1 = vpop.f32.mrf.mxu1 }
 0x42a   : > { %v15018_v23 = vpop.f32.mrf.mxu0 }
 0x42b   : > { %v15020_v22 = vpop.f32.mrf.mxu1 }
 0x42c   : > { %v15022_v53 = vpop.f32.mrf.mxu0 }
 0x42d   : > { %v11303_v20 = vpop.f32.mrf.mxu1  ;;  %11590 = vmatmul.mubr.msk.bf16.vlgmr.msra.gmra.mxu1 %vm991_vm3, %v14949_v33  ;;  %v6691_v12 = vadd.f32 %v15022_v53, %v15020_v22 }
 0x42e   : > { %v11315_v3 = vpop.f32.mrf.mxu0  ;;  %11593 = vmatprep.mubr.msk.bf16.mxu1 %vm991_vm3, %v10167_v35  ;;  %v6775_v50 = vadd.f32 %v11303_v20, %v6680_v28 }
 0x42f   : > { %v6742_v38 = vpop.f32.mrf.mxu1 }
 0x430   : > { %v6857_v41 = vpop.f32.mrf.mxu0  ;;  %v6773_v60 = vadd.f32 %v6742_v38, %v6672_v46  ;;  %v6890_v18 = vadd.f32 %v11315_v3, %v6775_v50  ;;  %v6699_v46 = vadd.f32 %v15018_v23, %v15016_v1 }
 0x431   : > { %v11304_v56 = vpop.f32.mrf.mxu1 }
 0x432   : > { %v11316_v27 = vpop.f32.mrf.mxu0  ;;  %v6776_v4 = vadd.f32 %v11304_v56, %v6683_v52  ;;  %v6888_v16 = vadd.f32 %v6857_v41, %v6773_v60 }
 0x433   : > { %v6745_v37 = vpop.f32.mrf.mxu1 }
 0x434   : > { %v6860_v10 = vpop.f32.mrf.mxu0  ;;  %v6774_v39 = vadd.f32 %v6745_v37, %v6675_v57  ;;  %v6891_v25 = vadd.f32 %v11316_v27, %v6776_v4 }
 0x435   : > { %v11307_v45 = vpop.f32.mrf.mxu1  ;;  %11594 = vmatmul.mubr.msk.bf16.gmra.mxu1 %vm991_vm3, %v10180_v61  ;;  %v6688_v61 = vadd.f32 %v6687_v40, %v6604_v47 }
 0x436   : > { %v11319_v58 = vpop.f32.mrf.mxu0  ;;  %v6779_v2 = vadd.f32 %v11307_v45, %v6696_v34  ;;  %v6889_v3 = vadd.f32 %v6860_v10, %v6774_v39 }
 0x437   : > { %v6758_v14 = vpop.f32.mrf.mxu1 }
 0x438   : > { %v6873_v36 = vpop.f32.mrf.mxu0  ;;  %v6777_v0 = vadd.f32 %v6758_v14, %v6688_v61  ;;  %v6894_v47 = vadd.f32 %v11319_v58, %v6779_v2 }
 0x439   : > { %v11308_v8 = vpop.f32.mrf.mxu1 }
 0x43a   : > { %v15028_v31 = vpop.f32.mrf.mxu0  ;;  %v6780_v7 = vadd.f32 %v11308_v8, %v6699_v46 }
 0x43b   : > { %v6761_v33 = vpop.f32.mrf.mxu1 }
 0x43c   : > { %v15030_v54 = vpop.f32.mrf.mxu0 }
 0x43d   : > { %v11327_v9 = vpop.f32.mrf.mxu1 }
 0x43e   : > { %v11339_v11 = vpop.f32.mrf.mxu0  ;;  %v6981_v20 = vadd.f32 %v11327_v9, %v6890_v18  ;;  %v6892_v9 = vadd.f32 %v6873_v36, %v6777_v0 }
 0x43f   : > { %v6948_v32 = vpop.f32.mrf.mxu1 }
 0x440   : > { %v7027_v6 = vpop.f32.mrf.mxu0  ;;  %v6979_v63 = vadd.f32 %v6948_v32, %v6888_v16  ;;  %v7060_v56 = vadd.f32 %v11339_v11, %v6981_v20  ;;  %v6778_v32 = vadd.f32 %v6761_v33, %v6691_v12 }
 0x441   : > { %v11328_v21 = vpop.f32.mrf.mxu1 }
 0x442   : > { %v11340_v13 = vpop.f32.mrf.mxu0  ;;  %v6982_v50 = vadd.f32 %v11328_v21, %v6891_v25  ;;  %v7058_v40 = vadd.f32 %v7027_v6, %v6979_v63  ;;  %v6895_v25 = vadd.f32 %v15028_v31, %v6780_v7  ;;  %v6893_v58 = vadd.f32 %v15030_v54, %v6778_v32 }
 0x443   : > { %v6951_v15 = vpop.f32.mrf.mxu1 }
 0x444   : > { %v7030_v19 = vpop.f32.mrf.mxu0  ;;  %v6980_v27 = vadd.f32 %v6951_v15, %v6889_v3  ;;  %v7061_v1 = vadd.f32 %v11340_v13, %v6982_v50 }
 0x445   : > { %v11331_v26 = vpop.f32.mrf.mxu1 }
 0x446   : > { %v15032_v5 = vpop.f32.mrf.mxu0  ;;  %v6985_v23 = vadd.f32 %v11331_v26, %v6894_v47  ;;  %v7059_v57 = vadd.f32 %v7030_v19, %v6980_v27 }
 0x447   : > { %v6964_v30 = vpop.f32.mrf.mxu1 }
 0x448   : > { %v15034_v35 = vpop.f32.mrf.mxu0  ;;  %v6983_v11 = vadd.f32 %v6964_v30, %v6892_v9  ;;  %v7064_v36 = vadd.f32 %v15032_v5, %v6985_v23 }
 0x449   : > { %v11332_v17 = vpop.f32.mrf.mxu1 }
 0x44a   : > { %v15038_v24 = vpop.f32.mrf.mxu0  ;;  %v6986_v6 = vadd.f32 %v11332_v17, %v6895_v25 }
 0x44b   : > { %v15040_v43 = vpop.f32.mrf.mxu1 }
 0x44c   : > { %v15044_v44 = vpop.f32.mrf.mxu0  ;;  %v6984_v31 = vadd.f32 %v15040_v43, %v6893_v58  ;;  %v7065_v17 = vadd.f32 %v15038_v24, %v6986_v6  ;;  %v15473_v58 = vld [vmem:[#allocation5_spill] sm:$0xff] }
 0x44d   : > { %v11351_v49 = vpop.f32.mrf.mxu1  ;;  %v6505_v6 = vrot.slane %v15473_v58, 4 }
 0x44e   : > { %v11363_v51 = vpop.f32.mrf.mxu0  ;;  %v7175_v37 = vadd.f32 %v11351_v49, %v7060_v56 }
 0x44f   : > { %v7142_v55 = vpop.f32.mrf.mxu1 }
 0x450   : > { %v7233_v59 = vpop.f32.mrf.mxu0  ;;  %v7173_v14 = vadd.f32 %v7142_v55, %v7058_v40  ;;  %v7266_v22 = vadd.f32 %v11363_v51, %v7175_v37  ;;  %v7062_v55 = vadd.f32 %v15034_v35, %v6983_v11  ;;  %v7063_v35 = vadd.f32 %v15044_v44, %v6984_v31 }
 0x451   : > { %v11352_v42 = vpop.f32.mrf.mxu1 }
 0x452   : > { %v11364_v48 = vpop.f32.mrf.mxu0  ;;  %v7176_v53 = vadd.f32 %v11352_v42, %v7061_v1  ;;  %v7264_v33 = vadd.f32 %v7233_v59, %v7173_v14 }
 0x453   : > { %v7145_v28 = vpop.f32.mrf.mxu1 }
 0x454   : > { %v7236_v38 = vpop.f32.mrf.mxu0  ;;  %v7174_v49 = vadd.f32 %v7145_v28, %v7059_v57  ;;  %v7267_v19 = vadd.f32 %v11364_v48, %v7176_v53 }
 0x455   : > { %v11355_v62 = vpop.f32.mrf.mxu1 }
 0x456   : > { %v11367_v52 = vpop.f32.mrf.mxu0  ;;  %v7179_v51 = vadd.f32 %v11355_v62, %v7064_v36  ;;  %v7265_v59 = vadd.f32 %v7236_v38, %v7174_v49 }
 0x457   : > { %v7158_v41 = vpop.f32.mrf.mxu1 }
 0x458   : > { %v7249_v45 = vpop.f32.mrf.mxu0  ;;  %v7177_v5 = vadd.f32 %v7158_v41, %v7062_v55  ;;  %v7270_v39 = vadd.f32 %v11367_v52, %v7179_v51 }
 0x459   : > { %v11356_v60 = vpop.f32.mrf.mxu1 }
 0x45a   : > { %v11368_v10 = vpop.f32.mrf.mxu0  ;;  %v7180_v43 = vadd.f32 %v11356_v60, %v7065_v17  ;;  %v7268_v24 = vadd.f32 %v7249_v45, %v7177_v5 }
 0x45b   : > { %v7161_v21 = vpop.f32.mrf.mxu1 }
 0x45c   : > { %v7252_v8 = vpop.f32.mrf.mxu0  ;;  %v7178_v28 = vadd.f32 %v7161_v21, %v7063_v35  ;;  %v7271_v3 = vadd.f32 %v11368_v10, %v7180_v43  ;;  %v6475_v10 = vrot.slane %v15008_v29, 4  ;;  %v6506_v35 = vadd.f32 %v6505_v6, %v15473_v58 }
 0x45d   : > { %v11375_v15 = vpop.f32.mrf.mxu1 }
 0x45e   : > { %v7345_v13 = vadd.f32 %v11375_v15, %v7266_v22  ;;  %v15058_v26 = vpop.f32.mrf.mxu0  ;;  %v7269_v27 = vadd.f32 %v7252_v8, %v7178_v28 }
 0x45f   : > { %v7312_v30 = vpop.f32.mrf.mxu1 }
 0x460   : > { %7353 = vst.msk [vmem:[#allocation3 + $0x50] sm:$0xff] %vm325_vm5, %v7345_v13  ;;  %v7343_v18 = vadd.f32 %v7312_v30, %v7264_v33  ;;  %v15063_v54 = vpop.f32.mrf.mxu0  ;;  %v7383_v2 = vmul.f32 %v7345_v13, %v7345_v13  ;;  %v7362_v56 = vsel %vm325_vm5, %v7345_v13, 0.0 }
 0x461   : > { %v11376_v4 = vpop.f32.mrf.mxu1 }
 0x462   : > { %7351 = vst.msk [vmem:[#allocation3 + $0x40] sm:$0xff] %vm325_vm5, %v7343_v18  ;;  %v7346_v42 = vadd.f32 %v11376_v4, %v7267_v19  ;;  %v15067_v34 = vpop.f32.mrf.mxu0  ;;  %v7381_v20 = vmul.f32 %v7343_v18, %v7343_v18  ;;  %v7359_v38 = vsel %vm325_vm5, %v7343_v18, 0.0  ;;  %v7392_v32 = vsel %vm325_vm5, %v7383_v2, 0.0 }
 0x463   : > { %v7315_v16 = vpop.f32.mrf.mxu1  ;;  %v6476_v19 = vadd.f32 %v6475_v10, %v15008_v29 }
 0x464   : > { %7354 = vst.msk [vmem:[#allocation3 + $0x58] sm:$0xff] %vm325_vm5, %v7346_v42  ;;  %v7344_v48 = vadd.f32 %v7315_v16, %v7265_v59  ;;  %v15071_v61 = vpop.f32.mrf.mxu0  ;;  %v7389_v12 = vsel %vm325_vm5, %v7381_v20, 0.0  ;;  %v7384_v7 = vmul.f32 %v7346_v42, %v7346_v42  ;;  %v7364_v60 = vsel %vm325_vm5, %v7346_v42, 0.0 }
 0x465   : > { %v11379_v63 = vpop.f32.mrf.mxu1 }
 0x466   : > { %7352 = vst.msk [vmem:[#allocation3 + $0x48] sm:$0xff] %vm325_vm5, %v7344_v48  ;;  %v7360_v46 = vsel %vm325_vm5, %v7344_v48, 0.0  ;;  %v7382_v44 = vmul.f32 %v7344_v48, %v7344_v48  ;;  %v7349_v0 = vadd.f32 %v11379_v63, %v7270_v39  ;;  %v15076_v62 = vpop.f32.mrf.mxu0  ;;  %v7394_v57 = vsel %vm325_vm5, %v7384_v7, 0.0 }
 0x467   : > { %v7361_v50 = vadd.f32 %v7360_v46, %v7359_v38  ;;  %v7328_v52 = vpop.f32.mrf.mxu1 }
 0x468   : > { %v7390_v41 = vsel %vm325_vm5, %v7382_v44, 0.0  ;;  %7357 = vst.msk [vmem:[#allocation3 + $0x70] sm:$0xff] %vm325_vm5, %v7349_v0  ;;  %v7347_v47 = vadd.f32 %v7328_v52, %v7268_v24  ;;  %v15082_v40 = vpop.f32.mrf.mxu0  ;;  %v7387_v49 = vmul.f32 %v7349_v0, %v7349_v0  ;;  %v7370_v5 = vsel %vm325_vm5, %v7349_v0, 0.0 }
 0x469   : > { %v7363_v37 = vadd.f32 %v7362_v56, %v7361_v50  ;;  %v7391_v45 = vadd.f32 %v7390_v41, %v7389_v12  ;;  %v11380_v9 = vpop.f32.mrf.mxu1  ;;  %v6477_v24 = vrot.slane %v6476_v19, 2  ;;  %v6507_v44 = vrot.slane %v6506_v35, 2 }
 0x46a   : > { %7355 = vst.msk [vmem:[#allocation3 + $0x60] sm:$0xff] %vm325_vm5, %v7347_v47  ;;  %v7385_v1 = vmul.f32 %v7347_v47, %v7347_v47  ;;  %v7350_v23 = vadd.f32 %v11380_v9, %v7271_v3  ;;  %v15087_v14 = vpop.f32.mrf.mxu0  ;;  %v7366_v22 = vsel %vm325_vm5, %v7347_v47, 0.0  ;;  %v7400_v20 = vsel %vm325_vm5, %v7387_v49, 0.0 }
 0x46b   : > { %v7393_v25 = vadd.f32 %v7392_v32, %v7391_v45  ;;  %v7365_v11 = vadd.f32 %v7364_v60, %v7363_v37  ;;  %v7331_v21 = vpop.f32.mrf.mxu1  ;;  %v6478_v52 = vadd.f32 %v6477_v24, %v6476_v19 }
 0x46c   : > { %7358 = vst.msk [vmem:[#allocation3 + $0x78] sm:$0xff] %vm325_vm5, %v7350_v23  ;;  %v7348_v53 = vadd.f32 %v7331_v21, %v7269_v27  ;;  %v15093_v8 = vpop.f32.mrf.mxu0  ;;  %v7396_v13 = vsel %vm325_vm5, %v7385_v1, 0.0  ;;  %v7388_v4 = vmul.f32 %v7350_v23, %v7350_v23  ;;  %v7372_v29 = vsel %vm325_vm5, %v7350_v23, 0.0 }
 0x46d   : > { %v7367_v15 = vadd.f32 %v7366_v22, %v7365_v11  ;;  %v7395_v36 = vadd.f32 %v7394_v57, %v7393_v25  ;;  %v15096_v33 = vpop.f32.mrf.mxu1  ;;  %v6508_v27 = vadd.f32 %v6507_v44, %v6506_v35  ;;  %v6479_v60 = vrot.slane %v6478_v52, 1 }
 0x46e   : > { %7356 = vst.msk [vmem:[#allocation3 + $0x68] sm:$0xff] %vm325_vm5, %v7348_v53  ;;  %v7368_v55 = vsel %vm325_vm5, %v7348_v53, 0.0  ;;  %v7386_v31 = vmul.f32 %v7348_v53, %v7348_v53  ;;  %v15101_v30 = vpop.f32.mrf.mxu0  ;;  %v7402_v38 = vsel %vm325_vm5, %v7388_v4, 0.0 }
 0x46f   : > { %v7397_v51 = vadd.f32 %v7396_v13, %v7395_v36  ;;  %v7369_v18 = vadd.f32 %v7368_v55, %v7367_v15  ;;  %v15104_v17 = vpop.f32.mrf.mxu1  ;;  %v6509_v11 = vrot.slane %v6508_v27, 1  ;;  %v6480_v58 = vadd.f32 %v6479_v60, %v6478_v52 }
 0x470   : > { %v7398_v59 = vsel %vm325_vm5, %v7386_v31, 0.0  ;;  %v15108_v42 = vpop.f32.mrf.mxu0  ;;  %v7571_v44 = vadd.f32 %v15104_v17, %v15063_v54 }
 0x471   : > { %v7371_v43 = vadd.f32 %v7370_v5, %v7369_v18  ;;  %v7399_v16 = vadd.f32 %v7398_v59, %v7397_v51  ;;  %v11400_v39 = vpop.f32.mrf.mxu1  ;;  %v6510_v13 = vadd.f32 %v6509_v11, %v6508_v27 }
 0x472   : > { %v15113_v48 = vpop.f32.mrf.mxu0 }
 0x473   : > { %v7373_v28 = vadd.f32 %v7372_v29, %v7371_v43  ;;  %v7401_v2 = vadd.f32 %v7400_v20, %v7399_v16  ;;  %v7573_v63 = vpop.f32.mrf.mxu1 }
 0x474   : > { %v15116_v46 = vpop.f32.mrf.mxu0 }
 0x475   : > { %v7374_v0 = vrot.slane %v7373_v28, 4  ;;  %v7403_v3 = vadd.f32 %v7402_v38, %v7401_v2  ;;  %v11403_v56 = vpop.f32.mrf.mxu1 }
 0x476   : > { %v15118_v50 = vpop.f32.mrf.mxu0 }
 0x477   : > { %v7375_v12 = vadd.f32 %v7374_v0, %v7373_v28  ;;  %v7404_v7 = vrot.slane %v7403_v3, 4  ;;  %v7586_v41 = vpop.f32.mrf.mxu1  ;;  %v7579_v28 = vadd.f32 %v15096_v33, %v15058_v26  ;;  %v7574_v26 = vadd.f32 %v7573_v63, %v15071_v61 }
 0x478   : > { %v15120_v47 = vpop.f32.mrf.mxu0  ;;  %v7587_v11 = vadd.f32 %v7586_v41, %v15082_v40 }
 0x479   : > { %v7376_v37 = vrot.slane %v7375_v12, 2  ;;  %v7405_v45 = vadd.f32 %v7404_v7, %v7403_v3  ;;  %v15122_v9 = vpop.f32.mrf.mxu1  ;;  %v7674_v52 = vadd.f32 %v15101_v30, %v7579_v28 }
 0x47a   : > { %v15124_v32 = vpop.f32.mrf.mxu0 }
 0x47b   : > { %v7377_v1 = vadd.f32 %v7376_v37, %v7375_v12  ;;  %v7406_v23 = vrot.slane %v7405_v45, 2  ;;  %v7589_v10 = vpop.f32.mrf.mxu1  ;;  %v7582_v12 = vadd.f32 %v11400_v39, %v15067_v34  ;;  %v7672_v37 = vadd.f32 %v15108_v42, %v7571_v44 }
 0x47c   : > { %v15126_v25 = vpop.f32.mrf.mxu0 }
 0x47d   : > { %v7378_v21 = vrot.slane %v7377_v1, 1  ;;  %v7407_v57 = vadd.f32 %v7406_v23, %v7405_v45  ;;  %v11423_v22 = vpop.f32.mrf.mxu1  ;;  %v7595_v23 = vadd.f32 %v11403_v56, %v15076_v62  ;;  %v7598_v62 = vadd.f32 %v15122_v9, %v15087_v14 }
 0x47e   : > { %v11435_v53 = vpop.f32.mrf.mxu0  ;;  %v7789_v45 = vadd.f32 %v11423_v22, %v7674_v52  ;;  %v7590_v56 = vadd.f32 %v7589_v10, %v15093_v8 }
 0x47f   : > { %v7379_v6 = vadd.f32 %v7378_v21, %v7377_v1  ;;  %v7408_v15 = vrot.slane %v7407_v57, 1  ;;  %v7756_v36 = vpop.f32.mrf.mxu1  ;;  %v7675_v1 = vadd.f32 %v15113_v48, %v7582_v12  ;;  %v7678_v22 = vadd.f32 %v15118_v50, %v7595_v23 }
 0x480   : > { %v7847_v49 = vpop.f32.mrf.mxu0  ;;  %v7787_v54 = vadd.f32 %v7756_v36, %v7672_v37  ;;  %v7880_v21 = vadd.f32 %v11435_v53, %v7789_v45  ;;  %v7676_v48 = vadd.f32 %v15120_v47, %v7587_v11  ;;  %v7677_v47 = vadd.f32 %v15126_v25, %v7590_v56 }
 0x481   : > { %v15128_v55 = vadd.f32 %v7379_v6, %v6480_v58  ;;  %v7409_v31 = vadd.f32 %v7408_v15, %v7407_v57  ;;  %v11424_v19 = vpop.f32.mrf.mxu1  ;;  %v7673_v57 = vadd.f32 %v15116_v46, %v7574_v26 }
 0x482   : > { %v11436_v51 = vpop.f32.mrf.mxu0  ;;  %v7790_v34 = vadd.f32 %v11424_v19, %v7675_v1  ;;  %v7878_v58 = vadd.f32 %v7847_v49, %v7787_v54  ;;  %v7679_v19 = vadd.f32 %v15124_v32, %v7598_v62 }
 0x483   : > { %v15130_v18 = vadd.f32 %v7409_v31, %v6510_v13  ;;  %v7759_v5 = vpop.f32.mrf.mxu1 }
 0x484   : > { %v7850_v4 = vpop.f32.mrf.mxu0  ;;  %v7788_v40 = vadd.f32 %v7759_v5, %v7673_v57  ;;  %v7881_v53 = vadd.f32 %v11436_v51, %v7790_v34 }
 0x485   : > { %v11427_v59 = vpop.f32.mrf.mxu1 }
 0x486   : > { %v11439_v35 = vpop.f32.mrf.mxu0  ;;  %v7793_v6 = vadd.f32 %v11427_v59, %v7678_v22  ;;  %v7879_v28 = vadd.f32 %v7850_v4, %v7788_v40 }
 0x487   : > { %v7772_v43 = vpop.f32.mrf.mxu1 }
 0x488   : > { %v7863_v16 = vpop.f32.mrf.mxu0  ;;  %v7791_v46 = vadd.f32 %v7772_v43, %v7676_v48  ;;  %v7884_v14 = vadd.f32 %v11439_v35, %v7793_v6 }
 0x489   : > { %v11428_v20 = vpop.f32.mrf.mxu1 }
 0x48a   : > { %v15132_v29 = vpop.f32.mrf.mxu0  ;;  %v7882_v5 = vadd.f32 %v7863_v16, %v7791_v46  ;;  %v7794_v51 = vadd.f32 %v11428_v20, %v7679_v19 }
 0x48b   : > { %v7775_v24 = vpop.f32.mrf.mxu1 }
 0x48c   : > { %v15136_v2 = vpop.f32.mrf.mxu0  ;;  %v7792_v59 = vadd.f32 %v7775_v24, %v7677_v47 }
 0x48d   : > { %v11447_v38 = vpop.f32.mrf.mxu1 }
 0x48e   : > { %v11459_v0 = vpop.f32.mrf.mxu0  ;;  %v7959_v61 = vadd.f32 %v11447_v38, %v7880_v21  ;;  %v7883_v20 = vadd.f32 %v15136_v2, %v7792_v59 }
 0x48f   : > { %v7926_v3 = vpop.f32.mrf.mxu1 }
 0x490   : > { %v8041_v7 = vpop.f32.mrf.mxu0  ;;  %v7957_v15 = vadd.f32 %v7926_v3, %v7878_v58  ;;  %v8074_v31 = vadd.f32 %v11459_v0, %v7959_v61 }
 0x491   : > { %v11448_v27 = vpop.f32.mrf.mxu1 }
 0x492   : > { %v11460_v60 = vpop.f32.mrf.mxu0  ;;  %v7960_v50 = vadd.f32 %v11448_v27, %v7881_v53  ;;  %v8072_v9 = vadd.f32 %v8041_v7, %v7957_v15  ;;  %v7885_v7 = vadd.f32 %v15132_v29, %v7794_v51 }
 0x493   : > { %v7929_v33 = vpop.f32.mrf.mxu1 }
 0x494   : > { %v8044_v17 = vpop.f32.mrf.mxu0  ;;  %v7958_v44 = vadd.f32 %v7929_v33, %v7879_v28  ;;  %v8075_v43 = vadd.f32 %v11460_v60, %v7960_v50 }
 0x495   : > { %v11451_v30 = vpop.f32.mrf.mxu1 }
 0x496   : > { %v11463_v39 = vpop.f32.mrf.mxu0  ;;  %v7963_v52 = vadd.f32 %v11451_v30, %v7884_v14  ;;  %v8073_v45 = vadd.f32 %v8044_v17, %v7958_v44 }
 0x497   : > { %v7942_v42 = vpop.f32.mrf.mxu1 }
 0x498   : > { %v8057_v63 = vpop.f32.mrf.mxu0  ;;  %v7961_v32 = vadd.f32 %v7942_v42, %v7882_v5  ;;  %v8078_v24 = vadd.f32 %v11463_v39, %v7963_v52 }
 0x499   : > { %v11452_v41 = vpop.f32.mrf.mxu1 }
 0x49a   : > { %v11464_v36 = vpop.f32.mrf.mxu0  ;;  %v7964_v33 = vadd.f32 %v11452_v41, %v7885_v7  ;;  %v8076_v54 = vadd.f32 %v8057_v63, %v7961_v32 }
 0x49b   : > { %v7945_v13 = vpop.f32.mrf.mxu1 }
 0x49c   : > { %v8060_v49 = vpop.f32.mrf.mxu0  ;;  %v7962_v11 = vadd.f32 %v7945_v13, %v7883_v20  ;;  %v8079_v22 = vadd.f32 %v11464_v36, %v7964_v33 }
 0x49d   : > { %v11471_v38 = vpop.f32.mrf.mxu1 }
 0x49e   : > { %v8165_v8 = vadd.f32 %v11471_v38, %v8074_v31  ;;  %v11483_v10 = vpop.f32.mrf.mxu0  ;;  %v8077_v62 = vadd.f32 %v8060_v49, %v7962_v11 }
 0x49f   : > { %v8132_v3 = vpop.f32.mrf.mxu1 }
 0x4a0   : > { %v8244_v0 = vadd.f32 %v11483_v10, %v8165_v8  ;;  %v8163_v12 = vadd.f32 %v8132_v3, %v8072_v9  ;;  %v8211_v27 = vpop.f32.mrf.mxu0 }
 0x4a1   : > { %v11472_v37 = vpop.f32.mrf.mxu1 }
 0x4a2   : > { %8252 = vst.msk [vmem:[#allocation3 + $0x90] sm:$0xff] %vm325_vm5, %v8244_v0  ;;  %v8242_v25 = vadd.f32 %v8211_v27, %v8163_v12  ;;  %v8166_v4 = vadd.f32 %v11472_v37, %v8075_v43  ;;  %v11484_v35 = vpop.f32.mrf.mxu0  ;;  %v8282_v57 = vmul.f32 %v8244_v0, %v8244_v0  ;;  %v8261_v56 = vsel %vm325_vm5, %v8244_v0, 0.0 }
 0x4a3   : > { %v8135_v16 = vpop.f32.mrf.mxu1 }
 0x4a4   : > { %8250 = vst.msk [vmem:[#allocation3 + $0x80] sm:$0xff] %vm325_vm5, %v8242_v25  ;;  %v8245_v60 = vadd.f32 %v11484_v35, %v8166_v4  ;;  %v8214_v26 = vpop.f32.mrf.mxu0  ;;  %v8164_v1 = vadd.f32 %v8135_v16, %v8073_v45  ;;  %v8280_v34 = vmul.f32 %v8242_v25, %v8242_v25  ;;  %v8258_v58 = vsel %vm325_vm5, %v8242_v25, 0.0 }
 0x4a5   : > { %v11475_v23 = vpop.f32.mrf.mxu1  ;;  %v8291_v31 = vsel %vm325_vm5, %v8282_v57, 0.0 }
 0x4a6   : > { %8253 = vst.msk [vmem:[#allocation3 + $0x98] sm:$0xff] %vm325_vm5, %v8245_v60  ;;  %v8169_v30 = vadd.f32 %v11475_v23, %v8078_v24  ;;  %v11487_v21 = vpop.f32.mrf.mxu0  ;;  %v8243_v29 = vadd.f32 %v8214_v26, %v8164_v1  ;;  %v8288_v6 = vsel %vm325_vm5, %v8280_v34, 0.0  ;;  %v8283_v15 = vmul.f32 %v8245_v60, %v8245_v60 }
 0x4a7   : > { %v8148_v17 = vpop.f32.mrf.mxu1  ;;  %v8263_v47 = vsel %vm325_vm5, %v8245_v60, 0.0 }
 0x4a8   : > { %v8248_v42 = vadd.f32 %v11487_v21, %v8169_v30  ;;  %v8167_v2 = vadd.f32 %v8148_v17, %v8076_v54  ;;  %v8227_v39 = vpop.f32.mrf.mxu0  ;;  %8251 = vst.msk [vmem:[#allocation3 + $0x88] sm:$0xff] %vm325_vm5, %v8243_v29  ;;  %v8259_v61 = vsel %vm325_vm5, %v8243_v29, 0.0  ;;  %v8281_v63 = vmul.f32 %v8243_v29, %v8243_v29 }
 0x4a9   : > { %v11476_v48 = vpop.f32.mrf.mxu1  ;;  %v8260_v40 = vadd.f32 %v8259_v61, %v8258_v58  ;;  %v8293_v51 = vsel %vm325_vm5, %v8283_v15, 0.0 }
 0x4aa   : > { %8256 = vst.msk [vmem:[#allocation3 + $0xb0] sm:$0xff] %vm325_vm5, %v8248_v42  ;;  %v8246_v41 = vadd.f32 %v8227_v39, %v8167_v2  ;;  %v11488_v53 = vpop.f32.mrf.mxu0  ;;  %v8289_v36 = vsel %vm325_vm5, %v8281_v63, 0.0  ;;  %v8170_v46 = vadd.f32 %v11476_v48, %v8079_v22  ;;  %v8286_v12 = vmul.f32 %v8248_v42, %v8248_v42 }
 0x4ab   : > { %v8151_v13 = vpop.f32.mrf.mxu1  ;;  %v8262_v50 = vadd.f32 %v8261_v56, %v8260_v40  ;;  %v8290_v19 = vadd.f32 %v8289_v36, %v8288_v6  ;;  %v8269_v45 = vsel %vm325_vm5, %v8248_v42, 0.0 }
 0x4ac   : > { %8254 = vst.msk [vmem:[#allocation3 + $0xa0] sm:$0xff] %vm325_vm5, %v8246_v41  ;;  %v8230_v49 = vpop.f32.mrf.mxu0  ;;  %v8284_v28 = vmul.f32 %v8246_v41, %v8246_v41  ;;  %v8249_v38 = vadd.f32 %v11488_v53, %v8170_v46  ;;  %v8168_v14 = vadd.f32 %v8151_v13, %v8077_v62  ;;  %v8265_v59 = vsel %vm325_vm5, %v8246_v41, 0.0 }
 0x4ad   : > { %v15170_v9 = vpop.f32.mrf.mxu1  ;;  %v8292_v8 = vadd.f32 %v8291_v31, %v8290_v19  ;;  %v8264_v10 = vadd.f32 %v8263_v47, %v8262_v50  ;;  %v8299_v1 = vsel %vm325_vm5, %v8286_v12, 0.0 }
 0x4ae   : > { %v15172_v5 = vpop.f32.mrf.mxu0  ;;  %8257 = vst.msk [vmem:[#allocation3 + $0xb8] sm:$0xff] %vm325_vm5, %v8249_v38  ;;  %v8247_v44 = vadd.f32 %v8230_v49, %v8168_v14  ;;  %v8295_v27 = vsel %vm325_vm5, %v8284_v28, 0.0  ;;  %v8287_v16 = vmul.f32 %v8249_v38, %v8249_v38  ;;  %v8271_v23 = vsel %vm325_vm5, %v8249_v38, 0.0 }
 0x4af   : > { %v15177_v3 = vpop.f32.mrf.mxu1  ;;  %v8266_v43 = vadd.f32 %v8265_v59, %v8264_v10  ;;  %v8294_v52 = vadd.f32 %v8293_v51, %v8292_v8 }
 0x4b0   : > { %v15179_v0 = vpop.f32.mrf.mxu0  ;;  %8255 = vst.msk [vmem:[#allocation3 + $0xa8] sm:$0xff] %vm325_vm5, %v8247_v44  ;;  %v8267_v37 = vsel %vm325_vm5, %v8247_v44, 0.0  ;;  %v8285_v32 = vmul.f32 %v8247_v44, %v8247_v44  ;;  %v8301_v34 = vsel %vm325_vm5, %v8287_v16, 0.0 }
 0x4b1   : > { %v15184_v25 = vpop.f32.mrf.mxu1  ;;  %v8296_v4 = vadd.f32 %v8295_v27, %v8294_v52  ;;  %v8268_v35 = vadd.f32 %v8267_v37, %v8266_v43 }
 0x4b2   : > { %v15186_v7 = vpop.f32.mrf.mxu0  ;;  %v8297_v20 = vsel %vm325_vm5, %v8285_v32, 0.0 }
 0x4b3   : > { %v15190_v24 = vpop.f32.mrf.mxu1  ;;  %v8270_v60 = vadd.f32 %v8269_v45, %v8268_v35  ;;  %v8298_v26 = vadd.f32 %v8297_v20, %v8296_v4 }
 0x4b4   : > { %v15192_v33 = vpop.f32.mrf.mxu0 }
 0x4b5   : > { %v15196_v54 = vpop.f32.mrf.mxu1  ;;  %v8272_v11 = vadd.f32 %v8271_v23, %v8270_v60  ;;  %v8300_v30 = vadd.f32 %v8299_v1, %v8298_v26  ;;  %v8478_v23 = vadd.f32 %v15172_v5, %v15170_v9 }
 0x4b6   : > { %v15198_v21 = vpop.f32.mrf.mxu0 }
 0x4b7   : > { %v15201_v29 = vpop.f32.mrf.mxu1  ;;  %v8273_v17 = vrot.slane %v8272_v11, 4  ;;  %v8302_v57 = vadd.f32 %v8301_v34, %v8300_v30  ;;  %v8470_v34 = vadd.f32 %v15179_v0, %v15177_v3  ;;  %v8494_v3 = vadd.f32 %v15198_v21, %v15196_v54 }
 0x4b8   : > { %v15203_v42 = vpop.f32.mrf.mxu0 }
 0x4b9   : > { %v15205_v2 = vpop.f32.mrf.mxu1  ;;  %v8274_v39 = vadd.f32 %v8273_v17, %v8272_v11  ;;  %v8303_v22 = vrot.slane %v8302_v57, 4 }
 0x4ba   : > { %v15207_v58 = vpop.f32.mrf.mxu0 }
 0x4bb   : > { %v15209_v61 = vpop.f32.mrf.mxu1  ;;  %v8275_v63 = vrot.slane %v8274_v39, 2  ;;  %v8304_v48 = vadd.f32 %v8303_v22, %v8302_v57  ;;  %v8481_v22 = vadd.f32 %v15186_v7, %v15184_v25  ;;  %v8486_v25 = vadd.f32 %v15203_v42, %v15201_v29 }
 0x4bc   : > { %v15211_v62 = vpop.f32.mrf.mxu0 }
 0x4bd   : > { %v11519_v56 = vpop.f32.mrf.mxu1  ;;  %v8276_v40 = vadd.f32 %v8275_v63, %v8274_v39  ;;  %v8305_v41 = vrot.slane %v8304_v48, 2  ;;  %v8489_v21 = vadd.f32 %v15211_v62, %v15209_v61 }
 0x4be   : > { %v11531_v53 = vpop.f32.mrf.mxu0  ;;  %v8573_v17 = vadd.f32 %v11519_v56, %v8478_v23 }
 0x4bf   : > { %v8540_v6 = vpop.f32.mrf.mxu1  ;;  %v8277_v15 = vrot.slane %v8276_v40, 1  ;;  %v8306_v36 = vadd.f32 %v8305_v41, %v8304_v48  ;;  %v8473_v41 = vadd.f32 %v15192_v33, %v15190_v24  ;;  %v8497_v24 = vadd.f32 %v15207_v58, %v15205_v2 }
 0x4c0   : > { %v8655_v46 = vpop.f32.mrf.mxu0  ;;  %v8571_v63 = vadd.f32 %v8540_v6, %v8470_v34  ;;  %v8688_v9 = vadd.f32 %v11531_v53, %v8573_v17 }
 0x4c1   : > { %v11520_v13 = vpop.f32.mrf.mxu1  ;;  %v8278_v31 = vadd.f32 %v8277_v15, %v8276_v40  ;;  %v8307_v50 = vrot.slane %v8306_v36, 1 }
 0x4c2   : > { %v11532_v19 = vpop.f32.mrf.mxu0  ;;  %v8574_v5 = vadd.f32 %v11520_v13, %v8481_v22  ;;  %v8686_v0 = vadd.f32 %v8655_v46, %v8571_v63 }
 0x4c3   : > { %v8543_v49 = vpop.f32.mrf.mxu1  ;;  %v15214_v47 = vadd.f32 %v8278_v31, %v15128_v55  ;;  %v8308_v28 = vadd.f32 %v8307_v50, %v8306_v36 }
 0x4c4   : > { %v8658_v38 = vpop.f32.mrf.mxu0  ;;  %v8572_v56 = vadd.f32 %v8543_v49, %v8473_v41  ;;  %v8689_v6 = vadd.f32 %v11532_v19, %v8574_v5 }
 0x4c5   : > { %v11523_v14 = vpop.f32.mrf.mxu1  ;;  %v15217_v8 = vadd.f32 %v8308_v28, %v15130_v18 }
 0x4c6   : > { %v11535_v10 = vpop.f32.mrf.mxu0  ;;  %v8577_v28 = vadd.f32 %v11523_v14, %v8494_v3  ;;  %v8687_v13 = vadd.f32 %v8658_v38, %v8572_v56 }
 0x4c7   : > { %v8556_v51 = vpop.f32.mrf.mxu1 }
 0x4c8   : > { %v8671_v59 = vpop.f32.mrf.mxu0  ;;  %v8575_v33 = vadd.f32 %v8556_v51, %v8486_v25 }
 0x4c9   : > { %v11524_v44 = vpop.f32.mrf.mxu1 }
 0x4ca   : > { %v15219_v43 = vpop.f32.mrf.mxu0  ;;  %v8578_v46 = vadd.f32 %v11524_v44, %v8497_v24  ;;  %v8690_v14 = vadd.f32 %v8671_v59, %v8575_v33 }
 0x4cb   : > { %v8559_v52 = vpop.f32.mrf.mxu1 }
 0x4cc   : > { %v15221_v12 = vpop.f32.mrf.mxu0  ;;  %v8693_v38 = vadd.f32 %v15219_v43, %v8578_v46 }
 0x4cd   : > { %v11543_v27 = vpop.f32.mrf.mxu1 }
 0x4ce   : > { %v11555_v37 = vpop.f32.mrf.mxu0  ;;  %v8779_v31 = vadd.f32 %v11543_v27, %v8688_v9  ;;  %v8692_v27 = vadd.f32 %v11535_v10, %v8577_v28 }
 0x4cf   : > { %v8746_v32 = vpop.f32.mrf.mxu1 }
 0x4d0   : > { %v8825_v55 = vpop.f32.mrf.mxu0  ;;  %v8777_v23 = vadd.f32 %v8746_v32, %v8686_v0  ;;  %v8858_v34 = vadd.f32 %v11555_v37, %v8779_v31  ;;  %v8576_v32 = vadd.f32 %v8559_v52, %v8489_v21 }
 0x4d1   : > { %v11544_v4 = vpop.f32.mrf.mxu1 }
 0x4d2   : > { %v11556_v35 = vpop.f32.mrf.mxu0  ;;  %v8780_v17 = vadd.f32 %v11544_v4, %v8689_v6  ;;  %v8856_v29 = vadd.f32 %v8825_v55, %v8777_v23  ;;  %v8691_v62 = vadd.f32 %v15221_v12, %v8576_v32 }
 0x4d3   : > { %v8749_v45 = vpop.f32.mrf.mxu1 }
 0x4d4   : > { %v8828_v16 = vpop.f32.mrf.mxu0  ;;  %v8778_v42 = vadd.f32 %v8749_v45, %v8687_v13  ;;  %v8859_v63 = vadd.f32 %v11556_v35, %v8780_v17 }
 0x4d5   : > { %v11547_v20 = vpop.f32.mrf.mxu1 }
 0x4d6   : > { %v11559_v18 = vpop.f32.mrf.mxu0  ;;  %v8783_v2 = vadd.f32 %v11547_v20, %v8692_v27  ;;  %v8857_v41 = vadd.f32 %v8828_v16, %v8778_v42 }
 0x4d7   : > { %v8762_v60 = vpop.f32.mrf.mxu1 }
 0x4d8   : > { %v15223_v26 = vpop.f32.mrf.mxu0  ;;  %v8781_v37 = vadd.f32 %v8762_v60, %v8690_v14  ;;  %v8862_v55 = vadd.f32 %v11559_v18, %v8783_v2 }
 0x4d9   : > { %v11548_v1 = vpop.f32.mrf.mxu1 }
 0x4da   : > { %v15227_v11 = vpop.f32.mrf.mxu0  ;;  %v8784_v10 = vadd.f32 %v11548_v1, %v8693_v38  ;;  %v8860_v35 = vadd.f32 %v15223_v26, %v8781_v37 }
 0x4db   : > { %v8765_v30 = vpop.f32.mrf.mxu1 }
 0x4dc   : > { %v15231_v57 = vpop.f32.mrf.mxu0  ;;  %v8782_v20 = vadd.f32 %v8765_v30, %v8691_v62  ;;  %v8863_v60 = vadd.f32 %v15227_v11, %v8784_v10 }
 0x4dd   : > { %v11567_v39 = vpop.f32.mrf.mxu1 }
 0x4de   : > { %v11579_v48 = vpop.f32.mrf.mxu0  ;;  %v8973_v19 = vadd.f32 %v11567_v39, %v8858_v34 }
 0x4df   : > { %v8940_v40 = vpop.f32.mrf.mxu1 }
 0x4e0   : > { %v9031_v15 = vpop.f32.mrf.mxu0  ;;  %v8971_v58 = vadd.f32 %v8940_v40, %v8856_v29  ;;  %v9064_v9 = vadd.f32 %v11579_v48, %v8973_v19 }
 0x4e1   : > { %v11568_v36 = vpop.f32.mrf.mxu1 }
 0x4e2   : > { %v11580_v50 = vpop.f32.mrf.mxu0  ;;  %v8974_v61 = vadd.f32 %v11568_v36, %v8859_v63  ;;  %v9062_v45 = vadd.f32 %v9031_v15, %v8971_v58  ;;  %v8861_v15 = vadd.f32 %v15231_v57, %v8782_v20 }
 0x4e3   : > { %v8943_v7 = vpop.f32.mrf.mxu1 }
 0x4e4   : > { %v9034_v54 = vpop.f32.mrf.mxu0  ;;  %v8972_v59 = vadd.f32 %v8943_v7, %v8857_v41  ;;  %v9065_v5 = vadd.f32 %v11580_v50, %v8974_v61 }
 0x4e5   : > { %v11571_v53 = vpop.f32.mrf.mxu1 }
 0x4e6   : > { %v11583_v51 = vpop.f32.mrf.mxu0  ;;  %v8977_v43 = vadd.f32 %v11571_v53, %v8862_v55  ;;  %v9063_v1 = vadd.f32 %v9034_v54, %v8972_v59 }
 0x4e7   : > { %v8956_v49 = vpop.f32.mrf.mxu1 }
 0x4e8   : > { %v9047_v52 = vpop.f32.mrf.mxu0  ;;  %v8975_v48 = vadd.f32 %v8956_v49, %v8860_v35  ;;  %v9068_v30 = vadd.f32 %v11583_v51, %v8977_v43 }
 0x4e9   : > { %v11572_v22 = vpop.f32.mrf.mxu1 }
 0x4ea   : > { %v11584_v36 = vpop.f32.mrf.mxu0  ;;  %v8978_v3 = vadd.f32 %v11572_v22, %v8863_v60  ;;  %v9066_v31 = vadd.f32 %v9047_v52, %v8975_v48 }
 0x4eb   : > { %v8959_v4 = vpop.f32.mrf.mxu1 }
 0x4ec   : > { %v8976_v50 = vadd.f32 %v8959_v4, %v8861_v15  ;;  %v9050_v7 = vpop.f32.mrf.mxu0  ;;  %v9069_v24 = vadd.f32 %v11584_v36, %v8978_v3 }
 0x4ed   : > { %v11591_v44 = vpop.f32.mrf.mxu1 }
 0x4ee   : > { %v9143_v39 = vadd.f32 %v11591_v44, %v9064_v9  ;;  %v9067_v46 = vadd.f32 %v9050_v7, %v8976_v50 }
 0x4ef   : > { %v9110_v40 = vpop.f32.mrf.mxu1 }
 0x4f0   : > { %9151 = vst.msk [vmem:[#allocation3 + $0xd0] sm:$0xff] %vm325_vm5, %v9143_v39  ;;  %v9141_v16 = vadd.f32 %v9110_v40, %v9062_v45  ;;  %v9181_v25 = vmul.f32 %v9143_v39, %v9143_v39  ;;  %v9160_v33 = vsel %vm325_vm5, %v9143_v39, 0.0 }
 0x4f1   : > { %v11592_v12 = vpop.f32.mrf.mxu1 }
 0x4f2   : > { %9149 = vst.msk [vmem:[#allocation3 + $0xc0] sm:$0xff] %vm325_vm5, %v9141_v16  ;;  %v9144_v18 = vadd.f32 %v11592_v12, %v9065_v5  ;;  %v9179_v0 = vmul.f32 %v9141_v16, %v9141_v16  ;;  %v9157_v6 = vsel %vm325_vm5, %v9141_v16, 0.0  ;;  %v9190_v42 = vsel %vm325_vm5, %v9181_v25, 0.0 }
 0x4f3   : > { %v9113_v26 = vpop.f32.mrf.mxu1 }
 0x4f4   : > { %9152 = vst.msk [vmem:[#allocation3 + $0xd8] sm:$0xff] %vm325_vm5, %v9144_v18  ;;  %v9142_v56 = vadd.f32 %v9113_v26, %v9063_v1  ;;  %v9187_v34 = vsel %vm325_vm5, %v9179_v0, 0.0  ;;  %v9182_v17 = vmul.f32 %v9144_v18, %v9144_v18  ;;  %v9162_v19 = vsel %vm325_vm5, %v9144_v18, 0.0 }
 0x4f5   : > { %v11595_v11 = vpop.f32.mrf.mxu1 }
 0x4f6   : > { %9150 = vst.msk [vmem:[#allocation3 + $0xc8] sm:$0xff] %vm325_vm5, %v9142_v56  ;;  %v9158_v28 = vsel %vm325_vm5, %v9142_v56, 0.0  ;;  %v9180_v23 = vmul.f32 %v9142_v56, %v9142_v56  ;;  %v9147_v57 = vadd.f32 %v11595_v11, %v9068_v30  ;;  %v9192_v58 = vsel %vm325_vm5, %v9182_v17, 0.0  ;;  %v9225_v17 = vld [vmem:[#allocation3 + $0x38] sm:$0xff] }
 0x4f7   : > { %v9159_v53 = vadd.f32 %v9158_v28, %v9157_v6  ;;  %v9126_v13 = vpop.f32.mrf.mxu1 }
 0x4f8   : > { %v9188_v54 = vsel %vm325_vm5, %v9180_v23, 0.0  ;;  %9155 = vst.msk [vmem:[#allocation3 + $0xf0] sm:$0xff] %vm325_vm5, %v9147_v57  ;;  %v9145_v21 = vadd.f32 %v9126_v13, %v9066_v31  ;;  %v9185_v41 = vmul.f32 %v9147_v57, %v9147_v57  ;;  %v9168_v55 = vsel %vm325_vm5, %v9147_v57, 0.0  ;;  %v9220_v57 = vld [vmem:[#allocation3 + $0x10] sm:$0xff] }
 0x4f9   : > { %v9161_v49 = vadd.f32 %v9160_v33, %v9159_v53  ;;  %v9189_v27 = vadd.f32 %v9188_v54, %v9187_v34  ;;  %v11596_v29 = vpop.f32.mrf.mxu1  ;;  %v9221_v33 = vld [vmem:[#allocation3 + $0x18] sm:$0xff]  ;;  %v9224_v34 = vld [vmem:[#allocation3 + $0x30] sm:$0xff]  ;;  %v9223_v54 = vld [vmem:[#allocation3 + $0x28] sm:$0xff] }
 0x4fa   : > { %9153 = vst.msk [vmem:[#allocation3 + $0xe0] sm:$0xff] %vm325_vm5, %v9145_v21  ;;  %v9183_v14 = vmul.f32 %v9145_v21, %v9145_v21  ;;  %v9148_v32 = vadd.f32 %v11596_v29, %v9069_v24  ;;  %v9164_v51 = vsel %vm325_vm5, %v9145_v21, 0.0  ;;  %v9198_v35 = vsel %vm325_vm5, %v9185_v41, 0.0  ;;  %v9218_v24 = vld [vmem:[#allocation3] sm:$0xff] }
 0x4fb   : > { %v9191_v22 = vadd.f32 %v9190_v42, %v9189_v27  ;;  %v9163_v63 = vadd.f32 %v9162_v19, %v9161_v49  ;;  %v9129_v2 = vpop.f32.mrf.mxu1  ;;  %v9227_v42 = vld [vmem:[%s12319_s27 + $0x8] sm:$0xff]  ;;  %v9228_v19 = vld [vmem:[%s12319_s27 + $0x10] sm:$0xff] }
 0x4fc   : > { %9156 = vst.msk [vmem:[#allocation3 + $0xf8] sm:$0xff] %vm325_vm5, %v9148_v32  ;;  %v9146_v38 = vadd.f32 %v9129_v2, %v9067_v46  ;;  %v9194_v9 = vsel %vm325_vm5, %v9183_v14, 0.0  ;;  %v9186_v45 = vmul.f32 %v9148_v32, %v9148_v32  ;;  %v9170_v20 = vsel %vm325_vm5, %v9148_v32, 0.0  ;;  %v9226_v46 = vld [vmem:[%s12319_s27] sm:$0xff]  ;;  %v9229_v14 = vld [vmem:[%s12319_s27 + $0x18] sm:$0xff] }
 0x4fd   : > { %v9165_v37 = vadd.f32 %v9164_v51, %v9163_v63  ;;  %v9193_v4 = vadd.f32 %v9192_v58, %v9191_v22  ;;  %v9230_v58 = vld [vmem:[%s12319_s27 + $0x20] sm:$0xff]  ;;  %v9231_v51 = vld [vmem:[%s12319_s27 + $0x28] sm:$0xff] }
 0x4fe   : > { %9154 = vst.msk [vmem:[#allocation3 + $0xe8] sm:$0xff] %vm325_vm5, %v9146_v38  ;;  %v9166_v61 = vsel %vm325_vm5, %v9146_v38, 0.0  ;;  %v9184_v62 = vmul.f32 %v9146_v38, %v9146_v38  ;;  %v9200_v43 = vsel %vm325_vm5, %v9186_v45, 0.0  ;;  %v9232_v38 = vld [vmem:[%s12319_s27 + $0x30] sm:$0xff] }
 0x4ff   : > { %v9195_v10 = vadd.f32 %v9194_v9, %v9193_v4  ;;  %v9167_v44 = vadd.f32 %v9166_v61, %v9165_v37  ;;  %v9233_v61 = vld [vmem:[%s12319_s27 + $0x38] sm:$0xff] }
 0x500   : > { %v9196_v59 = vsel %vm325_vm5, %v9184_v62, 0.0 }
 0x501   : > { %v9169_v52 = vadd.f32 %v9168_v55, %v9167_v44  ;;  %v9197_v39 = vadd.f32 %v9196_v59, %v9195_v10 }
 0x503   : > { %v9171_v40 = vadd.f32 %v9170_v20, %v9169_v52  ;;  %v9199_v5 = vadd.f32 %v9198_v35, %v9197_v39  ;;  %v9276_v35 = vld [vmem:[#allocation3 + $0x50] sm:$0xff] }
 0x505   : > { %v9172_v16 = vrot.slane %v9171_v40, 4  ;;  %v9201_v60 = vadd.f32 %v9200_v43, %v9199_v5 }
 0x507   : > { %v9173_v48 = vadd.f32 %v9172_v16, %v9171_v40  ;;  %v9202_v12 = vrot.slane %v9201_v60, 4  ;;  %v9274_v16 = vld [vmem:[#allocation3 + $0x40] sm:$0xff] }
 0x509   : > { %v9174_v1 = vrot.slane %v9173_v48, 2  ;;  %v9203_v36 = vadd.f32 %v9202_v12, %v9201_v60  ;;  %v9277_v60 = vld [vmem:[#allocation3 + $0x58] sm:$0xff] }
 0x50b   : > { %v9175_v18 = vadd.f32 %v9174_v1, %v9173_v48  ;;  %v9204_v15 = vrot.slane %v9203_v36, 2  ;;  %v9275_v48 = vld [vmem:[#allocation3 + $0x48] sm:$0xff] }
 0x50d   : > { %v9176_v3 = vrot.slane %v9175_v18, 1  ;;  %v9205_v26 = vadd.f32 %v9204_v15, %v9203_v36  ;;  %v9280_v15 = vld [vmem:[#allocation3 + $0x70] sm:$0xff] }
 0x50f   : > { %v9177_v30 = vadd.f32 %v9176_v3, %v9175_v18  ;;  %v9206_v0 = vrot.slane %v9205_v26, 1  ;;  %v9278_v3 = vld [vmem:[#allocation3 + $0x60] sm:$0xff] }
 0x511   : > { %v9178_v56 = vadd.f32 %v9177_v30, %v15214_v47  ;;  %v9207_v31 = vadd.f32 %v9206_v0, %v9205_v26  ;;  %v9219_v47 = vld [vmem:[#allocation3 + $0x8] sm:$0xff] }
 0x513   : > { %v9208_v50 = vadd.f32 %v9207_v31, %v15217_v8  ;;  %v9209_v25 = vmul.f32 0.00390625, %v9178_v56  ;;  %v9222_v8 = vld [vmem:[#allocation3 + $0x20] sm:$0xff]  ;;  %v9281_v31 = vld [vmem:[#allocation3 + $0x78] sm:$0xff] }
 0x515   : > { %v9210_v11 = vmul.f32 0.00390625, %v9208_v50  ;;  %v9211_v7 = vmul.f32 %v9209_v25, %v9209_v25  ;;  %v9216_v53 = vsub.f32 0.0, %v9209_v25  ;;  %v9279_v50 = vld [vmem:[#allocation3 + $0x68] sm:$0xff] }
 0x517   : > { %v9212_v6 = vsub.f32 %v9210_v11, %v9211_v7  ;;  %v10185_v11 = vld [vmem:[%s12319_s27 + $0x40] sm:$0xff] }
 0x519   : > { %v9213_v28 = vmax.f32 %v9212_v6, 0.0 }
 0x51b   : > { %v9214_v23 = vadd.f32 1e-05, %v9213_v28 }
 0x51d   : > { %12184 = vrsqrt.f32 %v9214_v23  ;;  %v10186_v23 = vld [vmem:[%s12319_s27 + $0x48] sm:$0xff] }
 0x52a   : > { %v15276_v13 = vpop.eup %12184 }
 0x52b   : > { %v15279_v21 = vmul.f32 %v15276_v13, %v9216_v53  ;;  %v9234_v49 = vmul.f32 %v15276_v13, %v9218_v24  ;;  %v9235_v27 = vmul.f32 %v15276_v13, %v9219_v47  ;;  %v9236_v29 = vmul.f32 %v15276_v13, %v9220_v57  ;;  %v10187_v57 = vld [vmem:[%s12319_s27 + $0x50] sm:$0xff]  ;;  %v10188_v24 = vld [vmem:[%s12319_s27 + $0x58] sm:$0xff] }
 0x52c   : > { %v9237_v32 = vmul.f32 %v15276_v13, %v9221_v33  ;;  %v9238_v22 = vmul.f32 %v15276_v13, %v9222_v8  ;;  %v9239_v63 = vmul.f32 %v15276_v13, %v9223_v54  ;;  %v9240_v2 = vmul.f32 %v15276_v13, %v9224_v34  ;;  %v10189_v8 = vld [vmem:[%s12319_s27 + $0x60] sm:$0xff]  ;;  %v10191_v54 = vld [vmem:[%s12319_s27 + $0x70] sm:$0xff] }
 0x52d   : > { %v9241_v37 = vmul.f32 %v15276_v13, %v9225_v17  ;;  %v9242_v4 = vadd.f32 %v9234_v49, %v15279_v21  ;;  %v9243_v41 = vadd.f32 %v9235_v27, %v15279_v21  ;;  %v9244_v9 = vadd.f32 %v9236_v29, %v15279_v21  ;;  %v10190_v17 = vld [vmem:[%s12319_s27 + $0x68] sm:$0xff] }
 0x52e   : > { %v9245_v62 = vadd.f32 %v9237_v32, %v15279_v21  ;;  %v9246_v10 = vadd.f32 %v9238_v22, %v15279_v21  ;;  %v9247_v44 = vadd.f32 %v9239_v63, %v15279_v21  ;;  %v9248_v55 = vadd.f32 %v9240_v2, %v15279_v21 }
 0x52f   : > { %v9249_v45 = vadd.f32 %v9241_v37, %v15279_v21  ;;  %v9250_v59 = vadd.f32 %v9242_v4, %v9226_v46  ;;  %v9251_v52 = vadd.f32 %v9243_v41, %v9227_v42  ;;  %v9252_v39 = vadd.f32 %v9244_v9, %v9228_v19  ;;  %v10192_v42 = vld [vmem:[%s12319_s27 + $0x78] sm:$0xff] }
 0x530   : > { %v9253_v20 = vadd.f32 %v9245_v62, %v9229_v14  ;;  %v9254_v40 = vadd.f32 %v9246_v10, %v9230_v58  ;;  %v9255_v5 = vadd.f32 %v9247_v44, %v9231_v51  ;;  %v9256_v43 = vadd.f32 %v9248_v55, %v9232_v38  ;;  %v9333_v38 = vld [vmem:[#allocation3 + $0x90] sm:$0xff]  ;;  %v9334_v62 = vld [vmem:[#allocation3 + $0x98] sm:$0xff]  ;;  %v9332_v10 = vld [vmem:[#allocation3 + $0x88] sm:$0xff] }
 0x531   : > { %v9257_v12 = vadd.f32 %v9249_v45, %v9233_v61  ;;  %v9258_v1 = vmax.f32 %v9250_v59, 0.0  ;;  %v9259_v36 = vmax.f32 %v9251_v52, 0.0  ;;  %v9260_v18 = vmax.f32 %v9252_v39, 0.0  ;;  %v9331_v61 = vld [vmem:[#allocation3 + $0x80] sm:$0xff]  ;;  %v9337_v52 = vld [vmem:[#allocation3 + $0xb0] sm:$0xff] }
 0x532   : > { %v9261_v26 = vmax.f32 %v9253_v20, 0.0  ;;  %v9262_v30 = vmax.f32 %v9254_v40, 0.0  ;;  %v9263_v0 = vmax.f32 %v9255_v5, 0.0  ;;  %v9264_v56 = vmax.f32 %v9256_v43, 0.0  ;;  %v9335_v39 = vld [vmem:[#allocation3 + $0xa0] sm:$0xff]  ;;  %v9338_v43 = vld [vmem:[#allocation3 + $0xb8] sm:$0xff] }
 0x533   : > { %v9265_v25 = vmax.f32 %v9257_v12, 0.0  ;;  %9266 = vst.msk [vmem:[%s15310_s7] sm:$0xff] %vm325_vm5, %v9258_v1  ;;  %9267 = vst.msk [vmem:[%s15310_s7 + $0x8] sm:$0xff] %vm325_vm5, %v9259_v36  ;;  %v9290_v7 = vmul.f32 %v15276_v13, %v9274_v16  ;;  %v9291_v6 = vmul.f32 %v15276_v13, %v9275_v48  ;;  %v9292_v28 = vmul.f32 %v15276_v13, %v9276_v35  ;;  %v9336_v16 = vld [vmem:[#allocation3 + $0xa8] sm:$0xff]  ;;  %v10201_v48 = vld [vmem:[%s12319_s27 + $0x80] sm:$0xff] }
 0x534   : > { %9268 = vst.msk [vmem:[%s15310_s7 + $0x10] sm:$0xff] %vm325_vm5, %v9260_v18  ;;  %9269 = vst.msk [vmem:[%s15310_s7 + $0x18] sm:$0xff] %vm325_vm5, %v9261_v26  ;;  %v9293_v33 = vmul.f32 %v15276_v13, %v9277_v60  ;;  %v9294_v53 = vmul.f32 %v15276_v13, %v9278_v3  ;;  %v9295_v47 = vmul.f32 %v15276_v13, %v9279_v50  ;;  %v10202_v18 = vld [vmem:[%s12319_s27 + $0x88] sm:$0xff]  ;;  %v10204_v3 = vld [vmem:[%s12319_s27 + $0x98] sm:$0xff] }
 0x535   : > { %9270 = vst.msk [vmem:[%s15310_s7 + $0x20] sm:$0xff] %vm325_vm5, %v9262_v30  ;;  %9271 = vst.msk [vmem:[%s15310_s7 + $0x28] sm:$0xff] %vm325_vm5, %v9263_v0  ;;  %v9296_v34 = vmul.f32 %v15276_v13, %v9280_v15  ;;  %v9297_v46 = vmul.f32 %v15276_v13, %v9281_v31  ;;  %v9298_v49 = vadd.f32 %v9290_v7, %v15279_v21  ;;  %v10203_v15 = vld [vmem:[%s12319_s27 + $0x90] sm:$0xff]  ;;  %v10205_v31 = vld [vmem:[%s12319_s27 + $0xa0] sm:$0xff] }
 0x536   : > { %9272 = vst.msk [vmem:[%s15310_s7 + $0x30] sm:$0xff] %vm325_vm5, %v9264_v56  ;;  %9273 = vst.msk [vmem:[%s15310_s7 + $0x38] sm:$0xff] %vm325_vm5, %v9265_v25  ;;  %v9299_v27 = vadd.f32 %v9291_v6, %v15279_v21  ;;  %v9300_v29 = vadd.f32 %v9292_v28, %v15279_v21  ;;  %v9301_v19 = vadd.f32 %v9293_v33, %v15279_v21  ;;  %v10206_v50 = vld [vmem:[%s12319_s27 + $0xa8] sm:$0xff]  ;;  %v10207_v25 = vld [vmem:[%s12319_s27 + $0xb0] sm:$0xff] }
 0x537   : > { %v9302_v14 = vadd.f32 %v9294_v53, %v15279_v21  ;;  %v9303_v32 = vadd.f32 %v9295_v47, %v15279_v21  ;;  %v9304_v22 = vadd.f32 %v9296_v34, %v15279_v21  ;;  %v9305_v63 = vadd.f32 %v9297_v46, %v15279_v21 }
 0x538   : > { %v9306_v2 = vadd.f32 %v10185_v11, %v9298_v49  ;;  %v9307_v58 = vadd.f32 %v10186_v23, %v9299_v27  ;;  %v9308_v51 = vadd.f32 %v10187_v57, %v9300_v29  ;;  %v9309_v37 = vadd.f32 %v10188_v24, %v9301_v19  ;;  %v10208_v23 = vld [vmem:[%s12319_s27 + $0xb8] sm:$0xff]  ;;  %v9390_v29 = vld [vmem:[#allocation3 + $0xd0] sm:$0xff] }
 0x539   : > { %v9310_v4 = vadd.f32 %v10189_v8, %v9302_v14  ;;  %v9311_v41 = vadd.f32 %v10190_v17, %v9303_v32  ;;  %v9312_v9 = vadd.f32 %v10191_v54, %v9304_v22  ;;  %v9313_v44 = vadd.f32 %v10192_v42, %v9305_v63  ;;  %v9388_v42 = vld [vmem:[#allocation3 + $0xc0] sm:$0xff]  ;;  %v9391_v63 = vld [vmem:[#allocation3 + $0xd8] sm:$0xff] }
 0x53a   : > { %v9314_v55 = vmax.f32 %v9306_v2, 0.0  ;;  %v9315_v45 = vmax.f32 %v9307_v58, 0.0  ;;  %v9316_v59 = vmax.f32 %v9308_v51, 0.0  ;;  %v9317_v35 = vmax.f32 %v9309_v37, 0.0  ;;  %v9389_v2 = vld [vmem:[#allocation3 + $0xc8] sm:$0xff] }
 0x53b   : > { %v9318_v20 = vmax.f32 %v9310_v4, 0.0  ;;  %v9319_v40 = vmax.f32 %v9311_v41, 0.0  ;;  %v9320_v5 = vmax.f32 %v9312_v9, 0.0  ;;  %v9321_v60 = vmax.f32 %v9313_v44, 0.0  ;;  %v10217_v4 = vld [vmem:[%s12319_s27 + $0xc0] sm:$0xff]  ;;  %v10218_v41 = vld [vmem:[%s12319_s27 + $0xc8] sm:$0xff] }
 0x53c   : > { %10193 = vst.msk [vmem:[%s15310_s7 + $0x40] sm:$0xff] %vm325_vm5, %v9314_v55  ;;  %10194 = vst.msk [vmem:[%s15310_s7 + $0x48] sm:$0xff] %vm325_vm5, %v9315_v45  ;;  %v9347_v12 = vmul.f32 %v15276_v13, %v9331_v61  ;;  %v9348_v1 = vmul.f32 %v15276_v13, %v9332_v10  ;;  %v9349_v36 = vmul.f32 %v15276_v13, %v9333_v38  ;;  %v9394_v9 = vld [vmem:[#allocation3 + $0xf0] sm:$0xff]  ;;  %v9392_v61 = vld [vmem:[#allocation3 + $0xe0] sm:$0xff] }
 0x53d   : > { %10195 = vst.msk [vmem:[%s15310_s7 + $0x50] sm:$0xff] %vm325_vm5, %v9316_v59  ;;  %10196 = vst.msk [vmem:[%s15310_s7 + $0x58] sm:$0xff] %vm325_vm5, %v9317_v35  ;;  %v9350_v26 = vmul.f32 %v15276_v13, %v9334_v62  ;;  %v9351_v30 = vmul.f32 %v15276_v13, %v9335_v39  ;;  %v9352_v0 = vmul.f32 %v15276_v13, %v9336_v16  ;;  %v9393_v10 = vld [vmem:[#allocation3 + $0xe8] sm:$0xff]  ;;  %v9395_v59 = vld [vmem:[#allocation3 + $0xf8] sm:$0xff] }
 0x53e   : > { %10197 = vst.msk [vmem:[%s15310_s7 + $0x60] sm:$0xff] %vm325_vm5, %v9318_v20  ;;  %10198 = vst.msk [vmem:[%s15310_s7 + $0x68] sm:$0xff] %vm325_vm5, %v9319_v40  ;;  %v9353_v56 = vmul.f32 %v15276_v13, %v9337_v52  ;;  %v9354_v11 = vmul.f32 %v15276_v13, %v9338_v43  ;;  %v9355_v7 = vadd.f32 %v9347_v12, %v15279_v21  ;;  %v10219_v52 = vld [vmem:[%s12319_s27 + $0xd0] sm:$0xff]  ;;  %v10220_v39 = vld [vmem:[%s12319_s27 + $0xd8] sm:$0xff] }
 0x53f   : > { %10199 = vst.msk [vmem:[%s15310_s7 + $0x70] sm:$0xff] %vm325_vm5, %v9320_v5  ;;  %10200 = vst.msk [vmem:[%s15310_s7 + $0x78] sm:$0xff] %vm325_vm5, %v9321_v60  ;;  %v9356_v6 = vadd.f32 %v9348_v1, %v15279_v21  ;;  %v9357_v28 = vadd.f32 %v9349_v36, %v15279_v21  ;;  %v9358_v57 = vadd.f32 %v9350_v26, %v15279_v21  ;;  %v10221_v43 = vld [vmem:[%s12319_s27 + $0xe0] sm:$0xff]  ;;  %v10222_v16 = vld [vmem:[%s12319_s27 + $0xe8] sm:$0xff] }
 0x540   : > { %v9359_v24 = vadd.f32 %v9351_v30, %v15279_v21  ;;  %v9360_v33 = vadd.f32 %v9352_v0, %v15279_v21  ;;  %v9361_v53 = vadd.f32 %v9353_v56, %v15279_v21  ;;  %v9362_v47 = vadd.f32 %v9354_v11, %v15279_v21  ;;  %v10223_v60 = vld [vmem:[%s12319_s27 + $0xf0] sm:$0xff] }
 0x541   : > { %v9363_v34 = vadd.f32 %v10201_v48, %v9355_v7  ;;  %v9364_v8 = vadd.f32 %v10202_v18, %v9356_v6  ;;  %v9365_v17 = vadd.f32 %v10203_v15, %v9357_v28  ;;  %v9366_v54 = vadd.f32 %v10204_v3, %v9358_v57  ;;  %v10224_v18 = vld [vmem:[%s12319_s27 + $0xf8] sm:$0xff] }
 0x542   : > { %v9367_v46 = vadd.f32 %v10205_v31, %v9359_v24  ;;  %v9368_v49 = vadd.f32 %v10206_v50, %v9360_v33  ;;  %v9369_v27 = vadd.f32 %v10207_v25, %v9361_v53  ;;  %v9370_v19 = vadd.f32 %v10208_v23, %v9362_v47 }
 0x543   : > { %v9371_v14 = vmax.f32 %v9363_v34, 0.0  ;;  %v9372_v32 = vmax.f32 %v9364_v8, 0.0  ;;  %v9373_v22 = vmax.f32 %v9365_v17, 0.0  ;;  %v9374_v58 = vmax.f32 %v9366_v54, 0.0 }
 0x544   : > { %v9375_v51 = vmax.f32 %v9367_v46, 0.0  ;;  %v9376_v38 = vmax.f32 %v9368_v49, 0.0  ;;  %v9377_v37 = vmax.f32 %v9369_v27, 0.0  ;;  %v9378_v62 = vmax.f32 %v9370_v19, 0.0 }
 0x545   : > { %10209 = vst.msk [vmem:[%s15310_s7 + $0x80] sm:$0xff] %vm325_vm5, %v9371_v14  ;;  %10210 = vst.msk [vmem:[%s15310_s7 + $0x88] sm:$0xff] %vm325_vm5, %v9372_v32  ;;  %v9404_v44 = vmul.f32 %v15276_v13, %v9388_v42  ;;  %v9405_v55 = vmul.f32 %v15276_v13, %v9389_v2  ;;  %v9406_v45 = vmul.f32 %v15276_v13, %v9390_v29 }
 0x546   : > { %10211 = vst.msk [vmem:[%s15310_s7 + $0x90] sm:$0xff] %vm325_vm5, %v9373_v22  ;;  %10212 = vst.msk [vmem:[%s15310_s7 + $0x98] sm:$0xff] %vm325_vm5, %v9374_v58  ;;  %v9407_v35 = vmul.f32 %v15276_v13, %v9391_v63  ;;  %v9408_v20 = vmul.f32 %v15276_v13, %v9392_v61  ;;  %v9409_v40 = vmul.f32 %v15276_v13, %v9393_v10 }
 0x547   : > { %10213 = vst.msk [vmem:[%s15310_s7 + $0xa0] sm:$0xff] %vm325_vm5, %v9375_v51  ;;  %10214 = vst.msk [vmem:[%s15310_s7 + $0xa8] sm:$0xff] %vm325_vm5, %v9376_v38  ;;  %v9410_v5 = vmul.f32 %v15276_v13, %v9394_v9  ;;  %v9411_v48 = vmul.f32 %v15276_v13, %v9395_v59  ;;  %v9412_v12 = vadd.f32 %v9404_v44, %v15279_v21 }
 0x548   : > { %10215 = vst.msk [vmem:[%s15310_s7 + $0xb0] sm:$0xff] %vm325_vm5, %v9377_v37  ;;  %10216 = vst.msk [vmem:[%s15310_s7 + $0xb8] sm:$0xff] %vm325_vm5, %v9378_v62  ;;  %v9413_v1 = vadd.f32 %v9405_v55, %v15279_v21  ;;  %v9414_v36 = vadd.f32 %v9406_v45, %v15279_v21  ;;  %v9415_v15 = vadd.f32 %v9407_v35, %v15279_v21 }
 0x549   : > { %v9416_v3 = vadd.f32 %v9408_v20, %v15279_v21  ;;  %v9417_v26 = vadd.f32 %v9409_v40, %v15279_v21  ;;  %v9418_v30 = vadd.f32 %v9410_v5, %v15279_v21  ;;  %v9419_v0 = vadd.f32 %v9411_v48, %v15279_v21 }
 0x54a   : > { %v9420_v56 = vadd.f32 %v10217_v4, %v9412_v12  ;;  %v9421_v13 = vadd.f32 %v10218_v41, %v9413_v1  ;;  %v9422_v31 = vadd.f32 %v10219_v52, %v9414_v36  ;;  %v9423_v50 = vadd.f32 %v10220_v39, %v9415_v15 }
 0x54b   : > { %v9424_v25 = vadd.f32 %v10221_v43, %v9416_v3  ;;  %v9425_v11 = vadd.f32 %v10222_v16, %v9417_v26  ;;  %v9426_v7 = vadd.f32 %v10223_v60, %v9418_v30  ;;  %v9427_v6 = vadd.f32 %v10224_v18, %v9419_v0 }
 0x54c   : > { %v9428_v28 = vmax.f32 %v9420_v56, 0.0  ;;  %v9429_v23 = vmax.f32 %v9421_v13, 0.0  ;;  %v9430_v57 = vmax.f32 %v9422_v31, 0.0  ;;  %v9431_v21 = vmax.f32 %v9423_v50, 0.0 }
 0x54d   : > { %v9432_v24 = vmax.f32 %v9424_v25, 0.0  ;;  %v9433_v33 = vmax.f32 %v9425_v11, 0.0  ;;  %v9434_v53 = vmax.f32 %v9426_v7, 0.0  ;;  %v9435_v47 = vmax.f32 %v9427_v6, 0.0 }
 0x54e   : > { %10225 = vst.msk [vmem:[%s15310_s7 + $0xc0] sm:$0xff] %vm325_vm5, %v9428_v28  ;;  %10226 = vst.msk [vmem:[%s15310_s7 + $0xc8] sm:$0xff] %vm325_vm5, %v9429_v23 }
 0x54f   : > { %10227 = vst.msk [vmem:[%s15310_s7 + $0xd0] sm:$0xff] %vm325_vm5, %v9430_v57  ;;  %10228 = vst.msk [vmem:[%s15310_s7 + $0xd8] sm:$0xff] %vm325_vm5, %v9431_v21 }
 0x550   : > { %10229 = vst.msk [vmem:[%s15310_s7 + $0xe0] sm:$0xff] %vm325_vm5, %v9432_v24  ;;  %10230 = vst.msk [vmem:[%s15310_s7 + $0xe8] sm:$0xff] %vm325_vm5, %v9433_v33 }
 0x551   : > { %10231 = vst.msk [vmem:[%s15310_s7 + $0xf0] sm:$0xff] %vm325_vm5, %v9434_v53  ;;  %10232 = vst.msk [vmem:[%s15310_s7 + $0xf8] sm:$0xff] %vm325_vm5, %v9435_v47 }
 0x552 PF: > { %s13_s12 = sadd.s32 1, %s12228_s12  }
 0x553   : > { %p10_p4 = scmp.ge.s32.totalorder %s13_s12, 4  }
 0x555   :  { %12 = sbr.rel (!%p10_p4) target bundleno = 1 (0x1), region = 92 }

</bundles_post_ra>
